<compile_context>
chip_gen: v6e
topology: v6e:2x2x1
jax: 0.10.0
libtpu: 0.0.40
codegen_flags: <defaults>
</compile_context>

<pallas_src>
import jax
import jax.numpy as jnp
from jax.experimental import pallas as pl
from jax.experimental.pallas import tpu as pltpu


# ---------------- batched layout constants ----------------
_TR = 16                 # sublane rows of batch per grid step (multiple of 8)
_LANES = 128             # lane width (fixed by hardware)
_BLOCK = _TR * _LANES    # triplets per grid step

# ---------------- packed flat-parameter layout (SMEM) ----------------
#   [ w1 (2x10 row-major) | b1 (10) | w2 (10x10) | b2 (10) | w3 (10x2) | b3 (2) ]
_W1, _B1 = 0, 20
_W2, _B2 = 30, 130
_W3, _B3 = 140, 160
_P_LEN = 162


def _dml_kernel(p_ref, x_ref, out_ref):
    # p_ref  : SMEM (162,) f32  — packed parameters, resident across all steps
    # x_ref  : VMEM (6, TR, 128) f32 — feature planes [x_0, x_1, x0_0, x0_1, x1_0, x1_1]
    # out_ref: VMEM (2, TR, 128) f32 — softmax probabilities [p_a, p_b] per triplet
    def w1(i, j): return p_ref[_W1 + i * 10 + j]
    def b1(j):    return p_ref[_B1 + j]
    def w2(k, j): return p_ref[_W2 + k * 10 + j]
    def b2(j):    return p_ref[_B2 + j]
    def w3(k, j): return p_ref[_W3 + k * 2 + j]
    def b3(j):    return p_ref[_B3 + j]

    logits = []
    for s in range(3):                         # the three weight-shared MLP copies
        f0 = x_ref[2 * s]                      # (TR, 128)
        f1 = x_ref[2 * s + 1]                  # (TR, 128)

        # Layer 1 + ReLU: scalar weights from SMEM broadcast over the batch tile
        # -> pure VPU FMAs (no lane-slice / XLU broadcasts).
        h1 = [jnp.maximum(f0 * w1(0, j) + f1 * w1(1, j) + b1(j), 0.0)
              for j in range(10)]

        # Layers 2 + 3 fused: each hidden-2 unit is consumed immediately so
        # only ~15 (TR,128) planes stay live (no register spills at TR=16).
        lg0 = jnp.full_like(f0, b3(0))
        lg1 = jnp.full_like(f0, b3(1))
        for j in range(10):
            acc = h1[0] * w2(0, j)
            for k in range(1, 10):
                acc = acc + h1[k] * w2(k, j)
            h2j = jnp.maximum(acc + b2(j), 0.0)
            lg0 = lg0 + h2j * w3(j, 0)
            lg1 = lg1 + h2j * w3(j, 1)
        logits.append((lg0, lg1))

    (lx0, lx1), (la0, la1), (lb0, lb1) = logits

    # Squared distances per triplet.
    d0a = lx0 - la0
    d1a = lx1 - la1
    d0b = lx0 - lb0
    d1b = lx1 - lb1
    a = d0a * d0a + d1a * d1a
    b = d0b * d0b + d1b * d1b

    # Numerically-stable softmax over {a, b}, per lane.
    m = jnp.maximum(a, b)
    ea = jnp.exp(a - m)                         # EUP
    eb = jnp.exp(b - m)
    ssum = ea + eb
    inv = pl.reciprocal(ssum, approx=True)      # EUP approx reciprocal
    inv = inv * (2.0 - ssum * inv)              # one Newton step -> f32 accuracy
    out_ref[0] = ea * inv
    out_ref[1] = eb * inv


def init_params(key):
    """Deterministic init mimicking nn.Linear default (uniform +/- 1/sqrt(fan_in))."""
    def linear(key, fan_in, fan_out):
        kw, kb = jax.random.split(key)
        bound = 1.0 / jnp.sqrt(jnp.float32(fan_in))
        # stored as (in, out) so the forward computes x @ W  (== torch x @ W.T)
        w = jax.random.uniform(kw, (fan_in, fan_out), jnp.float32, -bound, bound)
        b = jax.random.uniform(kb, (fan_out,), jnp.float32, -bound, bound)
        return w, b

    k1, k2, k3 = jax.random.split(key, 3)
    w1, b1 = linear(k1, 2, 10)
    w2, b2 = linear(k2, 10, 10)
    w3, b3 = linear(k3, 10, 2)
    return (w1, b1, w2, b2, w3, b3)


def pack_params(params):
    """One-time host-side packing of all weights/biases into a flat f32 vector
    (single SMEM operand, resident across every grid step)."""
    w1, b1, w2, b2, w3, b3 = params
    flat = jnp.concatenate([
        w1.reshape(-1), b1, w2.reshape(-1), b2, w3.reshape(-1), b3
    ]).astype(jnp.float32)
    assert flat.shape == (_P_LEN,)
    return flat


def _pack_inputs(x, x0, x1):
    """(B,2)x3 -> kernel layout (6, R, 128); triplet b maps to (row b//128, lane b%128)."""
    B = x.shape[0]
    pad = (-B) % _BLOCK
    feats = jnp.stack(
        [x[:, 0], x[:, 1], x0[:, 0], x0[:, 1], x1[:, 0], x1[:, 1]],
        axis=0,
    ).astype(jnp.float32)                       # (6, B)
    feats = jnp.pad(feats, ((0, 0), (0, pad)))  # zero-pad -> padded lanes give [.5,.5]
    return feats.reshape(6, (B + pad) // _LANES, _LANES)


def _run_kernel(params_flat, xpk):
    _, R, _ = xpk.shape
    grid = (R // _TR,)
    return pl.pallas_call(
        _dml_kernel,
        out_shape=jax.ShapeDtypeStruct((2, R, _LANES), jnp.float32),
        grid=grid,
        in_specs=[
            # packed parameters: whole array in SMEM, resident across the grid
            pl.BlockSpec(memory_space=pltpu.MemorySpace.SMEM),
            # batched inputs: lane/sublane-dense (6, TR, 128) tiles
            pl.BlockSpec((6, _TR, _LANES), lambda i: (0, i, 0)),
        ],
        out_specs=pl.BlockSpec((2, _TR, _LANES), lambda i: (0, i, 0)),
        compiler_params=pltpu.CompilerParams(
            dimension_semantics=("parallel",),   # shards batch blocks across TCs (v7x)
        ),
    )(params_flat, xpk)


@jax.jit
def deep_metric_forward_batched(x, x0, x1, params_flat):
    """x, x0, x1: (B, 2) -> (B, 2) softmax([a, b]) per triplet."""
    B = x.shape[0]
    xpk = _pack_inputs(x, x0, x1)
    out = _run_kernel(params_flat, xpk)          # (2, R, 128)
    return out.reshape(2, -1)[:, :B].T           # (B, 2)


def deep_metric_forward(x, x0, x1, params_flat):
    """Original module signature: x, x0, x1 of shape (2,) -> (2,)."""
    return deep_metric_forward_batched(x[None, :], x0[None, :], x1[None, :],
                                       params_flat)[0]


def _reference_forward(x, x0, x1, params):
    """Pure-JAX reference (works for (2,) or (B,2) inputs)."""
    w1, b1, w2, b2, w3, b3 = params
    hp = jax.lax.Precision.HIGHEST

    def mlp(v):
        h1 = jnp.maximum(jnp.dot(v, w1, precision=hp) + b1, 0.0)
        h2 = jnp.maximum(jnp.dot(h1, w2, precision=hp) + b2, 0.0)
        return jnp.dot(h2, w3, precision=hp) + b3

    l, l0, l1 = mlp(x), mlp(x0), mlp(x1)
    a = jnp.sum((l - l0) ** 2, axis=-1)
    b = jnp.sum((l - l1) ** 2, axis=-1)
    return jax.nn.softmax(jnp.stack([a, b], axis=-1), axis=-1)


if __name__ == "__main__":
    key = jax.random.PRNGKey(0)
    kp, kx, kx0, kx1 = jax.random.split(key, 4)

    params = init_params(kp)
    packed = pack_params(params)                 # done once, reused across calls

    # --- batched path (the performance path): 3000 triplets, 2 grid steps ---
    B = 3000
    xb = jax.random.normal(kx, (B, 2), jnp.float32)
    x0b = jax.random.normal(kx0, (B, 2), jnp.float32)
    x1b = jax.random.normal(kx1, (B, 2), jnp.float32)

    out_b = deep_metric_forward_batched(xb, x0b, x1b, packed)
    out_b = jax.block_until_ready(out_b)
    ref_b = _reference_forward(xb, x0b, x1b, params)

    assert out_b.shape == (B, 2)
    assert jnp.allclose(out_b, ref_b, atol=1e-5, rtol=1e-4), (out_b[:4], ref_b[:4])
    assert jnp.allclose(jnp.sum(out_b, axis=-1), 1.0, atol=1e-5)

    # --- single-triplet path (matches the PyTorch module's forward exactly) ---
    x = xb[0]
    x0 = x0b[0]
    x1 = x1b[0]
    out = jax.block_until_ready(deep_metric_forward(x, x0, x1, packed))
    ref = _reference_forward(x, x0, x1, params)
    assert out.shape == (2,)
    assert jnp.allclose(out, ref, atol=1e-5, rtol=1e-4), (out, ref)
    assert jnp.allclose(jnp.sum(out), 1.0, atol=1e-5)

    print("KERNEL_OK")
</pallas_src>

<mosaic_0001>
module attributes {stable_mosaic.version = 11 : i64} {
  func.func @_dml_kernel(%arg0: i32, %arg1: memref<162xf32, #tpu.memory_space<smem>>, %arg2: memref<6x16x128xf32, #tpu.memory_space<vmem>>, %arg3: memref<2x16x128xf32, #tpu.memory_space<vmem>>) attributes {dimension_semantics = [#tpu.dimension_semantics<parallel>], iteration_bounds = array<i64: 2>, scalar_prefetch = 0 : i64, scratch_operands = 0 : i64, tpu.core_type = #tpu.core_type<tc>, window_params = [{transform_indices = @transform_0, window_bounds = array<i64: 162>}, {transform_indices = @transform_1, window_bounds = array<i64: 6, 16, 128>}, {transform_indices = @transform_2, window_bounds = array<i64: 2, 16, 128>}]} {
    %c0 = arith.constant 0 : index
    %c0_0 = arith.constant 0 : index
    %c0_1 = arith.constant 0 : index
    %0 = vector.load %arg2[%c0, %c0_0, %c0_1] : memref<6x16x128xf32, #tpu.memory_space<vmem>>, vector<1x16x128xf32>
    %1 = vector.shape_cast %0 : vector<1x16x128xf32> to vector<16x128xf32>
    %c1 = arith.constant 1 : index
    %c0_2 = arith.constant 0 : index
    %c0_3 = arith.constant 0 : index
    %2 = vector.load %arg2[%c1, %c0_2, %c0_3] : memref<6x16x128xf32, #tpu.memory_space<vmem>>, vector<1x16x128xf32>
    %3 = vector.shape_cast %2 : vector<1x16x128xf32> to vector<16x128xf32>
    %c0_4 = arith.constant 0 : index
    %4 = memref.load %arg1[%c0_4] : memref<162xf32, #tpu.memory_space<smem>>
    %5 = vector.broadcast %4 : f32 to vector<16x128xf32>
    %6 = arith.mulf %1, %5 : vector<16x128xf32>
    %c10 = arith.constant 10 : index
    %7 = memref.load %arg1[%c10] : memref<162xf32, #tpu.memory_space<smem>>
    %8 = vector.broadcast %7 : f32 to vector<16x128xf32>
    %9 = arith.mulf %3, %8 : vector<16x128xf32>
    %10 = arith.addf %6, %9 : vector<16x128xf32>
    %c20 = arith.constant 20 : index
    %11 = memref.load %arg1[%c20] : memref<162xf32, #tpu.memory_space<smem>>
    %12 = vector.broadcast %11 : f32 to vector<16x128xf32>
    %13 = arith.addf %10, %12 : vector<16x128xf32>
    %cst = arith.constant 0.000000e+00 : f32
    %14 = vector.broadcast %cst : f32 to vector<16x128xf32>
    %15 = arith.maximumf %13, %14 : vector<16x128xf32>
    %c1_5 = arith.constant 1 : index
    %16 = memref.load %arg1[%c1_5] : memref<162xf32, #tpu.memory_space<smem>>
    %17 = vector.broadcast %16 : f32 to vector<16x128xf32>
    %18 = arith.mulf %1, %17 : vector<16x128xf32>
    %c11 = arith.constant 11 : index
    %19 = memref.load %arg1[%c11] : memref<162xf32, #tpu.memory_space<smem>>
    %20 = vector.broadcast %19 : f32 to vector<16x128xf32>
    %21 = arith.mulf %3, %20 : vector<16x128xf32>
    %22 = arith.addf %18, %21 : vector<16x128xf32>
    %c21 = arith.constant 21 : index
    %23 = memref.load %arg1[%c21] : memref<162xf32, #tpu.memory_space<smem>>
    %24 = vector.broadcast %23 : f32 to vector<16x128xf32>
    %25 = arith.addf %22, %24 : vector<16x128xf32>
    %cst_6 = arith.constant 0.000000e+00 : f32
    %26 = vector.broadcast %cst_6 : f32 to vector<16x128xf32>
    %27 = arith.maximumf %25, %26 : vector<16x128xf32>
    %c2 = arith.constant 2 : index
    %28 = memref.load %arg1[%c2] : memref<162xf32, #tpu.memory_space<smem>>
    %29 = vector.broadcast %28 : f32 to vector<16x128xf32>
    %30 = arith.mulf %1, %29 : vector<16x128xf32>
    %c12 = arith.constant 12 : index
    %31 = memref.load %arg1[%c12] : memref<162xf32, #tpu.memory_space<smem>>
    %32 = vector.broadcast %31 : f32 to vector<16x128xf32>
    %33 = arith.mulf %3, %32 : vector<16x128xf32>
    %34 = arith.addf %30, %33 : vector<16x128xf32>
    %c22 = arith.constant 22 : index
    %35 = memref.load %arg1[%c22] : memref<162xf32, #tpu.memory_space<smem>>
    %36 = vector.broadcast %35 : f32 to vector<16x128xf32>
    %37 = arith.addf %34, %36 : vector<16x128xf32>
    %cst_7 = arith.constant 0.000000e+00 : f32
    %38 = vector.broadcast %cst_7 : f32 to vector<16x128xf32>
    %39 = arith.maximumf %37, %38 : vector<16x128xf32>
    %c3 = arith.constant 3 : index
    %40 = memref.load %arg1[%c3] : memref<162xf32, #tpu.memory_space<smem>>
    %41 = vector.broadcast %40 : f32 to vector<16x128xf32>
    %42 = arith.mulf %1, %41 : vector<16x128xf32>
    %c13 = arith.constant 13 : index
    %43 = memref.load %arg1[%c13] : memref<162xf32, #tpu.memory_space<smem>>
    %44 = vector.broadcast %43 : f32 to vector<16x128xf32>
    %45 = arith.mulf %3, %44 : vector<16x128xf32>
    %46 = arith.addf %42, %45 : vector<16x128xf32>
    %c23 = arith.constant 23 : index
    %47 = memref.load %arg1[%c23] : memref<162xf32, #tpu.memory_space<smem>>
    %48 = vector.broadcast %47 : f32 to vector<16x128xf32>
    %49 = arith.addf %46, %48 : vector<16x128xf32>
    %cst_8 = arith.constant 0.000000e+00 : f32
    %50 = vector.broadcast %cst_8 : f32 to vector<16x128xf32>
    %51 = arith.maximumf %49, %50 : vector<16x128xf32>
    %c4 = arith.constant 4 : index
    %52 = memref.load %arg1[%c4] : memref<162xf32, #tpu.memory_space<smem>>
    %53 = vector.broadcast %52 : f32 to vector<16x128xf32>
    %54 = arith.mulf %1, %53 : vector<16x128xf32>
    %c14 = arith.constant 14 : index
    %55 = memref.load %arg1[%c14] : memref<162xf32, #tpu.memory_space<smem>>
    %56 = vector.broadcast %55 : f32 to vector<16x128xf32>
    %57 = arith.mulf %3, %56 : vector<16x128xf32>
    %58 = arith.addf %54, %57 : vector<16x128xf32>
    %c24 = arith.constant 24 : index
    %59 = memref.load %arg1[%c24] : memref<162xf32, #tpu.memory_space<smem>>
    %60 = vector.broadcast %59 : f32 to vector<16x128xf32>
    %61 = arith.addf %58, %60 : vector<16x128xf32>
    %cst_9 = arith.constant 0.000000e+00 : f32
    %62 = vector.broadcast %cst_9 : f32 to vector<16x128xf32>
    %63 = arith.maximumf %61, %62 : vector<16x128xf32>
    %c5 = arith.constant 5 : index
    %64 = memref.load %arg1[%c5] : memref<162xf32, #tpu.memory_space<smem>>
    %65 = vector.broadcast %64 : f32 to vector<16x128xf32>
    %66 = arith.mulf %1, %65 : vector<16x128xf32>
    %c15 = arith.constant 15 : index
    %67 = memref.load %arg1[%c15] : memref<162xf32, #tpu.memory_space<smem>>
    %68 = vector.broadcast %67 : f32 to vector<16x128xf32>
    %69 = arith.mulf %3, %68 : vector<16x128xf32>
    %70 = arith.addf %66, %69 : vector<16x128xf32>
    %c25 = arith.constant 25 : index
    %71 = memref.load %arg1[%c25] : memref<162xf32, #tpu.memory_space<smem>>
    %72 = vector.broadcast %71 : f32 to vector<16x128xf32>
    %73 = arith.addf %70, %72 : vector<16x128xf32>
    %cst_10 = arith.constant 0.000000e+00 : f32
    %74 = vector.broadcast %cst_10 : f32 to vector<16x128xf32>
    %75 = arith.maximumf %73, %74 : vector<16x128xf32>
    %c6 = arith.constant 6 : index
    %76 = memref.load %arg1[%c6] : memref<162xf32, #tpu.memory_space<smem>>
    %77 = vector.broadcast %76 : f32 to vector<16x128xf32>
    %78 = arith.mulf %1, %77 : vector<16x128xf32>
    %c16 = arith.constant 16 : index
    %79 = memref.load %arg1[%c16] : memref<162xf32, #tpu.memory_space<smem>>
    %80 = vector.broadcast %79 : f32 to vector<16x128xf32>
    %81 = arith.mulf %3, %80 : vector<16x128xf32>
    %82 = arith.addf %78, %81 : vector<16x128xf32>
    %c26 = arith.constant 26 : index
    %83 = memref.load %arg1[%c26] : memref<162xf32, #tpu.memory_space<smem>>
    %84 = vector.broadcast %83 : f32 to vector<16x128xf32>
    %85 = arith.addf %82, %84 : vector<16x128xf32>
    %cst_11 = arith.constant 0.000000e+00 : f32
    %86 = vector.broadcast %cst_11 : f32 to vector<16x128xf32>
    %87 = arith.maximumf %85, %86 : vector<16x128xf32>
    %c7 = arith.constant 7 : index
    %88 = memref.load %arg1[%c7] : memref<162xf32, #tpu.memory_space<smem>>
    %89 = vector.broadcast %88 : f32 to vector<16x128xf32>
    %90 = arith.mulf %1, %89 : vector<16x128xf32>
    %c17 = arith.constant 17 : index
    %91 = memref.load %arg1[%c17] : memref<162xf32, #tpu.memory_space<smem>>
    %92 = vector.broadcast %91 : f32 to vector<16x128xf32>
    %93 = arith.mulf %3, %92 : vector<16x128xf32>
    %94 = arith.addf %90, %93 : vector<16x128xf32>
    %c27 = arith.constant 27 : index
    %95 = memref.load %arg1[%c27] : memref<162xf32, #tpu.memory_space<smem>>
    %96 = vector.broadcast %95 : f32 to vector<16x128xf32>
    %97 = arith.addf %94, %96 : vector<16x128xf32>
    %cst_12 = arith.constant 0.000000e+00 : f32
    %98 = vector.broadcast %cst_12 : f32 to vector<16x128xf32>
    %99 = arith.maximumf %97, %98 : vector<16x128xf32>
    %c8 = arith.constant 8 : index
    %100 = memref.load %arg1[%c8] : memref<162xf32, #tpu.memory_space<smem>>
    %101 = vector.broadcast %100 : f32 to vector<16x128xf32>
    %102 = arith.mulf %1, %101 : vector<16x128xf32>
    %c18 = arith.constant 18 : index
    %103 = memref.load %arg1[%c18] : memref<162xf32, #tpu.memory_space<smem>>
    %104 = vector.broadcast %103 : f32 to vector<16x128xf32>
    %105 = arith.mulf %3, %104 : vector<16x128xf32>
    %106 = arith.addf %102, %105 : vector<16x128xf32>
    %c28 = arith.constant 28 : index
    %107 = memref.load %arg1[%c28] : memref<162xf32, #tpu.memory_space<smem>>
    %108 = vector.broadcast %107 : f32 to vector<16x128xf32>
    %109 = arith.addf %106, %108 : vector<16x128xf32>
    %cst_13 = arith.constant 0.000000e+00 : f32
    %110 = vector.broadcast %cst_13 : f32 to vector<16x128xf32>
    %111 = arith.maximumf %109, %110 : vector<16x128xf32>
    %c9 = arith.constant 9 : index
    %112 = memref.load %arg1[%c9] : memref<162xf32, #tpu.memory_space<smem>>
    %113 = vector.broadcast %112 : f32 to vector<16x128xf32>
    %114 = arith.mulf %1, %113 : vector<16x128xf32>
    %c19 = arith.constant 19 : index
    %115 = memref.load %arg1[%c19] : memref<162xf32, #tpu.memory_space<smem>>
    %116 = vector.broadcast %115 : f32 to vector<16x128xf32>
    %117 = arith.mulf %3, %116 : vector<16x128xf32>
    %118 = arith.addf %114, %117 : vector<16x128xf32>
    %c29 = arith.constant 29 : index
    %119 = memref.load %arg1[%c29] : memref<162xf32, #tpu.memory_space<smem>>
    %120 = vector.broadcast %119 : f32 to vector<16x128xf32>
    %121 = arith.addf %118, %120 : vector<16x128xf32>
    %cst_14 = arith.constant 0.000000e+00 : f32
    %122 = vector.broadcast %cst_14 : f32 to vector<16x128xf32>
    %123 = arith.maximumf %121, %122 : vector<16x128xf32>
    %c160 = arith.constant 160 : index
    %124 = memref.load %arg1[%c160] : memref<162xf32, #tpu.memory_space<smem>>
    %125 = vector.broadcast %124 : f32 to vector<16x128xf32>
    %c161 = arith.constant 161 : index
    %126 = memref.load %arg1[%c161] : memref<162xf32, #tpu.memory_space<smem>>
    %127 = vector.broadcast %126 : f32 to vector<16x128xf32>
    %c30 = arith.constant 30 : index
    %128 = memref.load %arg1[%c30] : memref<162xf32, #tpu.memory_space<smem>>
    %129 = vector.broadcast %128 : f32 to vector<16x128xf32>
    %130 = arith.mulf %15, %129 : vector<16x128xf32>
    %c40 = arith.constant 40 : index
    %131 = memref.load %arg1[%c40] : memref<162xf32, #tpu.memory_space<smem>>
    %132 = vector.broadcast %131 : f32 to vector<16x128xf32>
    %133 = arith.mulf %27, %132 : vector<16x128xf32>
    %134 = arith.addf %130, %133 : vector<16x128xf32>
    %c50 = arith.constant 50 : index
    %135 = memref.load %arg1[%c50] : memref<162xf32, #tpu.memory_space<smem>>
    %136 = vector.broadcast %135 : f32 to vector<16x128xf32>
    %137 = arith.mulf %39, %136 : vector<16x128xf32>
    %138 = arith.addf %134, %137 : vector<16x128xf32>
    %c60 = arith.constant 60 : index
    %139 = memref.load %arg1[%c60] : memref<162xf32, #tpu.memory_space<smem>>
    %140 = vector.broadcast %139 : f32 to vector<16x128xf32>
    %141 = arith.mulf %51, %140 : vector<16x128xf32>
    %142 = arith.addf %138, %141 : vector<16x128xf32>
    %c70 = arith.constant 70 : index
    %143 = memref.load %arg1[%c70] : memref<162xf32, #tpu.memory_space<smem>>
    %144 = vector.broadcast %143 : f32 to vector<16x128xf32>
    %145 = arith.mulf %63, %144 : vector<16x128xf32>
    %146 = arith.addf %142, %145 : vector<16x128xf32>
    %c80 = arith.constant 80 : index
    %147 = memref.load %arg1[%c80] : memref<162xf32, #tpu.memory_space<smem>>
    %148 = vector.broadcast %147 : f32 to vector<16x128xf32>
    %149 = arith.mulf %75, %148 : vector<16x128xf32>
    %150 = arith.addf %146, %149 : vector<16x128xf32>
    %c90 = arith.constant 90 : index
    %151 = memref.load %arg1[%c90] : memref<162xf32, #tpu.memory_space<smem>>
    %152 = vector.broadcast %151 : f32 to vector<16x128xf32>
    %153 = arith.mulf %87, %152 : vector<16x128xf32>
    %154 = arith.addf %150, %153 : vector<16x128xf32>
    %c100 = arith.constant 100 : index
    %155 = memref.load %arg1[%c100] : memref<162xf32, #tpu.memory_space<smem>>
    %156 = vector.broadcast %155 : f32 to vector<16x128xf32>
    %157 = arith.mulf %99, %156 : vector<16x128xf32>
    %158 = arith.addf %154, %157 : vector<16x128xf32>
    %c110 = arith.constant 110 : index
    %159 = memref.load %arg1[%c110] : memref<162xf32, #tpu.memory_space<smem>>
    %160 = vector.broadcast %159 : f32 to vector<16x128xf32>
    %161 = arith.mulf %111, %160 : vector<16x128xf32>
    %162 = arith.addf %158, %161 : vector<16x128xf32>
    %c120 = arith.constant 120 : index
    %163 = memref.load %arg1[%c120] : memref<162xf32, #tpu.memory_space<smem>>
    %164 = vector.broadcast %163 : f32 to vector<16x128xf32>
    %165 = arith.mulf %123, %164 : vector<16x128xf32>
    %166 = arith.addf %162, %165 : vector<16x128xf32>
    %c130 = arith.constant 130 : index
    %167 = memref.load %arg1[%c130] : memref<162xf32, #tpu.memory_space<smem>>
    %168 = vector.broadcast %167 : f32 to vector<16x128xf32>
    %169 = arith.addf %166, %168 : vector<16x128xf32>
    %cst_15 = arith.constant 0.000000e+00 : f32
    %170 = vector.broadcast %cst_15 : f32 to vector<16x128xf32>
    %171 = arith.maximumf %169, %170 : vector<16x128xf32>
    %c140 = arith.constant 140 : index
    %172 = memref.load %arg1[%c140] : memref<162xf32, #tpu.memory_space<smem>>
    %173 = vector.broadcast %172 : f32 to vector<16x128xf32>
    %174 = arith.mulf %171, %173 : vector<16x128xf32>
    %175 = arith.addf %125, %174 : vector<16x128xf32>
    %c141 = arith.constant 141 : index
    %176 = memref.load %arg1[%c141] : memref<162xf32, #tpu.memory_space<smem>>
    %177 = vector.broadcast %176 : f32 to vector<16x128xf32>
    %178 = arith.mulf %171, %177 : vector<16x128xf32>
    %179 = arith.addf %127, %178 : vector<16x128xf32>
    %c31 = arith.constant 31 : index
    %180 = memref.load %arg1[%c31] : memref<162xf32, #tpu.memory_space<smem>>
    %181 = vector.broadcast %180 : f32 to vector<16x128xf32>
    %182 = arith.mulf %15, %181 : vector<16x128xf32>
    %c41 = arith.constant 41 : index
    %183 = memref.load %arg1[%c41] : memref<162xf32, #tpu.memory_space<smem>>
    %184 = vector.broadcast %183 : f32 to vector<16x128xf32>
    %185 = arith.mulf %27, %184 : vector<16x128xf32>
    %186 = arith.addf %182, %185 : vector<16x128xf32>
    %c51 = arith.constant 51 : index
    %187 = memref.load %arg1[%c51] : memref<162xf32, #tpu.memory_space<smem>>
    %188 = vector.broadcast %187 : f32 to vector<16x128xf32>
    %189 = arith.mulf %39, %188 : vector<16x128xf32>
    %190 = arith.addf %186, %189 : vector<16x128xf32>
    %c61 = arith.constant 61 : index
    %191 = memref.load %arg1[%c61] : memref<162xf32, #tpu.memory_space<smem>>
    %192 = vector.broadcast %191 : f32 to vector<16x128xf32>
    %193 = arith.mulf %51, %192 : vector<16x128xf32>
    %194 = arith.addf %190, %193 : vector<16x128xf32>
    %c71 = arith.constant 71 : index
    %195 = memref.load %arg1[%c71] : memref<162xf32, #tpu.memory_space<smem>>
    %196 = vector.broadcast %195 : f32 to vector<16x128xf32>
    %197 = arith.mulf %63, %196 : vector<16x128xf32>
    %198 = arith.addf %194, %197 : vector<16x128xf32>
    %c81 = arith.constant 81 : index
    %199 = memref.load %arg1[%c81] : memref<162xf32, #tpu.memory_space<smem>>
    %200 = vector.broadcast %199 : f32 to vector<16x128xf32>
    %201 = arith.mulf %75, %200 : vector<16x128xf32>
    %202 = arith.addf %198, %201 : vector<16x128xf32>
    %c91 = arith.constant 91 : index
    %203 = memref.load %arg1[%c91] : memref<162xf32, #tpu.memory_space<smem>>
    %204 = vector.broadcast %203 : f32 to vector<16x128xf32>
    %205 = arith.mulf %87, %204 : vector<16x128xf32>
    %206 = arith.addf %202, %205 : vector<16x128xf32>
    %c101 = arith.constant 101 : index
    %207 = memref.load %arg1[%c101] : memref<162xf32, #tpu.memory_space<smem>>
    %208 = vector.broadcast %207 : f32 to vector<16x128xf32>
    %209 = arith.mulf %99, %208 : vector<16x128xf32>
    %210 = arith.addf %206, %209 : vector<16x128xf32>
    %c111 = arith.constant 111 : index
    %211 = memref.load %arg1[%c111] : memref<162xf32, #tpu.memory_space<smem>>
    %212 = vector.broadcast %211 : f32 to vector<16x128xf32>
    %213 = arith.mulf %111, %212 : vector<16x128xf32>
    %214 = arith.addf %210, %213 : vector<16x128xf32>
    %c121 = arith.constant 121 : index
    %215 = memref.load %arg1[%c121] : memref<162xf32, #tpu.memory_space<smem>>
    %216 = vector.broadcast %215 : f32 to vector<16x128xf32>
    %217 = arith.mulf %123, %216 : vector<16x128xf32>
    %218 = arith.addf %214, %217 : vector<16x128xf32>
    %c131 = arith.constant 131 : index
    %219 = memref.load %arg1[%c131] : memref<162xf32, #tpu.memory_space<smem>>
    %220 = vector.broadcast %219 : f32 to vector<16x128xf32>
    %221 = arith.addf %218, %220 : vector<16x128xf32>
    %cst_16 = arith.constant 0.000000e+00 : f32
    %222 = vector.broadcast %cst_16 : f32 to vector<16x128xf32>
    %223 = arith.maximumf %221, %222 : vector<16x128xf32>
    %c142 = arith.constant 142 : index
    %224 = memref.load %arg1[%c142] : memref<162xf32, #tpu.memory_space<smem>>
    %225 = vector.broadcast %224 : f32 to vector<16x128xf32>
    %226 = arith.mulf %223, %225 : vector<16x128xf32>
    %227 = arith.addf %175, %226 : vector<16x128xf32>
    %c143 = arith.constant 143 : index
    %228 = memref.load %arg1[%c143] : memref<162xf32, #tpu.memory_space<smem>>
    %229 = vector.broadcast %228 : f32 to vector<16x128xf32>
    %230 = arith.mulf %223, %229 : vector<16x128xf32>
    %231 = arith.addf %179, %230 : vector<16x128xf32>
    %c32 = arith.constant 32 : index
    %232 = memref.load %arg1[%c32] : memref<162xf32, #tpu.memory_space<smem>>
    %233 = vector.broadcast %232 : f32 to vector<16x128xf32>
    %234 = arith.mulf %15, %233 : vector<16x128xf32>
    %c42 = arith.constant 42 : index
    %235 = memref.load %arg1[%c42] : memref<162xf32, #tpu.memory_space<smem>>
    %236 = vector.broadcast %235 : f32 to vector<16x128xf32>
    %237 = arith.mulf %27, %236 : vector<16x128xf32>
    %238 = arith.addf %234, %237 : vector<16x128xf32>
    %c52 = arith.constant 52 : index
    %239 = memref.load %arg1[%c52] : memref<162xf32, #tpu.memory_space<smem>>
    %240 = vector.broadcast %239 : f32 to vector<16x128xf32>
    %241 = arith.mulf %39, %240 : vector<16x128xf32>
    %242 = arith.addf %238, %241 : vector<16x128xf32>
    %c62 = arith.constant 62 : index
    %243 = memref.load %arg1[%c62] : memref<162xf32, #tpu.memory_space<smem>>
    %244 = vector.broadcast %243 : f32 to vector<16x128xf32>
    %245 = arith.mulf %51, %244 : vector<16x128xf32>
    %246 = arith.addf %242, %245 : vector<16x128xf32>
    %c72 = arith.constant 72 : index
    %247 = memref.load %arg1[%c72] : memref<162xf32, #tpu.memory_space<smem>>
    %248 = vector.broadcast %247 : f32 to vector<16x128xf32>
    %249 = arith.mulf %63, %248 : vector<16x128xf32>
    %250 = arith.addf %246, %249 : vector<16x128xf32>
    %c82 = arith.constant 82 : index
    %251 = memref.load %arg1[%c82] : memref<162xf32, #tpu.memory_space<smem>>
    %252 = vector.broadcast %251 : f32 to vector<16x128xf32>
    %253 = arith.mulf %75, %252 : vector<16x128xf32>
    %254 = arith.addf %250, %253 : vector<16x128xf32>
    %c92 = arith.constant 92 : index
    %255 = memref.load %arg1[%c92] : memref<162xf32, #tpu.memory_space<smem>>
    %256 = vector.broadcast %255 : f32 to vector<16x128xf32>
    %257 = arith.mulf %87, %256 : vector<16x128xf32>
    %258 = arith.addf %254, %257 : vector<16x128xf32>
    %c102 = arith.constant 102 : index
    %259 = memref.load %arg1[%c102] : memref<162xf32, #tpu.memory_space<smem>>
    %260 = vector.broadcast %259 : f32 to vector<16x128xf32>
    %261 = arith.mulf %99, %260 : vector<16x128xf32>
    %262 = arith.addf %258, %261 : vector<16x128xf32>
    %c112 = arith.constant 112 : index
    %263 = memref.load %arg1[%c112] : memref<162xf32, #tpu.memory_space<smem>>
    %264 = vector.broadcast %263 : f32 to vector<16x128xf32>
    %265 = arith.mulf %111, %264 : vector<16x128xf32>
    %266 = arith.addf %262, %265 : vector<16x128xf32>
    %c122 = arith.constant 122 : index
    %267 = memref.load %arg1[%c122] : memref<162xf32, #tpu.memory_space<smem>>
    %268 = vector.broadcast %267 : f32 to vector<16x128xf32>
    %269 = arith.mulf %123, %268 : vector<16x128xf32>
    %270 = arith.addf %266, %269 : vector<16x128xf32>
    %c132 = arith.constant 132 : index
    %271 = memref.load %arg1[%c132] : memref<162xf32, #tpu.memory_space<smem>>
    %272 = vector.broadcast %271 : f32 to vector<16x128xf32>
    %273 = arith.addf %270, %272 : vector<16x128xf32>
    %cst_17 = arith.constant 0.000000e+00 : f32
    %274 = vector.broadcast %cst_17 : f32 to vector<16x128xf32>
    %275 = arith.maximumf %273, %274 : vector<16x128xf32>
    %c144 = arith.constant 144 : index
    %276 = memref.load %arg1[%c144] : memref<162xf32, #tpu.memory_space<smem>>
    %277 = vector.broadcast %276 : f32 to vector<16x128xf32>
    %278 = arith.mulf %275, %277 : vector<16x128xf32>
    %279 = arith.addf %227, %278 : vector<16x128xf32>
    %c145 = arith.constant 145 : index
    %280 = memref.load %arg1[%c145] : memref<162xf32, #tpu.memory_space<smem>>
    %281 = vector.broadcast %280 : f32 to vector<16x128xf32>
    %282 = arith.mulf %275, %281 : vector<16x128xf32>
    %283 = arith.addf %231, %282 : vector<16x128xf32>
    %c33 = arith.constant 33 : index
    %284 = memref.load %arg1[%c33] : memref<162xf32, #tpu.memory_space<smem>>
    %285 = vector.broadcast %284 : f32 to vector<16x128xf32>
    %286 = arith.mulf %15, %285 : vector<16x128xf32>
    %c43 = arith.constant 43 : index
    %287 = memref.load %arg1[%c43] : memref<162xf32, #tpu.memory_space<smem>>
    %288 = vector.broadcast %287 : f32 to vector<16x128xf32>
    %289 = arith.mulf %27, %288 : vector<16x128xf32>
    %290 = arith.addf %286, %289 : vector<16x128xf32>
    %c53 = arith.constant 53 : index
    %291 = memref.load %arg1[%c53] : memref<162xf32, #tpu.memory_space<smem>>
    %292 = vector.broadcast %291 : f32 to vector<16x128xf32>
    %293 = arith.mulf %39, %292 : vector<16x128xf32>
    %294 = arith.addf %290, %293 : vector<16x128xf32>
    %c63 = arith.constant 63 : index
    %295 = memref.load %arg1[%c63] : memref<162xf32, #tpu.memory_space<smem>>
    %296 = vector.broadcast %295 : f32 to vector<16x128xf32>
    %297 = arith.mulf %51, %296 : vector<16x128xf32>
    %298 = arith.addf %294, %297 : vector<16x128xf32>
    %c73 = arith.constant 73 : index
    %299 = memref.load %arg1[%c73] : memref<162xf32, #tpu.memory_space<smem>>
    %300 = vector.broadcast %299 : f32 to vector<16x128xf32>
    %301 = arith.mulf %63, %300 : vector<16x128xf32>
    %302 = arith.addf %298, %301 : vector<16x128xf32>
    %c83 = arith.constant 83 : index
    %303 = memref.load %arg1[%c83] : memref<162xf32, #tpu.memory_space<smem>>
    %304 = vector.broadcast %303 : f32 to vector<16x128xf32>
    %305 = arith.mulf %75, %304 : vector<16x128xf32>
    %306 = arith.addf %302, %305 : vector<16x128xf32>
    %c93 = arith.constant 93 : index
    %307 = memref.load %arg1[%c93] : memref<162xf32, #tpu.memory_space<smem>>
    %308 = vector.broadcast %307 : f32 to vector<16x128xf32>
    %309 = arith.mulf %87, %308 : vector<16x128xf32>
    %310 = arith.addf %306, %309 : vector<16x128xf32>
    %c103 = arith.constant 103 : index
    %311 = memref.load %arg1[%c103] : memref<162xf32, #tpu.memory_space<smem>>
    %312 = vector.broadcast %311 : f32 to vector<16x128xf32>
    %313 = arith.mulf %99, %312 : vector<16x128xf32>
    %314 = arith.addf %310, %313 : vector<16x128xf32>
    %c113 = arith.constant 113 : index
    %315 = memref.load %arg1[%c113] : memref<162xf32, #tpu.memory_space<smem>>
    %316 = vector.broadcast %315 : f32 to vector<16x128xf32>
    %317 = arith.mulf %111, %316 : vector<16x128xf32>
    %318 = arith.addf %314, %317 : vector<16x128xf32>
    %c123 = arith.constant 123 : index
    %319 = memref.load %arg1[%c123] : memref<162xf32, #tpu.memory_space<smem>>
    %320 = vector.broadcast %319 : f32 to vector<16x128xf32>
    %321 = arith.mulf %123, %320 : vector<16x128xf32>
    %322 = arith.addf %318, %321 : vector<16x128xf32>
    %c133 = arith.constant 133 : index
    %323 = memref.load %arg1[%c133] : memref<162xf32, #tpu.memory_space<smem>>
    %324 = vector.broadcast %323 : f32 to vector<16x128xf32>
    %325 = arith.addf %322, %324 : vector<16x128xf32>
    %cst_18 = arith.constant 0.000000e+00 : f32
    %326 = vector.broadcast %cst_18 : f32 to vector<16x128xf32>
    %327 = arith.maximumf %325, %326 : vector<16x128xf32>
    %c146 = arith.constant 146 : index
    %328 = memref.load %arg1[%c146] : memref<162xf32, #tpu.memory_space<smem>>
    %329 = vector.broadcast %328 : f32 to vector<16x128xf32>
    %330 = arith.mulf %327, %329 : vector<16x128xf32>
    %331 = arith.addf %279, %330 : vector<16x128xf32>
    %c147 = arith.constant 147 : index
    %332 = memref.load %arg1[%c147] : memref<162xf32, #tpu.memory_space<smem>>
    %333 = vector.broadcast %332 : f32 to vector<16x128xf32>
    %334 = arith.mulf %327, %333 : vector<16x128xf32>
    %335 = arith.addf %283, %334 : vector<16x128xf32>
    %c34 = arith.constant 34 : index
    %336 = memref.load %arg1[%c34] : memref<162xf32, #tpu.memory_space<smem>>
    %337 = vector.broadcast %336 : f32 to vector<16x128xf32>
    %338 = arith.mulf %15, %337 : vector<16x128xf32>
    %c44 = arith.constant 44 : index
    %339 = memref.load %arg1[%c44] : memref<162xf32, #tpu.memory_space<smem>>
    %340 = vector.broadcast %339 : f32 to vector<16x128xf32>
    %341 = arith.mulf %27, %340 : vector<16x128xf32>
    %342 = arith.addf %338, %341 : vector<16x128xf32>
    %c54 = arith.constant 54 : index
    %343 = memref.load %arg1[%c54] : memref<162xf32, #tpu.memory_space<smem>>
    %344 = vector.broadcast %343 : f32 to vector<16x128xf32>
    %345 = arith.mulf %39, %344 : vector<16x128xf32>
    %346 = arith.addf %342, %345 : vector<16x128xf32>
    %c64 = arith.constant 64 : index
    %347 = memref.load %arg1[%c64] : memref<162xf32, #tpu.memory_space<smem>>
    %348 = vector.broadcast %347 : f32 to vector<16x128xf32>
    %349 = arith.mulf %51, %348 : vector<16x128xf32>
    %350 = arith.addf %346, %349 : vector<16x128xf32>
    %c74 = arith.constant 74 : index
    %351 = memref.load %arg1[%c74] : memref<162xf32, #tpu.memory_space<smem>>
    %352 = vector.broadcast %351 : f32 to vector<16x128xf32>
    %353 = arith.mulf %63, %352 : vector<16x128xf32>
    %354 = arith.addf %350, %353 : vector<16x128xf32>
    %c84 = arith.constant 84 : index
    %355 = memref.load %arg1[%c84] : memref<162xf32, #tpu.memory_space<smem>>
    %356 = vector.broadcast %355 : f32 to vector<16x128xf32>
    %357 = arith.mulf %75, %356 : vector<16x128xf32>
    %358 = arith.addf %354, %357 : vector<16x128xf32>
    %c94 = arith.constant 94 : index
    %359 = memref.load %arg1[%c94] : memref<162xf32, #tpu.memory_space<smem>>
    %360 = vector.broadcast %359 : f32 to vector<16x128xf32>
    %361 = arith.mulf %87, %360 : vector<16x128xf32>
    %362 = arith.addf %358, %361 : vector<16x128xf32>
    %c104 = arith.constant 104 : index
    %363 = memref.load %arg1[%c104] : memref<162xf32, #tpu.memory_space<smem>>
    %364 = vector.broadcast %363 : f32 to vector<16x128xf32>
    %365 = arith.mulf %99, %364 : vector<16x128xf32>
    %366 = arith.addf %362, %365 : vector<16x128xf32>
    %c114 = arith.constant 114 : index
    %367 = memref.load %arg1[%c114] : memref<162xf32, #tpu.memory_space<smem>>
    %368 = vector.broadcast %367 : f32 to vector<16x128xf32>
    %369 = arith.mulf %111, %368 : vector<16x128xf32>
    %370 = arith.addf %366, %369 : vector<16x128xf32>
    %c124 = arith.constant 124 : index
    %371 = memref.load %arg1[%c124] : memref<162xf32, #tpu.memory_space<smem>>
    %372 = vector.broadcast %371 : f32 to vector<16x128xf32>
    %373 = arith.mulf %123, %372 : vector<16x128xf32>
    %374 = arith.addf %370, %373 : vector<16x128xf32>
    %c134 = arith.constant 134 : index
    %375 = memref.load %arg1[%c134] : memref<162xf32, #tpu.memory_space<smem>>
    %376 = vector.broadcast %375 : f32 to vector<16x128xf32>
    %377 = arith.addf %374, %376 : vector<16x128xf32>
    %cst_19 = arith.constant 0.000000e+00 : f32
    %378 = vector.broadcast %cst_19 : f32 to vector<16x128xf32>
    %379 = arith.maximumf %377, %378 : vector<16x128xf32>
    %c148 = arith.constant 148 : index
    %380 = memref.load %arg1[%c148] : memref<162xf32, #tpu.memory_space<smem>>
    %381 = vector.broadcast %380 : f32 to vector<16x128xf32>
    %382 = arith.mulf %379, %381 : vector<16x128xf32>
    %383 = arith.addf %331, %382 : vector<16x128xf32>
    %c149 = arith.constant 149 : index
    %384 = memref.load %arg1[%c149] : memref<162xf32, #tpu.memory_space<smem>>
    %385 = vector.broadcast %384 : f32 to vector<16x128xf32>
    %386 = arith.mulf %379, %385 : vector<16x128xf32>
    %387 = arith.addf %335, %386 : vector<16x128xf32>
    %c35 = arith.constant 35 : index
    %388 = memref.load %arg1[%c35] : memref<162xf32, #tpu.memory_space<smem>>
    %389 = vector.broadcast %388 : f32 to vector<16x128xf32>
    %390 = arith.mulf %15, %389 : vector<16x128xf32>
    %c45 = arith.constant 45 : index
    %391 = memref.load %arg1[%c45] : memref<162xf32, #tpu.memory_space<smem>>
    %392 = vector.broadcast %391 : f32 to vector<16x128xf32>
    %393 = arith.mulf %27, %392 : vector<16x128xf32>
    %394 = arith.addf %390, %393 : vector<16x128xf32>
    %c55 = arith.constant 55 : index
    %395 = memref.load %arg1[%c55] : memref<162xf32, #tpu.memory_space<smem>>
    %396 = vector.broadcast %395 : f32 to vector<16x128xf32>
    %397 = arith.mulf %39, %396 : vector<16x128xf32>
    %398 = arith.addf %394, %397 : vector<16x128xf32>
    %c65 = arith.constant 65 : index
    %399 = memref.load %arg1[%c65] : memref<162xf32, #tpu.memory_space<smem>>
    %400 = vector.broadcast %399 : f32 to vector<16x128xf32>
    %401 = arith.mulf %51, %400 : vector<16x128xf32>
    %402 = arith.addf %398, %401 : vector<16x128xf32>
    %c75 = arith.constant 75 : index
    %403 = memref.load %arg1[%c75] : memref<162xf32, #tpu.memory_space<smem>>
    %404 = vector.broadcast %403 : f32 to vector<16x128xf32>
    %405 = arith.mulf %63, %404 : vector<16x128xf32>
    %406 = arith.addf %402, %405 : vector<16x128xf32>
    %c85 = arith.constant 85 : index
    %407 = memref.load %arg1[%c85] : memref<162xf32, #tpu.memory_space<smem>>
    %408 = vector.broadcast %407 : f32 to vector<16x128xf32>
    %409 = arith.mulf %75, %408 : vector<16x128xf32>
    %410 = arith.addf %406, %409 : vector<16x128xf32>
    %c95 = arith.constant 95 : index
    %411 = memref.load %arg1[%c95] : memref<162xf32, #tpu.memory_space<smem>>
    %412 = vector.broadcast %411 : f32 to vector<16x128xf32>
    %413 = arith.mulf %87, %412 : vector<16x128xf32>
    %414 = arith.addf %410, %413 : vector<16x128xf32>
    %c105 = arith.constant 105 : index
    %415 = memref.load %arg1[%c105] : memref<162xf32, #tpu.memory_space<smem>>
    %416 = vector.broadcast %415 : f32 to vector<16x128xf32>
    %417 = arith.mulf %99, %416 : vector<16x128xf32>
    %418 = arith.addf %414, %417 : vector<16x128xf32>
    %c115 = arith.constant 115 : index
    %419 = memref.load %arg1[%c115] : memref<162xf32, #tpu.memory_space<smem>>
    %420 = vector.broadcast %419 : f32 to vector<16x128xf32>
    %421 = arith.mulf %111, %420 : vector<16x128xf32>
    %422 = arith.addf %418, %421 : vector<16x128xf32>
    %c125 = arith.constant 125 : index
    %423 = memref.load %arg1[%c125] : memref<162xf32, #tpu.memory_space<smem>>
    %424 = vector.broadcast %423 : f32 to vector<16x128xf32>
    %425 = arith.mulf %123, %424 : vector<16x128xf32>
    %426 = arith.addf %422, %425 : vector<16x128xf32>
    %c135 = arith.constant 135 : index
    %427 = memref.load %arg1[%c135] : memref<162xf32, #tpu.memory_space<smem>>
    %428 = vector.broadcast %427 : f32 to vector<16x128xf32>
    %429 = arith.addf %426, %428 : vector<16x128xf32>
    %cst_20 = arith.constant 0.000000e+00 : f32
    %430 = vector.broadcast %cst_20 : f32 to vector<16x128xf32>
    %431 = arith.maximumf %429, %430 : vector<16x128xf32>
    %c150 = arith.constant 150 : index
    %432 = memref.load %arg1[%c150] : memref<162xf32, #tpu.memory_space<smem>>
    %433 = vector.broadcast %432 : f32 to vector<16x128xf32>
    %434 = arith.mulf %431, %433 : vector<16x128xf32>
    %435 = arith.addf %383, %434 : vector<16x128xf32>
    %c151 = arith.constant 151 : index
    %436 = memref.load %arg1[%c151] : memref<162xf32, #tpu.memory_space<smem>>
    %437 = vector.broadcast %436 : f32 to vector<16x128xf32>
    %438 = arith.mulf %431, %437 : vector<16x128xf32>
    %439 = arith.addf %387, %438 : vector<16x128xf32>
    %c36 = arith.constant 36 : index
    %440 = memref.load %arg1[%c36] : memref<162xf32, #tpu.memory_space<smem>>
    %441 = vector.broadcast %440 : f32 to vector<16x128xf32>
    %442 = arith.mulf %15, %441 : vector<16x128xf32>
    %c46 = arith.constant 46 : index
    %443 = memref.load %arg1[%c46] : memref<162xf32, #tpu.memory_space<smem>>
    %444 = vector.broadcast %443 : f32 to vector<16x128xf32>
    %445 = arith.mulf %27, %444 : vector<16x128xf32>
    %446 = arith.addf %442, %445 : vector<16x128xf32>
    %c56 = arith.constant 56 : index
    %447 = memref.load %arg1[%c56] : memref<162xf32, #tpu.memory_space<smem>>
    %448 = vector.broadcast %447 : f32 to vector<16x128xf32>
    %449 = arith.mulf %39, %448 : vector<16x128xf32>
    %450 = arith.addf %446, %449 : vector<16x128xf32>
    %c66 = arith.constant 66 : index
    %451 = memref.load %arg1[%c66] : memref<162xf32, #tpu.memory_space<smem>>
    %452 = vector.broadcast %451 : f32 to vector<16x128xf32>
    %453 = arith.mulf %51, %452 : vector<16x128xf32>
    %454 = arith.addf %450, %453 : vector<16x128xf32>
    %c76 = arith.constant 76 : index
    %455 = memref.load %arg1[%c76] : memref<162xf32, #tpu.memory_space<smem>>
    %456 = vector.broadcast %455 : f32 to vector<16x128xf32>
    %457 = arith.mulf %63, %456 : vector<16x128xf32>
    %458 = arith.addf %454, %457 : vector<16x128xf32>
    %c86 = arith.constant 86 : index
    %459 = memref.load %arg1[%c86] : memref<162xf32, #tpu.memory_space<smem>>
    %460 = vector.broadcast %459 : f32 to vector<16x128xf32>
    %461 = arith.mulf %75, %460 : vector<16x128xf32>
    %462 = arith.addf %458, %461 : vector<16x128xf32>
    %c96 = arith.constant 96 : index
    %463 = memref.load %arg1[%c96] : memref<162xf32, #tpu.memory_space<smem>>
    %464 = vector.broadcast %463 : f32 to vector<16x128xf32>
    %465 = arith.mulf %87, %464 : vector<16x128xf32>
    %466 = arith.addf %462, %465 : vector<16x128xf32>
    %c106 = arith.constant 106 : index
    %467 = memref.load %arg1[%c106] : memref<162xf32, #tpu.memory_space<smem>>
    %468 = vector.broadcast %467 : f32 to vector<16x128xf32>
    %469 = arith.mulf %99, %468 : vector<16x128xf32>
    %470 = arith.addf %466, %469 : vector<16x128xf32>
    %c116 = arith.constant 116 : index
    %471 = memref.load %arg1[%c116] : memref<162xf32, #tpu.memory_space<smem>>
    %472 = vector.broadcast %471 : f32 to vector<16x128xf32>
    %473 = arith.mulf %111, %472 : vector<16x128xf32>
    %474 = arith.addf %470, %473 : vector<16x128xf32>
    %c126 = arith.constant 126 : index
    %475 = memref.load %arg1[%c126] : memref<162xf32, #tpu.memory_space<smem>>
    %476 = vector.broadcast %475 : f32 to vector<16x128xf32>
    %477 = arith.mulf %123, %476 : vector<16x128xf32>
    %478 = arith.addf %474, %477 : vector<16x128xf32>
    %c136 = arith.constant 136 : index
    %479 = memref.load %arg1[%c136] : memref<162xf32, #tpu.memory_space<smem>>
    %480 = vector.broadcast %479 : f32 to vector<16x128xf32>
    %481 = arith.addf %478, %480 : vector<16x128xf32>
    %cst_21 = arith.constant 0.000000e+00 : f32
    %482 = vector.broadcast %cst_21 : f32 to vector<16x128xf32>
    %483 = arith.maximumf %481, %482 : vector<16x128xf32>
    %c152 = arith.constant 152 : index
    %484 = memref.load %arg1[%c152] : memref<162xf32, #tpu.memory_space<smem>>
    %485 = vector.broadcast %484 : f32 to vector<16x128xf32>
    %486 = arith.mulf %483, %485 : vector<16x128xf32>
    %487 = arith.addf %435, %486 : vector<16x128xf32>
    %c153 = arith.constant 153 : index
    %488 = memref.load %arg1[%c153] : memref<162xf32, #tpu.memory_space<smem>>
    %489 = vector.broadcast %488 : f32 to vector<16x128xf32>
    %490 = arith.mulf %483, %489 : vector<16x128xf32>
    %491 = arith.addf %439, %490 : vector<16x128xf32>
    %c37 = arith.constant 37 : index
    %492 = memref.load %arg1[%c37] : memref<162xf32, #tpu.memory_space<smem>>
    %493 = vector.broadcast %492 : f32 to vector<16x128xf32>
    %494 = arith.mulf %15, %493 : vector<16x128xf32>
    %c47 = arith.constant 47 : index
    %495 = memref.load %arg1[%c47] : memref<162xf32, #tpu.memory_space<smem>>
    %496 = vector.broadcast %495 : f32 to vector<16x128xf32>
    %497 = arith.mulf %27, %496 : vector<16x128xf32>
    %498 = arith.addf %494, %497 : vector<16x128xf32>
    %c57 = arith.constant 57 : index
    %499 = memref.load %arg1[%c57] : memref<162xf32, #tpu.memory_space<smem>>
    %500 = vector.broadcast %499 : f32 to vector<16x128xf32>
    %501 = arith.mulf %39, %500 : vector<16x128xf32>
    %502 = arith.addf %498, %501 : vector<16x128xf32>
    %c67 = arith.constant 67 : index
    %503 = memref.load %arg1[%c67] : memref<162xf32, #tpu.memory_space<smem>>
    %504 = vector.broadcast %503 : f32 to vector<16x128xf32>
    %505 = arith.mulf %51, %504 : vector<16x128xf32>
    %506 = arith.addf %502, %505 : vector<16x128xf32>
    %c77 = arith.constant 77 : index
    %507 = memref.load %arg1[%c77] : memref<162xf32, #tpu.memory_space<smem>>
    %508 = vector.broadcast %507 : f32 to vector<16x128xf32>
    %509 = arith.mulf %63, %508 : vector<16x128xf32>
    %510 = arith.addf %506, %509 : vector<16x128xf32>
    %c87 = arith.constant 87 : index
    %511 = memref.load %arg1[%c87] : memref<162xf32, #tpu.memory_space<smem>>
    %512 = vector.broadcast %511 : f32 to vector<16x128xf32>
    %513 = arith.mulf %75, %512 : vector<16x128xf32>
    %514 = arith.addf %510, %513 : vector<16x128xf32>
    %c97 = arith.constant 97 : index
    %515 = memref.load %arg1[%c97] : memref<162xf32, #tpu.memory_space<smem>>
    %516 = vector.broadcast %515 : f32 to vector<16x128xf32>
    %517 = arith.mulf %87, %516 : vector<16x128xf32>
    %518 = arith.addf %514, %517 : vector<16x128xf32>
    %c107 = arith.constant 107 : index
    %519 = memref.load %arg1[%c107] : memref<162xf32, #tpu.memory_space<smem>>
    %520 = vector.broadcast %519 : f32 to vector<16x128xf32>
    %521 = arith.mulf %99, %520 : vector<16x128xf32>
    %522 = arith.addf %518, %521 : vector<16x128xf32>
    %c117 = arith.constant 117 : index
    %523 = memref.load %arg1[%c117] : memref<162xf32, #tpu.memory_space<smem>>
    %524 = vector.broadcast %523 : f32 to vector<16x128xf32>
    %525 = arith.mulf %111, %524 : vector<16x128xf32>
    %526 = arith.addf %522, %525 : vector<16x128xf32>
    %c127 = arith.constant 127 : index
    %527 = memref.load %arg1[%c127] : memref<162xf32, #tpu.memory_space<smem>>
    %528 = vector.broadcast %527 : f32 to vector<16x128xf32>
    %529 = arith.mulf %123, %528 : vector<16x128xf32>
    %530 = arith.addf %526, %529 : vector<16x128xf32>
    %c137 = arith.constant 137 : index
    %531 = memref.load %arg1[%c137] : memref<162xf32, #tpu.memory_space<smem>>
    %532 = vector.broadcast %531 : f32 to vector<16x128xf32>
    %533 = arith.addf %530, %532 : vector<16x128xf32>
    %cst_22 = arith.constant 0.000000e+00 : f32
    %534 = vector.broadcast %cst_22 : f32 to vector<16x128xf32>
    %535 = arith.maximumf %533, %534 : vector<16x128xf32>
    %c154 = arith.constant 154 : index
    %536 = memref.load %arg1[%c154] : memref<162xf32, #tpu.memory_space<smem>>
    %537 = vector.broadcast %536 : f32 to vector<16x128xf32>
    %538 = arith.mulf %535, %537 : vector<16x128xf32>
    %539 = arith.addf %487, %538 : vector<16x128xf32>
    %c155 = arith.constant 155 : index
    %540 = memref.load %arg1[%c155] : memref<162xf32, #tpu.memory_space<smem>>
    %541 = vector.broadcast %540 : f32 to vector<16x128xf32>
    %542 = arith.mulf %535, %541 : vector<16x128xf32>
    %543 = arith.addf %491, %542 : vector<16x128xf32>
    %c38 = arith.constant 38 : index
    %544 = memref.load %arg1[%c38] : memref<162xf32, #tpu.memory_space<smem>>
    %545 = vector.broadcast %544 : f32 to vector<16x128xf32>
    %546 = arith.mulf %15, %545 : vector<16x128xf32>
    %c48 = arith.constant 48 : index
    %547 = memref.load %arg1[%c48] : memref<162xf32, #tpu.memory_space<smem>>
    %548 = vector.broadcast %547 : f32 to vector<16x128xf32>
    %549 = arith.mulf %27, %548 : vector<16x128xf32>
    %550 = arith.addf %546, %549 : vector<16x128xf32>
    %c58 = arith.constant 58 : index
    %551 = memref.load %arg1[%c58] : memref<162xf32, #tpu.memory_space<smem>>
    %552 = vector.broadcast %551 : f32 to vector<16x128xf32>
    %553 = arith.mulf %39, %552 : vector<16x128xf32>
    %554 = arith.addf %550, %553 : vector<16x128xf32>
    %c68 = arith.constant 68 : index
    %555 = memref.load %arg1[%c68] : memref<162xf32, #tpu.memory_space<smem>>
    %556 = vector.broadcast %555 : f32 to vector<16x128xf32>
    %557 = arith.mulf %51, %556 : vector<16x128xf32>
    %558 = arith.addf %554, %557 : vector<16x128xf32>
    %c78 = arith.constant 78 : index
    %559 = memref.load %arg1[%c78] : memref<162xf32, #tpu.memory_space<smem>>
    %560 = vector.broadcast %559 : f32 to vector<16x128xf32>
    %561 = arith.mulf %63, %560 : vector<16x128xf32>
    %562 = arith.addf %558, %561 : vector<16x128xf32>
    %c88 = arith.constant 88 : index
    %563 = memref.load %arg1[%c88] : memref<162xf32, #tpu.memory_space<smem>>
    %564 = vector.broadcast %563 : f32 to vector<16x128xf32>
    %565 = arith.mulf %75, %564 : vector<16x128xf32>
    %566 = arith.addf %562, %565 : vector<16x128xf32>
    %c98 = arith.constant 98 : index
    %567 = memref.load %arg1[%c98] : memref<162xf32, #tpu.memory_space<smem>>
    %568 = vector.broadcast %567 : f32 to vector<16x128xf32>
    %569 = arith.mulf %87, %568 : vector<16x128xf32>
    %570 = arith.addf %566, %569 : vector<16x128xf32>
    %c108 = arith.constant 108 : index
    %571 = memref.load %arg1[%c108] : memref<162xf32, #tpu.memory_space<smem>>
    %572 = vector.broadcast %571 : f32 to vector<16x128xf32>
    %573 = arith.mulf %99, %572 : vector<16x128xf32>
    %574 = arith.addf %570, %573 : vector<16x128xf32>
    %c118 = arith.constant 118 : index
    %575 = memref.load %arg1[%c118] : memref<162xf32, #tpu.memory_space<smem>>
    %576 = vector.broadcast %575 : f32 to vector<16x128xf32>
    %577 = arith.mulf %111, %576 : vector<16x128xf32>
    %578 = arith.addf %574, %577 : vector<16x128xf32>
    %c128 = arith.constant 128 : index
    %579 = memref.load %arg1[%c128] : memref<162xf32, #tpu.memory_space<smem>>
    %580 = vector.broadcast %579 : f32 to vector<16x128xf32>
    %581 = arith.mulf %123, %580 : vector<16x128xf32>
    %582 = arith.addf %578, %581 : vector<16x128xf32>
    %c138 = arith.constant 138 : index
    %583 = memref.load %arg1[%c138] : memref<162xf32, #tpu.memory_space<smem>>
    %584 = vector.broadcast %583 : f32 to vector<16x128xf32>
    %585 = arith.addf %582, %584 : vector<16x128xf32>
    %cst_23 = arith.constant 0.000000e+00 : f32
    %586 = vector.broadcast %cst_23 : f32 to vector<16x128xf32>
    %587 = arith.maximumf %585, %586 : vector<16x128xf32>
    %c156 = arith.constant 156 : index
    %588 = memref.load %arg1[%c156] : memref<162xf32, #tpu.memory_space<smem>>
    %589 = vector.broadcast %588 : f32 to vector<16x128xf32>
    %590 = arith.mulf %587, %589 : vector<16x128xf32>
    %591 = arith.addf %539, %590 : vector<16x128xf32>
    %c157 = arith.constant 157 : index
    %592 = memref.load %arg1[%c157] : memref<162xf32, #tpu.memory_space<smem>>
    %593 = vector.broadcast %592 : f32 to vector<16x128xf32>
    %594 = arith.mulf %587, %593 : vector<16x128xf32>
    %595 = arith.addf %543, %594 : vector<16x128xf32>
    %c39 = arith.constant 39 : index
    %596 = memref.load %arg1[%c39] : memref<162xf32, #tpu.memory_space<smem>>
    %597 = vector.broadcast %596 : f32 to vector<16x128xf32>
    %598 = arith.mulf %15, %597 : vector<16x128xf32>
    %c49 = arith.constant 49 : index
    %599 = memref.load %arg1[%c49] : memref<162xf32, #tpu.memory_space<smem>>
    %600 = vector.broadcast %599 : f32 to vector<16x128xf32>
    %601 = arith.mulf %27, %600 : vector<16x128xf32>
    %602 = arith.addf %598, %601 : vector<16x128xf32>
    %c59 = arith.constant 59 : index
    %603 = memref.load %arg1[%c59] : memref<162xf32, #tpu.memory_space<smem>>
    %604 = vector.broadcast %603 : f32 to vector<16x128xf32>
    %605 = arith.mulf %39, %604 : vector<16x128xf32>
    %606 = arith.addf %602, %605 : vector<16x128xf32>
    %c69 = arith.constant 69 : index
    %607 = memref.load %arg1[%c69] : memref<162xf32, #tpu.memory_space<smem>>
    %608 = vector.broadcast %607 : f32 to vector<16x128xf32>
    %609 = arith.mulf %51, %608 : vector<16x128xf32>
    %610 = arith.addf %606, %609 : vector<16x128xf32>
    %c79 = arith.constant 79 : index
    %611 = memref.load %arg1[%c79] : memref<162xf32, #tpu.memory_space<smem>>
    %612 = vector.broadcast %611 : f32 to vector<16x128xf32>
    %613 = arith.mulf %63, %612 : vector<16x128xf32>
    %614 = arith.addf %610, %613 : vector<16x128xf32>
    %c89 = arith.constant 89 : index
    %615 = memref.load %arg1[%c89] : memref<162xf32, #tpu.memory_space<smem>>
    %616 = vector.broadcast %615 : f32 to vector<16x128xf32>
    %617 = arith.mulf %75, %616 : vector<16x128xf32>
    %618 = arith.addf %614, %617 : vector<16x128xf32>
    %c99 = arith.constant 99 : index
    %619 = memref.load %arg1[%c99] : memref<162xf32, #tpu.memory_space<smem>>
    %620 = vector.broadcast %619 : f32 to vector<16x128xf32>
    %621 = arith.mulf %87, %620 : vector<16x128xf32>
    %622 = arith.addf %618, %621 : vector<16x128xf32>
    %c109 = arith.constant 109 : index
    %623 = memref.load %arg1[%c109] : memref<162xf32, #tpu.memory_space<smem>>
    %624 = vector.broadcast %623 : f32 to vector<16x128xf32>
    %625 = arith.mulf %99, %624 : vector<16x128xf32>
    %626 = arith.addf %622, %625 : vector<16x128xf32>
    %c119 = arith.constant 119 : index
    %627 = memref.load %arg1[%c119] : memref<162xf32, #tpu.memory_space<smem>>
    %628 = vector.broadcast %627 : f32 to vector<16x128xf32>
    %629 = arith.mulf %111, %628 : vector<16x128xf32>
    %630 = arith.addf %626, %629 : vector<16x128xf32>
    %c129 = arith.constant 129 : index
    %631 = memref.load %arg1[%c129] : memref<162xf32, #tpu.memory_space<smem>>
    %632 = vector.broadcast %631 : f32 to vector<16x128xf32>
    %633 = arith.mulf %123, %632 : vector<16x128xf32>
    %634 = arith.addf %630, %633 : vector<16x128xf32>
    %c139 = arith.constant 139 : index
    %635 = memref.load %arg1[%c139] : memref<162xf32, #tpu.memory_space<smem>>
    %636 = vector.broadcast %635 : f32 to vector<16x128xf32>
    %637 = arith.addf %634, %636 : vector<16x128xf32>
    %cst_24 = arith.constant 0.000000e+00 : f32
    %638 = vector.broadcast %cst_24 : f32 to vector<16x128xf32>
    %639 = arith.maximumf %637, %638 : vector<16x128xf32>
    %c158 = arith.constant 158 : index
    %640 = memref.load %arg1[%c158] : memref<162xf32, #tpu.memory_space<smem>>
    %641 = vector.broadcast %640 : f32 to vector<16x128xf32>
    %642 = arith.mulf %639, %641 : vector<16x128xf32>
    %643 = arith.addf %591, %642 : vector<16x128xf32>
    %c159 = arith.constant 159 : index
    %644 = memref.load %arg1[%c159] : memref<162xf32, #tpu.memory_space<smem>>
    %645 = vector.broadcast %644 : f32 to vector<16x128xf32>
    %646 = arith.mulf %639, %645 : vector<16x128xf32>
    %647 = arith.addf %595, %646 : vector<16x128xf32>
    %c2_25 = arith.constant 2 : index
    %c0_26 = arith.constant 0 : index
    %c0_27 = arith.constant 0 : index
    %648 = vector.load %arg2[%c2_25, %c0_26, %c0_27] : memref<6x16x128xf32, #tpu.memory_space<vmem>>, vector<1x16x128xf32>
    %649 = vector.shape_cast %648 : vector<1x16x128xf32> to vector<16x128xf32>
    %c3_28 = arith.constant 3 : index
    %c0_29 = arith.constant 0 : index
    %c0_30 = arith.constant 0 : index
    %650 = vector.load %arg2[%c3_28, %c0_29, %c0_30] : memref<6x16x128xf32, #tpu.memory_space<vmem>>, vector<1x16x128xf32>
    %651 = vector.shape_cast %650 : vector<1x16x128xf32> to vector<16x128xf32>
    %c0_31 = arith.constant 0 : index
    %652 = memref.load %arg1[%c0_31] : memref<162xf32, #tpu.memory_space<smem>>
    %653 = vector.broadcast %652 : f32 to vector<16x128xf32>
    %654 = arith.mulf %649, %653 : vector<16x128xf32>
    %c10_32 = arith.constant 10 : index
    %655 = memref.load %arg1[%c10_32] : memref<162xf32, #tpu.memory_space<smem>>
    %656 = vector.broadcast %655 : f32 to vector<16x128xf32>
    %657 = arith.mulf %651, %656 : vector<16x128xf32>
    %658 = arith.addf %654, %657 : vector<16x128xf32>
    %c20_33 = arith.constant 20 : index
    %659 = memref.load %arg1[%c20_33] : memref<162xf32, #tpu.memory_space<smem>>
    %660 = vector.broadcast %659 : f32 to vector<16x128xf32>
    %661 = arith.addf %658, %660 : vector<16x128xf32>
    %cst_34 = arith.constant 0.000000e+00 : f32
    %662 = vector.broadcast %cst_34 : f32 to vector<16x128xf32>
    %663 = arith.maximumf %661, %662 : vector<16x128xf32>
    %c1_35 = arith.constant 1 : index
    %664 = memref.load %arg1[%c1_35] : memref<162xf32, #tpu.memory_space<smem>>
    %665 = vector.broadcast %664 : f32 to vector<16x128xf32>
    %666 = arith.mulf %649, %665 : vector<16x128xf32>
    %c11_36 = arith.constant 11 : index
    %667 = memref.load %arg1[%c11_36] : memref<162xf32, #tpu.memory_space<smem>>
    %668 = vector.broadcast %667 : f32 to vector<16x128xf32>
    %669 = arith.mulf %651, %668 : vector<16x128xf32>
    %670 = arith.addf %666, %669 : vector<16x128xf32>
    %c21_37 = arith.constant 21 : index
    %671 = memref.load %arg1[%c21_37] : memref<162xf32, #tpu.memory_space<smem>>
    %672 = vector.broadcast %671 : f32 to vector<16x128xf32>
    %673 = arith.addf %670, %672 : vector<16x128xf32>
    %cst_38 = arith.constant 0.000000e+00 : f32
    %674 = vector.broadcast %cst_38 : f32 to vector<16x128xf32>
    %675 = arith.maximumf %673, %674 : vector<16x128xf32>
    %c2_39 = arith.constant 2 : index
    %676 = memref.load %arg1[%c2_39] : memref<162xf32, #tpu.memory_space<smem>>
    %677 = vector.broadcast %676 : f32 to vector<16x128xf32>
    %678 = arith.mulf %649, %677 : vector<16x128xf32>
    %c12_40 = arith.constant 12 : index
    %679 = memref.load %arg1[%c12_40] : memref<162xf32, #tpu.memory_space<smem>>
    %680 = vector.broadcast %679 : f32 to vector<16x128xf32>
    %681 = arith.mulf %651, %680 : vector<16x128xf32>
    %682 = arith.addf %678, %681 : vector<16x128xf32>
    %c22_41 = arith.constant 22 : index
    %683 = memref.load %arg1[%c22_41] : memref<162xf32, #tpu.memory_space<smem>>
    %684 = vector.broadcast %683 : f32 to vector<16x128xf32>
    %685 = arith.addf %682, %684 : vector<16x128xf32>
    %cst_42 = arith.constant 0.000000e+00 : f32
    %686 = vector.broadcast %cst_42 : f32 to vector<16x128xf32>
    %687 = arith.maximumf %685, %686 : vector<16x128xf32>
    %c3_43 = arith.constant 3 : index
    %688 = memref.load %arg1[%c3_43] : memref<162xf32, #tpu.memory_space<smem>>
    %689 = vector.broadcast %688 : f32 to vector<16x128xf32>
    %690 = arith.mulf %649, %689 : vector<16x128xf32>
    %c13_44 = arith.constant 13 : index
    %691 = memref.load %arg1[%c13_44] : memref<162xf32, #tpu.memory_space<smem>>
    %692 = vector.broadcast %691 : f32 to vector<16x128xf32>
    %693 = arith.mulf %651, %692 : vector<16x128xf32>
    %694 = arith.addf %690, %693 : vector<16x128xf32>
    %c23_45 = arith.constant 23 : index
    %695 = memref.load %arg1[%c23_45] : memref<162xf32, #tpu.memory_space<smem>>
    %696 = vector.broadcast %695 : f32 to vector<16x128xf32>
    %697 = arith.addf %694, %696 : vector<16x128xf32>
    %cst_46 = arith.constant 0.000000e+00 : f32
    %698 = vector.broadcast %cst_46 : f32 to vector<16x128xf32>
    %699 = arith.maximumf %697, %698 : vector<16x128xf32>
    %c4_47 = arith.constant 4 : index
    %700 = memref.load %arg1[%c4_47] : memref<162xf32, #tpu.memory_space<smem>>
    %701 = vector.broadcast %700 : f32 to vector<16x128xf32>
    %702 = arith.mulf %649, %701 : vector<16x128xf32>
    %c14_48 = arith.constant 14 : index
    %703 = memref.load %arg1[%c14_48] : memref<162xf32, #tpu.memory_space<smem>>
    %704 = vector.broadcast %703 : f32 to vector<16x128xf32>
    %705 = arith.mulf %651, %704 : vector<16x128xf32>
    %706 = arith.addf %702, %705 : vector<16x128xf32>
    %c24_49 = arith.constant 24 : index
    %707 = memref.load %arg1[%c24_49] : memref<162xf32, #tpu.memory_space<smem>>
    %708 = vector.broadcast %707 : f32 to vector<16x128xf32>
    %709 = arith.addf %706, %708 : vector<16x128xf32>
    %cst_50 = arith.constant 0.000000e+00 : f32
    %710 = vector.broadcast %cst_50 : f32 to vector<16x128xf32>
    %711 = arith.maximumf %709, %710 : vector<16x128xf32>
    %c5_51 = arith.constant 5 : index
    %712 = memref.load %arg1[%c5_51] : memref<162xf32, #tpu.memory_space<smem>>
    %713 = vector.broadcast %712 : f32 to vector<16x128xf32>
    %714 = arith.mulf %649, %713 : vector<16x128xf32>
    %c15_52 = arith.constant 15 : index
    %715 = memref.load %arg1[%c15_52] : memref<162xf32, #tpu.memory_space<smem>>
    %716 = vector.broadcast %715 : f32 to vector<16x128xf32>
    %717 = arith.mulf %651, %716 : vector<16x128xf32>
    %718 = arith.addf %714, %717 : vector<16x128xf32>
    %c25_53 = arith.constant 25 : index
    %719 = memref.load %arg1[%c25_53] : memref<162xf32, #tpu.memory_space<smem>>
    %720 = vector.broadcast %719 : f32 to vector<16x128xf32>
    %721 = arith.addf %718, %720 : vector<16x128xf32>
    %cst_54 = arith.constant 0.000000e+00 : f32
    %722 = vector.broadcast %cst_54 : f32 to vector<16x128xf32>
    %723 = arith.maximumf %721, %722 : vector<16x128xf32>
    %c6_55 = arith.constant 6 : index
    %724 = memref.load %arg1[%c6_55] : memref<162xf32, #tpu.memory_space<smem>>
    %725 = vector.broadcast %724 : f32 to vector<16x128xf32>
    %726 = arith.mulf %649, %725 : vector<16x128xf32>
    %c16_56 = arith.constant 16 : index
    %727 = memref.load %arg1[%c16_56] : memref<162xf32, #tpu.memory_space<smem>>
    %728 = vector.broadcast %727 : f32 to vector<16x128xf32>
    %729 = arith.mulf %651, %728 : vector<16x128xf32>
    %730 = arith.addf %726, %729 : vector<16x128xf32>
    %c26_57 = arith.constant 26 : index
    %731 = memref.load %arg1[%c26_57] : memref<162xf32, #tpu.memory_space<smem>>
    %732 = vector.broadcast %731 : f32 to vector<16x128xf32>
    %733 = arith.addf %730, %732 : vector<16x128xf32>
    %cst_58 = arith.constant 0.000000e+00 : f32
    %734 = vector.broadcast %cst_58 : f32 to vector<16x128xf32>
    %735 = arith.maximumf %733, %734 : vector<16x128xf32>
    %c7_59 = arith.constant 7 : index
    %736 = memref.load %arg1[%c7_59] : memref<162xf32, #tpu.memory_space<smem>>
    %737 = vector.broadcast %736 : f32 to vector<16x128xf32>
    %738 = arith.mulf %649, %737 : vector<16x128xf32>
    %c17_60 = arith.constant 17 : index
    %739 = memref.load %arg1[%c17_60] : memref<162xf32, #tpu.memory_space<smem>>
    %740 = vector.broadcast %739 : f32 to vector<16x128xf32>
    %741 = arith.mulf %651, %740 : vector<16x128xf32>
    %742 = arith.addf %738, %741 : vector<16x128xf32>
    %c27_61 = arith.constant 27 : index
    %743 = memref.load %arg1[%c27_61] : memref<162xf32, #tpu.memory_space<smem>>
    %744 = vector.broadcast %743 : f32 to vector<16x128xf32>
    %745 = arith.addf %742, %744 : vector<16x128xf32>
    %cst_62 = arith.constant 0.000000e+00 : f32
    %746 = vector.broadcast %cst_62 : f32 to vector<16x128xf32>
    %747 = arith.maximumf %745, %746 : vector<16x128xf32>
    %c8_63 = arith.constant 8 : index
    %748 = memref.load %arg1[%c8_63] : memref<162xf32, #tpu.memory_space<smem>>
    %749 = vector.broadcast %748 : f32 to vector<16x128xf32>
    %750 = arith.mulf %649, %749 : vector<16x128xf32>
    %c18_64 = arith.constant 18 : index
    %751 = memref.load %arg1[%c18_64] : memref<162xf32, #tpu.memory_space<smem>>
    %752 = vector.broadcast %751 : f32 to vector<16x128xf32>
    %753 = arith.mulf %651, %752 : vector<16x128xf32>
    %754 = arith.addf %750, %753 : vector<16x128xf32>
    %c28_65 = arith.constant 28 : index
    %755 = memref.load %arg1[%c28_65] : memref<162xf32, #tpu.memory_space<smem>>
    %756 = vector.broadcast %755 : f32 to vector<16x128xf32>
    %757 = arith.addf %754, %756 : vector<16x128xf32>
    %cst_66 = arith.constant 0.000000e+00 : f32
    %758 = vector.broadcast %cst_66 : f32 to vector<16x128xf32>
    %759 = arith.maximumf %757, %758 : vector<16x128xf32>
    %c9_67 = arith.constant 9 : index
    %760 = memref.load %arg1[%c9_67] : memref<162xf32, #tpu.memory_space<smem>>
    %761 = vector.broadcast %760 : f32 to vector<16x128xf32>
    %762 = arith.mulf %649, %761 : vector<16x128xf32>
    %c19_68 = arith.constant 19 : index
    %763 = memref.load %arg1[%c19_68] : memref<162xf32, #tpu.memory_space<smem>>
    %764 = vector.broadcast %763 : f32 to vector<16x128xf32>
    %765 = arith.mulf %651, %764 : vector<16x128xf32>
    %766 = arith.addf %762, %765 : vector<16x128xf32>
    %c29_69 = arith.constant 29 : index
    %767 = memref.load %arg1[%c29_69] : memref<162xf32, #tpu.memory_space<smem>>
    %768 = vector.broadcast %767 : f32 to vector<16x128xf32>
    %769 = arith.addf %766, %768 : vector<16x128xf32>
    %cst_70 = arith.constant 0.000000e+00 : f32
    %770 = vector.broadcast %cst_70 : f32 to vector<16x128xf32>
    %771 = arith.maximumf %769, %770 : vector<16x128xf32>
    %c160_71 = arith.constant 160 : index
    %772 = memref.load %arg1[%c160_71] : memref<162xf32, #tpu.memory_space<smem>>
    %773 = vector.broadcast %772 : f32 to vector<16x128xf32>
    %c161_72 = arith.constant 161 : index
    %774 = memref.load %arg1[%c161_72] : memref<162xf32, #tpu.memory_space<smem>>
    %775 = vector.broadcast %774 : f32 to vector<16x128xf32>
    %c30_73 = arith.constant 30 : index
    %776 = memref.load %arg1[%c30_73] : memref<162xf32, #tpu.memory_space<smem>>
    %777 = vector.broadcast %776 : f32 to vector<16x128xf32>
    %778 = arith.mulf %663, %777 : vector<16x128xf32>
    %c40_74 = arith.constant 40 : index
    %779 = memref.load %arg1[%c40_74] : memref<162xf32, #tpu.memory_space<smem>>
    %780 = vector.broadcast %779 : f32 to vector<16x128xf32>
    %781 = arith.mulf %675, %780 : vector<16x128xf32>
    %782 = arith.addf %778, %781 : vector<16x128xf32>
    %c50_75 = arith.constant 50 : index
    %783 = memref.load %arg1[%c50_75] : memref<162xf32, #tpu.memory_space<smem>>
    %784 = vector.broadcast %783 : f32 to vector<16x128xf32>
    %785 = arith.mulf %687, %784 : vector<16x128xf32>
    %786 = arith.addf %782, %785 : vector<16x128xf32>
    %c60_76 = arith.constant 60 : index
    %787 = memref.load %arg1[%c60_76] : memref<162xf32, #tpu.memory_space<smem>>
    %788 = vector.broadcast %787 : f32 to vector<16x128xf32>
    %789 = arith.mulf %699, %788 : vector<16x128xf32>
    %790 = arith.addf %786, %789 : vector<16x128xf32>
    %c70_77 = arith.constant 70 : index
    %791 = memref.load %arg1[%c70_77] : memref<162xf32, #tpu.memory_space<smem>>
    %792 = vector.broadcast %791 : f32 to vector<16x128xf32>
    %793 = arith.mulf %711, %792 : vector<16x128xf32>
    %794 = arith.addf %790, %793 : vector<16x128xf32>
    %c80_78 = arith.constant 80 : index
    %795 = memref.load %arg1[%c80_78] : memref<162xf32, #tpu.memory_space<smem>>
    %796 = vector.broadcast %795 : f32 to vector<16x128xf32>
    %797 = arith.mulf %723, %796 : vector<16x128xf32>
    %798 = arith.addf %794, %797 : vector<16x128xf32>
    %c90_79 = arith.constant 90 : index
    %799 = memref.load %arg1[%c90_79] : memref<162xf32, #tpu.memory_space<smem>>
    %800 = vector.broadcast %799 : f32 to vector<16x128xf32>
    %801 = arith.mulf %735, %800 : vector<16x128xf32>
    %802 = arith.addf %798, %801 : vector<16x128xf32>
    %c100_80 = arith.constant 100 : index
    %803 = memref.load %arg1[%c100_80] : memref<162xf32, #tpu.memory_space<smem>>
    %804 = vector.broadcast %803 : f32 to vector<16x128xf32>
    %805 = arith.mulf %747, %804 : vector<16x128xf32>
    %806 = arith.addf %802, %805 : vector<16x128xf32>
    %c110_81 = arith.constant 110 : index
    %807 = memref.load %arg1[%c110_81] : memref<162xf32, #tpu.memory_space<smem>>
    %808 = vector.broadcast %807 : f32 to vector<16x128xf32>
    %809 = arith.mulf %759, %808 : vector<16x128xf32>
    %810 = arith.addf %806, %809 : vector<16x128xf32>
    %c120_82 = arith.constant 120 : index
    %811 = memref.load %arg1[%c120_82] : memref<162xf32, #tpu.memory_space<smem>>
    %812 = vector.broadcast %811 : f32 to vector<16x128xf32>
    %813 = arith.mulf %771, %812 : vector<16x128xf32>
    %814 = arith.addf %810, %813 : vector<16x128xf32>
    %c130_83 = arith.constant 130 : index
    %815 = memref.load %arg1[%c130_83] : memref<162xf32, #tpu.memory_space<smem>>
    %816 = vector.broadcast %815 : f32 to vector<16x128xf32>
    %817 = arith.addf %814, %816 : vector<16x128xf32>
    %cst_84 = arith.constant 0.000000e+00 : f32
    %818 = vector.broadcast %cst_84 : f32 to vector<16x128xf32>
    %819 = arith.maximumf %817, %818 : vector<16x128xf32>
    %c140_85 = arith.constant 140 : index
    %820 = memref.load %arg1[%c140_85] : memref<162xf32, #tpu.memory_space<smem>>
    %821 = vector.broadcast %820 : f32 to vector<16x128xf32>
    %822 = arith.mulf %819, %821 : vector<16x128xf32>
    %823 = arith.addf %773, %822 : vector<16x128xf32>
    %c141_86 = arith.constant 141 : index
    %824 = memref.load %arg1[%c141_86] : memref<162xf32, #tpu.memory_space<smem>>
    %825 = vector.broadcast %824 : f32 to vector<16x128xf32>
    %826 = arith.mulf %819, %825 : vector<16x128xf32>
    %827 = arith.addf %775, %826 : vector<16x128xf32>
    %c31_87 = arith.constant 31 : index
    %828 = memref.load %arg1[%c31_87] : memref<162xf32, #tpu.memory_space<smem>>
    %829 = vector.broadcast %828 : f32 to vector<16x128xf32>
    %830 = arith.mulf %663, %829 : vector<16x128xf32>
    %c41_88 = arith.constant 41 : index
    %831 = memref.load %arg1[%c41_88] : memref<162xf32, #tpu.memory_space<smem>>
    %832 = vector.broadcast %831 : f32 to vector<16x128xf32>
    %833 = arith.mulf %675, %832 : vector<16x128xf32>
    %834 = arith.addf %830, %833 : vector<16x128xf32>
    %c51_89 = arith.constant 51 : index
    %835 = memref.load %arg1[%c51_89] : memref<162xf32, #tpu.memory_space<smem>>
    %836 = vector.broadcast %835 : f32 to vector<16x128xf32>
    %837 = arith.mulf %687, %836 : vector<16x128xf32>
    %838 = arith.addf %834, %837 : vector<16x128xf32>
    %c61_90 = arith.constant 61 : index
    %839 = memref.load %arg1[%c61_90] : memref<162xf32, #tpu.memory_space<smem>>
    %840 = vector.broadcast %839 : f32 to vector<16x128xf32>
    %841 = arith.mulf %699, %840 : vector<16x128xf32>
    %842 = arith.addf %838, %841 : vector<16x128xf32>
    %c71_91 = arith.constant 71 : index
    %843 = memref.load %arg1[%c71_91] : memref<162xf32, #tpu.memory_space<smem>>
    %844 = vector.broadcast %843 : f32 to vector<16x128xf32>
    %845 = arith.mulf %711, %844 : vector<16x128xf32>
    %846 = arith.addf %842, %845 : vector<16x128xf32>
    %c81_92 = arith.constant 81 : index
    %847 = memref.load %arg1[%c81_92] : memref<162xf32, #tpu.memory_space<smem>>
    %848 = vector.broadcast %847 : f32 to vector<16x128xf32>
    %849 = arith.mulf %723, %848 : vector<16x128xf32>
    %850 = arith.addf %846, %849 : vector<16x128xf32>
    %c91_93 = arith.constant 91 : index
    %851 = memref.load %arg1[%c91_93] : memref<162xf32, #tpu.memory_space<smem>>
    %852 = vector.broadcast %851 : f32 to vector<16x128xf32>
    %853 = arith.mulf %735, %852 : vector<16x128xf32>
    %854 = arith.addf %850, %853 : vector<16x128xf32>
    %c101_94 = arith.constant 101 : index
    %855 = memref.load %arg1[%c101_94] : memref<162xf32, #tpu.memory_space<smem>>
    %856 = vector.broadcast %855 : f32 to vector<16x128xf32>
    %857 = arith.mulf %747, %856 : vector<16x128xf32>
    %858 = arith.addf %854, %857 : vector<16x128xf32>
    %c111_95 = arith.constant 111 : index
    %859 = memref.load %arg1[%c111_95] : memref<162xf32, #tpu.memory_space<smem>>
    %860 = vector.broadcast %859 : f32 to vector<16x128xf32>
    %861 = arith.mulf %759, %860 : vector<16x128xf32>
    %862 = arith.addf %858, %861 : vector<16x128xf32>
    %c121_96 = arith.constant 121 : index
    %863 = memref.load %arg1[%c121_96] : memref<162xf32, #tpu.memory_space<smem>>
    %864 = vector.broadcast %863 : f32 to vector<16x128xf32>
    %865 = arith.mulf %771, %864 : vector<16x128xf32>
    %866 = arith.addf %862, %865 : vector<16x128xf32>
    %c131_97 = arith.constant 131 : index
    %867 = memref.load %arg1[%c131_97] : memref<162xf32, #tpu.memory_space<smem>>
    %868 = vector.broadcast %867 : f32 to vector<16x128xf32>
    %869 = arith.addf %866, %868 : vector<16x128xf32>
    %cst_98 = arith.constant 0.000000e+00 : f32
    %870 = vector.broadcast %cst_98 : f32 to vector<16x128xf32>
    %871 = arith.maximumf %869, %870 : vector<16x128xf32>
    %c142_99 = arith.constant 142 : index
    %872 = memref.load %arg1[%c142_99] : memref<162xf32, #tpu.memory_space<smem>>
    %873 = vector.broadcast %872 : f32 to vector<16x128xf32>
    %874 = arith.mulf %871, %873 : vector<16x128xf32>
    %875 = arith.addf %823, %874 : vector<16x128xf32>
    %c143_100 = arith.constant 143 : index
    %876 = memref.load %arg1[%c143_100] : memref<162xf32, #tpu.memory_space<smem>>
    %877 = vector.broadcast %876 : f32 to vector<16x128xf32>
    %878 = arith.mulf %871, %877 : vector<16x128xf32>
    %879 = arith.addf %827, %878 : vector<16x128xf32>
    %c32_101 = arith.constant 32 : index
    %880 = memref.load %arg1[%c32_101] : memref<162xf32, #tpu.memory_space<smem>>
    %881 = vector.broadcast %880 : f32 to vector<16x128xf32>
    %882 = arith.mulf %663, %881 : vector<16x128xf32>
    %c42_102 = arith.constant 42 : index
    %883 = memref.load %arg1[%c42_102] : memref<162xf32, #tpu.memory_space<smem>>
    %884 = vector.broadcast %883 : f32 to vector<16x128xf32>
    %885 = arith.mulf %675, %884 : vector<16x128xf32>
    %886 = arith.addf %882, %885 : vector<16x128xf32>
    %c52_103 = arith.constant 52 : index
    %887 = memref.load %arg1[%c52_103] : memref<162xf32, #tpu.memory_space<smem>>
    %888 = vector.broadcast %887 : f32 to vector<16x128xf32>
    %889 = arith.mulf %687, %888 : vector<16x128xf32>
    %890 = arith.addf %886, %889 : vector<16x128xf32>
    %c62_104 = arith.constant 62 : index
    %891 = memref.load %arg1[%c62_104] : memref<162xf32, #tpu.memory_space<smem>>
    %892 = vector.broadcast %891 : f32 to vector<16x128xf32>
    %893 = arith.mulf %699, %892 : vector<16x128xf32>
    %894 = arith.addf %890, %893 : vector<16x128xf32>
    %c72_105 = arith.constant 72 : index
    %895 = memref.load %arg1[%c72_105] : memref<162xf32, #tpu.memory_space<smem>>
    %896 = vector.broadcast %895 : f32 to vector<16x128xf32>
    %897 = arith.mulf %711, %896 : vector<16x128xf32>
    %898 = arith.addf %894, %897 : vector<16x128xf32>
    %c82_106 = arith.constant 82 : index
    %899 = memref.load %arg1[%c82_106] : memref<162xf32, #tpu.memory_space<smem>>
    %900 = vector.broadcast %899 : f32 to vector<16x128xf32>
    %901 = arith.mulf %723, %900 : vector<16x128xf32>
    %902 = arith.addf %898, %901 : vector<16x128xf32>
    %c92_107 = arith.constant 92 : index
    %903 = memref.load %arg1[%c92_107] : memref<162xf32, #tpu.memory_space<smem>>
    %904 = vector.broadcast %903 : f32 to vector<16x128xf32>
    %905 = arith.mulf %735, %904 : vector<16x128xf32>
    %906 = arith.addf %902, %905 : vector<16x128xf32>
    %c102_108 = arith.constant 102 : index
    %907 = memref.load %arg1[%c102_108] : memref<162xf32, #tpu.memory_space<smem>>
    %908 = vector.broadcast %907 : f32 to vector<16x128xf32>
    %909 = arith.mulf %747, %908 : vector<16x128xf32>
    %910 = arith.addf %906, %909 : vector<16x128xf32>
    %c112_109 = arith.constant 112 : index
    %911 = memref.load %arg1[%c112_109] : memref<162xf32, #tpu.memory_space<smem>>
    %912 = vector.broadcast %911 : f32 to vector<16x128xf32>
    %913 = arith.mulf %759, %912 : vector<16x128xf32>
    %914 = arith.addf %910, %913 : vector<16x128xf32>
    %c122_110 = arith.constant 122 : index
    %915 = memref.load %arg1[%c122_110] : memref<162xf32, #tpu.memory_space<smem>>
    %916 = vector.broadcast %915 : f32 to vector<16x128xf32>
    %917 = arith.mulf %771, %916 : vector<16x128xf32>
    %918 = arith.addf %914, %917 : vector<16x128xf32>
    %c132_111 = arith.constant 132 : index
    %919 = memref.load %arg1[%c132_111] : memref<162xf32, #tpu.memory_space<smem>>
    %920 = vector.broadcast %919 : f32 to vector<16x128xf32>
    %921 = arith.addf %918, %920 : vector<16x128xf32>
    %cst_112 = arith.constant 0.000000e+00 : f32
    %922 = vector.broadcast %cst_112 : f32 to vector<16x128xf32>
    %923 = arith.maximumf %921, %922 : vector<16x128xf32>
    %c144_113 = arith.constant 144 : index
    %924 = memref.load %arg1[%c144_113] : memref<162xf32, #tpu.memory_space<smem>>
    %925 = vector.broadcast %924 : f32 to vector<16x128xf32>
    %926 = arith.mulf %923, %925 : vector<16x128xf32>
    %927 = arith.addf %875, %926 : vector<16x128xf32>
    %c145_114 = arith.constant 145 : index
    %928 = memref.load %arg1[%c145_114] : memref<162xf32, #tpu.memory_space<smem>>
    %929 = vector.broadcast %928 : f32 to vector<16x128xf32>
    %930 = arith.mulf %923, %929 : vector<16x128xf32>
    %931 = arith.addf %879, %930 : vector<16x128xf32>
    %c33_115 = arith.constant 33 : index
    %932 = memref.load %arg1[%c33_115] : memref<162xf32, #tpu.memory_space<smem>>
    %933 = vector.broadcast %932 : f32 to vector<16x128xf32>
    %934 = arith.mulf %663, %933 : vector<16x128xf32>
    %c43_116 = arith.constant 43 : index
    %935 = memref.load %arg1[%c43_116] : memref<162xf32, #tpu.memory_space<smem>>
    %936 = vector.broadcast %935 : f32 to vector<16x128xf32>
    %937 = arith.mulf %675, %936 : vector<16x128xf32>
    %938 = arith.addf %934, %937 : vector<16x128xf32>
    %c53_117 = arith.constant 53 : index
    %939 = memref.load %arg1[%c53_117] : memref<162xf32, #tpu.memory_space<smem>>
    %940 = vector.broadcast %939 : f32 to vector<16x128xf32>
    %941 = arith.mulf %687, %940 : vector<16x128xf32>
    %942 = arith.addf %938, %941 : vector<16x128xf32>
    %c63_118 = arith.constant 63 : index
    %943 = memref.load %arg1[%c63_118] : memref<162xf32, #tpu.memory_space<smem>>
    %944 = vector.broadcast %943 : f32 to vector<16x128xf32>
    %945 = arith.mulf %699, %944 : vector<16x128xf32>
    %946 = arith.addf %942, %945 : vector<16x128xf32>
    %c73_119 = arith.constant 73 : index
    %947 = memref.load %arg1[%c73_119] : memref<162xf32, #tpu.memory_space<smem>>
    %948 = vector.broadcast %947 : f32 to vector<16x128xf32>
    %949 = arith.mulf %711, %948 : vector<16x128xf32>
    %950 = arith.addf %946, %949 : vector<16x128xf32>
    %c83_120 = arith.constant 83 : index
    %951 = memref.load %arg1[%c83_120] : memref<162xf32, #tpu.memory_space<smem>>
    %952 = vector.broadcast %951 : f32 to vector<16x128xf32>
    %953 = arith.mulf %723, %952 : vector<16x128xf32>
    %954 = arith.addf %950, %953 : vector<16x128xf32>
    %c93_121 = arith.constant 93 : index
    %955 = memref.load %arg1[%c93_121] : memref<162xf32, #tpu.memory_space<smem>>
    %956 = vector.broadcast %955 : f32 to vector<16x128xf32>
    %957 = arith.mulf %735, %956 : vector<16x128xf32>
    %958 = arith.addf %954, %957 : vector<16x128xf32>
    %c103_122 = arith.constant 103 : index
    %959 = memref.load %arg1[%c103_122] : memref<162xf32, #tpu.memory_space<smem>>
    %960 = vector.broadcast %959 : f32 to vector<16x128xf32>
    %961 = arith.mulf %747, %960 : vector<16x128xf32>
    %962 = arith.addf %958, %961 : vector<16x128xf32>
    %c113_123 = arith.constant 113 : index
    %963 = memref.load %arg1[%c113_123] : memref<162xf32, #tpu.memory_space<smem>>
    %964 = vector.broadcast %963 : f32 to vector<16x128xf32>
    %965 = arith.mulf %759, %964 : vector<16x128xf32>
    %966 = arith.addf %962, %965 : vector<16x128xf32>
    %c123_124 = arith.constant 123 : index
    %967 = memref.load %arg1[%c123_124] : memref<162xf32, #tpu.memory_space<smem>>
    %968 = vector.broadcast %967 : f32 to vector<16x128xf32>
    %969 = arith.mulf %771, %968 : vector<16x128xf32>
    %970 = arith.addf %966, %969 : vector<16x128xf32>
    %c133_125 = arith.constant 133 : index
    %971 = memref.load %arg1[%c133_125] : memref<162xf32, #tpu.memory_space<smem>>
    %972 = vector.broadcast %971 : f32 to vector<16x128xf32>
    %973 = arith.addf %970, %972 : vector<16x128xf32>
    %cst_126 = arith.constant 0.000000e+00 : f32
    %974 = vector.broadcast %cst_126 : f32 to vector<16x128xf32>
    %975 = arith.maximumf %973, %974 : vector<16x128xf32>
    %c146_127 = arith.constant 146 : index
    %976 = memref.load %arg1[%c146_127] : memref<162xf32, #tpu.memory_space<smem>>
    %977 = vector.broadcast %976 : f32 to vector<16x128xf32>
    %978 = arith.mulf %975, %977 : vector<16x128xf32>
    %979 = arith.addf %927, %978 : vector<16x128xf32>
    %c147_128 = arith.constant 147 : index
    %980 = memref.load %arg1[%c147_128] : memref<162xf32, #tpu.memory_space<smem>>
    %981 = vector.broadcast %980 : f32 to vector<16x128xf32>
    %982 = arith.mulf %975, %981 : vector<16x128xf32>
    %983 = arith.addf %931, %982 : vector<16x128xf32>
    %c34_129 = arith.constant 34 : index
    %984 = memref.load %arg1[%c34_129] : memref<162xf32, #tpu.memory_space<smem>>
    %985 = vector.broadcast %984 : f32 to vector<16x128xf32>
    %986 = arith.mulf %663, %985 : vector<16x128xf32>
    %c44_130 = arith.constant 44 : index
    %987 = memref.load %arg1[%c44_130] : memref<162xf32, #tpu.memory_space<smem>>
    %988 = vector.broadcast %987 : f32 to vector<16x128xf32>
    %989 = arith.mulf %675, %988 : vector<16x128xf32>
    %990 = arith.addf %986, %989 : vector<16x128xf32>
    %c54_131 = arith.constant 54 : index
    %991 = memref.load %arg1[%c54_131] : memref<162xf32, #tpu.memory_space<smem>>
    %992 = vector.broadcast %991 : f32 to vector<16x128xf32>
    %993 = arith.mulf %687, %992 : vector<16x128xf32>
    %994 = arith.addf %990, %993 : vector<16x128xf32>
    %c64_132 = arith.constant 64 : index
    %995 = memref.load %arg1[%c64_132] : memref<162xf32, #tpu.memory_space<smem>>
    %996 = vector.broadcast %995 : f32 to vector<16x128xf32>
    %997 = arith.mulf %699, %996 : vector<16x128xf32>
    %998 = arith.addf %994, %997 : vector<16x128xf32>
    %c74_133 = arith.constant 74 : index
    %999 = memref.load %arg1[%c74_133] : memref<162xf32, #tpu.memory_space<smem>>
    %1000 = vector.broadcast %999 : f32 to vector<16x128xf32>
    %1001 = arith.mulf %711, %1000 : vector<16x128xf32>
    %1002 = arith.addf %998, %1001 : vector<16x128xf32>
    %c84_134 = arith.constant 84 : index
    %1003 = memref.load %arg1[%c84_134] : memref<162xf32, #tpu.memory_space<smem>>
    %1004 = vector.broadcast %1003 : f32 to vector<16x128xf32>
    %1005 = arith.mulf %723, %1004 : vector<16x128xf32>
    %1006 = arith.addf %1002, %1005 : vector<16x128xf32>
    %c94_135 = arith.constant 94 : index
    %1007 = memref.load %arg1[%c94_135] : memref<162xf32, #tpu.memory_space<smem>>
    %1008 = vector.broadcast %1007 : f32 to vector<16x128xf32>
    %1009 = arith.mulf %735, %1008 : vector<16x128xf32>
    %1010 = arith.addf %1006, %1009 : vector<16x128xf32>
    %c104_136 = arith.constant 104 : index
    %1011 = memref.load %arg1[%c104_136] : memref<162xf32, #tpu.memory_space<smem>>
    %1012 = vector.broadcast %1011 : f32 to vector<16x128xf32>
    %1013 = arith.mulf %747, %1012 : vector<16x128xf32>
    %1014 = arith.addf %1010, %1013 : vector<16x128xf32>
    %c114_137 = arith.constant 114 : index
    %1015 = memref.load %arg1[%c114_137] : memref<162xf32, #tpu.memory_space<smem>>
    %1016 = vector.broadcast %1015 : f32 to vector<16x128xf32>
    %1017 = arith.mulf %759, %1016 : vector<16x128xf32>
    %1018 = arith.addf %1014, %1017 : vector<16x128xf32>
    %c124_138 = arith.constant 124 : index
    %1019 = memref.load %arg1[%c124_138] : memref<162xf32, #tpu.memory_space<smem>>
    %1020 = vector.broadcast %1019 : f32 to vector<16x128xf32>
    %1021 = arith.mulf %771, %1020 : vector<16x128xf32>
    %1022 = arith.addf %1018, %1021 : vector<16x128xf32>
    %c134_139 = arith.constant 134 : index
    %1023 = memref.load %arg1[%c134_139] : memref<162xf32, #tpu.memory_space<smem>>
    %1024 = vector.broadcast %1023 : f32 to vector<16x128xf32>
    %1025 = arith.addf %1022, %1024 : vector<16x128xf32>
    %cst_140 = arith.constant 0.000000e+00 : f32
    %1026 = vector.broadcast %cst_140 : f32 to vector<16x128xf32>
    %1027 = arith.maximumf %1025, %1026 : vector<16x128xf32>
    %c148_141 = arith.constant 148 : index
    %1028 = memref.load %arg1[%c148_141] : memref<162xf32, #tpu.memory_space<smem>>
    %1029 = vector.broadcast %1028 : f32 to vector<16x128xf32>
    %1030 = arith.mulf %1027, %1029 : vector<16x128xf32>
    %1031 = arith.addf %979, %1030 : vector<16x128xf32>
    %c149_142 = arith.constant 149 : index
    %1032 = memref.load %arg1[%c149_142] : memref<162xf32, #tpu.memory_space<smem>>
    %1033 = vector.broadcast %1032 : f32 to vector<16x128xf32>
    %1034 = arith.mulf %1027, %1033 : vector<16x128xf32>
    %1035 = arith.addf %983, %1034 : vector<16x128xf32>
    %c35_143 = arith.constant 35 : index
    %1036 = memref.load %arg1[%c35_143] : memref<162xf32, #tpu.memory_space<smem>>
    %1037 = vector.broadcast %1036 : f32 to vector<16x128xf32>
    %1038 = arith.mulf %663, %1037 : vector<16x128xf32>
    %c45_144 = arith.constant 45 : index
    %1039 = memref.load %arg1[%c45_144] : memref<162xf32, #tpu.memory_space<smem>>
    %1040 = vector.broadcast %1039 : f32 to vector<16x128xf32>
    %1041 = arith.mulf %675, %1040 : vector<16x128xf32>
    %1042 = arith.addf %1038, %1041 : vector<16x128xf32>
    %c55_145 = arith.constant 55 : index
    %1043 = memref.load %arg1[%c55_145] : memref<162xf32, #tpu.memory_space<smem>>
    %1044 = vector.broadcast %1043 : f32 to vector<16x128xf32>
    %1045 = arith.mulf %687, %1044 : vector<16x128xf32>
    %1046 = arith.addf %1042, %1045 : vector<16x128xf32>
    %c65_146 = arith.constant 65 : index
    %1047 = memref.load %arg1[%c65_146] : memref<162xf32, #tpu.memory_space<smem>>
    %1048 = vector.broadcast %1047 : f32 to vector<16x128xf32>
    %1049 = arith.mulf %699, %1048 : vector<16x128xf32>
    %1050 = arith.addf %1046, %1049 : vector<16x128xf32>
    %c75_147 = arith.constant 75 : index
    %1051 = memref.load %arg1[%c75_147] : memref<162xf32, #tpu.memory_space<smem>>
    %1052 = vector.broadcast %1051 : f32 to vector<16x128xf32>
    %1053 = arith.mulf %711, %1052 : vector<16x128xf32>
    %1054 = arith.addf %1050, %1053 : vector<16x128xf32>
    %c85_148 = arith.constant 85 : index
    %1055 = memref.load %arg1[%c85_148] : memref<162xf32, #tpu.memory_space<smem>>
    %1056 = vector.broadcast %1055 : f32 to vector<16x128xf32>
    %1057 = arith.mulf %723, %1056 : vector<16x128xf32>
    %1058 = arith.addf %1054, %1057 : vector<16x128xf32>
    %c95_149 = arith.constant 95 : index
    %1059 = memref.load %arg1[%c95_149] : memref<162xf32, #tpu.memory_space<smem>>
    %1060 = vector.broadcast %1059 : f32 to vector<16x128xf32>
    %1061 = arith.mulf %735, %1060 : vector<16x128xf32>
    %1062 = arith.addf %1058, %1061 : vector<16x128xf32>
    %c105_150 = arith.constant 105 : index
    %1063 = memref.load %arg1[%c105_150] : memref<162xf32, #tpu.memory_space<smem>>
    %1064 = vector.broadcast %1063 : f32 to vector<16x128xf32>
    %1065 = arith.mulf %747, %1064 : vector<16x128xf32>
    %1066 = arith.addf %1062, %1065 : vector<16x128xf32>
    %c115_151 = arith.constant 115 : index
    %1067 = memref.load %arg1[%c115_151] : memref<162xf32, #tpu.memory_space<smem>>
    %1068 = vector.broadcast %1067 : f32 to vector<16x128xf32>
    %1069 = arith.mulf %759, %1068 : vector<16x128xf32>
    %1070 = arith.addf %1066, %1069 : vector<16x128xf32>
    %c125_152 = arith.constant 125 : index
    %1071 = memref.load %arg1[%c125_152] : memref<162xf32, #tpu.memory_space<smem>>
    %1072 = vector.broadcast %1071 : f32 to vector<16x128xf32>
    %1073 = arith.mulf %771, %1072 : vector<16x128xf32>
    %1074 = arith.addf %1070, %1073 : vector<16x128xf32>
    %c135_153 = arith.constant 135 : index
    %1075 = memref.load %arg1[%c135_153] : memref<162xf32, #tpu.memory_space<smem>>
    %1076 = vector.broadcast %1075 : f32 to vector<16x128xf32>
    %1077 = arith.addf %1074, %1076 : vector<16x128xf32>
    %cst_154 = arith.constant 0.000000e+00 : f32
    %1078 = vector.broadcast %cst_154 : f32 to vector<16x128xf32>
    %1079 = arith.maximumf %1077, %1078 : vector<16x128xf32>
    %c150_155 = arith.constant 150 : index
    %1080 = memref.load %arg1[%c150_155] : memref<162xf32, #tpu.memory_space<smem>>
    %1081 = vector.broadcast %1080 : f32 to vector<16x128xf32>
    %1082 = arith.mulf %1079, %1081 : vector<16x128xf32>
    %1083 = arith.addf %1031, %1082 : vector<16x128xf32>
    %c151_156 = arith.constant 151 : index
    %1084 = memref.load %arg1[%c151_156] : memref<162xf32, #tpu.memory_space<smem>>
    %1085 = vector.broadcast %1084 : f32 to vector<16x128xf32>
    %1086 = arith.mulf %1079, %1085 : vector<16x128xf32>
    %1087 = arith.addf %1035, %1086 : vector<16x128xf32>
    %c36_157 = arith.constant 36 : index
    %1088 = memref.load %arg1[%c36_157] : memref<162xf32, #tpu.memory_space<smem>>
    %1089 = vector.broadcast %1088 : f32 to vector<16x128xf32>
    %1090 = arith.mulf %663, %1089 : vector<16x128xf32>
    %c46_158 = arith.constant 46 : index
    %1091 = memref.load %arg1[%c46_158] : memref<162xf32, #tpu.memory_space<smem>>
    %1092 = vector.broadcast %1091 : f32 to vector<16x128xf32>
    %1093 = arith.mulf %675, %1092 : vector<16x128xf32>
    %1094 = arith.addf %1090, %1093 : vector<16x128xf32>
    %c56_159 = arith.constant 56 : index
    %1095 = memref.load %arg1[%c56_159] : memref<162xf32, #tpu.memory_space<smem>>
    %1096 = vector.broadcast %1095 : f32 to vector<16x128xf32>
    %1097 = arith.mulf %687, %1096 : vector<16x128xf32>
    %1098 = arith.addf %1094, %1097 : vector<16x128xf32>
    %c66_160 = arith.constant 66 : index
    %1099 = memref.load %arg1[%c66_160] : memref<162xf32, #tpu.memory_space<smem>>
    %1100 = vector.broadcast %1099 : f32 to vector<16x128xf32>
    %1101 = arith.mulf %699, %1100 : vector<16x128xf32>
    %1102 = arith.addf %1098, %1101 : vector<16x128xf32>
    %c76_161 = arith.constant 76 : index
    %1103 = memref.load %arg1[%c76_161] : memref<162xf32, #tpu.memory_space<smem>>
    %1104 = vector.broadcast %1103 : f32 to vector<16x128xf32>
    %1105 = arith.mulf %711, %1104 : vector<16x128xf32>
    %1106 = arith.addf %1102, %1105 : vector<16x128xf32>
    %c86_162 = arith.constant 86 : index
    %1107 = memref.load %arg1[%c86_162] : memref<162xf32, #tpu.memory_space<smem>>
    %1108 = vector.broadcast %1107 : f32 to vector<16x128xf32>
    %1109 = arith.mulf %723, %1108 : vector<16x128xf32>
    %1110 = arith.addf %1106, %1109 : vector<16x128xf32>
    %c96_163 = arith.constant 96 : index
    %1111 = memref.load %arg1[%c96_163] : memref<162xf32, #tpu.memory_space<smem>>
    %1112 = vector.broadcast %1111 : f32 to vector<16x128xf32>
    %1113 = arith.mulf %735, %1112 : vector<16x128xf32>
    %1114 = arith.addf %1110, %1113 : vector<16x128xf32>
    %c106_164 = arith.constant 106 : index
    %1115 = memref.load %arg1[%c106_164] : memref<162xf32, #tpu.memory_space<smem>>
    %1116 = vector.broadcast %1115 : f32 to vector<16x128xf32>
    %1117 = arith.mulf %747, %1116 : vector<16x128xf32>
    %1118 = arith.addf %1114, %1117 : vector<16x128xf32>
    %c116_165 = arith.constant 116 : index
    %1119 = memref.load %arg1[%c116_165] : memref<162xf32, #tpu.memory_space<smem>>
    %1120 = vector.broadcast %1119 : f32 to vector<16x128xf32>
    %1121 = arith.mulf %759, %1120 : vector<16x128xf32>
    %1122 = arith.addf %1118, %1121 : vector<16x128xf32>
    %c126_166 = arith.constant 126 : index
    %1123 = memref.load %arg1[%c126_166] : memref<162xf32, #tpu.memory_space<smem>>
    %1124 = vector.broadcast %1123 : f32 to vector<16x128xf32>
    %1125 = arith.mulf %771, %1124 : vector<16x128xf32>
    %1126 = arith.addf %1122, %1125 : vector<16x128xf32>
    %c136_167 = arith.constant 136 : index
    %1127 = memref.load %arg1[%c136_167] : memref<162xf32, #tpu.memory_space<smem>>
    %1128 = vector.broadcast %1127 : f32 to vector<16x128xf32>
    %1129 = arith.addf %1126, %1128 : vector<16x128xf32>
    %cst_168 = arith.constant 0.000000e+00 : f32
    %1130 = vector.broadcast %cst_168 : f32 to vector<16x128xf32>
    %1131 = arith.maximumf %1129, %1130 : vector<16x128xf32>
    %c152_169 = arith.constant 152 : index
    %1132 = memref.load %arg1[%c152_169] : memref<162xf32, #tpu.memory_space<smem>>
    %1133 = vector.broadcast %1132 : f32 to vector<16x128xf32>
    %1134 = arith.mulf %1131, %1133 : vector<16x128xf32>
    %1135 = arith.addf %1083, %1134 : vector<16x128xf32>
    %c153_170 = arith.constant 153 : index
    %1136 = memref.load %arg1[%c153_170] : memref<162xf32, #tpu.memory_space<smem>>
    %1137 = vector.broadcast %1136 : f32 to vector<16x128xf32>
    %1138 = arith.mulf %1131, %1137 : vector<16x128xf32>
    %1139 = arith.addf %1087, %1138 : vector<16x128xf32>
    %c37_171 = arith.constant 37 : index
    %1140 = memref.load %arg1[%c37_171] : memref<162xf32, #tpu.memory_space<smem>>
    %1141 = vector.broadcast %1140 : f32 to vector<16x128xf32>
    %1142 = arith.mulf %663, %1141 : vector<16x128xf32>
    %c47_172 = arith.constant 47 : index
    %1143 = memref.load %arg1[%c47_172] : memref<162xf32, #tpu.memory_space<smem>>
    %1144 = vector.broadcast %1143 : f32 to vector<16x128xf32>
    %1145 = arith.mulf %675, %1144 : vector<16x128xf32>
    %1146 = arith.addf %1142, %1145 : vector<16x128xf32>
    %c57_173 = arith.constant 57 : index
    %1147 = memref.load %arg1[%c57_173] : memref<162xf32, #tpu.memory_space<smem>>
    %1148 = vector.broadcast %1147 : f32 to vector<16x128xf32>
    %1149 = arith.mulf %687, %1148 : vector<16x128xf32>
    %1150 = arith.addf %1146, %1149 : vector<16x128xf32>
    %c67_174 = arith.constant 67 : index
    %1151 = memref.load %arg1[%c67_174] : memref<162xf32, #tpu.memory_space<smem>>
    %1152 = vector.broadcast %1151 : f32 to vector<16x128xf32>
    %1153 = arith.mulf %699, %1152 : vector<16x128xf32>
    %1154 = arith.addf %1150, %1153 : vector<16x128xf32>
    %c77_175 = arith.constant 77 : index
    %1155 = memref.load %arg1[%c77_175] : memref<162xf32, #tpu.memory_space<smem>>
    %1156 = vector.broadcast %1155 : f32 to vector<16x128xf32>
    %1157 = arith.mulf %711, %1156 : vector<16x128xf32>
    %1158 = arith.addf %1154, %1157 : vector<16x128xf32>
    %c87_176 = arith.constant 87 : index
    %1159 = memref.load %arg1[%c87_176] : memref<162xf32, #tpu.memory_space<smem>>
    %1160 = vector.broadcast %1159 : f32 to vector<16x128xf32>
    %1161 = arith.mulf %723, %1160 : vector<16x128xf32>
    %1162 = arith.addf %1158, %1161 : vector<16x128xf32>
    %c97_177 = arith.constant 97 : index
    %1163 = memref.load %arg1[%c97_177] : memref<162xf32, #tpu.memory_space<smem>>
    %1164 = vector.broadcast %1163 : f32 to vector<16x128xf32>
    %1165 = arith.mulf %735, %1164 : vector<16x128xf32>
    %1166 = arith.addf %1162, %1165 : vector<16x128xf32>
    %c107_178 = arith.constant 107 : index
    %1167 = memref.load %arg1[%c107_178] : memref<162xf32, #tpu.memory_space<smem>>
    %1168 = vector.broadcast %1167 : f32 to vector<16x128xf32>
    %1169 = arith.mulf %747, %1168 : vector<16x128xf32>
    %1170 = arith.addf %1166, %1169 : vector<16x128xf32>
    %c117_179 = arith.constant 117 : index
    %1171 = memref.load %arg1[%c117_179] : memref<162xf32, #tpu.memory_space<smem>>
    %1172 = vector.broadcast %1171 : f32 to vector<16x128xf32>
    %1173 = arith.mulf %759, %1172 : vector<16x128xf32>
    %1174 = arith.addf %1170, %1173 : vector<16x128xf32>
    %c127_180 = arith.constant 127 : index
    %1175 = memref.load %arg1[%c127_180] : memref<162xf32, #tpu.memory_space<smem>>
    %1176 = vector.broadcast %1175 : f32 to vector<16x128xf32>
    %1177 = arith.mulf %771, %1176 : vector<16x128xf32>
    %1178 = arith.addf %1174, %1177 : vector<16x128xf32>
    %c137_181 = arith.constant 137 : index
    %1179 = memref.load %arg1[%c137_181] : memref<162xf32, #tpu.memory_space<smem>>
    %1180 = vector.broadcast %1179 : f32 to vector<16x128xf32>
    %1181 = arith.addf %1178, %1180 : vector<16x128xf32>
    %cst_182 = arith.constant 0.000000e+00 : f32
    %1182 = vector.broadcast %cst_182 : f32 to vector<16x128xf32>
    %1183 = arith.maximumf %1181, %1182 : vector<16x128xf32>
    %c154_183 = arith.constant 154 : index
    %1184 = memref.load %arg1[%c154_183] : memref<162xf32, #tpu.memory_space<smem>>
    %1185 = vector.broadcast %1184 : f32 to vector<16x128xf32>
    %1186 = arith.mulf %1183, %1185 : vector<16x128xf32>
    %1187 = arith.addf %1135, %1186 : vector<16x128xf32>
    %c155_184 = arith.constant 155 : index
    %1188 = memref.load %arg1[%c155_184] : memref<162xf32, #tpu.memory_space<smem>>
    %1189 = vector.broadcast %1188 : f32 to vector<16x128xf32>
    %1190 = arith.mulf %1183, %1189 : vector<16x128xf32>
    %1191 = arith.addf %1139, %1190 : vector<16x128xf32>
    %c38_185 = arith.constant 38 : index
    %1192 = memref.load %arg1[%c38_185] : memref<162xf32, #tpu.memory_space<smem>>
    %1193 = vector.broadcast %1192 : f32 to vector<16x128xf32>
    %1194 = arith.mulf %663, %1193 : vector<16x128xf32>
    %c48_186 = arith.constant 48 : index
    %1195 = memref.load %arg1[%c48_186] : memref<162xf32, #tpu.memory_space<smem>>
    %1196 = vector.broadcast %1195 : f32 to vector<16x128xf32>
    %1197 = arith.mulf %675, %1196 : vector<16x128xf32>
    %1198 = arith.addf %1194, %1197 : vector<16x128xf32>
    %c58_187 = arith.constant 58 : index
    %1199 = memref.load %arg1[%c58_187] : memref<162xf32, #tpu.memory_space<smem>>
    %1200 = vector.broadcast %1199 : f32 to vector<16x128xf32>
    %1201 = arith.mulf %687, %1200 : vector<16x128xf32>
    %1202 = arith.addf %1198, %1201 : vector<16x128xf32>
    %c68_188 = arith.constant 68 : index
    %1203 = memref.load %arg1[%c68_188] : memref<162xf32, #tpu.memory_space<smem>>
    %1204 = vector.broadcast %1203 : f32 to vector<16x128xf32>
    %1205 = arith.mulf %699, %1204 : vector<16x128xf32>
    %1206 = arith.addf %1202, %1205 : vector<16x128xf32>
    %c78_189 = arith.constant 78 : index
    %1207 = memref.load %arg1[%c78_189] : memref<162xf32, #tpu.memory_space<smem>>
    %1208 = vector.broadcast %1207 : f32 to vector<16x128xf32>
    %1209 = arith.mulf %711, %1208 : vector<16x128xf32>
    %1210 = arith.addf %1206, %1209 : vector<16x128xf32>
    %c88_190 = arith.constant 88 : index
    %1211 = memref.load %arg1[%c88_190] : memref<162xf32, #tpu.memory_space<smem>>
    %1212 = vector.broadcast %1211 : f32 to vector<16x128xf32>
    %1213 = arith.mulf %723, %1212 : vector<16x128xf32>
    %1214 = arith.addf %1210, %1213 : vector<16x128xf32>
    %c98_191 = arith.constant 98 : index
    %1215 = memref.load %arg1[%c98_191] : memref<162xf32, #tpu.memory_space<smem>>
    %1216 = vector.broadcast %1215 : f32 to vector<16x128xf32>
    %1217 = arith.mulf %735, %1216 : vector<16x128xf32>
    %1218 = arith.addf %1214, %1217 : vector<16x128xf32>
    %c108_192 = arith.constant 108 : index
    %1219 = memref.load %arg1[%c108_192] : memref<162xf32, #tpu.memory_space<smem>>
    %1220 = vector.broadcast %1219 : f32 to vector<16x128xf32>
    %1221 = arith.mulf %747, %1220 : vector<16x128xf32>
    %1222 = arith.addf %1218, %1221 : vector<16x128xf32>
    %c118_193 = arith.constant 118 : index
    %1223 = memref.load %arg1[%c118_193] : memref<162xf32, #tpu.memory_space<smem>>
    %1224 = vector.broadcast %1223 : f32 to vector<16x128xf32>
    %1225 = arith.mulf %759, %1224 : vector<16x128xf32>
    %1226 = arith.addf %1222, %1225 : vector<16x128xf32>
    %c128_194 = arith.constant 128 : index
    %1227 = memref.load %arg1[%c128_194] : memref<162xf32, #tpu.memory_space<smem>>
    %1228 = vector.broadcast %1227 : f32 to vector<16x128xf32>
    %1229 = arith.mulf %771, %1228 : vector<16x128xf32>
    %1230 = arith.addf %1226, %1229 : vector<16x128xf32>
    %c138_195 = arith.constant 138 : index
    %1231 = memref.load %arg1[%c138_195] : memref<162xf32, #tpu.memory_space<smem>>
    %1232 = vector.broadcast %1231 : f32 to vector<16x128xf32>
    %1233 = arith.addf %1230, %1232 : vector<16x128xf32>
    %cst_196 = arith.constant 0.000000e+00 : f32
    %1234 = vector.broadcast %cst_196 : f32 to vector<16x128xf32>
    %1235 = arith.maximumf %1233, %1234 : vector<16x128xf32>
    %c156_197 = arith.constant 156 : index
    %1236 = memref.load %arg1[%c156_197] : memref<162xf32, #tpu.memory_space<smem>>
    %1237 = vector.broadcast %1236 : f32 to vector<16x128xf32>
    %1238 = arith.mulf %1235, %1237 : vector<16x128xf32>
    %1239 = arith.addf %1187, %1238 : vector<16x128xf32>
    %c157_198 = arith.constant 157 : index
    %1240 = memref.load %arg1[%c157_198] : memref<162xf32, #tpu.memory_space<smem>>
    %1241 = vector.broadcast %1240 : f32 to vector<16x128xf32>
    %1242 = arith.mulf %1235, %1241 : vector<16x128xf32>
    %1243 = arith.addf %1191, %1242 : vector<16x128xf32>
    %c39_199 = arith.constant 39 : index
    %1244 = memref.load %arg1[%c39_199] : memref<162xf32, #tpu.memory_space<smem>>
    %1245 = vector.broadcast %1244 : f32 to vector<16x128xf32>
    %1246 = arith.mulf %663, %1245 : vector<16x128xf32>
    %c49_200 = arith.constant 49 : index
    %1247 = memref.load %arg1[%c49_200] : memref<162xf32, #tpu.memory_space<smem>>
    %1248 = vector.broadcast %1247 : f32 to vector<16x128xf32>
    %1249 = arith.mulf %675, %1248 : vector<16x128xf32>
    %1250 = arith.addf %1246, %1249 : vector<16x128xf32>
    %c59_201 = arith.constant 59 : index
    %1251 = memref.load %arg1[%c59_201] : memref<162xf32, #tpu.memory_space<smem>>
    %1252 = vector.broadcast %1251 : f32 to vector<16x128xf32>
    %1253 = arith.mulf %687, %1252 : vector<16x128xf32>
    %1254 = arith.addf %1250, %1253 : vector<16x128xf32>
    %c69_202 = arith.constant 69 : index
    %1255 = memref.load %arg1[%c69_202] : memref<162xf32, #tpu.memory_space<smem>>
    %1256 = vector.broadcast %1255 : f32 to vector<16x128xf32>
    %1257 = arith.mulf %699, %1256 : vector<16x128xf32>
    %1258 = arith.addf %1254, %1257 : vector<16x128xf32>
    %c79_203 = arith.constant 79 : index
    %1259 = memref.load %arg1[%c79_203] : memref<162xf32, #tpu.memory_space<smem>>
    %1260 = vector.broadcast %1259 : f32 to vector<16x128xf32>
    %1261 = arith.mulf %711, %1260 : vector<16x128xf32>
    %1262 = arith.addf %1258, %1261 : vector<16x128xf32>
    %c89_204 = arith.constant 89 : index
    %1263 = memref.load %arg1[%c89_204] : memref<162xf32, #tpu.memory_space<smem>>
    %1264 = vector.broadcast %1263 : f32 to vector<16x128xf32>
    %1265 = arith.mulf %723, %1264 : vector<16x128xf32>
    %1266 = arith.addf %1262, %1265 : vector<16x128xf32>
    %c99_205 = arith.constant 99 : index
    %1267 = memref.load %arg1[%c99_205] : memref<162xf32, #tpu.memory_space<smem>>
    %1268 = vector.broadcast %1267 : f32 to vector<16x128xf32>
    %1269 = arith.mulf %735, %1268 : vector<16x128xf32>
    %1270 = arith.addf %1266, %1269 : vector<16x128xf32>
    %c109_206 = arith.constant 109 : index
    %1271 = memref.load %arg1[%c109_206] : memref<162xf32, #tpu.memory_space<smem>>
    %1272 = vector.broadcast %1271 : f32 to vector<16x128xf32>
    %1273 = arith.mulf %747, %1272 : vector<16x128xf32>
    %1274 = arith.addf %1270, %1273 : vector<16x128xf32>
    %c119_207 = arith.constant 119 : index
    %1275 = memref.load %arg1[%c119_207] : memref<162xf32, #tpu.memory_space<smem>>
    %1276 = vector.broadcast %1275 : f32 to vector<16x128xf32>
    %1277 = arith.mulf %759, %1276 : vector<16x128xf32>
    %1278 = arith.addf %1274, %1277 : vector<16x128xf32>
    %c129_208 = arith.constant 129 : index
    %1279 = memref.load %arg1[%c129_208] : memref<162xf32, #tpu.memory_space<smem>>
    %1280 = vector.broadcast %1279 : f32 to vector<16x128xf32>
    %1281 = arith.mulf %771, %1280 : vector<16x128xf32>
    %1282 = arith.addf %1278, %1281 : vector<16x128xf32>
    %c139_209 = arith.constant 139 : index
    %1283 = memref.load %arg1[%c139_209] : memref<162xf32, #tpu.memory_space<smem>>
    %1284 = vector.broadcast %1283 : f32 to vector<16x128xf32>
    %1285 = arith.addf %1282, %1284 : vector<16x128xf32>
    %cst_210 = arith.constant 0.000000e+00 : f32
    %1286 = vector.broadcast %cst_210 : f32 to vector<16x128xf32>
    %1287 = arith.maximumf %1285, %1286 : vector<16x128xf32>
    %c158_211 = arith.constant 158 : index
    %1288 = memref.load %arg1[%c158_211] : memref<162xf32, #tpu.memory_space<smem>>
    %1289 = vector.broadcast %1288 : f32 to vector<16x128xf32>
    %1290 = arith.mulf %1287, %1289 : vector<16x128xf32>
    %1291 = arith.addf %1239, %1290 : vector<16x128xf32>
    %c159_212 = arith.constant 159 : index
    %1292 = memref.load %arg1[%c159_212] : memref<162xf32, #tpu.memory_space<smem>>
    %1293 = vector.broadcast %1292 : f32 to vector<16x128xf32>
    %1294 = arith.mulf %1287, %1293 : vector<16x128xf32>
    %1295 = arith.addf %1243, %1294 : vector<16x128xf32>
    %c4_213 = arith.constant 4 : index
    %c0_214 = arith.constant 0 : index
    %c0_215 = arith.constant 0 : index
    %1296 = vector.load %arg2[%c4_213, %c0_214, %c0_215] : memref<6x16x128xf32, #tpu.memory_space<vmem>>, vector<1x16x128xf32>
    %1297 = vector.shape_cast %1296 : vector<1x16x128xf32> to vector<16x128xf32>
    %c5_216 = arith.constant 5 : index
    %c0_217 = arith.constant 0 : index
    %c0_218 = arith.constant 0 : index
    %1298 = vector.load %arg2[%c5_216, %c0_217, %c0_218] : memref<6x16x128xf32, #tpu.memory_space<vmem>>, vector<1x16x128xf32>
    %1299 = vector.shape_cast %1298 : vector<1x16x128xf32> to vector<16x128xf32>
    %c0_219 = arith.constant 0 : index
    %1300 = memref.load %arg1[%c0_219] : memref<162xf32, #tpu.memory_space<smem>>
    %1301 = vector.broadcast %1300 : f32 to vector<16x128xf32>
    %1302 = arith.mulf %1297, %1301 : vector<16x128xf32>
    %c10_220 = arith.constant 10 : index
    %1303 = memref.load %arg1[%c10_220] : memref<162xf32, #tpu.memory_space<smem>>
    %1304 = vector.broadcast %1303 : f32 to vector<16x128xf32>
    %1305 = arith.mulf %1299, %1304 : vector<16x128xf32>
    %1306 = arith.addf %1302, %1305 : vector<16x128xf32>
    %c20_221 = arith.constant 20 : index
    %1307 = memref.load %arg1[%c20_221] : memref<162xf32, #tpu.memory_space<smem>>
    %1308 = vector.broadcast %1307 : f32 to vector<16x128xf32>
    %1309 = arith.addf %1306, %1308 : vector<16x128xf32>
    %cst_222 = arith.constant 0.000000e+00 : f32
    %1310 = vector.broadcast %cst_222 : f32 to vector<16x128xf32>
    %1311 = arith.maximumf %1309, %1310 : vector<16x128xf32>
    %c1_223 = arith.constant 1 : index
    %1312 = memref.load %arg1[%c1_223] : memref<162xf32, #tpu.memory_space<smem>>
    %1313 = vector.broadcast %1312 : f32 to vector<16x128xf32>
    %1314 = arith.mulf %1297, %1313 : vector<16x128xf32>
    %c11_224 = arith.constant 11 : index
    %1315 = memref.load %arg1[%c11_224] : memref<162xf32, #tpu.memory_space<smem>>
    %1316 = vector.broadcast %1315 : f32 to vector<16x128xf32>
    %1317 = arith.mulf %1299, %1316 : vector<16x128xf32>
    %1318 = arith.addf %1314, %1317 : vector<16x128xf32>
    %c21_225 = arith.constant 21 : index
    %1319 = memref.load %arg1[%c21_225] : memref<162xf32, #tpu.memory_space<smem>>
    %1320 = vector.broadcast %1319 : f32 to vector<16x128xf32>
    %1321 = arith.addf %1318, %1320 : vector<16x128xf32>
    %cst_226 = arith.constant 0.000000e+00 : f32
    %1322 = vector.broadcast %cst_226 : f32 to vector<16x128xf32>
    %1323 = arith.maximumf %1321, %1322 : vector<16x128xf32>
    %c2_227 = arith.constant 2 : index
    %1324 = memref.load %arg1[%c2_227] : memref<162xf32, #tpu.memory_space<smem>>
    %1325 = vector.broadcast %1324 : f32 to vector<16x128xf32>
    %1326 = arith.mulf %1297, %1325 : vector<16x128xf32>
    %c12_228 = arith.constant 12 : index
    %1327 = memref.load %arg1[%c12_228] : memref<162xf32, #tpu.memory_space<smem>>
    %1328 = vector.broadcast %1327 : f32 to vector<16x128xf32>
    %1329 = arith.mulf %1299, %1328 : vector<16x128xf32>
    %1330 = arith.addf %1326, %1329 : vector<16x128xf32>
    %c22_229 = arith.constant 22 : index
    %1331 = memref.load %arg1[%c22_229] : memref<162xf32, #tpu.memory_space<smem>>
    %1332 = vector.broadcast %1331 : f32 to vector<16x128xf32>
    %1333 = arith.addf %1330, %1332 : vector<16x128xf32>
    %cst_230 = arith.constant 0.000000e+00 : f32
    %1334 = vector.broadcast %cst_230 : f32 to vector<16x128xf32>
    %1335 = arith.maximumf %1333, %1334 : vector<16x128xf32>
    %c3_231 = arith.constant 3 : index
    %1336 = memref.load %arg1[%c3_231] : memref<162xf32, #tpu.memory_space<smem>>
    %1337 = vector.broadcast %1336 : f32 to vector<16x128xf32>
    %1338 = arith.mulf %1297, %1337 : vector<16x128xf32>
    %c13_232 = arith.constant 13 : index
    %1339 = memref.load %arg1[%c13_232] : memref<162xf32, #tpu.memory_space<smem>>
    %1340 = vector.broadcast %1339 : f32 to vector<16x128xf32>
    %1341 = arith.mulf %1299, %1340 : vector<16x128xf32>
    %1342 = arith.addf %1338, %1341 : vector<16x128xf32>
    %c23_233 = arith.constant 23 : index
    %1343 = memref.load %arg1[%c23_233] : memref<162xf32, #tpu.memory_space<smem>>
    %1344 = vector.broadcast %1343 : f32 to vector<16x128xf32>
    %1345 = arith.addf %1342, %1344 : vector<16x128xf32>
    %cst_234 = arith.constant 0.000000e+00 : f32
    %1346 = vector.broadcast %cst_234 : f32 to vector<16x128xf32>
    %1347 = arith.maximumf %1345, %1346 : vector<16x128xf32>
    %c4_235 = arith.constant 4 : index
    %1348 = memref.load %arg1[%c4_235] : memref<162xf32, #tpu.memory_space<smem>>
    %1349 = vector.broadcast %1348 : f32 to vector<16x128xf32>
    %1350 = arith.mulf %1297, %1349 : vector<16x128xf32>
    %c14_236 = arith.constant 14 : index
    %1351 = memref.load %arg1[%c14_236] : memref<162xf32, #tpu.memory_space<smem>>
    %1352 = vector.broadcast %1351 : f32 to vector<16x128xf32>
    %1353 = arith.mulf %1299, %1352 : vector<16x128xf32>
    %1354 = arith.addf %1350, %1353 : vector<16x128xf32>
    %c24_237 = arith.constant 24 : index
    %1355 = memref.load %arg1[%c24_237] : memref<162xf32, #tpu.memory_space<smem>>
    %1356 = vector.broadcast %1355 : f32 to vector<16x128xf32>
    %1357 = arith.addf %1354, %1356 : vector<16x128xf32>
    %cst_238 = arith.constant 0.000000e+00 : f32
    %1358 = vector.broadcast %cst_238 : f32 to vector<16x128xf32>
    %1359 = arith.maximumf %1357, %1358 : vector<16x128xf32>
    %c5_239 = arith.constant 5 : index
    %1360 = memref.load %arg1[%c5_239] : memref<162xf32, #tpu.memory_space<smem>>
    %1361 = vector.broadcast %1360 : f32 to vector<16x128xf32>
    %1362 = arith.mulf %1297, %1361 : vector<16x128xf32>
    %c15_240 = arith.constant 15 : index
    %1363 = memref.load %arg1[%c15_240] : memref<162xf32, #tpu.memory_space<smem>>
    %1364 = vector.broadcast %1363 : f32 to vector<16x128xf32>
    %1365 = arith.mulf %1299, %1364 : vector<16x128xf32>
    %1366 = arith.addf %1362, %1365 : vector<16x128xf32>
    %c25_241 = arith.constant 25 : index
    %1367 = memref.load %arg1[%c25_241] : memref<162xf32, #tpu.memory_space<smem>>
    %1368 = vector.broadcast %1367 : f32 to vector<16x128xf32>
    %1369 = arith.addf %1366, %1368 : vector<16x128xf32>
    %cst_242 = arith.constant 0.000000e+00 : f32
    %1370 = vector.broadcast %cst_242 : f32 to vector<16x128xf32>
    %1371 = arith.maximumf %1369, %1370 : vector<16x128xf32>
    %c6_243 = arith.constant 6 : index
    %1372 = memref.load %arg1[%c6_243] : memref<162xf32, #tpu.memory_space<smem>>
    %1373 = vector.broadcast %1372 : f32 to vector<16x128xf32>
    %1374 = arith.mulf %1297, %1373 : vector<16x128xf32>
    %c16_244 = arith.constant 16 : index
    %1375 = memref.load %arg1[%c16_244] : memref<162xf32, #tpu.memory_space<smem>>
    %1376 = vector.broadcast %1375 : f32 to vector<16x128xf32>
    %1377 = arith.mulf %1299, %1376 : vector<16x128xf32>
    %1378 = arith.addf %1374, %1377 : vector<16x128xf32>
    %c26_245 = arith.constant 26 : index
    %1379 = memref.load %arg1[%c26_245] : memref<162xf32, #tpu.memory_space<smem>>
    %1380 = vector.broadcast %1379 : f32 to vector<16x128xf32>
    %1381 = arith.addf %1378, %1380 : vector<16x128xf32>
    %cst_246 = arith.constant 0.000000e+00 : f32
    %1382 = vector.broadcast %cst_246 : f32 to vector<16x128xf32>
    %1383 = arith.maximumf %1381, %1382 : vector<16x128xf32>
    %c7_247 = arith.constant 7 : index
    %1384 = memref.load %arg1[%c7_247] : memref<162xf32, #tpu.memory_space<smem>>
    %1385 = vector.broadcast %1384 : f32 to vector<16x128xf32>
    %1386 = arith.mulf %1297, %1385 : vector<16x128xf32>
    %c17_248 = arith.constant 17 : index
    %1387 = memref.load %arg1[%c17_248] : memref<162xf32, #tpu.memory_space<smem>>
    %1388 = vector.broadcast %1387 : f32 to vector<16x128xf32>
    %1389 = arith.mulf %1299, %1388 : vector<16x128xf32>
    %1390 = arith.addf %1386, %1389 : vector<16x128xf32>
    %c27_249 = arith.constant 27 : index
    %1391 = memref.load %arg1[%c27_249] : memref<162xf32, #tpu.memory_space<smem>>
    %1392 = vector.broadcast %1391 : f32 to vector<16x128xf32>
    %1393 = arith.addf %1390, %1392 : vector<16x128xf32>
    %cst_250 = arith.constant 0.000000e+00 : f32
    %1394 = vector.broadcast %cst_250 : f32 to vector<16x128xf32>
    %1395 = arith.maximumf %1393, %1394 : vector<16x128xf32>
    %c8_251 = arith.constant 8 : index
    %1396 = memref.load %arg1[%c8_251] : memref<162xf32, #tpu.memory_space<smem>>
    %1397 = vector.broadcast %1396 : f32 to vector<16x128xf32>
    %1398 = arith.mulf %1297, %1397 : vector<16x128xf32>
    %c18_252 = arith.constant 18 : index
    %1399 = memref.load %arg1[%c18_252] : memref<162xf32, #tpu.memory_space<smem>>
    %1400 = vector.broadcast %1399 : f32 to vector<16x128xf32>
    %1401 = arith.mulf %1299, %1400 : vector<16x128xf32>
    %1402 = arith.addf %1398, %1401 : vector<16x128xf32>
    %c28_253 = arith.constant 28 : index
    %1403 = memref.load %arg1[%c28_253] : memref<162xf32, #tpu.memory_space<smem>>
    %1404 = vector.broadcast %1403 : f32 to vector<16x128xf32>
    %1405 = arith.addf %1402, %1404 : vector<16x128xf32>
    %cst_254 = arith.constant 0.000000e+00 : f32
    %1406 = vector.broadcast %cst_254 : f32 to vector<16x128xf32>
    %1407 = arith.maximumf %1405, %1406 : vector<16x128xf32>
    %c9_255 = arith.constant 9 : index
    %1408 = memref.load %arg1[%c9_255] : memref<162xf32, #tpu.memory_space<smem>>
    %1409 = vector.broadcast %1408 : f32 to vector<16x128xf32>
    %1410 = arith.mulf %1297, %1409 : vector<16x128xf32>
    %c19_256 = arith.constant 19 : index
    %1411 = memref.load %arg1[%c19_256] : memref<162xf32, #tpu.memory_space<smem>>
    %1412 = vector.broadcast %1411 : f32 to vector<16x128xf32>
    %1413 = arith.mulf %1299, %1412 : vector<16x128xf32>
    %1414 = arith.addf %1410, %1413 : vector<16x128xf32>
    %c29_257 = arith.constant 29 : index
    %1415 = memref.load %arg1[%c29_257] : memref<162xf32, #tpu.memory_space<smem>>
    %1416 = vector.broadcast %1415 : f32 to vector<16x128xf32>
    %1417 = arith.addf %1414, %1416 : vector<16x128xf32>
    %cst_258 = arith.constant 0.000000e+00 : f32
    %1418 = vector.broadcast %cst_258 : f32 to vector<16x128xf32>
    %1419 = arith.maximumf %1417, %1418 : vector<16x128xf32>
    %c160_259 = arith.constant 160 : index
    %1420 = memref.load %arg1[%c160_259] : memref<162xf32, #tpu.memory_space<smem>>
    %1421 = vector.broadcast %1420 : f32 to vector<16x128xf32>
    %c161_260 = arith.constant 161 : index
    %1422 = memref.load %arg1[%c161_260] : memref<162xf32, #tpu.memory_space<smem>>
    %1423 = vector.broadcast %1422 : f32 to vector<16x128xf32>
    %c30_261 = arith.constant 30 : index
    %1424 = memref.load %arg1[%c30_261] : memref<162xf32, #tpu.memory_space<smem>>
    %1425 = vector.broadcast %1424 : f32 to vector<16x128xf32>
    %1426 = arith.mulf %1311, %1425 : vector<16x128xf32>
    %c40_262 = arith.constant 40 : index
    %1427 = memref.load %arg1[%c40_262] : memref<162xf32, #tpu.memory_space<smem>>
    %1428 = vector.broadcast %1427 : f32 to vector<16x128xf32>
    %1429 = arith.mulf %1323, %1428 : vector<16x128xf32>
    %1430 = arith.addf %1426, %1429 : vector<16x128xf32>
    %c50_263 = arith.constant 50 : index
    %1431 = memref.load %arg1[%c50_263] : memref<162xf32, #tpu.memory_space<smem>>
    %1432 = vector.broadcast %1431 : f32 to vector<16x128xf32>
    %1433 = arith.mulf %1335, %1432 : vector<16x128xf32>
    %1434 = arith.addf %1430, %1433 : vector<16x128xf32>
    %c60_264 = arith.constant 60 : index
    %1435 = memref.load %arg1[%c60_264] : memref<162xf32, #tpu.memory_space<smem>>
    %1436 = vector.broadcast %1435 : f32 to vector<16x128xf32>
    %1437 = arith.mulf %1347, %1436 : vector<16x128xf32>
    %1438 = arith.addf %1434, %1437 : vector<16x128xf32>
    %c70_265 = arith.constant 70 : index
    %1439 = memref.load %arg1[%c70_265] : memref<162xf32, #tpu.memory_space<smem>>
    %1440 = vector.broadcast %1439 : f32 to vector<16x128xf32>
    %1441 = arith.mulf %1359, %1440 : vector<16x128xf32>
    %1442 = arith.addf %1438, %1441 : vector<16x128xf32>
    %c80_266 = arith.constant 80 : index
    %1443 = memref.load %arg1[%c80_266] : memref<162xf32, #tpu.memory_space<smem>>
    %1444 = vector.broadcast %1443 : f32 to vector<16x128xf32>
    %1445 = arith.mulf %1371, %1444 : vector<16x128xf32>
    %1446 = arith.addf %1442, %1445 : vector<16x128xf32>
    %c90_267 = arith.constant 90 : index
    %1447 = memref.load %arg1[%c90_267] : memref<162xf32, #tpu.memory_space<smem>>
    %1448 = vector.broadcast %1447 : f32 to vector<16x128xf32>
    %1449 = arith.mulf %1383, %1448 : vector<16x128xf32>
    %1450 = arith.addf %1446, %1449 : vector<16x128xf32>
    %c100_268 = arith.constant 100 : index
    %1451 = memref.load %arg1[%c100_268] : memref<162xf32, #tpu.memory_space<smem>>
    %1452 = vector.broadcast %1451 : f32 to vector<16x128xf32>
    %1453 = arith.mulf %1395, %1452 : vector<16x128xf32>
    %1454 = arith.addf %1450, %1453 : vector<16x128xf32>
    %c110_269 = arith.constant 110 : index
    %1455 = memref.load %arg1[%c110_269] : memref<162xf32, #tpu.memory_space<smem>>
    %1456 = vector.broadcast %1455 : f32 to vector<16x128xf32>
    %1457 = arith.mulf %1407, %1456 : vector<16x128xf32>
    %1458 = arith.addf %1454, %1457 : vector<16x128xf32>
    %c120_270 = arith.constant 120 : index
    %1459 = memref.load %arg1[%c120_270] : memref<162xf32, #tpu.memory_space<smem>>
    %1460 = vector.broadcast %1459 : f32 to vector<16x128xf32>
    %1461 = arith.mulf %1419, %1460 : vector<16x128xf32>
    %1462 = arith.addf %1458, %1461 : vector<16x128xf32>
    %c130_271 = arith.constant 130 : index
    %1463 = memref.load %arg1[%c130_271] : memref<162xf32, #tpu.memory_space<smem>>
    %1464 = vector.broadcast %1463 : f32 to vector<16x128xf32>
    %1465 = arith.addf %1462, %1464 : vector<16x128xf32>
    %cst_272 = arith.constant 0.000000e+00 : f32
    %1466 = vector.broadcast %cst_272 : f32 to vector<16x128xf32>
    %1467 = arith.maximumf %1465, %1466 : vector<16x128xf32>
    %c140_273 = arith.constant 140 : index
    %1468 = memref.load %arg1[%c140_273] : memref<162xf32, #tpu.memory_space<smem>>
    %1469 = vector.broadcast %1468 : f32 to vector<16x128xf32>
    %1470 = arith.mulf %1467, %1469 : vector<16x128xf32>
    %1471 = arith.addf %1421, %1470 : vector<16x128xf32>
    %c141_274 = arith.constant 141 : index
    %1472 = memref.load %arg1[%c141_274] : memref<162xf32, #tpu.memory_space<smem>>
    %1473 = vector.broadcast %1472 : f32 to vector<16x128xf32>
    %1474 = arith.mulf %1467, %1473 : vector<16x128xf32>
    %1475 = arith.addf %1423, %1474 : vector<16x128xf32>
    %c31_275 = arith.constant 31 : index
    %1476 = memref.load %arg1[%c31_275] : memref<162xf32, #tpu.memory_space<smem>>
    %1477 = vector.broadcast %1476 : f32 to vector<16x128xf32>
    %1478 = arith.mulf %1311, %1477 : vector<16x128xf32>
    %c41_276 = arith.constant 41 : index
    %1479 = memref.load %arg1[%c41_276] : memref<162xf32, #tpu.memory_space<smem>>
    %1480 = vector.broadcast %1479 : f32 to vector<16x128xf32>
    %1481 = arith.mulf %1323, %1480 : vector<16x128xf32>
    %1482 = arith.addf %1478, %1481 : vector<16x128xf32>
    %c51_277 = arith.constant 51 : index
    %1483 = memref.load %arg1[%c51_277] : memref<162xf32, #tpu.memory_space<smem>>
    %1484 = vector.broadcast %1483 : f32 to vector<16x128xf32>
    %1485 = arith.mulf %1335, %1484 : vector<16x128xf32>
    %1486 = arith.addf %1482, %1485 : vector<16x128xf32>
    %c61_278 = arith.constant 61 : index
    %1487 = memref.load %arg1[%c61_278] : memref<162xf32, #tpu.memory_space<smem>>
    %1488 = vector.broadcast %1487 : f32 to vector<16x128xf32>
    %1489 = arith.mulf %1347, %1488 : vector<16x128xf32>
    %1490 = arith.addf %1486, %1489 : vector<16x128xf32>
    %c71_279 = arith.constant 71 : index
    %1491 = memref.load %arg1[%c71_279] : memref<162xf32, #tpu.memory_space<smem>>
    %1492 = vector.broadcast %1491 : f32 to vector<16x128xf32>
    %1493 = arith.mulf %1359, %1492 : vector<16x128xf32>
    %1494 = arith.addf %1490, %1493 : vector<16x128xf32>
    %c81_280 = arith.constant 81 : index
    %1495 = memref.load %arg1[%c81_280] : memref<162xf32, #tpu.memory_space<smem>>
    %1496 = vector.broadcast %1495 : f32 to vector<16x128xf32>
    %1497 = arith.mulf %1371, %1496 : vector<16x128xf32>
    %1498 = arith.addf %1494, %1497 : vector<16x128xf32>
    %c91_281 = arith.constant 91 : index
    %1499 = memref.load %arg1[%c91_281] : memref<162xf32, #tpu.memory_space<smem>>
    %1500 = vector.broadcast %1499 : f32 to vector<16x128xf32>
    %1501 = arith.mulf %1383, %1500 : vector<16x128xf32>
    %1502 = arith.addf %1498, %1501 : vector<16x128xf32>
    %c101_282 = arith.constant 101 : index
    %1503 = memref.load %arg1[%c101_282] : memref<162xf32, #tpu.memory_space<smem>>
    %1504 = vector.broadcast %1503 : f32 to vector<16x128xf32>
    %1505 = arith.mulf %1395, %1504 : vector<16x128xf32>
    %1506 = arith.addf %1502, %1505 : vector<16x128xf32>
    %c111_283 = arith.constant 111 : index
    %1507 = memref.load %arg1[%c111_283] : memref<162xf32, #tpu.memory_space<smem>>
    %1508 = vector.broadcast %1507 : f32 to vector<16x128xf32>
    %1509 = arith.mulf %1407, %1508 : vector<16x128xf32>
    %1510 = arith.addf %1506, %1509 : vector<16x128xf32>
    %c121_284 = arith.constant 121 : index
    %1511 = memref.load %arg1[%c121_284] : memref<162xf32, #tpu.memory_space<smem>>
    %1512 = vector.broadcast %1511 : f32 to vector<16x128xf32>
    %1513 = arith.mulf %1419, %1512 : vector<16x128xf32>
    %1514 = arith.addf %1510, %1513 : vector<16x128xf32>
    %c131_285 = arith.constant 131 : index
    %1515 = memref.load %arg1[%c131_285] : memref<162xf32, #tpu.memory_space<smem>>
    %1516 = vector.broadcast %1515 : f32 to vector<16x128xf32>
    %1517 = arith.addf %1514, %1516 : vector<16x128xf32>
    %cst_286 = arith.constant 0.000000e+00 : f32
    %1518 = vector.broadcast %cst_286 : f32 to vector<16x128xf32>
    %1519 = arith.maximumf %1517, %1518 : vector<16x128xf32>
    %c142_287 = arith.constant 142 : index
    %1520 = memref.load %arg1[%c142_287] : memref<162xf32, #tpu.memory_space<smem>>
    %1521 = vector.broadcast %1520 : f32 to vector<16x128xf32>
    %1522 = arith.mulf %1519, %1521 : vector<16x128xf32>
    %1523 = arith.addf %1471, %1522 : vector<16x128xf32>
    %c143_288 = arith.constant 143 : index
    %1524 = memref.load %arg1[%c143_288] : memref<162xf32, #tpu.memory_space<smem>>
    %1525 = vector.broadcast %1524 : f32 to vector<16x128xf32>
    %1526 = arith.mulf %1519, %1525 : vector<16x128xf32>
    %1527 = arith.addf %1475, %1526 : vector<16x128xf32>
    %c32_289 = arith.constant 32 : index
    %1528 = memref.load %arg1[%c32_289] : memref<162xf32, #tpu.memory_space<smem>>
    %1529 = vector.broadcast %1528 : f32 to vector<16x128xf32>
    %1530 = arith.mulf %1311, %1529 : vector<16x128xf32>
    %c42_290 = arith.constant 42 : index
    %1531 = memref.load %arg1[%c42_290] : memref<162xf32, #tpu.memory_space<smem>>
    %1532 = vector.broadcast %1531 : f32 to vector<16x128xf32>
    %1533 = arith.mulf %1323, %1532 : vector<16x128xf32>
    %1534 = arith.addf %1530, %1533 : vector<16x128xf32>
    %c52_291 = arith.constant 52 : index
    %1535 = memref.load %arg1[%c52_291] : memref<162xf32, #tpu.memory_space<smem>>
    %1536 = vector.broadcast %1535 : f32 to vector<16x128xf32>
    %1537 = arith.mulf %1335, %1536 : vector<16x128xf32>
    %1538 = arith.addf %1534, %1537 : vector<16x128xf32>
    %c62_292 = arith.constant 62 : index
    %1539 = memref.load %arg1[%c62_292] : memref<162xf32, #tpu.memory_space<smem>>
    %1540 = vector.broadcast %1539 : f32 to vector<16x128xf32>
    %1541 = arith.mulf %1347, %1540 : vector<16x128xf32>
    %1542 = arith.addf %1538, %1541 : vector<16x128xf32>
    %c72_293 = arith.constant 72 : index
    %1543 = memref.load %arg1[%c72_293] : memref<162xf32, #tpu.memory_space<smem>>
    %1544 = vector.broadcast %1543 : f32 to vector<16x128xf32>
    %1545 = arith.mulf %1359, %1544 : vector<16x128xf32>
    %1546 = arith.addf %1542, %1545 : vector<16x128xf32>
    %c82_294 = arith.constant 82 : index
    %1547 = memref.load %arg1[%c82_294] : memref<162xf32, #tpu.memory_space<smem>>
    %1548 = vector.broadcast %1547 : f32 to vector<16x128xf32>
    %1549 = arith.mulf %1371, %1548 : vector<16x128xf32>
    %1550 = arith.addf %1546, %1549 : vector<16x128xf32>
    %c92_295 = arith.constant 92 : index
    %1551 = memref.load %arg1[%c92_295] : memref<162xf32, #tpu.memory_space<smem>>
    %1552 = vector.broadcast %1551 : f32 to vector<16x128xf32>
    %1553 = arith.mulf %1383, %1552 : vector<16x128xf32>
    %1554 = arith.addf %1550, %1553 : vector<16x128xf32>
    %c102_296 = arith.constant 102 : index
    %1555 = memref.load %arg1[%c102_296] : memref<162xf32, #tpu.memory_space<smem>>
    %1556 = vector.broadcast %1555 : f32 to vector<16x128xf32>
    %1557 = arith.mulf %1395, %1556 : vector<16x128xf32>
    %1558 = arith.addf %1554, %1557 : vector<16x128xf32>
    %c112_297 = arith.constant 112 : index
    %1559 = memref.load %arg1[%c112_297] : memref<162xf32, #tpu.memory_space<smem>>
    %1560 = vector.broadcast %1559 : f32 to vector<16x128xf32>
    %1561 = arith.mulf %1407, %1560 : vector<16x128xf32>
    %1562 = arith.addf %1558, %1561 : vector<16x128xf32>
    %c122_298 = arith.constant 122 : index
    %1563 = memref.load %arg1[%c122_298] : memref<162xf32, #tpu.memory_space<smem>>
    %1564 = vector.broadcast %1563 : f32 to vector<16x128xf32>
    %1565 = arith.mulf %1419, %1564 : vector<16x128xf32>
    %1566 = arith.addf %1562, %1565 : vector<16x128xf32>
    %c132_299 = arith.constant 132 : index
    %1567 = memref.load %arg1[%c132_299] : memref<162xf32, #tpu.memory_space<smem>>
    %1568 = vector.broadcast %1567 : f32 to vector<16x128xf32>
    %1569 = arith.addf %1566, %1568 : vector<16x128xf32>
    %cst_300 = arith.constant 0.000000e+00 : f32
    %1570 = vector.broadcast %cst_300 : f32 to vector<16x128xf32>
    %1571 = arith.maximumf %1569, %1570 : vector<16x128xf32>
    %c144_301 = arith.constant 144 : index
    %1572 = memref.load %arg1[%c144_301] : memref<162xf32, #tpu.memory_space<smem>>
    %1573 = vector.broadcast %1572 : f32 to vector<16x128xf32>
    %1574 = arith.mulf %1571, %1573 : vector<16x128xf32>
    %1575 = arith.addf %1523, %1574 : vector<16x128xf32>
    %c145_302 = arith.constant 145 : index
    %1576 = memref.load %arg1[%c145_302] : memref<162xf32, #tpu.memory_space<smem>>
    %1577 = vector.broadcast %1576 : f32 to vector<16x128xf32>
    %1578 = arith.mulf %1571, %1577 : vector<16x128xf32>
    %1579 = arith.addf %1527, %1578 : vector<16x128xf32>
    %c33_303 = arith.constant 33 : index
    %1580 = memref.load %arg1[%c33_303] : memref<162xf32, #tpu.memory_space<smem>>
    %1581 = vector.broadcast %1580 : f32 to vector<16x128xf32>
    %1582 = arith.mulf %1311, %1581 : vector<16x128xf32>
    %c43_304 = arith.constant 43 : index
    %1583 = memref.load %arg1[%c43_304] : memref<162xf32, #tpu.memory_space<smem>>
    %1584 = vector.broadcast %1583 : f32 to vector<16x128xf32>
    %1585 = arith.mulf %1323, %1584 : vector<16x128xf32>
    %1586 = arith.addf %1582, %1585 : vector<16x128xf32>
    %c53_305 = arith.constant 53 : index
    %1587 = memref.load %arg1[%c53_305] : memref<162xf32, #tpu.memory_space<smem>>
    %1588 = vector.broadcast %1587 : f32 to vector<16x128xf32>
    %1589 = arith.mulf %1335, %1588 : vector<16x128xf32>
    %1590 = arith.addf %1586, %1589 : vector<16x128xf32>
    %c63_306 = arith.constant 63 : index
    %1591 = memref.load %arg1[%c63_306] : memref<162xf32, #tpu.memory_space<smem>>
    %1592 = vector.broadcast %1591 : f32 to vector<16x128xf32>
    %1593 = arith.mulf %1347, %1592 : vector<16x128xf32>
    %1594 = arith.addf %1590, %1593 : vector<16x128xf32>
    %c73_307 = arith.constant 73 : index
    %1595 = memref.load %arg1[%c73_307] : memref<162xf32, #tpu.memory_space<smem>>
    %1596 = vector.broadcast %1595 : f32 to vector<16x128xf32>
    %1597 = arith.mulf %1359, %1596 : vector<16x128xf32>
    %1598 = arith.addf %1594, %1597 : vector<16x128xf32>
    %c83_308 = arith.constant 83 : index
    %1599 = memref.load %arg1[%c83_308] : memref<162xf32, #tpu.memory_space<smem>>
    %1600 = vector.broadcast %1599 : f32 to vector<16x128xf32>
    %1601 = arith.mulf %1371, %1600 : vector<16x128xf32>
    %1602 = arith.addf %1598, %1601 : vector<16x128xf32>
    %c93_309 = arith.constant 93 : index
    %1603 = memref.load %arg1[%c93_309] : memref<162xf32, #tpu.memory_space<smem>>
    %1604 = vector.broadcast %1603 : f32 to vector<16x128xf32>
    %1605 = arith.mulf %1383, %1604 : vector<16x128xf32>
    %1606 = arith.addf %1602, %1605 : vector<16x128xf32>
    %c103_310 = arith.constant 103 : index
    %1607 = memref.load %arg1[%c103_310] : memref<162xf32, #tpu.memory_space<smem>>
    %1608 = vector.broadcast %1607 : f32 to vector<16x128xf32>
    %1609 = arith.mulf %1395, %1608 : vector<16x128xf32>
    %1610 = arith.addf %1606, %1609 : vector<16x128xf32>
    %c113_311 = arith.constant 113 : index
    %1611 = memref.load %arg1[%c113_311] : memref<162xf32, #tpu.memory_space<smem>>
    %1612 = vector.broadcast %1611 : f32 to vector<16x128xf32>
    %1613 = arith.mulf %1407, %1612 : vector<16x128xf32>
    %1614 = arith.addf %1610, %1613 : vector<16x128xf32>
    %c123_312 = arith.constant 123 : index
    %1615 = memref.load %arg1[%c123_312] : memref<162xf32, #tpu.memory_space<smem>>
    %1616 = vector.broadcast %1615 : f32 to vector<16x128xf32>
    %1617 = arith.mulf %1419, %1616 : vector<16x128xf32>
    %1618 = arith.addf %1614, %1617 : vector<16x128xf32>
    %c133_313 = arith.constant 133 : index
    %1619 = memref.load %arg1[%c133_313] : memref<162xf32, #tpu.memory_space<smem>>
    %1620 = vector.broadcast %1619 : f32 to vector<16x128xf32>
    %1621 = arith.addf %1618, %1620 : vector<16x128xf32>
    %cst_314 = arith.constant 0.000000e+00 : f32
    %1622 = vector.broadcast %cst_314 : f32 to vector<16x128xf32>
    %1623 = arith.maximumf %1621, %1622 : vector<16x128xf32>
    %c146_315 = arith.constant 146 : index
    %1624 = memref.load %arg1[%c146_315] : memref<162xf32, #tpu.memory_space<smem>>
    %1625 = vector.broadcast %1624 : f32 to vector<16x128xf32>
    %1626 = arith.mulf %1623, %1625 : vector<16x128xf32>
    %1627 = arith.addf %1575, %1626 : vector<16x128xf32>
    %c147_316 = arith.constant 147 : index
    %1628 = memref.load %arg1[%c147_316] : memref<162xf32, #tpu.memory_space<smem>>
    %1629 = vector.broadcast %1628 : f32 to vector<16x128xf32>
    %1630 = arith.mulf %1623, %1629 : vector<16x128xf32>
    %1631 = arith.addf %1579, %1630 : vector<16x128xf32>
    %c34_317 = arith.constant 34 : index
    %1632 = memref.load %arg1[%c34_317] : memref<162xf32, #tpu.memory_space<smem>>
    %1633 = vector.broadcast %1632 : f32 to vector<16x128xf32>
    %1634 = arith.mulf %1311, %1633 : vector<16x128xf32>
    %c44_318 = arith.constant 44 : index
    %1635 = memref.load %arg1[%c44_318] : memref<162xf32, #tpu.memory_space<smem>>
    %1636 = vector.broadcast %1635 : f32 to vector<16x128xf32>
    %1637 = arith.mulf %1323, %1636 : vector<16x128xf32>
    %1638 = arith.addf %1634, %1637 : vector<16x128xf32>
    %c54_319 = arith.constant 54 : index
    %1639 = memref.load %arg1[%c54_319] : memref<162xf32, #tpu.memory_space<smem>>
    %1640 = vector.broadcast %1639 : f32 to vector<16x128xf32>
    %1641 = arith.mulf %1335, %1640 : vector<16x128xf32>
    %1642 = arith.addf %1638, %1641 : vector<16x128xf32>
    %c64_320 = arith.constant 64 : index
    %1643 = memref.load %arg1[%c64_320] : memref<162xf32, #tpu.memory_space<smem>>
    %1644 = vector.broadcast %1643 : f32 to vector<16x128xf32>
    %1645 = arith.mulf %1347, %1644 : vector<16x128xf32>
    %1646 = arith.addf %1642, %1645 : vector<16x128xf32>
    %c74_321 = arith.constant 74 : index
    %1647 = memref.load %arg1[%c74_321] : memref<162xf32, #tpu.memory_space<smem>>
    %1648 = vector.broadcast %1647 : f32 to vector<16x128xf32>
    %1649 = arith.mulf %1359, %1648 : vector<16x128xf32>
    %1650 = arith.addf %1646, %1649 : vector<16x128xf32>
    %c84_322 = arith.constant 84 : index
    %1651 = memref.load %arg1[%c84_322] : memref<162xf32, #tpu.memory_space<smem>>
    %1652 = vector.broadcast %1651 : f32 to vector<16x128xf32>
    %1653 = arith.mulf %1371, %1652 : vector<16x128xf32>
    %1654 = arith.addf %1650, %1653 : vector<16x128xf32>
    %c94_323 = arith.constant 94 : index
    %1655 = memref.load %arg1[%c94_323] : memref<162xf32, #tpu.memory_space<smem>>
    %1656 = vector.broadcast %1655 : f32 to vector<16x128xf32>
    %1657 = arith.mulf %1383, %1656 : vector<16x128xf32>
    %1658 = arith.addf %1654, %1657 : vector<16x128xf32>
    %c104_324 = arith.constant 104 : index
    %1659 = memref.load %arg1[%c104_324] : memref<162xf32, #tpu.memory_space<smem>>
    %1660 = vector.broadcast %1659 : f32 to vector<16x128xf32>
    %1661 = arith.mulf %1395, %1660 : vector<16x128xf32>
    %1662 = arith.addf %1658, %1661 : vector<16x128xf32>
    %c114_325 = arith.constant 114 : index
    %1663 = memref.load %arg1[%c114_325] : memref<162xf32, #tpu.memory_space<smem>>
    %1664 = vector.broadcast %1663 : f32 to vector<16x128xf32>
    %1665 = arith.mulf %1407, %1664 : vector<16x128xf32>
    %1666 = arith.addf %1662, %1665 : vector<16x128xf32>
    %c124_326 = arith.constant 124 : index
    %1667 = memref.load %arg1[%c124_326] : memref<162xf32, #tpu.memory_space<smem>>
    %1668 = vector.broadcast %1667 : f32 to vector<16x128xf32>
    %1669 = arith.mulf %1419, %1668 : vector<16x128xf32>
    %1670 = arith.addf %1666, %1669 : vector<16x128xf32>
    %c134_327 = arith.constant 134 : index
    %1671 = memref.load %arg1[%c134_327] : memref<162xf32, #tpu.memory_space<smem>>
    %1672 = vector.broadcast %1671 : f32 to vector<16x128xf32>
    %1673 = arith.addf %1670, %1672 : vector<16x128xf32>
    %cst_328 = arith.constant 0.000000e+00 : f32
    %1674 = vector.broadcast %cst_328 : f32 to vector<16x128xf32>
    %1675 = arith.maximumf %1673, %1674 : vector<16x128xf32>
    %c148_329 = arith.constant 148 : index
    %1676 = memref.load %arg1[%c148_329] : memref<162xf32, #tpu.memory_space<smem>>
    %1677 = vector.broadcast %1676 : f32 to vector<16x128xf32>
    %1678 = arith.mulf %1675, %1677 : vector<16x128xf32>
    %1679 = arith.addf %1627, %1678 : vector<16x128xf32>
    %c149_330 = arith.constant 149 : index
    %1680 = memref.load %arg1[%c149_330] : memref<162xf32, #tpu.memory_space<smem>>
    %1681 = vector.broadcast %1680 : f32 to vector<16x128xf32>
    %1682 = arith.mulf %1675, %1681 : vector<16x128xf32>
    %1683 = arith.addf %1631, %1682 : vector<16x128xf32>
    %c35_331 = arith.constant 35 : index
    %1684 = memref.load %arg1[%c35_331] : memref<162xf32, #tpu.memory_space<smem>>
    %1685 = vector.broadcast %1684 : f32 to vector<16x128xf32>
    %1686 = arith.mulf %1311, %1685 : vector<16x128xf32>
    %c45_332 = arith.constant 45 : index
    %1687 = memref.load %arg1[%c45_332] : memref<162xf32, #tpu.memory_space<smem>>
    %1688 = vector.broadcast %1687 : f32 to vector<16x128xf32>
    %1689 = arith.mulf %1323, %1688 : vector<16x128xf32>
    %1690 = arith.addf %1686, %1689 : vector<16x128xf32>
    %c55_333 = arith.constant 55 : index
    %1691 = memref.load %arg1[%c55_333] : memref<162xf32, #tpu.memory_space<smem>>
    %1692 = vector.broadcast %1691 : f32 to vector<16x128xf32>
    %1693 = arith.mulf %1335, %1692 : vector<16x128xf32>
    %1694 = arith.addf %1690, %1693 : vector<16x128xf32>
    %c65_334 = arith.constant 65 : index
    %1695 = memref.load %arg1[%c65_334] : memref<162xf32, #tpu.memory_space<smem>>
    %1696 = vector.broadcast %1695 : f32 to vector<16x128xf32>
    %1697 = arith.mulf %1347, %1696 : vector<16x128xf32>
    %1698 = arith.addf %1694, %1697 : vector<16x128xf32>
    %c75_335 = arith.constant 75 : index
    %1699 = memref.load %arg1[%c75_335] : memref<162xf32, #tpu.memory_space<smem>>
    %1700 = vector.broadcast %1699 : f32 to vector<16x128xf32>
    %1701 = arith.mulf %1359, %1700 : vector<16x128xf32>
    %1702 = arith.addf %1698, %1701 : vector<16x128xf32>
    %c85_336 = arith.constant 85 : index
    %1703 = memref.load %arg1[%c85_336] : memref<162xf32, #tpu.memory_space<smem>>
    %1704 = vector.broadcast %1703 : f32 to vector<16x128xf32>
    %1705 = arith.mulf %1371, %1704 : vector<16x128xf32>
    %1706 = arith.addf %1702, %1705 : vector<16x128xf32>
    %c95_337 = arith.constant 95 : index
    %1707 = memref.load %arg1[%c95_337] : memref<162xf32, #tpu.memory_space<smem>>
    %1708 = vector.broadcast %1707 : f32 to vector<16x128xf32>
    %1709 = arith.mulf %1383, %1708 : vector<16x128xf32>
    %1710 = arith.addf %1706, %1709 : vector<16x128xf32>
    %c105_338 = arith.constant 105 : index
    %1711 = memref.load %arg1[%c105_338] : memref<162xf32, #tpu.memory_space<smem>>
    %1712 = vector.broadcast %1711 : f32 to vector<16x128xf32>
    %1713 = arith.mulf %1395, %1712 : vector<16x128xf32>
    %1714 = arith.addf %1710, %1713 : vector<16x128xf32>
    %c115_339 = arith.constant 115 : index
    %1715 = memref.load %arg1[%c115_339] : memref<162xf32, #tpu.memory_space<smem>>
    %1716 = vector.broadcast %1715 : f32 to vector<16x128xf32>
    %1717 = arith.mulf %1407, %1716 : vector<16x128xf32>
    %1718 = arith.addf %1714, %1717 : vector<16x128xf32>
    %c125_340 = arith.constant 125 : index
    %1719 = memref.load %arg1[%c125_340] : memref<162xf32, #tpu.memory_space<smem>>
    %1720 = vector.broadcast %1719 : f32 to vector<16x128xf32>
    %1721 = arith.mulf %1419, %1720 : vector<16x128xf32>
    %1722 = arith.addf %1718, %1721 : vector<16x128xf32>
    %c135_341 = arith.constant 135 : index
    %1723 = memref.load %arg1[%c135_341] : memref<162xf32, #tpu.memory_space<smem>>
    %1724 = vector.broadcast %1723 : f32 to vector<16x128xf32>
    %1725 = arith.addf %1722, %1724 : vector<16x128xf32>
    %cst_342 = arith.constant 0.000000e+00 : f32
    %1726 = vector.broadcast %cst_342 : f32 to vector<16x128xf32>
    %1727 = arith.maximumf %1725, %1726 : vector<16x128xf32>
    %c150_343 = arith.constant 150 : index
    %1728 = memref.load %arg1[%c150_343] : memref<162xf32, #tpu.memory_space<smem>>
    %1729 = vector.broadcast %1728 : f32 to vector<16x128xf32>
    %1730 = arith.mulf %1727, %1729 : vector<16x128xf32>
    %1731 = arith.addf %1679, %1730 : vector<16x128xf32>
    %c151_344 = arith.constant 151 : index
    %1732 = memref.load %arg1[%c151_344] : memref<162xf32, #tpu.memory_space<smem>>
    %1733 = vector.broadcast %1732 : f32 to vector<16x128xf32>
    %1734 = arith.mulf %1727, %1733 : vector<16x128xf32>
    %1735 = arith.addf %1683, %1734 : vector<16x128xf32>
    %c36_345 = arith.constant 36 : index
    %1736 = memref.load %arg1[%c36_345] : memref<162xf32, #tpu.memory_space<smem>>
    %1737 = vector.broadcast %1736 : f32 to vector<16x128xf32>
    %1738 = arith.mulf %1311, %1737 : vector<16x128xf32>
    %c46_346 = arith.constant 46 : index
    %1739 = memref.load %arg1[%c46_346] : memref<162xf32, #tpu.memory_space<smem>>
    %1740 = vector.broadcast %1739 : f32 to vector<16x128xf32>
    %1741 = arith.mulf %1323, %1740 : vector<16x128xf32>
    %1742 = arith.addf %1738, %1741 : vector<16x128xf32>
    %c56_347 = arith.constant 56 : index
    %1743 = memref.load %arg1[%c56_347] : memref<162xf32, #tpu.memory_space<smem>>
    %1744 = vector.broadcast %1743 : f32 to vector<16x128xf32>
    %1745 = arith.mulf %1335, %1744 : vector<16x128xf32>
    %1746 = arith.addf %1742, %1745 : vector<16x128xf32>
    %c66_348 = arith.constant 66 : index
    %1747 = memref.load %arg1[%c66_348] : memref<162xf32, #tpu.memory_space<smem>>
    %1748 = vector.broadcast %1747 : f32 to vector<16x128xf32>
    %1749 = arith.mulf %1347, %1748 : vector<16x128xf32>
    %1750 = arith.addf %1746, %1749 : vector<16x128xf32>
    %c76_349 = arith.constant 76 : index
    %1751 = memref.load %arg1[%c76_349] : memref<162xf32, #tpu.memory_space<smem>>
    %1752 = vector.broadcast %1751 : f32 to vector<16x128xf32>
    %1753 = arith.mulf %1359, %1752 : vector<16x128xf32>
    %1754 = arith.addf %1750, %1753 : vector<16x128xf32>
    %c86_350 = arith.constant 86 : index
    %1755 = memref.load %arg1[%c86_350] : memref<162xf32, #tpu.memory_space<smem>>
    %1756 = vector.broadcast %1755 : f32 to vector<16x128xf32>
    %1757 = arith.mulf %1371, %1756 : vector<16x128xf32>
    %1758 = arith.addf %1754, %1757 : vector<16x128xf32>
    %c96_351 = arith.constant 96 : index
    %1759 = memref.load %arg1[%c96_351] : memref<162xf32, #tpu.memory_space<smem>>
    %1760 = vector.broadcast %1759 : f32 to vector<16x128xf32>
    %1761 = arith.mulf %1383, %1760 : vector<16x128xf32>
    %1762 = arith.addf %1758, %1761 : vector<16x128xf32>
    %c106_352 = arith.constant 106 : index
    %1763 = memref.load %arg1[%c106_352] : memref<162xf32, #tpu.memory_space<smem>>
    %1764 = vector.broadcast %1763 : f32 to vector<16x128xf32>
    %1765 = arith.mulf %1395, %1764 : vector<16x128xf32>
    %1766 = arith.addf %1762, %1765 : vector<16x128xf32>
    %c116_353 = arith.constant 116 : index
    %1767 = memref.load %arg1[%c116_353] : memref<162xf32, #tpu.memory_space<smem>>
    %1768 = vector.broadcast %1767 : f32 to vector<16x128xf32>
    %1769 = arith.mulf %1407, %1768 : vector<16x128xf32>
    %1770 = arith.addf %1766, %1769 : vector<16x128xf32>
    %c126_354 = arith.constant 126 : index
    %1771 = memref.load %arg1[%c126_354] : memref<162xf32, #tpu.memory_space<smem>>
    %1772 = vector.broadcast %1771 : f32 to vector<16x128xf32>
    %1773 = arith.mulf %1419, %1772 : vector<16x128xf32>
    %1774 = arith.addf %1770, %1773 : vector<16x128xf32>
    %c136_355 = arith.constant 136 : index
    %1775 = memref.load %arg1[%c136_355] : memref<162xf32, #tpu.memory_space<smem>>
    %1776 = vector.broadcast %1775 : f32 to vector<16x128xf32>
    %1777 = arith.addf %1774, %1776 : vector<16x128xf32>
    %cst_356 = arith.constant 0.000000e+00 : f32
    %1778 = vector.broadcast %cst_356 : f32 to vector<16x128xf32>
    %1779 = arith.maximumf %1777, %1778 : vector<16x128xf32>
    %c152_357 = arith.constant 152 : index
    %1780 = memref.load %arg1[%c152_357] : memref<162xf32, #tpu.memory_space<smem>>
    %1781 = vector.broadcast %1780 : f32 to vector<16x128xf32>
    %1782 = arith.mulf %1779, %1781 : vector<16x128xf32>
    %1783 = arith.addf %1731, %1782 : vector<16x128xf32>
    %c153_358 = arith.constant 153 : index
    %1784 = memref.load %arg1[%c153_358] : memref<162xf32, #tpu.memory_space<smem>>
    %1785 = vector.broadcast %1784 : f32 to vector<16x128xf32>
    %1786 = arith.mulf %1779, %1785 : vector<16x128xf32>
    %1787 = arith.addf %1735, %1786 : vector<16x128xf32>
    %c37_359 = arith.constant 37 : index
    %1788 = memref.load %arg1[%c37_359] : memref<162xf32, #tpu.memory_space<smem>>
    %1789 = vector.broadcast %1788 : f32 to vector<16x128xf32>
    %1790 = arith.mulf %1311, %1789 : vector<16x128xf32>
    %c47_360 = arith.constant 47 : index
    %1791 = memref.load %arg1[%c47_360] : memref<162xf32, #tpu.memory_space<smem>>
    %1792 = vector.broadcast %1791 : f32 to vector<16x128xf32>
    %1793 = arith.mulf %1323, %1792 : vector<16x128xf32>
    %1794 = arith.addf %1790, %1793 : vector<16x128xf32>
    %c57_361 = arith.constant 57 : index
    %1795 = memref.load %arg1[%c57_361] : memref<162xf32, #tpu.memory_space<smem>>
    %1796 = vector.broadcast %1795 : f32 to vector<16x128xf32>
    %1797 = arith.mulf %1335, %1796 : vector<16x128xf32>
    %1798 = arith.addf %1794, %1797 : vector<16x128xf32>
    %c67_362 = arith.constant 67 : index
    %1799 = memref.load %arg1[%c67_362] : memref<162xf32, #tpu.memory_space<smem>>
    %1800 = vector.broadcast %1799 : f32 to vector<16x128xf32>
    %1801 = arith.mulf %1347, %1800 : vector<16x128xf32>
    %1802 = arith.addf %1798, %1801 : vector<16x128xf32>
    %c77_363 = arith.constant 77 : index
    %1803 = memref.load %arg1[%c77_363] : memref<162xf32, #tpu.memory_space<smem>>
    %1804 = vector.broadcast %1803 : f32 to vector<16x128xf32>
    %1805 = arith.mulf %1359, %1804 : vector<16x128xf32>
    %1806 = arith.addf %1802, %1805 : vector<16x128xf32>
    %c87_364 = arith.constant 87 : index
    %1807 = memref.load %arg1[%c87_364] : memref<162xf32, #tpu.memory_space<smem>>
    %1808 = vector.broadcast %1807 : f32 to vector<16x128xf32>
    %1809 = arith.mulf %1371, %1808 : vector<16x128xf32>
    %1810 = arith.addf %1806, %1809 : vector<16x128xf32>
    %c97_365 = arith.constant 97 : index
    %1811 = memref.load %arg1[%c97_365] : memref<162xf32, #tpu.memory_space<smem>>
    %1812 = vector.broadcast %1811 : f32 to vector<16x128xf32>
    %1813 = arith.mulf %1383, %1812 : vector<16x128xf32>
    %1814 = arith.addf %1810, %1813 : vector<16x128xf32>
    %c107_366 = arith.constant 107 : index
    %1815 = memref.load %arg1[%c107_366] : memref<162xf32, #tpu.memory_space<smem>>
    %1816 = vector.broadcast %1815 : f32 to vector<16x128xf32>
    %1817 = arith.mulf %1395, %1816 : vector<16x128xf32>
    %1818 = arith.addf %1814, %1817 : vector<16x128xf32>
    %c117_367 = arith.constant 117 : index
    %1819 = memref.load %arg1[%c117_367] : memref<162xf32, #tpu.memory_space<smem>>
    %1820 = vector.broadcast %1819 : f32 to vector<16x128xf32>
    %1821 = arith.mulf %1407, %1820 : vector<16x128xf32>
    %1822 = arith.addf %1818, %1821 : vector<16x128xf32>
    %c127_368 = arith.constant 127 : index
    %1823 = memref.load %arg1[%c127_368] : memref<162xf32, #tpu.memory_space<smem>>
    %1824 = vector.broadcast %1823 : f32 to vector<16x128xf32>
    %1825 = arith.mulf %1419, %1824 : vector<16x128xf32>
    %1826 = arith.addf %1822, %1825 : vector<16x128xf32>
    %c137_369 = arith.constant 137 : index
    %1827 = memref.load %arg1[%c137_369] : memref<162xf32, #tpu.memory_space<smem>>
    %1828 = vector.broadcast %1827 : f32 to vector<16x128xf32>
    %1829 = arith.addf %1826, %1828 : vector<16x128xf32>
    %cst_370 = arith.constant 0.000000e+00 : f32
    %1830 = vector.broadcast %cst_370 : f32 to vector<16x128xf32>
    %1831 = arith.maximumf %1829, %1830 : vector<16x128xf32>
    %c154_371 = arith.constant 154 : index
    %1832 = memref.load %arg1[%c154_371] : memref<162xf32, #tpu.memory_space<smem>>
    %1833 = vector.broadcast %1832 : f32 to vector<16x128xf32>
    %1834 = arith.mulf %1831, %1833 : vector<16x128xf32>
    %1835 = arith.addf %1783, %1834 : vector<16x128xf32>
    %c155_372 = arith.constant 155 : index
    %1836 = memref.load %arg1[%c155_372] : memref<162xf32, #tpu.memory_space<smem>>
    %1837 = vector.broadcast %1836 : f32 to vector<16x128xf32>
    %1838 = arith.mulf %1831, %1837 : vector<16x128xf32>
    %1839 = arith.addf %1787, %1838 : vector<16x128xf32>
    %c38_373 = arith.constant 38 : index
    %1840 = memref.load %arg1[%c38_373] : memref<162xf32, #tpu.memory_space<smem>>
    %1841 = vector.broadcast %1840 : f32 to vector<16x128xf32>
    %1842 = arith.mulf %1311, %1841 : vector<16x128xf32>
    %c48_374 = arith.constant 48 : index
    %1843 = memref.load %arg1[%c48_374] : memref<162xf32, #tpu.memory_space<smem>>
    %1844 = vector.broadcast %1843 : f32 to vector<16x128xf32>
    %1845 = arith.mulf %1323, %1844 : vector<16x128xf32>
    %1846 = arith.addf %1842, %1845 : vector<16x128xf32>
    %c58_375 = arith.constant 58 : index
    %1847 = memref.load %arg1[%c58_375] : memref<162xf32, #tpu.memory_space<smem>>
    %1848 = vector.broadcast %1847 : f32 to vector<16x128xf32>
    %1849 = arith.mulf %1335, %1848 : vector<16x128xf32>
    %1850 = arith.addf %1846, %1849 : vector<16x128xf32>
    %c68_376 = arith.constant 68 : index
    %1851 = memref.load %arg1[%c68_376] : memref<162xf32, #tpu.memory_space<smem>>
    %1852 = vector.broadcast %1851 : f32 to vector<16x128xf32>
    %1853 = arith.mulf %1347, %1852 : vector<16x128xf32>
    %1854 = arith.addf %1850, %1853 : vector<16x128xf32>
    %c78_377 = arith.constant 78 : index
    %1855 = memref.load %arg1[%c78_377] : memref<162xf32, #tpu.memory_space<smem>>
    %1856 = vector.broadcast %1855 : f32 to vector<16x128xf32>
    %1857 = arith.mulf %1359, %1856 : vector<16x128xf32>
    %1858 = arith.addf %1854, %1857 : vector<16x128xf32>
    %c88_378 = arith.constant 88 : index
    %1859 = memref.load %arg1[%c88_378] : memref<162xf32, #tpu.memory_space<smem>>
    %1860 = vector.broadcast %1859 : f32 to vector<16x128xf32>
    %1861 = arith.mulf %1371, %1860 : vector<16x128xf32>
    %1862 = arith.addf %1858, %1861 : vector<16x128xf32>
    %c98_379 = arith.constant 98 : index
    %1863 = memref.load %arg1[%c98_379] : memref<162xf32, #tpu.memory_space<smem>>
    %1864 = vector.broadcast %1863 : f32 to vector<16x128xf32>
    %1865 = arith.mulf %1383, %1864 : vector<16x128xf32>
    %1866 = arith.addf %1862, %1865 : vector<16x128xf32>
    %c108_380 = arith.constant 108 : index
    %1867 = memref.load %arg1[%c108_380] : memref<162xf32, #tpu.memory_space<smem>>
    %1868 = vector.broadcast %1867 : f32 to vector<16x128xf32>
    %1869 = arith.mulf %1395, %1868 : vector<16x128xf32>
    %1870 = arith.addf %1866, %1869 : vector<16x128xf32>
    %c118_381 = arith.constant 118 : index
    %1871 = memref.load %arg1[%c118_381] : memref<162xf32, #tpu.memory_space<smem>>
    %1872 = vector.broadcast %1871 : f32 to vector<16x128xf32>
    %1873 = arith.mulf %1407, %1872 : vector<16x128xf32>
    %1874 = arith.addf %1870, %1873 : vector<16x128xf32>
    %c128_382 = arith.constant 128 : index
    %1875 = memref.load %arg1[%c128_382] : memref<162xf32, #tpu.memory_space<smem>>
    %1876 = vector.broadcast %1875 : f32 to vector<16x128xf32>
    %1877 = arith.mulf %1419, %1876 : vector<16x128xf32>
    %1878 = arith.addf %1874, %1877 : vector<16x128xf32>
    %c138_383 = arith.constant 138 : index
    %1879 = memref.load %arg1[%c138_383] : memref<162xf32, #tpu.memory_space<smem>>
    %1880 = vector.broadcast %1879 : f32 to vector<16x128xf32>
    %1881 = arith.addf %1878, %1880 : vector<16x128xf32>
    %cst_384 = arith.constant 0.000000e+00 : f32
    %1882 = vector.broadcast %cst_384 : f32 to vector<16x128xf32>
    %1883 = arith.maximumf %1881, %1882 : vector<16x128xf32>
    %c156_385 = arith.constant 156 : index
    %1884 = memref.load %arg1[%c156_385] : memref<162xf32, #tpu.memory_space<smem>>
    %1885 = vector.broadcast %1884 : f32 to vector<16x128xf32>
    %1886 = arith.mulf %1883, %1885 : vector<16x128xf32>
    %1887 = arith.addf %1835, %1886 : vector<16x128xf32>
    %c157_386 = arith.constant 157 : index
    %1888 = memref.load %arg1[%c157_386] : memref<162xf32, #tpu.memory_space<smem>>
    %1889 = vector.broadcast %1888 : f32 to vector<16x128xf32>
    %1890 = arith.mulf %1883, %1889 : vector<16x128xf32>
    %1891 = arith.addf %1839, %1890 : vector<16x128xf32>
    %c39_387 = arith.constant 39 : index
    %1892 = memref.load %arg1[%c39_387] : memref<162xf32, #tpu.memory_space<smem>>
    %1893 = vector.broadcast %1892 : f32 to vector<16x128xf32>
    %1894 = arith.mulf %1311, %1893 : vector<16x128xf32>
    %c49_388 = arith.constant 49 : index
    %1895 = memref.load %arg1[%c49_388] : memref<162xf32, #tpu.memory_space<smem>>
    %1896 = vector.broadcast %1895 : f32 to vector<16x128xf32>
    %1897 = arith.mulf %1323, %1896 : vector<16x128xf32>
    %1898 = arith.addf %1894, %1897 : vector<16x128xf32>
    %c59_389 = arith.constant 59 : index
    %1899 = memref.load %arg1[%c59_389] : memref<162xf32, #tpu.memory_space<smem>>
    %1900 = vector.broadcast %1899 : f32 to vector<16x128xf32>
    %1901 = arith.mulf %1335, %1900 : vector<16x128xf32>
    %1902 = arith.addf %1898, %1901 : vector<16x128xf32>
    %c69_390 = arith.constant 69 : index
    %1903 = memref.load %arg1[%c69_390] : memref<162xf32, #tpu.memory_space<smem>>
    %1904 = vector.broadcast %1903 : f32 to vector<16x128xf32>
    %1905 = arith.mulf %1347, %1904 : vector<16x128xf32>
    %1906 = arith.addf %1902, %1905 : vector<16x128xf32>
    %c79_391 = arith.constant 79 : index
    %1907 = memref.load %arg1[%c79_391] : memref<162xf32, #tpu.memory_space<smem>>
    %1908 = vector.broadcast %1907 : f32 to vector<16x128xf32>
    %1909 = arith.mulf %1359, %1908 : vector<16x128xf32>
    %1910 = arith.addf %1906, %1909 : vector<16x128xf32>
    %c89_392 = arith.constant 89 : index
    %1911 = memref.load %arg1[%c89_392] : memref<162xf32, #tpu.memory_space<smem>>
    %1912 = vector.broadcast %1911 : f32 to vector<16x128xf32>
    %1913 = arith.mulf %1371, %1912 : vector<16x128xf32>
    %1914 = arith.addf %1910, %1913 : vector<16x128xf32>
    %c99_393 = arith.constant 99 : index
    %1915 = memref.load %arg1[%c99_393] : memref<162xf32, #tpu.memory_space<smem>>
    %1916 = vector.broadcast %1915 : f32 to vector<16x128xf32>
    %1917 = arith.mulf %1383, %1916 : vector<16x128xf32>
    %1918 = arith.addf %1914, %1917 : vector<16x128xf32>
    %c109_394 = arith.constant 109 : index
    %1919 = memref.load %arg1[%c109_394] : memref<162xf32, #tpu.memory_space<smem>>
    %1920 = vector.broadcast %1919 : f32 to vector<16x128xf32>
    %1921 = arith.mulf %1395, %1920 : vector<16x128xf32>
    %1922 = arith.addf %1918, %1921 : vector<16x128xf32>
    %c119_395 = arith.constant 119 : index
    %1923 = memref.load %arg1[%c119_395] : memref<162xf32, #tpu.memory_space<smem>>
    %1924 = vector.broadcast %1923 : f32 to vector<16x128xf32>
    %1925 = arith.mulf %1407, %1924 : vector<16x128xf32>
    %1926 = arith.addf %1922, %1925 : vector<16x128xf32>
    %c129_396 = arith.constant 129 : index
    %1927 = memref.load %arg1[%c129_396] : memref<162xf32, #tpu.memory_space<smem>>
    %1928 = vector.broadcast %1927 : f32 to vector<16x128xf32>
    %1929 = arith.mulf %1419, %1928 : vector<16x128xf32>
    %1930 = arith.addf %1926, %1929 : vector<16x128xf32>
    %c139_397 = arith.constant 139 : index
    %1931 = memref.load %arg1[%c139_397] : memref<162xf32, #tpu.memory_space<smem>>
    %1932 = vector.broadcast %1931 : f32 to vector<16x128xf32>
    %1933 = arith.addf %1930, %1932 : vector<16x128xf32>
    %cst_398 = arith.constant 0.000000e+00 : f32
    %1934 = vector.broadcast %cst_398 : f32 to vector<16x128xf32>
    %1935 = arith.maximumf %1933, %1934 : vector<16x128xf32>
    %c158_399 = arith.constant 158 : index
    %1936 = memref.load %arg1[%c158_399] : memref<162xf32, #tpu.memory_space<smem>>
    %1937 = vector.broadcast %1936 : f32 to vector<16x128xf32>
    %1938 = arith.mulf %1935, %1937 : vector<16x128xf32>
    %1939 = arith.addf %1887, %1938 : vector<16x128xf32>
    %c159_400 = arith.constant 159 : index
    %1940 = memref.load %arg1[%c159_400] : memref<162xf32, #tpu.memory_space<smem>>
    %1941 = vector.broadcast %1940 : f32 to vector<16x128xf32>
    %1942 = arith.mulf %1935, %1941 : vector<16x128xf32>
    %1943 = arith.addf %1891, %1942 : vector<16x128xf32>
    %1944 = arith.subf %643, %1291 : vector<16x128xf32>
    %1945 = arith.subf %647, %1295 : vector<16x128xf32>
    %1946 = arith.subf %643, %1939 : vector<16x128xf32>
    %1947 = arith.subf %647, %1943 : vector<16x128xf32>
    %1948 = arith.mulf %1944, %1944 : vector<16x128xf32>
    %1949 = arith.mulf %1945, %1945 : vector<16x128xf32>
    %1950 = arith.addf %1948, %1949 : vector<16x128xf32>
    %1951 = arith.mulf %1946, %1946 : vector<16x128xf32>
    %1952 = arith.mulf %1947, %1947 : vector<16x128xf32>
    %1953 = arith.addf %1951, %1952 : vector<16x128xf32>
    %1954 = arith.maximumf %1950, %1953 : vector<16x128xf32>
    %1955 = arith.subf %1950, %1954 : vector<16x128xf32>
    %1956 = math.exp %1955 : vector<16x128xf32>
    %1957 = arith.subf %1953, %1954 : vector<16x128xf32>
    %1958 = math.exp %1957 : vector<16x128xf32>
    %1959 = arith.addf %1956, %1958 : vector<16x128xf32>
    %1960 = tpu.reciprocal %1959 {approx = true} : vector<16x128xf32> -> vector<16x128xf32>
    %1961 = arith.mulf %1959, %1960 : vector<16x128xf32>
    %cst_401 = arith.constant 2.000000e+00 : f32
    %1962 = vector.broadcast %cst_401 : f32 to vector<16x128xf32>
    %1963 = arith.subf %1962, %1961 : vector<16x128xf32>
    %1964 = arith.mulf %1960, %1963 : vector<16x128xf32>
    %1965 = arith.mulf %1956, %1964 : vector<16x128xf32>
    %c0_402 = arith.constant 0 : index
    %c0_403 = arith.constant 0 : index
    %c0_404 = arith.constant 0 : index
    %1966 = vector.load %arg3[%c0_402, %c0_403, %c0_404] : memref<2x16x128xf32, #tpu.memory_space<vmem>>, vector<1x16x128xf32>
    %1967 = vector.shape_cast %1966 : vector<1x16x128xf32> to vector<16x128xf32>
    %1968 = vector.shape_cast %1965 : vector<16x128xf32> to vector<1x16x128xf32>
    tpu.vector_store %arg3[%c0_402, %c0_403, %c0_404], %1968 {strides = array<i32>} : memref<2x16x128xf32, #tpu.memory_space<vmem>>, vector<1x16x128xf32>,
    %1969 = arith.mulf %1958, %1964 : vector<16x128xf32>
    %c1_405 = arith.constant 1 : index
    %c0_406 = arith.constant 0 : index
    %c0_407 = arith.constant 0 : index
    %1970 = vector.load %arg3[%c1_405, %c0_406, %c0_407] : memref<2x16x128xf32, #tpu.memory_space<vmem>>, vector<1x16x128xf32>
    %1971 = vector.shape_cast %1970 : vector<1x16x128xf32> to vector<16x128xf32>
    %1972 = vector.shape_cast %1969 : vector<16x128xf32> to vector<1x16x128xf32>
    tpu.vector_store %arg3[%c1_405, %c0_406, %c0_407], %1972 {strides = array<i32>} : memref<2x16x128xf32, #tpu.memory_space<vmem>>, vector<1x16x128xf32>,
    return
  }
  func.func @transform_0(%arg0: i32) -> i32 {
    %c0_i32 = arith.constant 0 : i32
    %c0_i32_0 = arith.constant 0 : i32
    return %c0_i32 : i32
  }
  func.func @transform_1(%arg0: i32) -> (i32, i32, i32) {
    %c0_i32 = arith.constant 0 : i32
    %c0_i32_0 = arith.constant 0 : i32
    %c0_i32_1 = arith.constant 0 : i32
    return %c0_i32, %arg0, %c0_i32_0 : i32, i32, i32
  }
  func.func @transform_2(%arg0: i32) -> (i32, i32, i32) {
    %c0_i32 = arith.constant 0 : i32
    %c0_i32_0 = arith.constant 0 : i32
    %c0_i32_1 = arith.constant 0 : i32
    return %c0_i32, %arg0, %c0_i32_0 : i32, i32, i32
  }
}

</mosaic_0001>

<bundles_post_ra>
// kernel: deep_metric_forward_batched.1
= control target key start
LH: loop header
LB: loop body
LE: loop exit
PB: predicated region body
PF: predicated region fallthrough
CT: control target
= control target key end

     0   :  { %7 = vsyncpa [#allocation3], 0  ;;  %s2849_s9 = smov 0   ;;  %s2851_s10 = smov 0   ;;  %s5851_s0 = inlined_call_operand.vmem [shape: f32[162], index: 0, kind: input, shape index: {}]   ;;  %s5852_s1 = inlined_call_operand.vmem [shape: f32[6,32,128], index: 1, kind: input, shape index: {}]   ;;  %s5853_s2 = inlined_call_operand.vmem [shape: f32[2,32,128], index: 2, kind: output, shape index: {}]  }
   0x1   :  { %s2853_s11 = smov 0  }
   0x2 LB: > { %s2865_s12 = sadd.s32 4294967295, %s2831_s11   ;;  %s2868_s13 = sadd.s32 1, %s2831_s11   ;;  %s2831_s11 = sphi %s2853_s11, %s6828_s11   ;;  %s2827_s10 = sphi %s2851_s10, %s6827_s10   ;;  %s2823_s9 = sphi %s2849_s9, %s6826_s9  }
   0x3   : > { %s38_s14 = ssub.s32 %s2831_s11, %s2868_s13  ;;  %s41_s15 = sadd.s32 1, %s2827_s10 }
   0x4   : > { %p39_p0 = scmp.eq.s32.totalorder %s38_s14, 0  ;;  %p48_p1 = scmp.ne.s32.totalorder %s2827_s10, %s2823_s9 }
   0x5   : > { %p49_p2 = scmp.eq.s32.totalorder %s2831_s11, 0  ;;  %p78_p3 = scmp.eq.s32.totalorder %s2865_s12, 1 }
   0x6   : > { %s2878_s16 = scalar_select %p39_p0, %s2827_s10, %s41_s15  }
   0x7   : > { %p2880_p4 = por %p49_p2, %p48_p1  ;;  %p2884_p5 = por %p78_p3, %p48_p1 }
   0x8   : > { %p2553_p6 = scmp.ge.s32.totalorder %s2831_s11, 1  ;;  %p91_p7 = scmp.lt.s32.totalorder %s2831_s11, 3 }
   0x9   : > { %s6329_s18 = scalar_select %p2884_p5, 1, 0 }
   0xa   : > { %p2751_p8 = scmp.eq.s32.totalorder %s2865_s12, 0  ;;  %p2891_p9 = pnand %p2553_p6, %p91_p7 }
   0xb   : > { %s104_s22 = sshll.u32 %s5851_s0, 4  ;;  %s105_s22 = int_to_ptr.vmem [resolvable:$true] %s104_s22 }
   0xc   : > { %p2747_p10 = pneg %p2891_p9  ;;  %s2790_s23 = scalar_lea.vmem %s105_s22, 32 }
   0xd   : > { %p2791_p12 = scmp.ne.s32.totalorder %s105_s22, %s2790_s23  ;;  %p2798_p2 = scmp.lt.s32.totalorder %s105_s22, %s105_s22 }
   0xe   : > { %p2748_p11 = pnand %p2751_p8, %p2747_p10  ;;  %p2799_p3 = scmp.lt.s32.totalorder %s2790_s23, %s2790_s23 }
  0x10   : > { %p2792_p13 = pneg %p2748_p11  ;;  %p2800_p6 = por %p2799_p3, %p2798_p2 }
  0x12   : > { %p2793_p0 = pnand %p2792_p13, %p2791_p12 }
  0x14   : > { %p2794_p1 = pneg %p2793_p0 }
  0x16   : > { %p2801_p7 = pnand %p2800_p6, %p2794_p1 }
  0x18   : > { %2804 = shalt.err (!%p2801_p7)
}
  0x19   : > { %s2833_s24 = smov [#allocation2]   ;;  %p2555_p5 = scmp.ge.s32.totalorder %s2831_s11, 2 }
  0x1a   : > { %2750 = dma.vmem_to_smem (!%p2748_p11), %s105_s22, 32, %s2833_s24, [#allocation3]  }
  0x1b   : > { %111 = sbr.rel (%p2555_p5) target bundleno = 42 (0x2a), region = 20 }
  0x20   : > { %114 = sbr.rel (!%p2880_p4) target bundleno = 42 (0x2a), region = 24  ;;  %s116_s25 = sand.u32 (%p2880_p4), 1, %s2827_s10  }
  0x21   : > { %s2739_s26 = sshll.u32 (%p2880_p4), %s2831_s11, 4  ;;  %s2741_s27 = smul.u32 (%p2880_p4), 96, %s116_s25 }
  0x22   : > { %s121_s30 = scalar_lea.vmem (%p2880_p4), %s5852_s1, %s2739_s26 }
  0x23   : > { %v172_v0 = vld [vmem:[%s121_s30] sm:$0xff] (%p2880_p4)  ;;  %v174_v1 = vld [vmem:[%s121_s30 + $0x8] sm:$0xff] (%p2880_p4)  ;;  %s118_s3 = scalar_lea.vmem (%p2880_p4), [#allocation4], %s2741_s27 }
  0x24   : > { %v176_v2 = vld [vmem:[%s121_s30 + $0x20] sm:$0xff] (%p2880_p4)  ;;  %v178_v3 = vld [vmem:[%s121_s30 + $0x28] sm:$0xff] (%p2880_p4)  ;;  %173 = vst [vmem:[%s118_s3] sm:$0xff] (%p2880_p4), %v172_v0  ;;  %175 = vst [vmem:[%s118_s3 + $0x8] sm:$0xff] (%p2880_p4), %v174_v1 }
  0x25   : > { %v180_v4 = vld [vmem:[%s121_s30 + $0x40] sm:$0xff]  ;;  %v182_v5 = vld [vmem:[%s121_s30 + $0x48] sm:$0xff]  ;;  %177 = vst [vmem:[%s118_s3 + $0x10] sm:$0xff] %v176_v2  ;;  %179 = vst [vmem:[%s118_s3 + $0x18] sm:$0xff] %v178_v3 }
  0x26   : > { %181 = vst [vmem:[%s118_s3 + $0x20] sm:$0xff] %v180_v4  ;;  %183 = vst [vmem:[%s118_s3 + $0x28] sm:$0xff] %v182_v5  ;;  %v184_v6 = vld [vmem:[%s121_s30 + $0x60] sm:$0xff]  ;;  %v186_v7 = vld [vmem:[%s121_s30 + $0x68] sm:$0xff] }
  0x27   : > { %v188_v8 = vld [vmem:[%s121_s30 + $0x80] sm:$0xff]  ;;  %185 = vst [vmem:[%s118_s3 + $0x30] sm:$0xff] %v184_v6  ;;  %187 = vst [vmem:[%s118_s3 + $0x38] sm:$0xff] %v186_v7  ;;  %v190_v9 = vld [vmem:[%s121_s30 + $0x88] sm:$0xff] }
  0x28   : > { %189 = vst [vmem:[%s118_s3 + $0x40] sm:$0xff] %v188_v8  ;;  %v192_v10 = vld [vmem:[%s121_s30 + $0xa0] sm:$0xff]  ;;  %v194_v11 = vld [vmem:[%s121_s30 + $0xa8] sm:$0xff]  ;;  %191 = vst [vmem:[%s118_s3 + $0x48] sm:$0xff] %v190_v9 }
  0x29   : > { %193 = vst [vmem:[%s118_s3 + $0x50] sm:$0xff] %v192_v10  ;;  %195 = vst [vmem:[%s118_s3 + $0x58] sm:$0xff] %v194_v11 }
  0x2a PF: > { %204 = sbr.rel (%p2891_p9) target bundleno = 621 (0x26d), region = 62 }
  0x2f   : > { %2818 = dma.done.wait (%p2751_p8), [#allocation3], 32  }
  0x30   : > { %2820 = vsyncadd (%p2751_p8), [#allocation3], 4294967264  ;;  %s211_s4 = sand.u32 1, %s2823_s9  }
  0x31   : > { %s2742_s5 = smul.u32 96, %s211_s4 }
  0x33   : > { %s2919_s6 = scalar_lea.vmem [#allocation4], %s2742_s5 }
  0x34   : > { %217 = sfence }
  0x35   : > { %s239_s7 = sld [smem:[#allocation2]]  ;;  %v2922_v12 = vld [vmem:[%s2919_s6] sm:$0xff]  ;;  %v2925_v13 = vld [vmem:[%s2919_s6 + $0x8] sm:$0xff]  ;;  %v2928_v14 = vld [vmem:[%s2919_s6 + $0x10] sm:$0xff]  ;;  %p6825_p4 = scmp.ne.s32.totalorder %s6329_s18, 0 }
  0x36   : > { %s2563_s8 = sld [smem:[#allocation2 + $0xa]]  ;;  %v2931_v15 = vld [vmem:[%s2919_s6 + $0x18] sm:$0xff] }
  0x37   : > { %s2564_s11 = sld [smem:[#allocation2 + $0x14]] }
  0x38   : > { %s2565_s14 = sld [smem:[#allocation2 + $0x1]] }
  0x39   : > { %s2566_s15 = sld [smem:[#allocation2 + $0xb]] }
  0x3a   : > { %s2933_s17 = sld [smem:[#allocation2 + $0x15]] }
  0x3b   : > { %v2935_v16 = vstv %s239_s7  ;;  %s2568_s19 = sld [smem:[#allocation2 + $0x2]] }
  0x3c   : > { %6331 = vst [vmem:[#allocation7_spill] sm:$0xff] %v2935_v16  ;;  %v241_v17 = vmul.f32 %v2935_v16, %v2922_v12  ;;  %v242_v18 = vmul.f32 %v2935_v16, %v2925_v13  ;;  %v2941_v19 = vstv %s2563_s8  ;;  %s2569_s20 = sld [smem:[#allocation2 + $0xc]] }
  0x3d   : > { %6332 = vst [vmem:[#allocation8_spill] sm:$0xff] %v2941_v19  ;;  %v245_v20 = vmul.f32 %v2928_v14, %v2941_v19  ;;  %v246_v21 = vmul.f32 %v2931_v15, %v2941_v19  ;;  %s2947_s21 = sld [smem:[#allocation2 + $0x16]]  ;;  %v2951_v25 = vstv %s2564_s11 }
  0x3e   : > { %v2949_v22 = vstv %s2565_s14  ;;  %s2571_s22 = sld [smem:[#allocation2 + $0x3]]  ;;  %6334 = vst [vmem:[#allocation10_spill] sm:$0xff] %v2951_v25 }
  0x3f   : > { %6333 = vst [vmem:[#allocation9_spill] sm:$0xff] %v2949_v22  ;;  %v247_v23 = vadd.f32 %v245_v20, %v241_v17  ;;  %v248_v24 = vadd.f32 %v246_v21, %v242_v18  ;;  %s2572_s23 = sld [smem:[#allocation2 + $0xd]]  ;;  %v2953_v26 = vstv %s2566_s15  ;;  %v257_v27 = vmul.f32 %v2949_v22, %v2922_v12 }
  0x40   : > { %6335 = vst [vmem:[#allocation11_spill] sm:$0xff] %v2953_v26  ;;  %s2955_s24 = sld [smem:[#allocation2 + $0x17]]  ;;  %v261_v28 = vmul.f32 %v2928_v14, %v2953_v26  ;;  %v258_v29 = vmul.f32 %v2949_v22, %v2925_v13  ;;  %v262_v30 = vmul.f32 %v2931_v15, %v2953_v26  ;;  %v2990_v42 = vstv %s2933_s17 }
  0x41   : > { %s2961_s25 = sld [smem:[#allocation2 + $0x4]]  ;;  %v2967_v31 = vstv %s2568_s19  ;;  %v251_v33 = vadd.f32 %v2951_v25, %v247_v23  ;;  %v252_v34 = vadd.f32 %v2951_v25, %v248_v24  ;;  %6339 = vst [vmem:[#allocation15_spill] sm:$0xff] %v2990_v42 }
  0x42   : > { %6336 = vst [vmem:[#allocation12_spill] sm:$0xff] %v2967_v31  ;;  %v2969_v32 = vstv %s2569_s20  ;;  %s2575_s26 = sld [smem:[#allocation2 + $0xe]]  ;;  %v273_v35 = vmul.f32 %v2967_v31, %v2922_v12  ;;  %v274_v36 = vmul.f32 %v2967_v31, %v2925_v13  ;;  %v263_v39 = vadd.f32 %v261_v28, %v257_v27 }
  0x43   : > { %6337 = vst [vmem:[#allocation13_spill] sm:$0xff] %v2969_v32  ;;  %s2973_s27 = sld [smem:[#allocation2 + $0x18]]  ;;  %v277_v37 = vmul.f32 %v2928_v14, %v2969_v32  ;;  %v278_v38 = vmul.f32 %v2931_v15, %v2969_v32  ;;  %v264_v41 = vadd.f32 %v262_v30, %v258_v29  ;;  %v2996_v45 = vmax.f32 %v251_v33, 0.0 }
  0x44   : > { %s2983_s28 = sld [smem:[#allocation2 + $0x5]]  ;;  %v2985_v40 = vstv %s2571_s22  ;;  %v2998_v46 = vmax.f32 %v252_v34, 0.0  ;;  %v267_v52 = vadd.f32 %v2990_v42, %v263_v39  ;;  %v3012_v53 = vstv %s2947_s21 }
  0x45   : > { %6338 = vst [vmem:[#allocation14_spill] sm:$0xff] %v2985_v40  ;;  %s2987_s29 = sld [smem:[#allocation2 + $0xf]]  ;;  %v289_v43 = vmul.f32 %v2985_v40, %v2922_v12  ;;  %v290_v44 = vmul.f32 %v2985_v40, %v2925_v13  ;;  %v3000_v47 = vstv %s2572_s23  ;;  %v279_v48 = vadd.f32 %v277_v37, %v273_v35  ;;  %6341 = vst [vmem:[#allocation17_spill] sm:$0xff] %v3012_v53 }
  0x46   : > { %6340 = vst [vmem:[#allocation16_spill] sm:$0xff] %v3000_v47  ;;  %s3002_s30 = sld [smem:[#allocation2 + $0x6]]  ;;  %v280_v49 = vadd.f32 %v278_v38, %v274_v36  ;;  %v293_v50 = vmul.f32 %v2928_v14, %v3000_v47  ;;  %v294_v51 = vmul.f32 %v2931_v15, %v3000_v47  ;;  %v268_v56 = vadd.f32 %v2990_v42, %v264_v41 }
  0x47   : > { %s3008_s3 = sld [smem:[#allocation2 + $0x19]]  ;;  %v3015_v54 = vstv %s2961_s25  ;;  %v3023_v59 = vstv %s2955_s24  ;;  %v283_v0 = vadd.f32 %v3012_v53, %v279_v48  ;;  %v3064_v17 = vmax.f32 %v267_v52, 0.0 }
  0x48   : > { %6342 = vst [vmem:[#allocation18_spill] sm:$0xff] %v3015_v54  ;;  %v3017_v55 = vstv %s2575_s26  ;;  %s3019_s5 = sld [smem:[#allocation2 + $0x10]]  ;;  %v295_v57 = vadd.f32 %v293_v50, %v289_v43  ;;  %v296_v58 = vadd.f32 %v294_v51, %v290_v44  ;;  %6344 = vst [vmem:[#allocation20_spill] sm:$0xff] %v3023_v59  ;;  %v305_v60 = vmul.f32 %v3015_v54, %v2922_v12 }
  0x49   : > { %6343 = vst [vmem:[#allocation19_spill] sm:$0xff] %v3017_v55  ;;  %s3025_s7 = sld [smem:[#allocation2 + $0x7]]  ;;  %v306_v61 = vmul.f32 %v3015_v54, %v2925_v13  ;;  %v309_v62 = vmul.f32 %v2928_v14, %v3017_v55  ;;  %v310_v63 = vmul.f32 %v2931_v15, %v3017_v55  ;;  %v284_v1 = vadd.f32 %v3012_v53, %v280_v49 }
  0x4a   : > { %s3035_s8 = sld [smem:[#allocation2 + $0x11]]  ;;  %v3040_v2 = vstv %s2983_s28  ;;  %v299_v4 = vadd.f32 %v3023_v59, %v295_v57  ;;  %v300_v5 = vadd.f32 %v3023_v59, %v296_v58  ;;  %v3050_v7 = vstv %s2973_s27 }
  0x4b   : > { %6345 = vst [vmem:[#allocation21_spill] sm:$0xff] %v3040_v2  ;;  %v3043_v3 = vstv %s2987_s29  ;;  %s3045_s11 = sld [smem:[#allocation2 + $0x1a]]  ;;  %v311_v6 = vadd.f32 %v309_v62, %v305_v60  ;;  %6347 = vst [vmem:[#allocation23_spill] sm:$0xff] %v3050_v7  ;;  %v321_v8 = vmul.f32 %v3040_v2, %v2922_v12  ;;  %v322_v9 = vmul.f32 %v3040_v2, %v2925_v13 }
  0x4c   : > { %6346 = vst [vmem:[#allocation22_spill] sm:$0xff] %v3043_v3  ;;  %s3052_s14 = sld [smem:[#allocation2 + $0x8]]  ;;  %v325_v10 = vmul.f32 %v2928_v14, %v3043_v3  ;;  %v326_v11 = vmul.f32 %v2931_v15, %v3043_v3  ;;  %v3066_v18 = vmax.f32 %v268_v56, 0.0  ;;  %v312_v20 = vadd.f32 %v310_v63, %v306_v61 }
  0x4d   : > { %s3062_s15 = sld [smem:[#allocation2 + $0x1b]]  ;;  %v3069_v21 = vstv %s3002_s30  ;;  %v3073_v23 = vmax.f32 %v283_v0, 0.0  ;;  %v3075_v24 = vmax.f32 %v284_v1, 0.0  ;;  %v3083_v29 = vmax.f32 %v299_v4, 0.0 }
  0x4e   : > { %6348 = vst [vmem:[#allocation24_spill] sm:$0xff] %v3069_v21  ;;  %s3071_s17 = sld [smem:[#allocation2 + $0x12]]  ;;  %v337_v27 = vmul.f32 %v3069_v21, %v2922_v12  ;;  %v338_v28 = vmul.f32 %v3069_v21, %v2925_v13  ;;  %v3085_v30 = vmax.f32 %v300_v5, 0.0  ;;  %v315_v33 = vadd.f32 %v3050_v7, %v311_v6 }
  0x4f   : > { %s3081_s19 = sld [smem:[#allocation2 + $0x9]]  ;;  %v3089_v34 = vstv %s3019_s5  ;;  %v327_v35 = vadd.f32 %v325_v10, %v321_v8  ;;  %v328_v36 = vadd.f32 %v326_v11, %v322_v9  ;;  %v316_v39 = vadd.f32 %v3050_v7, %v312_v20 }
  0x50   : > { %6349 = vst [vmem:[#allocation25_spill] sm:$0xff] %v3089_v34  ;;  %s3091_s20 = sld [smem:[#allocation2 + $0x13]]  ;;  %v341_v37 = vmul.f32 %v2928_v14, %v3089_v34  ;;  %v342_v38 = vmul.f32 %v2931_v15, %v3089_v34  ;;  %v3099_v41 = vstv %s3008_s3  ;;  %v3102_v43 = vstv %s3025_s7 }
  0x51   : > { %6350 = vst [vmem:[#allocation26_spill] sm:$0xff] %v3099_v41  ;;  %6351 = vst [vmem:[#allocation27_spill] sm:$0xff] %v3102_v43  ;;  %v3105_v44 = vstv %s3035_s8  ;;  %s3107_s21 = sld [smem:[#allocation2 + $0x1c]]  ;;  %v3110_v50 = vstv %s3045_s11  ;;  %v353_v52 = vmul.f32 %v3102_v43, %v2922_v12  ;;  %v354_v56 = vmul.f32 %v3102_v43, %v2925_v13 }
  0x52   : > { %6352 = vst [vmem:[#allocation28_spill] sm:$0xff] %v3105_v44  ;;  %v343_v48 = vadd.f32 %v341_v37, %v337_v27  ;;  %v344_v49 = vadd.f32 %v342_v38, %v338_v28  ;;  %6353 = vst [vmem:[#allocation29_spill] sm:$0xff] %v3110_v50  ;;  %v3113_v51 = vstv %s3052_s14  ;;  %s3115_s22 = sld [smem:[#allocation2 + $0x1d]]  ;;  %v357_v57 = vmul.f32 %v2928_v14, %v3105_v44 }
  0x53   : > { %6354 = vst [vmem:[#allocation30_spill] sm:$0xff] %v3113_v51  ;;  %v358_v58 = vmul.f32 %v2931_v15, %v3105_v44  ;;  %s3125_s23 = sld [smem:[#allocation2 + $0x1e]]  ;;  %v3127_v60 = vmax.f32 %v315_v33, 0.0  ;;  %v331_v61 = vadd.f32 %v3099_v41, %v327_v35  ;;  %v332_v62 = vadd.f32 %v3099_v41, %v328_v36 }
  0x54   : > { %v3132_v63 = vstv %s3062_s15  ;;  %s3134_s24 = sld [smem:[#allocation2 + $0x28]]  ;;  %v359_v0 = vadd.f32 %v357_v57, %v353_v52  ;;  %v369_v4 = vmul.f32 %v3113_v51, %v2922_v12  ;;  %v3139_v5 = vstv %s3071_s17 }
  0x55   : > { %6355 = vst [vmem:[#allocation31_spill] sm:$0xff] %v3132_v63  ;;  %v360_v1 = vadd.f32 %v358_v58, %v354_v56  ;;  %6356 = vst [vmem:[#allocation32_spill] sm:$0xff] %v3139_v5  ;;  %s3141_s25 = sld [smem:[#allocation2 + $0x32]]  ;;  %v347_v6 = vadd.f32 %v3110_v50, %v343_v48  ;;  %v348_v8 = vadd.f32 %v3110_v50, %v344_v49  ;;  %v3155_v27 = vstv %s3081_s19 }
  0x56   : > { %v370_v9 = vmul.f32 %v3113_v51, %v2925_v13  ;;  %v373_v10 = vmul.f32 %v2928_v14, %v3139_v5  ;;  %s3149_s26 = sld [smem:[#allocation2 + $0x3c]]  ;;  %v363_v11 = vadd.f32 %v3132_v63, %v359_v0  ;;  %v374_v20 = vmul.f32 %v2931_v15, %v3139_v5  ;;  %6357 = vst [vmem:[#allocation33_spill] sm:$0xff] %v3155_v27 }
  0x57   : > { %v3158_v28 = vstv %s3091_s20  ;;  %s3160_s27 = sld [smem:[#allocation2 + $0x46]]  ;;  %v3162_v33 = vmax.f32 %v316_v39, 0.0  ;;  %v3164_v35 = vmax.f32 %v331_v61, 0.0  ;;  %v364_v36 = vadd.f32 %v3132_v63, %v360_v1 }
  0x58   : > { %6358 = vst [vmem:[#allocation34_spill] sm:$0xff] %v3158_v28  ;;  %v385_v37 = vmul.f32 %v3155_v27, %v2922_v12  ;;  %s3169_s28 = sld [smem:[#allocation2 + $0x50]]  ;;  %v375_v38 = vadd.f32 %v373_v10, %v369_v4  ;;  %v386_v48 = vmul.f32 %v3155_v27, %v2925_v13  ;;  %v389_v49 = vmul.f32 %v2928_v14, %v3158_v28 }
  0x59   : > { %v390_v39 = vmul.f32 %v2931_v15, %v3158_v28  ;;  %s3177_s29 = sld [smem:[#allocation2 + $0x5a]]  ;;  %v3179_v52 = vmax.f32 %v332_v62, 0.0  ;;  %v3181_v56 = vmax.f32 %v347_v6, 0.0  ;;  %v3183_v12 = vmax.f32 %v348_v8, 0.0 }
  0x5a   : > { %v3186_v57 = vstv %s3107_s21  ;;  %s3188_s30 = sld [smem:[#allocation2 + $0x64]]  ;;  %v3190_v13 = vmax.f32 %v363_v11, 0.0  ;;  %v376_v14 = vadd.f32 %v374_v20, %v370_v9  ;;  %v391_v58 = vadd.f32 %v389_v49, %v385_v37 }
  0x5b   : > { %6359 = vst [vmem:[#allocation35_spill] sm:$0xff] %v3186_v57  ;;  %v3193_v61 = vstv %s3125_s23  ;;  %s3195_s3 = sld [smem:[#allocation2 + $0x6e]]  ;;  %v3197_v15 = vmax.f32 %v364_v36, 0.0  ;;  %v3200_v62 = vstv %s3115_s22  ;;  %v379_v4 = vadd.f32 %v3186_v57, %v375_v38 }
  0x5c   : > { %6360 = vst [vmem:[#allocation36_spill] sm:$0xff] %v3193_v61  ;;  %6361 = vst [vmem:[#allocation37_spill] sm:$0xff] %v3200_v62  ;;  %v405_v0 = vmul.f32 %v3193_v61, %v2996_v45  ;;  %v406_v1 = vmul.f32 %v3193_v61, %v2998_v46  ;;  %v392_v6 = vadd.f32 %v390_v39, %v386_v48  ;;  %v3208_v8 = vstv %s3134_s24  ;;  %s3229_s5 = sld [smem:[#allocation2 + $0x78]] }
  0x5d   : > { %6362 = vst [vmem:[#allocation38_spill] sm:$0xff] %v3208_v8  ;;  %v3211_v9 = vstv %s3141_s25  ;;  %v409_v10 = vmul.f32 %v3208_v8, %v3064_v17  ;;  %v410_v11 = vmul.f32 %v3208_v8, %v3066_v18  ;;  %v380_v37 = vadd.f32 %v3186_v57, %v376_v14  ;;  %s3235_s7 = sld [smem:[#allocation2 + $0x1f]] }
  0x5e   : > { %6363 = vst [vmem:[#allocation39_spill] sm:$0xff] %v3211_v9  ;;  %v415_v20 = vmul.f32 %v3211_v9, %v3073_v23  ;;  %v416_v36 = vmul.f32 %v3211_v9, %v3075_v24  ;;  %v395_v38 = vadd.f32 %v3200_v62, %v391_v58  ;;  %v3224_v48 = vstv %s3149_s26  ;;  %s2608_s8 = sld [smem:[#allocation2 + $0x29]] }
  0x5f   : > { %6364 = vst [vmem:[#allocation40_spill] sm:$0xff] %v3224_v48  ;;  %v3227_v49 = vstv %s3160_s27  ;;  %v411_v39 = vadd.f32 %v409_v10, %v405_v0  ;;  %v412_v8 = vadd.f32 %v410_v11, %v406_v1  ;;  %v421_v63 = vmul.f32 %v3224_v48, %v3083_v29  ;;  %s3250_s11 = sld [smem:[#allocation2 + $0x33]] }
  0x60   : > { %6365 = vst [vmem:[#allocation41_spill] sm:$0xff] %v3227_v49  ;;  %v422_v9 = vmul.f32 %v3224_v48, %v3085_v30  ;;  %v3237_v14 = vmax.f32 %v379_v4, 0.0  ;;  %v396_v58 = vadd.f32 %v3200_v62, %v392_v6  ;;  %v427_v57 = vmul.f32 %v3227_v49, %v3127_v60  ;;  %s2610_s14 = sld [smem:[#allocation2 + $0x3d]] }
  0x61   : > { %v3243_v61 = vstv %s3169_s28  ;;  %v417_v0 = vadd.f32 %v415_v20, %v411_v39  ;;  %v418_v1 = vadd.f32 %v416_v36, %v412_v8  ;;  %v428_v10 = vmul.f32 %v3227_v49, %v3162_v33  ;;  %s3266_s15 = sld [smem:[#allocation2 + $0x47]] }
  0x62   : > { %6366 = vst [vmem:[#allocation42_spill] sm:$0xff] %v3243_v61  ;;  %v3248_v11 = vstv %s3177_s29  ;;  %v3252_v48 = vmax.f32 %v380_v37, 0.0  ;;  %v3254_v4 = vmax.f32 %v395_v38, 0.0  ;;  %v3257_v6 = vstv %s3188_s30  ;;  %s3276_s17 = sld [smem:[#allocation2 + $0x51]] }
  0x63   : > { %6367 = vst [vmem:[#allocation43_spill] sm:$0xff] %v3248_v11  ;;  %6368 = vst [vmem:[#allocation44_spill] sm:$0xff] %v3257_v6  ;;  %v3260_v62 = vstv %s3195_s3  ;;  %v423_v28 = vadd.f32 %v421_v63, %v417_v0  ;;  %v424_v8 = vadd.f32 %v422_v9, %v418_v1  ;;  %v433_v20 = vmul.f32 %v3243_v61, %v3164_v35  ;;  %s3292_s19 = sld [smem:[#allocation2 + $0x5b]] }
  0x64   : > { %6369 = vst [vmem:[#allocation45_spill] sm:$0xff] %v3260_v62  ;;  %v434_v36 = vmul.f32 %v3243_v61, %v3179_v52  ;;  %v3268_v37 = vmax.f32 %v396_v58, 0.0  ;;  %v439_v38 = vmul.f32 %v3248_v11, %v3181_v56  ;;  %v440_v39 = vmul.f32 %v3248_v11, %v3183_v12  ;;  %s3298_s20 = sld [smem:[#allocation2 + $0x65]] }
  0x65   : > { %v445_v63 = vmul.f32 %v3257_v6, %v3190_v13  ;;  %v429_v9 = vadd.f32 %v427_v57, %v423_v28  ;;  %v430_v0 = vadd.f32 %v428_v10, %v424_v8  ;;  %v446_v1 = vmul.f32 %v3257_v6, %v3197_v15  ;;  %s3300_s21 = sld [smem:[#allocation2 + $0xa0]] }
  0x66   : > { %v451_v58 = vmul.f32 %v3260_v62, %v3237_v14  ;;  %v452_v61 = vmul.f32 %v3260_v62, %v3252_v48  ;;  %v3285_v49 = vstv %s3229_s5  ;;  %v3288_v11 = vstv %s3235_s7  ;;  %s3315_s22 = sld [smem:[#allocation2 + $0x6f]] }
  0x67   : > { %6370 = vst [vmem:[#allocation46_spill] sm:$0xff] %v3285_v49  ;;  %6371 = vst [vmem:[#allocation47_spill] sm:$0xff] %v3288_v11  ;;  %v3290_v27 = vstv %s2608_s8  ;;  %v435_v28 = vadd.f32 %v433_v20, %v429_v9  ;;  %v436_v57 = vadd.f32 %v434_v36, %v430_v0  ;;  %v481_v10 = vmul.f32 %v3288_v11, %v2996_v45  ;;  %s3317_s23 = sld [smem:[#allocation2 + $0xa1]] }
  0x68   : > { %6372 = vst [vmem:[#allocation48_spill] sm:$0xff] %v3290_v27  ;;  %v482_v8 = vmul.f32 %v3288_v11, %v2998_v46  ;;  %v485_v62 = vmul.f32 %v3290_v27, %v3064_v17  ;;  %v486_v6 = vmul.f32 %v3290_v27, %v3066_v18  ;;  %v3307_v5 = vstv %s3250_s11  ;;  %s3323_s24 = sld [smem:[#allocation2 + $0x82]] }
  0x69   : > { %6373 = vst [vmem:[#allocation49_spill] sm:$0xff] %v3307_v5  ;;  %v3309_v20 = vstv %s2610_s14  ;;  %v441_v36 = vadd.f32 %v439_v38, %v435_v28  ;;  %v442_v9 = vadd.f32 %v440_v39, %v436_v57  ;;  %v491_v0 = vmul.f32 %v3307_v5, %v3073_v23  ;;  %s3331_s25 = sld [smem:[#allocation2 + $0x8c]] }
  0x6a   : > { %6374 = vst [vmem:[#allocation50_spill] sm:$0xff] %v3309_v20  ;;  %v492_v11 = vmul.f32 %v3307_v5, %v3075_v24  ;;  %v487_v50 = vadd.f32 %v485_v62, %v481_v10  ;;  %v488_v27 = vadd.f32 %v486_v6, %v482_v8  ;;  %v497_v51 = vmul.f32 %v3309_v20, %v3083_v29  ;;  %s3341_s26 = sld [smem:[#allocation2 + $0x79]] }
  0x6b   : > { %v498_v44 = vmul.f32 %v3309_v20, %v3085_v30  ;;  %v447_v38 = vadd.f32 %v445_v63, %v441_v36  ;;  %v448_v39 = vadd.f32 %v446_v1, %v442_v9  ;;  %v3326_v28 = vstv %s3266_s15  ;;  %s3348_s27 = sld [smem:[#allocation2 + $0x20]] }
  0x6c   : > { %6375 = vst [vmem:[#allocation51_spill] sm:$0xff] %v3326_v28  ;;  %v3329_v57 = vstv %s3276_s17  ;;  %v493_v5 = vadd.f32 %v491_v0, %v487_v50  ;;  %v494_v62 = vadd.f32 %v492_v11, %v488_v27  ;;  %v503_v6 = vmul.f32 %v3326_v28, %v3127_v60  ;;  %s3352_s28 = sld [smem:[#allocation2 + $0x8d]] }
  0x6d   : > { %6376 = vst [vmem:[#allocation52_spill] sm:$0xff] %v3329_v57  ;;  %v504_v10 = vmul.f32 %v3326_v28, %v3162_v33  ;;  %v457_v63 = vmul.f32 %v3285_v49, %v3254_v4  ;;  %v509_v1 = vmul.f32 %v3329_v57, %v3164_v35  ;;  %v510_v50 = vmul.f32 %v3329_v57, %v3179_v52  ;;  %s3361_s29 = sld [smem:[#allocation2 + $0x2a]] }
  0x6e   : > { %v499_v8 = vadd.f32 %v497_v51, %v493_v5  ;;  %v500_v36 = vadd.f32 %v498_v44, %v494_v62  ;;  %v3346_v27 = vstv %s3292_s19  ;;  %v453_v11 = vadd.f32 %v451_v58, %v447_v38  ;;  %s3366_s30 = sld [smem:[#allocation2 + $0x34]] }
  0x6f   : > { %6377 = vst [vmem:[#allocation53_spill] sm:$0xff] %v3346_v27  ;;  %v454_v9 = vadd.f32 %v452_v61, %v448_v39  ;;  %v458_v0 = vmul.f32 %v3285_v49, %v3268_v37  ;;  %v3355_v28 = vstv %s3298_s20  ;;  %v515_v44 = vmul.f32 %v3346_v27, %v3181_v56  ;;  %s3372_s3 = sld [smem:[#allocation2 + $0x3e]] }
  0x70   : > { %6378 = vst [vmem:[#allocation54_spill] sm:$0xff] %v3355_v28  ;;  %v505_v20 = vadd.f32 %v503_v6, %v499_v8  ;;  %v506_v51 = vadd.f32 %v504_v10, %v500_v36  ;;  %v516_v5 = vmul.f32 %v3346_v27, %v3183_v12  ;;  %v3364_v61 = vstv %s3315_s22  ;;  %s3374_s5 = sld [smem:[#allocation2 + $0x83]] }
  0x71   : > { %6379 = vst [vmem:[#allocation55_spill] sm:$0xff] %v3364_v61  ;;  %v521_v39 = vmul.f32 %v3355_v28, %v3190_v13  ;;  %v522_v62 = vmul.f32 %v3355_v28, %v3197_v15  ;;  %v459_v6 = vadd.f32 %v457_v63, %v453_v11  ;;  %v460_v10 = vadd.f32 %v458_v0, %v454_v9  ;;  %s3381_s7 = sld [smem:[#allocation2 + $0x48]] }
  0x72   : > { %v511_v58 = vadd.f32 %v509_v1, %v505_v20  ;;  %v512_v38 = vadd.f32 %v510_v50, %v506_v51  ;;  %v3377_v8 = vstv %s3323_s24  ;;  %v527_v1 = vmul.f32 %v3364_v61, %v3237_v14  ;;  %s3389_s8 = sld [smem:[#allocation2 + $0x52]] }
  0x73   : > { %6380 = vst [vmem:[#allocation56_spill] sm:$0xff] %v3377_v8  ;;  %v3384_v50 = vstv %s3300_s21  ;;  %v3387_v51 = vstv %s3341_s26  ;;  %v528_v9 = vmul.f32 %v3364_v61, %v3252_v48  ;;  %s3393_s11 = sld [smem:[#allocation2 + $0x8e]]  ;;  %v3396_v0 = vstv %s3348_s27 }
  0x74   : > { %v517_v36 = vadd.f32 %v515_v44, %v511_v58  ;;  %v518_v20 = vadd.f32 %v516_v5, %v512_v38  ;;  %6381 = vst [vmem:[#allocation57_spill] sm:$0xff] %v3384_v50  ;;  %6382 = vst [vmem:[#allocation58_spill] sm:$0xff] %v3387_v51  ;;  %v3399_v44 = vstv %s3317_s23  ;;  %v463_v5 = vadd.f32 %v3377_v8, %v459_v6  ;;  %s3406_s14 = sld [smem:[#allocation2 + $0x8f]] }
  0x75   : > { %6383 = vst [vmem:[#allocation59_spill] sm:$0xff] %v3396_v0  ;;  %6384 = vst [vmem:[#allocation60_spill] sm:$0xff] %v3399_v44  ;;  %v464_v58 = vadd.f32 %v3377_v8, %v460_v10  ;;  %v3404_v38 = vstv %s3331_s25  ;;  %s3414_s15 = sld [smem:[#allocation2 + $0x5c]]  ;;  %v3417_v6 = vstv %s3352_s28  ;;  %v534_v10 = vmul.f32 %v3387_v51, %v3268_v37 }
  0x76   : > { %v523_v63 = vadd.f32 %v521_v39, %v517_v36  ;;  %v524_v11 = vadd.f32 %v522_v62, %v518_v20  ;;  %6385 = vst [vmem:[#allocation61_spill] sm:$0xff] %v3404_v38  ;;  %v533_v62 = vmul.f32 %v3387_v51, %v3254_v4  ;;  %v557_v36 = vmul.f32 %v3396_v0, %v2996_v45  ;;  %s3427_s17 = sld [smem:[#allocation2 + $0x66]] }
  0x77   : > { %v558_v20 = vmul.f32 %v3396_v0, %v2998_v46  ;;  %6386 = vst [vmem:[#allocation62_spill] sm:$0xff] %v3417_v6  ;;  %v3422_v8 = vstv %s3361_s29  ;;  %v3434_v0 = vstv %s3372_s3  ;;  %s3436_s19 = sld [smem:[#allocation2 + $0x70]]  ;;  %v465_v51 = vmax.f32 %v463_v5, 0.0 }
  0x78   : > { %v529_v39 = vadd.f32 %v527_v1, %v523_v63  ;;  %6387 = vst [vmem:[#allocation63_spill] sm:$0xff] %v3422_v8  ;;  %v3425_v1 = vstv %s3366_s30  ;;  %v530_v63 = vadd.f32 %v528_v9, %v524_v11  ;;  %v561_v61 = vmul.f32 %v3422_v8, %v3064_v17  ;;  %6389 = vst [vmem:[#allocation65_spill] sm:$0xff] %v3434_v0  ;;  %s3445_s20 = sld [smem:[#allocation2 + $0x7a]] }
  0x79   : > { %6388 = vst [vmem:[#allocation64_spill] sm:$0xff] %v3425_v1  ;;  %v562_v28 = vmul.f32 %v3422_v8, %v3066_v18  ;;  %v466_v27 = vmax.f32 %v464_v58, 0.0  ;;  %v567_v49 = vmul.f32 %v3425_v1, %v3073_v23  ;;  %v568_v11 = vmul.f32 %v3425_v1, %v3075_v24  ;;  %s3457_s21 = sld [smem:[#allocation2 + $0x21]] }
  0x7a   : > { %v535_v9 = vadd.f32 %v533_v62, %v529_v39  ;;  %v563_v57 = vadd.f32 %v561_v61, %v557_v36  ;;  %v3443_v43 = vstv %s3381_s7  ;;  %v3448_v8 = vstv %s3374_s5  ;;  %s3462_s22 = sld [smem:[#allocation2 + $0x2b]] }
  0x7b   : > { %v564_v41 = vadd.f32 %v562_v28, %v558_v20  ;;  %6390 = vst [vmem:[#allocation66_spill] sm:$0xff] %v3443_v43  ;;  %6391 = vst [vmem:[#allocation67_spill] sm:$0xff] %v3448_v8  ;;  %v573_v7 = vmul.f32 %v3434_v0, %v3083_v29  ;;  %v574_v5 = vmul.f32 %v3434_v0, %v3085_v30  ;;  %v3455_v58 = vstv %s3389_s8  ;;  %s3474_s23 = sld [smem:[#allocation2 + $0x35]] }
  0x7c   : > { %6392 = vst [vmem:[#allocation68_spill] sm:$0xff] %v3455_v58  ;;  %v536_v39 = vadd.f32 %v534_v10, %v530_v63  ;;  %v3460_v61 = vstv %s3393_s11  ;;  %v569_v28 = vadd.f32 %v567_v49, %v563_v57  ;;  %v3465_v36 = vmul.f32 %v3404_v38, %v465_v51  ;;  %s3487_s24 = sld [smem:[#allocation2 + $0x3f]] }
  0x7d   : > { %6393 = vst [vmem:[#allocation69_spill] sm:$0xff] %v3460_v61  ;;  %v570_v62 = vadd.f32 %v568_v11, %v564_v41  ;;  %v3468_v20 = vmul.f32 %v3404_v38, %v466_v27  ;;  %v579_v0 = vmul.f32 %v3443_v43, %v3127_v60  ;;  %v580_v10 = vmul.f32 %v3443_v43, %v3162_v33  ;;  %s3506_s25 = sld [smem:[#allocation2 + $0x49]] }
  0x7e   : > { %v3477_v41 = vmul.f32 %v3417_v6, %v465_v51  ;;  %v3480_v49 = vadd.f32 %v3448_v8, %v535_v9  ;;  %v585_v57 = vmul.f32 %v3455_v58, %v3164_v35  ;;  %v3485_v63 = vstv %s3414_s15  ;;  %s3512_s26 = sld [smem:[#allocation2 + $0x53]] }
  0x7f   : > { %6394 = vst [vmem:[#allocation70_spill] sm:$0xff] %v3485_v63  ;;  %v575_v11 = vadd.f32 %v573_v7, %v569_v28  ;;  %v576_v38 = vadd.f32 %v574_v5, %v570_v62  ;;  %v586_v43 = vmul.f32 %v3455_v58, %v3179_v52  ;;  %v3492_v1 = vstv %s3427_s17  ;;  %s3526_s27 = sld [smem:[#allocation2 + $0x84]] }
  0x80   : > { %6395 = vst [vmem:[#allocation71_spill] sm:$0xff] %v3492_v1  ;;  %v3495_v51 = vmul.f32 %v3417_v6, %v466_v27  ;;  %v3498_v9 = vadd.f32 %v3448_v8, %v536_v39  ;;  %v3501_v34 = vstv %s3406_s14  ;;  %v3504_v21 = vstv %s3436_s19  ;;  %s3538_s28 = sld [smem:[#allocation2 + $0x5d]] }
  0x81   : > { %6396 = vst [vmem:[#allocation72_spill] sm:$0xff] %v3501_v34  ;;  %6397 = vst [vmem:[#allocation73_spill] sm:$0xff] %v3504_v21  ;;  %v581_v7 = vadd.f32 %v579_v0, %v575_v11  ;;  %v582_v5 = vadd.f32 %v580_v10, %v576_v38  ;;  %v591_v28 = vmul.f32 %v3485_v63, %v3181_v56  ;;  %v3520_v0 = vstv %s3445_s20  ;;  %s3544_s29 = sld [smem:[#allocation2 + $0x67]] }
  0x82   : > { %v592_v27 = vmul.f32 %v3485_v63, %v3183_v12  ;;  %v597_v62 = vmul.f32 %v3492_v1, %v3190_v13  ;;  %v598_v8 = vmul.f32 %v3492_v1, %v3197_v15  ;;  %6398 = vst [vmem:[#allocation74_spill] sm:$0xff] %v3520_v0  ;;  %v603_v11 = vmul.f32 %v3504_v21, %v3237_v14  ;;  %s3560_s30 = sld [smem:[#allocation2 + $0x71]] }
  0x83   : > { %v587_v38 = vadd.f32 %v585_v57, %v581_v7  ;;  %v588_v10 = vadd.f32 %v586_v43, %v582_v5  ;;  %v604_v6 = vmul.f32 %v3504_v21, %v3252_v48  ;;  %v609_v39 = vmul.f32 %v3520_v0, %v3254_v4  ;;  %s3566_s3 = sld [smem:[#allocation2 + $0x90]] }
  0x84   : > { %v610_v1 = vmul.f32 %v3520_v0, %v3268_v37  ;;  %v3533_v63 = vstv %s3457_s21  ;;  %v3536_v57 = vstv %s3462_s22  ;;  %v3551_v59 = vstv %s3474_s23  ;;  %s3578_s5 = sld [smem:[#allocation2 + $0x7b]] }
  0x85   : > { %6399 = vst [vmem:[#allocation75_spill] sm:$0xff] %v3533_v63  ;;  %6400 = vst [vmem:[#allocation76_spill] sm:$0xff] %v3536_v57  ;;  %v593_v43 = vadd.f32 %v591_v28, %v587_v38  ;;  %v594_v7 = vadd.f32 %v592_v27, %v588_v10  ;;  %v633_v5 = vmul.f32 %v3533_v63, %v2996_v45  ;;  %v3554_v28 = vstv %s3487_s24  ;;  %s3586_s7 = sld [smem:[#allocation2 + $0x22]] }
  0x86   : > { %v634_v21 = vmul.f32 %v3533_v63, %v2998_v46  ;;  %v637_v58 = vmul.f32 %v3536_v57, %v3064_v17  ;;  %v638_v0 = vmul.f32 %v3536_v57, %v3066_v18  ;;  %6401 = vst [vmem:[#allocation77_spill] sm:$0xff] %v3551_v59  ;;  %6402 = vst [vmem:[#allocation78_spill] sm:$0xff] %v3554_v28  ;;  %s3593_s8 = sld [smem:[#allocation2 + $0x2c]] }
  0x87   : > { %v599_v27 = vadd.f32 %v597_v62, %v593_v43  ;;  %v600_v38 = vadd.f32 %v598_v8, %v594_v7  ;;  %v643_v10 = vmul.f32 %v3551_v59, %v3073_v23  ;;  %v644_v63 = vmul.f32 %v3551_v59, %v3075_v24  ;;  %s3602_s11 = sld [smem:[#allocation2 + $0x36]] }
  0x88   : > { %v639_v3 = vadd.f32 %v637_v58, %v633_v5  ;;  %v640_v2 = vadd.f32 %v638_v0, %v634_v21  ;;  %v649_v57 = vmul.f32 %v3554_v28, %v3083_v29  ;;  %v650_v55 = vmul.f32 %v3554_v28, %v3085_v30  ;;  %s3618_s14 = sld [smem:[#allocation2 + $0x40]] }
  0x89   : > { %v605_v54 = vadd.f32 %v603_v11, %v599_v27  ;;  %v606_v62 = vadd.f32 %v604_v6, %v600_v38  ;;  %v3569_v8 = vstv %s3506_s25  ;;  %v3572_v43 = vstv %s3512_s26  ;;  %s3624_s15 = sld [smem:[#allocation2 + $0x4a]] }
  0x8a   : > { %6403 = vst [vmem:[#allocation79_spill] sm:$0xff] %v3569_v8  ;;  %6404 = vst [vmem:[#allocation80_spill] sm:$0xff] %v3572_v43  ;;  %v645_v7 = vadd.f32 %v643_v10, %v639_v3  ;;  %v646_v59 = vadd.f32 %v644_v63, %v640_v2  ;;  %v655_v21 = vmul.f32 %v3569_v8, %v3127_v60  ;;  %v542_v6 = vmax.f32 %v3498_v9, 0.0  ;;  %s3640_s17 = sld [smem:[#allocation2 + $0x91]] }
  0x8b   : > { %v656_v58 = vmul.f32 %v3569_v8, %v3162_v33  ;;  %v611_v0 = vadd.f32 %v609_v39, %v605_v54  ;;  %v3582_v11 = vstv %s3526_s27  ;;  %v661_v5 = vmul.f32 %v3572_v43, %v3164_v35  ;;  %s3645_s19 = sld [smem:[#allocation2 + $0x85]] }
  0x8c   : > { %6405 = vst [vmem:[#allocation81_spill] sm:$0xff] %v3582_v11  ;;  %v651_v2 = vadd.f32 %v649_v57, %v645_v7  ;;  %v652_v3 = vadd.f32 %v650_v55, %v646_v59  ;;  %v662_v63 = vmul.f32 %v3572_v43, %v3179_v52  ;;  %v3591_v27 = vstv %s3538_s28  ;;  %s3657_s20 = sld [smem:[#allocation2 + $0x54]] }
  0x8d   : > { %6406 = vst [vmem:[#allocation82_spill] sm:$0xff] %v3591_v27  ;;  %v471_v54 = vadd.f32 %v3465_v36, %v3384_v50  ;;  %v472_v9 = vadd.f32 %v3468_v20, %v3384_v50  ;;  %v612_v39 = vadd.f32 %v610_v1, %v606_v62  ;;  %v3600_v38 = vstv %s3544_s29  ;;  %s3662_s21 = sld [smem:[#allocation2 + $0x5e]] }
  0x8e   : > { %6407 = vst [vmem:[#allocation83_spill] sm:$0xff] %v3600_v38  ;;  %v657_v55 = vadd.f32 %v655_v21, %v651_v2  ;;  %v658_v59 = vadd.f32 %v656_v58, %v652_v3  ;;  %v667_v57 = vmul.f32 %v3591_v27, %v3181_v56  ;;  %v668_v10 = vmul.f32 %v3591_v27, %v3183_v12  ;;  %s3676_s22 = sld [smem:[#allocation2 + $0x92]] }
  0x8f   : > { %v6408_v7 = vmax.f32 %v3480_v49, 0.0  ;;  %v546_v43 = vmul.f32 %v3460_v61, %v542_v6  ;;  %v3613_v1 = vadd.f32 %v3582_v11, %v611_v0  ;;  %v3616_v20 = vstv %s3560_s30  ;;  %s3682_s23 = sld [smem:[#allocation2 + $0x93]] }
  0x90   : > { %6409 = vst [vmem:[#allocation84_spill] sm:$0xff] %v3616_v20  ;;  %v663_v62 = vadd.f32 %v661_v5, %v657_v55  ;;  %v664_v21 = vadd.f32 %v662_v63, %v658_v59  ;;  %v673_v58 = vmul.f32 %v3600_v38, %v3190_v13  ;;  %v674_v2 = vmul.f32 %v3600_v38, %v3197_v15  ;;  %s3700_s24 = sld [smem:[#allocation2 + $0x68]] }
  0x91   : > { %v545_v36 = vmul.f32 %v3460_v61, %v6408_v7  ;;  %v3628_v0 = vadd.f32 %v3477_v41, %v3399_v44  ;;  %v3632_v3 = vadd.f32 %v3495_v51, %v3399_v44  ;;  %v6410_v5 = vmov %v6408_v7  ;;  %s3706_s25 = sld [smem:[#allocation2 + $0x72]] }
  0x92   : > { %v551_v63 = vmul.f32 %v3501_v34, %v6410_v5  ;;  %v3638_v55 = vadd.f32 %v3582_v11, %v612_v39  ;;  %v552_v59 = vmul.f32 %v3501_v34, %v542_v6  ;;  %v669_v7 = vadd.f32 %v667_v57, %v663_v62  ;;  %s3716_s26 = sld [smem:[#allocation2 + $0x7c]] }
  0x93   : > { %v670_v41 = vadd.f32 %v668_v10, %v664_v21  ;;  %v679_v51 = vmul.f32 %v3616_v20, %v3237_v14  ;;  %v3647_v49 = vadd.f32 %v545_v36, %v471_v54  ;;  %v3649_v5 = vadd.f32 %v546_v43, %v472_v9  ;;  %s3723_s27 = sld [smem:[#allocation2 + $0x23]] }
  0x94   : > { %v3652_v39 = vstv %s3566_s3  ;;  %v3655_v11 = vstv %s3578_s5  ;;  %v617_v6 = vmax.f32 %v3613_v1, 0.0  ;;  %v675_v57 = vadd.f32 %v673_v58, %v669_v7  ;;  %s3730_s28 = sld [smem:[#allocation2 + $0x2d]] }
  0x95   : > { %6411 = vst [vmem:[#allocation85_spill] sm:$0xff] %v3652_v39  ;;  %6412 = vst [vmem:[#allocation86_spill] sm:$0xff] %v3655_v11  ;;  %v676_v10 = vadd.f32 %v674_v2, %v670_v41  ;;  %v680_v62 = vmul.f32 %v3616_v20, %v3252_v48  ;;  %v618_v54 = vmax.f32 %v3638_v55, 0.0  ;;  %v3666_v43 = vstv %s3586_s7  ;;  %s3736_s29 = sld [smem:[#allocation2 + $0x37]] }
  0x96   : > { %6413 = vst [vmem:[#allocation87_spill] sm:$0xff] %v3666_v43  ;;  %v3669_v9 = vstv %s3593_s8  ;;  %v3672_v36 = vstv %s3602_s11  ;;  %v681_v21 = vadd.f32 %v679_v51, %v675_v57  ;;  %v685_v1 = vmul.f32 %v3655_v11, %v3254_v4  ;;  %s3746_s30 = sld [smem:[#allocation2 + $0x41]] }
  0x97   : > { %6414 = vst [vmem:[#allocation88_spill] sm:$0xff] %v3669_v9  ;;  %6415 = vst [vmem:[#allocation89_spill] sm:$0xff] %v3672_v36  ;;  %v709_v58 = vmul.f32 %v3666_v43, %v2996_v45  ;;  %v710_v2 = vmul.f32 %v3666_v43, %v2998_v46  ;;  %v713_v55 = vmul.f32 %v3669_v9, %v3064_v17  ;;  %v3695_v38 = vstv %s3618_s14  ;;  %s3762_s3 = sld [smem:[#allocation2 + $0x4b]] }
  0x98   : > { %v714_v7 = vmul.f32 %v3669_v9, %v3066_v18  ;;  %v719_v41 = vmul.f32 %v3672_v36, %v3073_v23  ;;  %v720_v51 = vmul.f32 %v3672_v36, %v3075_v24  ;;  %v682_v57 = vadd.f32 %v680_v62, %v676_v10  ;;  %6416 = vst [vmem:[#allocation90_spill] sm:$0xff] %v3695_v38  ;;  %s3770_s5 = sld [smem:[#allocation2 + $0x55]] }
  0x99   : > { %v686_v20 = vmul.f32 %v3655_v11, %v3268_v37  ;;  %v3698_v43 = vstv %s3624_s15  ;;  %v715_v34 = vadd.f32 %v713_v55, %v709_v58  ;;  %v725_v9 = vmul.f32 %v3695_v38, %v3083_v29  ;;  %s3794_s7 = sld [smem:[#allocation2 + $0x5f]] }
  0x9a   : > { %6417 = vst [vmem:[#allocation91_spill] sm:$0xff] %v3698_v43  ;;  %v716_v61 = vadd.f32 %v714_v7, %v710_v2  ;;  %v726_v36 = vmul.f32 %v3695_v38, %v3085_v30  ;;  %v3709_v10 = vstv %s3640_s17  ;;  %v687_v62 = vadd.f32 %v685_v1, %v681_v21  ;;  %s3801_s8 = sld [smem:[#allocation2 + $0x86]] }
  0x9b   : > { %6418 = vst [vmem:[#allocation92_spill] sm:$0xff] %v3709_v10  ;;  %v3712_v11 = vstv %s3645_s19  ;;  %v731_v27 = vmul.f32 %v3698_v43, %v3127_v60  ;;  %v721_v58 = vadd.f32 %v719_v41, %v715_v34  ;;  %v732_v55 = vmul.f32 %v3698_v43, %v3162_v33  ;;  %s3807_s11 = sld [smem:[#allocation2 + $0x94]] }
  0x9c   : > { %6419 = vst [vmem:[#allocation93_spill] sm:$0xff] %v3712_v11  ;;  %v722_v2 = vadd.f32 %v720_v51, %v716_v61  ;;  %v3721_v7 = vstv %s3657_s20  ;;  %v621_v38 = vmul.f32 %v3652_v39, %v617_v6  ;;  %v622_v21 = vmul.f32 %v3652_v39, %v618_v54  ;;  %s3823_s14 = sld [smem:[#allocation2 + $0x69]] }
  0x9d   : > { %6420 = vst [vmem:[#allocation94_spill] sm:$0xff] %v3721_v7  ;;  %v688_v1 = vadd.f32 %v686_v20, %v682_v57  ;;  %v3728_v8 = vstv %s3662_s21  ;;  %v727_v44 = vadd.f32 %v725_v9, %v721_v58  ;;  %v737_v34 = vmul.f32 %v3721_v7, %v3164_v35  ;;  %s3825_s15 = sld [smem:[#allocation2 + $0x95]] }
  0x9e   : > { %6421 = vst [vmem:[#allocation95_spill] sm:$0xff] %v3728_v8  ;;  %v728_v50 = vadd.f32 %v726_v36, %v722_v2  ;;  %v738_v61 = vmul.f32 %v3721_v7, %v3179_v52  ;;  %v553_v41 = vadd.f32 %v551_v63, %v3628_v0  ;;  %v3740_v51 = vadd.f32 %v552_v59, %v3632_v3  ;;  %s3840_s17 = sld [smem:[#allocation2 + $0x73]] }
  0x9f   : > { %v627_v20 = vmul.f32 %v3709_v10, %v617_v6  ;;  %v3744_v9 = vadd.f32 %v3712_v11, %v687_v62  ;;  %v733_v36 = vadd.f32 %v731_v27, %v727_v44  ;;  %v743_v58 = vmul.f32 %v3728_v8, %v3181_v56  ;;  %s3846_s19 = sld [smem:[#allocation2 + $0x7d]] }
  0xa0   : > { %v734_v57 = vadd.f32 %v732_v55, %v728_v50  ;;  %v744_v0 = vmul.f32 %v3728_v8, %v3183_v12  ;;  %v3753_v3 = vadd.f32 %v621_v38, %v3647_v49  ;;  %v628_v63 = vmul.f32 %v3709_v10, %v618_v54  ;;  %s3852_s20 = sld [smem:[#allocation2 + $0x24]] }
  0xa1   : > { %v3757_v59 = vadd.f32 %v3712_v11, %v688_v1  ;;  %v3760_v6 = vstv %s3700_s24  ;;  %v3765_v50 = vadd.f32 %v622_v21, %v3649_v5  ;;  %v739_v44 = vadd.f32 %v737_v34, %v733_v36  ;;  %s3859_s21 = sld [smem:[#allocation2 + $0x2e]] }
  0xa2   : > { %6422 = vst [vmem:[#allocation96_spill] sm:$0xff] %v3760_v6  ;;  %v740_v27 = vadd.f32 %v738_v61, %v734_v57  ;;  %v3768_v62 = vstv %s3706_s25  ;;  %v3772_v38 = vadd.f32 %v627_v20, %v553_v41  ;;  %v693_v49 = vmax.f32 %v3744_v9, 0.0  ;;  %s3882_s24 = sld [smem:[#allocation2 + $0x4c]] }
  0xa3   : > { %6423 = vst [vmem:[#allocation97_spill] sm:$0xff] %v3768_v62  ;;  %v3776_v54 = vstv %s3676_s22  ;;  %v3779_v2 = vstv %s3682_s23  ;;  %v745_v55 = vadd.f32 %v743_v58, %v739_v44  ;;  %v749_v5 = vmul.f32 %v3760_v6, %v3190_v13  ;;  %s3865_s22 = sld [smem:[#allocation2 + $0x38]] }
  0xa4   : > { %6424 = vst [vmem:[#allocation98_spill] sm:$0xff] %v3776_v54  ;;  %6425 = vst [vmem:[#allocation99_spill] sm:$0xff] %v3779_v2  ;;  %v746_v1 = vadd.f32 %v744_v0, %v740_v27  ;;  %v750_v21 = vmul.f32 %v3760_v6, %v3197_v15  ;;  %v694_v34 = vmax.f32 %v3757_v59, 0.0  ;;  %v755_v61 = vmul.f32 %v3768_v62, %v3237_v14  ;;  %s3874_s23 = sld [smem:[#allocation2 + $0x42]] }
  0xa5   : > { %v3789_v41 = vstv %s3723_s27  ;;  %v3792_v20 = vstv %s3730_s28  ;;  %v756_v9 = vmul.f32 %v3768_v62, %v3252_v48  ;;  %v3799_v36 = vstv %s3716_s26  ;;  %s3907_s25 = sld [smem:[#allocation2 + $0x56]] }
  0xa6   : > { %6426 = vst [vmem:[#allocation100_spill] sm:$0xff] %v3789_v41  ;;  %6427 = vst [vmem:[#allocation101_spill] sm:$0xff] %v3792_v20  ;;  %v785_v57 = vmul.f32 %v3789_v41, %v2996_v45  ;;  %v786_v58 = vmul.f32 %v3789_v41, %v2998_v46  ;;  %v789_v0 = vmul.f32 %v3792_v20, %v3064_v17  ;;  %v3814_v44 = vstv %s3736_s29  ;;  %s3919_s26 = sld [smem:[#allocation2 + $0x60]] }
  0xa7   : > { %6428 = vst [vmem:[#allocation102_spill] sm:$0xff] %v3799_v36  ;;  %v790_v59 = vmul.f32 %v3792_v20, %v3066_v18  ;;  %6429 = vst [vmem:[#allocation103_spill] sm:$0xff] %v3814_v44  ;;  %v3817_v27 = vstv %s3746_s30  ;;  %v751_v11 = vadd.f32 %v749_v5, %v745_v55  ;;  %v752_v10 = vadd.f32 %v750_v21, %v746_v1  ;;  %s3921_s27 = sld [smem:[#allocation2 + $0x87]] }
  0xa8   : > { %6430 = vst [vmem:[#allocation104_spill] sm:$0xff] %v3817_v27  ;;  %v795_v62 = vmul.f32 %v3814_v44, %v3073_v23  ;;  %v796_v39 = vmul.f32 %v3814_v44, %v3075_v24  ;;  %v791_v6 = vadd.f32 %v789_v0, %v785_v57  ;;  %v801_v20 = vmul.f32 %v3817_v27, %v3083_v29  ;;  %s3933_s28 = sld [smem:[#allocation2 + $0x96]] }
  0xa9   : > { %v792_v41 = vadd.f32 %v790_v59, %v786_v58  ;;  %v802_v8 = vmul.f32 %v3817_v27, %v3085_v30  ;;  %v697_v55 = vmul.f32 %v3776_v54, %v693_v49  ;;  %v761_v1 = vmul.f32 %v3799_v36, %v3254_v4  ;;  %s3946_s29 = sld [smem:[#allocation2 + $0x6a]] }
  0xaa   : > { %v3835_v5 = vstv %s3762_s3  ;;  %v3838_v21 = vstv %s3770_s5  ;;  %v797_v57 = vadd.f32 %v795_v62, %v791_v6  ;;  %v757_v27 = vadd.f32 %v755_v61, %v751_v11  ;;  %s3951_s30 = sld [smem:[#allocation2 + $0x74]] }
  0xab   : > { %6431 = vst [vmem:[#allocation105_spill] sm:$0xff] %v3835_v5  ;;  %6432 = vst [vmem:[#allocation106_spill] sm:$0xff] %v3838_v21  ;;  %v798_v58 = vadd.f32 %v796_v39, %v792_v41  ;;  %v807_v0 = vmul.f32 %v3835_v5, %v3127_v60  ;;  %v808_v59 = vmul.f32 %v3835_v5, %v3162_v33  ;;  %v3857_v41 = vstv %s3794_s7  ;;  %s3961_s3 = sld [smem:[#allocation2 + $0x25]] }
  0xac   : > { %v758_v44 = vadd.f32 %v756_v9, %v752_v10  ;;  %v762_v7 = vmul.f32 %v3799_v36, %v3268_v37  ;;  %v813_v43 = vmul.f32 %v3838_v21, %v3164_v35  ;;  %v803_v6 = vadd.f32 %v801_v20, %v797_v57  ;;  %6433 = vst [vmem:[#allocation107_spill] sm:$0xff] %v3857_v41  ;;  %s3963_s5 = sld [smem:[#allocation2 + $0x2f]] }
  0xad   : > { %v804_v39 = vadd.f32 %v802_v8, %v798_v58  ;;  %v814_v62 = vmul.f32 %v3838_v21, %v3179_v52  ;;  %v630_v11 = vadd.f32 %v628_v63, %v3740_v51  ;;  %v698_v10 = vmul.f32 %v3776_v54, %v694_v34  ;;  %s3973_s7 = sld [smem:[#allocation2 + $0x39]] }
  0xae   : > { %v703_v61 = vmul.f32 %v3779_v2, %v693_v49  ;;  %v704_v9 = vmul.f32 %v3779_v2, %v694_v34  ;;  %v809_v20 = vadd.f32 %v807_v0, %v803_v6  ;;  %v819_v57 = vmul.f32 %v3857_v41, %v3181_v56 }
  0xaf   : > { %v810_v8 = vadd.f32 %v808_v59, %v804_v39  ;;  %v820_v58 = vmul.f32 %v3857_v41, %v3183_v12  ;;  %v763_v36 = vadd.f32 %v761_v1, %v757_v27  ;;  %v764_v21 = vadd.f32 %v762_v7, %v758_v44  ;;  %v6537_v41 = vld [vmem:[#allocation65_spill] sm:$0xff] }
  0xb0   : > { %v3872_v51 = vstv %s3823_s14  ;;  %v3877_v63 = vadd.f32 %v697_v55, %v3753_v3  ;;  %v3880_v49 = vstv %s3801_s8  ;;  %v815_v34 = vadd.f32 %v813_v43, %v809_v20  ;;  %s3979_s8 = sld [smem:[#allocation2 + $0x43]] }
  0xb1   : > { %6434 = vst [vmem:[#allocation108_spill] sm:$0xff] %v3872_v51  ;;  %6435 = vst [vmem:[#allocation109_spill] sm:$0xff] %v3880_v49  ;;  %v816_v0 = vadd.f32 %v814_v62, %v810_v8  ;;  %v3885_v59 = vadd.f32 %v698_v10, %v3765_v50  ;;  %v3888_v7 = vadd.f32 %v703_v61, %v3772_v38  ;;  %v3893_v27 = vstv %s3840_s17  ;;  %s4005_s14 = sld [smem:[#allocation2 + $0x4d]] }
  0xb2   : > { %v3890_v44 = vadd.f32 %v704_v9, %v630_v11  ;;  %6436 = vst [vmem:[#allocation110_spill] sm:$0xff] %v3893_v27  ;;  %v821_v3 = vadd.f32 %v819_v57, %v815_v34  ;;  %v825_v43 = vmul.f32 %v3872_v51, %v3190_v13  ;;  %v826_v1 = vmul.f32 %v3872_v51, %v3197_v15  ;;  %s4031_s17 = sld [smem:[#allocation2 + $0x61]] }
  0xb3   : > { %v822_v55 = vadd.f32 %v820_v58, %v816_v0  ;;  %v767_v50 = vadd.f32 %v3880_v49, %v763_v36  ;;  %v768_v6 = vadd.f32 %v3880_v49, %v764_v21  ;;  %v3902_v38 = vstv %s3807_s11  ;;  %s3987_s11 = sld [smem:[#allocation2 + $0x7e]] }
  0xb4   : > { %6437 = vst [vmem:[#allocation111_spill] sm:$0xff] %v3902_v38  ;;  %v3905_v39 = vstv %s3825_s15  ;;  %v831_v62 = vmul.f32 %v3893_v27, %v3237_v14  ;;  %v832_v11 = vmul.f32 %v3893_v27, %v3252_v48  ;;  %v3914_v10 = vstv %s3846_s19  ;;  %s4013_s15 = sld [smem:[#allocation2 + $0x57]] }
  0xb5   : > { %6438 = vst [vmem:[#allocation112_spill] sm:$0xff] %v3905_v39  ;;  %6439 = vst [vmem:[#allocation113_spill] sm:$0xff] %v3914_v10  ;;  %v3917_v61 = vstv %s3852_s20  ;;  %v3928_v9 = vstv %s3859_s21  ;;  %v3931_v20 = vstv %s3865_s22  ;;  %v827_v8 = vadd.f32 %v825_v43, %v821_v3  ;;  %s4033_s19 = sld [smem:[#allocation2 + $0x97]] }
  0xb6   : > { %6440 = vst [vmem:[#allocation114_spill] sm:$0xff] %v3917_v61  ;;  %v861_v36 = vmul.f32 %v3917_v61, %v2996_v45  ;;  %v862_v21 = vmul.f32 %v3917_v61, %v2998_v46  ;;  %6441 = vst [vmem:[#allocation115_spill] sm:$0xff] %v3928_v9  ;;  %v828_v57 = vadd.f32 %v826_v1, %v822_v55  ;;  %v769_v0 = vmax.f32 %v767_v50, 0.0  ;;  %s4056_s20 = sld [smem:[#allocation2 + $0x6b]] }
  0xb7   : > { %6442 = vst [vmem:[#allocation116_spill] sm:$0xff] %v3931_v20  ;;  %v865_v58 = vmul.f32 %v3928_v9, %v3064_v17  ;;  %v866_v34 = vmul.f32 %v3928_v9, %v3066_v18  ;;  %v871_v49 = vmul.f32 %v3931_v20, %v3073_v23  ;;  %v872_v2 = vmul.f32 %v3931_v20, %v3075_v24  ;;  %s4058_s21 = sld [smem:[#allocation2 + $0x88]] }
  0xb8   : > { %v3944_v54 = vstv %s3874_s23  ;;  %v770_v3 = vmax.f32 %v768_v6, 0.0  ;;  %v3949_v1 = vstv %s3882_s24  ;;  %v837_v50 = vmul.f32 %v3914_v10, %v3254_v4  ;;  %s4072_s22 = sld [smem:[#allocation2 + $0x75]] }
  0xb9   : > { %6443 = vst [vmem:[#allocation117_spill] sm:$0xff] %v3944_v54  ;;  %v867_v55 = vadd.f32 %v865_v58, %v861_v36  ;;  %v868_v43 = vadd.f32 %v866_v34, %v862_v21  ;;  %6444 = vst [vmem:[#allocation118_spill] sm:$0xff] %v3949_v1  ;;  %v838_v27 = vmul.f32 %v3914_v10, %v3268_v37  ;;  %v3971_v51 = vstv %s3907_s25  ;;  %s4086_s23 = sld [smem:[#allocation2 + $0x7f]] }
  0xba   : > { %v877_v20 = vmul.f32 %v3944_v54, %v3083_v29  ;;  %v878_v6 = vmul.f32 %v3944_v54, %v3085_v30  ;;  %v833_v36 = vadd.f32 %v831_v62, %v827_v8  ;;  %v834_v21 = vadd.f32 %v832_v11, %v828_v57  ;;  %6445 = vst [vmem:[#allocation119_spill] sm:$0xff] %v3971_v51  ;;  %s4092_s24 = sld [smem:[#allocation2 + $0x26]] }
  0xbb   : > { %v873_v58 = vadd.f32 %v871_v49, %v867_v55  ;;  %v874_v34 = vadd.f32 %v872_v2, %v868_v43  ;;  %v773_v9 = vmul.f32 %v3902_v38, %v769_v0  ;;  %v883_v10 = vmul.f32 %v3949_v1, %v3127_v60  ;;  %s4099_s25 = sld [smem:[#allocation2 + $0x30]] }
  0xbc   : > { %v884_v61 = vmul.f32 %v3949_v1, %v3162_v33  ;;  %v774_v62 = vmul.f32 %v3902_v38, %v770_v3  ;;  %v3977_v2 = vstv %s3919_s26  ;;  %v779_v8 = vmul.f32 %v3905_v39, %v769_v0  ;;  %s4105_s26 = sld [smem:[#allocation2 + $0x3a]] }
  0xbd   : > { %v879_v11 = vadd.f32 %v877_v20, %v873_v58  ;;  %v880_v49 = vadd.f32 %v878_v6, %v874_v34  ;;  %6446 = vst [vmem:[#allocation120_spill] sm:$0xff] %v3977_v2  ;;  %v780_v57 = vmul.f32 %v3905_v39, %v770_v3  ;;  %v889_v55 = vmul.f32 %v3971_v51, %v3164_v35 }
  0xbe   : > { %v890_v43 = vmul.f32 %v3971_v51, %v3179_v52  ;;  %v839_v38 = vadd.f32 %v837_v50, %v833_v36  ;;  %v840_v20 = vadd.f32 %v838_v27, %v834_v21  ;;  %v3990_v6 = vstv %s3921_s27  ;;  %s4115_s27 = sld [smem:[#allocation2 + $0x44]] }
  0xbf   : > { %6447 = vst [vmem:[#allocation121_spill] sm:$0xff] %v3990_v6  ;;  %v885_v58 = vadd.f32 %v883_v10, %v879_v11  ;;  %v886_v34 = vadd.f32 %v884_v61, %v880_v49  ;;  %v895_v0 = vmul.f32 %v3977_v2, %v3181_v56  ;;  %v896_v3 = vmul.f32 %v3977_v2, %v3183_v12 }
  0xc0   : > { %v3997_v39 = vadd.f32 %v773_v9, %v3877_v63  ;;  %v4000_v51 = vadd.f32 %v774_v62, %v3885_v59  ;;  %v4003_v50 = vstv %s3946_s29  ;;  %v4008_v27 = vadd.f32 %v779_v8, %v3888_v7  ;;  %s4129_s29 = sld [smem:[#allocation2 + $0x98]] }
  0xc1   : > { %6448 = vst [vmem:[#allocation122_spill] sm:$0xff] %v4003_v50  ;;  %v4011_v10 = vadd.f32 %v780_v57, %v3890_v44  ;;  %v891_v61 = vadd.f32 %v889_v55, %v885_v58  ;;  %v892_v63 = vadd.f32 %v890_v43, %v886_v34  ;;  %v4016_v59 = vadd.f32 %v3990_v6, %v839_v38 }
  0xc2   : > { %v4019_v9 = vadd.f32 %v3990_v6, %v840_v20  ;;  %v4022_v36 = vstv %s3933_s28  ;;  %v4025_v7 = vstv %s3951_s30  ;;  %v901_v62 = vmul.f32 %v4003_v50, %v3190_v13  ;;  %s4127_s28 = sld [smem:[#allocation2 + $0x4e]] }
  0xc3   : > { %6449 = vst [vmem:[#allocation123_spill] sm:$0xff] %v4022_v36  ;;  %6450 = vst [vmem:[#allocation124_spill] sm:$0xff] %v4025_v7  ;;  %v897_v21 = vadd.f32 %v895_v0, %v891_v61  ;;  %v898_v44 = vadd.f32 %v896_v3, %v892_v63  ;;  %v902_v11 = vmul.f32 %v4003_v50, %v3197_v15  ;;  %v4036_v38 = vstv %s3961_s3  ;;  %s4143_s30 = sld [smem:[#allocation2 + $0x89]] }
  0xc4   : > { %6451 = vst [vmem:[#allocation125_spill] sm:$0xff] %v4036_v38  ;;  %v4039_v49 = vstv %s3963_s5  ;;  %v4042_v8 = vstv %s3973_s7  ;;  %v4045_v57 = vstv %s3979_s8  ;;  %v907_v55 = vmul.f32 %v4025_v7, %v3237_v14  ;;  %s4150_s3 = sld [smem:[#allocation2 + $0x58]] }
  0xc5   : > { %6452 = vst [vmem:[#allocation126_spill] sm:$0xff] %v4039_v49  ;;  %6453 = vst [vmem:[#allocation127_spill] sm:$0xff] %v4042_v8  ;;  %v4050_v43 = vstv %s3987_s11  ;;  %v937_v20 = vmul.f32 %v4036_v38, %v2996_v45  ;;  %v938_v58 = vmul.f32 %v4036_v38, %v2998_v46  ;;  %v941_v34 = vmul.f32 %v4039_v49, %v3064_v17  ;;  %s4163_s5 = sld [smem:[#allocation2 + $0x62]] }
  0xc6   : > { %6454 = vst [vmem:[#allocation128_spill] sm:$0xff] %v4045_v57  ;;  %6455 = vst [vmem:[#allocation129_spill] sm:$0xff] %v4050_v43  ;;  %v942_v0 = vmul.f32 %v4039_v49, %v3066_v18  ;;  %v947_v3 = vmul.f32 %v4042_v8, %v3073_v23  ;;  %v948_v61 = vmul.f32 %v4042_v8, %v3075_v24  ;;  %v4077_v54 = vstv %s4005_s14  ;;  %s4169_s7 = sld [smem:[#allocation2 + $0x99]] }
  0xc7   : > { %v903_v63 = vadd.f32 %v901_v62, %v897_v21  ;;  %v904_v6 = vadd.f32 %v902_v11, %v898_v44  ;;  %v908_v50 = vmul.f32 %v4025_v7, %v3252_v48  ;;  %v953_v38 = vmul.f32 %v4045_v57, %v3083_v29  ;;  %6456 = vst [vmem:[#allocation130_spill] sm:$0xff] %v4077_v54  ;;  %s4188_s8 = sld [smem:[#allocation2 + $0x6c]] }
  0xc8   : > { %v943_v2 = vadd.f32 %v941_v34, %v937_v20  ;;  %v944_v1 = vadd.f32 %v942_v0, %v938_v58  ;;  %v954_v49 = vmul.f32 %v4045_v57, %v3085_v30  ;;  %v845_v8 = vmax.f32 %v4016_v59, 0.0  ;;  %s4197_s11 = sld [smem:[#allocation2 + $0x76]] }
  0xc9   : > { %v846_v21 = vmax.f32 %v4019_v9, 0.0  ;;  %v913_v44 = vmul.f32 %v4050_v43, %v3254_v4  ;;  %v4084_v62 = vstv %s4013_s15  ;;  %v959_v58 = vmul.f32 %v4077_v54, %v3127_v60  ;;  %s4199_s14 = sld [smem:[#allocation2 + $0x9a]] }
  0xca   : > { %6457 = vst [vmem:[#allocation131_spill] sm:$0xff] %v4084_v62  ;;  %v949_v11 = vadd.f32 %v947_v3, %v943_v2  ;;  %v950_v20 = vadd.f32 %v948_v61, %v944_v1  ;;  %v960_v34 = vmul.f32 %v4077_v54, %v3162_v33  ;;  %v909_v59 = vadd.f32 %v907_v55, %v903_v63  ;;  %s4210_s15 = sld [smem:[#allocation2 + $0x80]] }
  0xcb   : > { %v910_v9 = vadd.f32 %v908_v50, %v904_v6  ;;  %v914_v0 = vmul.f32 %v4050_v43, %v3268_v37  ;;  %v4097_v57 = vstv %s4031_s17  ;;  %v965_v3 = vmul.f32 %v4084_v62, %v3164_v35  ;;  %s4218_s17 = sld [smem:[#allocation2 + $0x27]] }
  0xcc   : > { %6458 = vst [vmem:[#allocation132_spill] sm:$0xff] %v4097_v57  ;;  %v955_v1 = vadd.f32 %v953_v38, %v949_v11  ;;  %v956_v2 = vadd.f32 %v954_v49, %v950_v20  ;;  %v966_v61 = vmul.f32 %v4084_v62, %v3179_v52  ;;  %v849_v6 = vmul.f32 %v4022_v36, %v845_v8 }
  0xcd   : > { %v850_v50 = vmul.f32 %v4022_v36, %v846_v21  ;;  %v4110_v55 = vstv %s4033_s19  ;;  %v4113_v63 = vstv %s4056_s20  ;;  %v971_v11 = vmul.f32 %v4097_v57, %v3181_v56  ;;  %s4230_s19 = sld [smem:[#allocation2 + $0x31]] }
  0xce   : > { %6459 = vst [vmem:[#allocation133_spill] sm:$0xff] %v4110_v55  ;;  %6460 = vst [vmem:[#allocation134_spill] sm:$0xff] %v4113_v63  ;;  %v961_v38 = vadd.f32 %v959_v58, %v955_v1  ;;  %v962_v49 = vadd.f32 %v960_v34, %v956_v2  ;;  %v972_v20 = vmul.f32 %v4097_v57, %v3183_v12  ;;  %v4122_v54 = vstv %s4058_s21  ;;  %s4235_s20 = sld [smem:[#allocation2 + $0x3b]] }
  0xcf   : > { %v915_v43 = vadd.f32 %v913_v44, %v909_v59  ;;  %v916_v62 = vadd.f32 %v914_v0, %v910_v9  ;;  %6461 = vst [vmem:[#allocation135_spill] sm:$0xff] %v4122_v54  ;;  %v4125_v36 = vstv %s4072_s22  ;;  %v977_v34 = vmul.f32 %v4113_v63, %v3190_v13  ;;  %s4247_s21 = sld [smem:[#allocation2 + $0x45]] }
  0xd0   : > { %6462 = vst [vmem:[#allocation136_spill] sm:$0xff] %v4125_v36  ;;  %v967_v7 = vadd.f32 %v965_v3, %v961_v38  ;;  %v968_v58 = vadd.f32 %v966_v61, %v962_v49  ;;  %v978_v1 = vmul.f32 %v4113_v63, %v3197_v15  ;;  %v4136_v44 = vadd.f32 %v849_v6, %v3997_v39  ;;  %s4265_s22 = sld [smem:[#allocation2 + $0x4f]] }
  0xd1   : > { %v4139_v59 = vadd.f32 %v850_v50, %v4000_v51  ;;  %v855_v9 = vmul.f32 %v4110_v55, %v845_v8  ;;  %v856_v0 = vmul.f32 %v4110_v55, %v846_v21  ;;  %v983_v61 = vmul.f32 %v4125_v36, %v3237_v14 }
  0xd2   : > { %v973_v2 = vadd.f32 %v971_v11, %v967_v7  ;;  %v974_v3 = vadd.f32 %v972_v20, %v968_v58  ;;  %v4148_v38 = vstv %s4086_s23  ;;  %v4153_v51 = vadd.f32 %v4122_v54, %v915_v43  ;;  %s4279_s23 = sld [smem:[#allocation2 + $0x59]] }
  0xd3   : > { %6463 = vst [vmem:[#allocation137_spill] sm:$0xff] %v4148_v38  ;;  %v4156_v39 = vadd.f32 %v4122_v54, %v916_v62  ;;  %v984_v7 = vmul.f32 %v4125_v36, %v3252_v48  ;;  %v4161_v8 = vstv %s4092_s24  ;;  %v989_v62 = vmul.f32 %v4148_v38, %v3254_v4  ;;  %s4284_s24 = sld [smem:[#allocation2 + $0x8a]] }
  0xd4   : > { %6464 = vst [vmem:[#allocation138_spill] sm:$0xff] %v4161_v8  ;;  %v979_v21 = vadd.f32 %v977_v34, %v973_v2  ;;  %v980_v6 = vadd.f32 %v978_v1, %v974_v3  ;;  %v1013_v50 = vmul.f32 %v4161_v8, %v2996_v45  ;;  %v1014_v43 = vmul.f32 %v4161_v8, %v2998_v46 }
  0xd5   : > { %v4174_v49 = vstv %s4099_s25  ;;  %v4177_v11 = vstv %s4105_s26  ;;  %v4180_v20 = vstv %s4115_s27  ;;  %v990_v34 = vmul.f32 %v4148_v38, %v3268_v37  ;;  %s4295_s25 = sld [smem:[#allocation2 + $0x63]] }
  0xd6   : > { %6465 = vst [vmem:[#allocation139_spill] sm:$0xff] %v4174_v49  ;;  %6466 = vst [vmem:[#allocation140_spill] sm:$0xff] %v4177_v11  ;;  %v985_v58 = vadd.f32 %v983_v61, %v979_v21  ;;  %v1017_v1 = vmul.f32 %v4174_v49, %v3064_v17  ;;  %v1018_v2 = vmul.f32 %v4174_v49, %v3066_v18  ;;  %v4195_v61 = vstv %s4127_s28  ;;  %s4303_s26 = sld [smem:[#allocation2 + $0x6d]] }
  0xd7   : > { %6467 = vst [vmem:[#allocation141_spill] sm:$0xff] %v4180_v20  ;;  %v986_v3 = vadd.f32 %v984_v7, %v980_v6  ;;  %v1023_v54 = vmul.f32 %v4177_v11, %v3073_v23  ;;  %v1024_v36 = vmul.f32 %v4177_v11, %v3075_v24  ;;  %6468 = vst [vmem:[#allocation142_spill] sm:$0xff] %v4195_v61  ;;  %v921_v63 = vmax.f32 %v4153_v51, 0.0  ;;  %s4325_s27 = sld [smem:[#allocation2 + $0x77]] }
  0xd8   : > { %v1019_v21 = vadd.f32 %v1017_v1, %v1013_v50  ;;  %v1020_v38 = vadd.f32 %v1018_v2, %v1014_v43  ;;  %v1029_v7 = vmul.f32 %v4180_v20, %v3083_v29  ;;  %v1030_v6 = vmul.f32 %v4180_v20, %v3085_v30  ;;  %s4327_s28 = sld [smem:[#allocation2 + $0x9b]] }
  0xd9   : > { %v4206_v55 = vadd.f32 %v855_v9, %v4008_v27  ;;  %v922_v11 = vmax.f32 %v4156_v39, 0.0  ;;  %v991_v49 = vadd.f32 %v989_v62, %v985_v58  ;;  %v4213_v50 = vstv %s4143_s30  ;;  %s4354_s30 = sld [smem:[#allocation2 + $0x9c]] }
  0xda   : > { %6469 = vst [vmem:[#allocation143_spill] sm:$0xff] %v4213_v50  ;;  %v1025_v43 = vadd.f32 %v1023_v54, %v1019_v21  ;;  %v1026_v1 = vadd.f32 %v1024_v36, %v1020_v38  ;;  %v4216_v2 = vstv %s4150_s3  ;;  %v4221_v20 = vstv %s4129_s29  ;;  %s4348_s29 = sld [smem:[#allocation2 + $0x81]] }
  0xdb   : > { %6470 = vst [vmem:[#allocation144_spill] sm:$0xff] %v4216_v2  ;;  %6471 = vst [vmem:[#allocation145_spill] sm:$0xff] %v4221_v20  ;;  %v1035_v27 = vmul.f32 %v4195_v61, %v3127_v60  ;;  %v1036_v9 = vmul.f32 %v4195_v61, %v3162_v33  ;;  %v4228_v51 = vstv %s4163_s5  ;;  %v4233_v54 = vadd.f32 %v856_v0, %v4011_v10  ;;  %s4385_s3 = sld [smem:[#allocation2 + $0x9d]] }
  0xdc   : > { %6472 = vst [vmem:[#allocation146_spill] sm:$0xff] %v4228_v51  ;;  %v992_v36 = vadd.f32 %v990_v34, %v986_v3  ;;  %v1031_v38 = vadd.f32 %v1029_v7, %v1025_v43  ;;  %v1032_v39 = vadd.f32 %v1030_v6, %v1026_v1  ;;  %v4238_v62 = vstv %s4169_s7  ;;  %s4391_s5 = sld [smem:[#allocation2 + $0x8b]] }
  0xdd   : > { %6473 = vst [vmem:[#allocation147_spill] sm:$0xff] %v4238_v62  ;;  %v4241_v58 = vadd.f32 %v4213_v50, %v991_v49  ;;  %v1041_v21 = vmul.f32 %v4216_v2, %v3164_v35  ;;  %v1042_v61 = vmul.f32 %v4216_v2, %v3179_v52  ;;  %v4250_v10 = vmul.f32 %v4221_v20, %v921_v63  ;;  %s4425_s7 = sld [smem:[#allocation2 + $0x9e]] }
  0xde   : > { %v4253_v0 = vmul.f32 %v4221_v20, %v922_v11  ;;  %v1047_v34 = vmul.f32 %v4228_v51, %v3181_v56  ;;  %v4258_v49 = vstv %s4188_s8  ;;  %v1037_v3 = vadd.f32 %v1035_v27, %v1031_v38  ;;  %s4429_s8 = sld [smem:[#allocation2 + $0x9f]] }
  0xdf   : > { %6474 = vst [vmem:[#allocation148_spill] sm:$0xff] %v4258_v49  ;;  %v1038_v7 = vadd.f32 %v1036_v9, %v1032_v39  ;;  %v1048_v6 = vmul.f32 %v4228_v51, %v3183_v12  ;;  %v4263_v43 = vstv %s4197_s11  ;;  %v4268_v1 = vmul.f32 %v4238_v62, %v921_v63 }
  0xe0   : > { %6475 = vst [vmem:[#allocation149_spill] sm:$0xff] %v4263_v43  ;;  %v4271_v20 = vmul.f32 %v4238_v62, %v922_v11  ;;  %v4274_v2 = vadd.f32 %v4213_v50, %v992_v36  ;;  %v4277_v27 = vstv %s4199_s14  ;;  %v1043_v38 = vadd.f32 %v1041_v21, %v1037_v3  ;;  %s2740_s14 = sshll.u32 (%p6825_p4), %s2865_s12, 4 }
  0xe1   : > { %6476 = vst [vmem:[#allocation150_spill] sm:$0xff] %v4277_v27  ;;  %v1044_v39 = vadd.f32 %v1042_v61, %v1038_v7  ;;  %v1053_v63 = vmul.f32 %v4258_v49, %v3190_v13  ;;  %v1054_v11 = vmul.f32 %v4258_v49, %v3197_v15  ;;  %v1059_v36 = vmul.f32 %v4263_v43, %v3237_v14 }
  0xe2   : > { %v1060_v50 = vmul.f32 %v4263_v43, %v3252_v48  ;;  %v4293_v62 = vstv %s4210_s15  ;;  %v1049_v61 = vadd.f32 %v1047_v34, %v1043_v38  ;;  %v4298_v3 = vstv %s4218_s17  ;;  %s2437_s15 = scalar_lea.vmem (%p6825_p4), %s5853_s2, %s2740_s14 }
  0xe3   : > { %6477 = vst [vmem:[#allocation151_spill] sm:$0xff] %v4293_v62  ;;  %v1050_v21 = vadd.f32 %v1048_v6, %v1044_v39  ;;  %6478 = vst [vmem:[#allocation152_spill] sm:$0xff] %v4298_v3  ;;  %v4301_v7 = vstv %s4230_s19  ;;  %v1089_v9 = vmul.f32 %v4298_v3, %v2996_v45  ;;  %v1090_v49 = vmul.f32 %v4298_v3, %v2998_v46 }
  0xe4   : > { %6479 = vst [vmem:[#allocation153_spill] sm:$0xff] %v4301_v7  ;;  %v1093_v43 = vmul.f32 %v4301_v7, %v3064_v17  ;;  %v1094_v51 = vmul.f32 %v4301_v7, %v3066_v18  ;;  %v1055_v34 = vadd.f32 %v1053_v63, %v1049_v61  ;;  %v1065_v6 = vmul.f32 %v4293_v62, %v3254_v4 }
  0xe5   : > { %v4316_v38 = vstv %s4235_s20  ;;  %v4319_v39 = vstv %s4247_s21  ;;  %v1056_v18 = vadd.f32 %v1054_v11, %v1050_v21 }
  0xe6   : > { %6480 = vst [vmem:[#allocation154_spill] sm:$0xff] %v4316_v38  ;;  %6481 = vst [vmem:[#allocation155_spill] sm:$0xff] %v4319_v39  ;;  %v1095_v45 = vadd.f32 %v1093_v43, %v1089_v9  ;;  %v1096_v8 = vadd.f32 %v1094_v51, %v1090_v49  ;;  %v1099_v46 = vmul.f32 %v4316_v38, %v3073_v23  ;;  %v4334_v23 = vstv %s4265_s22 }
  0xe7   : > { %v1100_v17 = vmul.f32 %v4316_v38, %v3075_v24  ;;  %v1061_v63 = vadd.f32 %v1059_v36, %v1055_v34  ;;  %v1105_v61 = vmul.f32 %v4319_v39, %v3083_v29  ;;  %v1106_v7 = vmul.f32 %v4319_v39, %v3085_v30  ;;  %6482 = vst [vmem:[#allocation156_spill] sm:$0xff] %v4334_v23 }
  0xe8   : > { %v1101_v43 = vadd.f32 %v1099_v46, %v1095_v45  ;;  %v4337_v49 = vstv %s4279_s23  ;;  %v1066_v24 = vmul.f32 %v4293_v62, %v3268_v37  ;;  %v4342_v9 = vstv %s4284_s24 }
  0xe9   : > { %v1102_v51 = vadd.f32 %v1100_v17, %v1096_v8  ;;  %6483 = vst [vmem:[#allocation157_spill] sm:$0xff] %v4337_v49  ;;  %6484 = vst [vmem:[#allocation158_spill] sm:$0xff] %v4342_v9  ;;  %v1111_v11 = vmul.f32 %v4334_v23, %v3127_v60  ;;  %v1112_v29 = vmul.f32 %v4334_v23, %v3162_v33  ;;  %v4357_v60 = vstv %s4295_s25  ;;  %v6528_v23 = vld [vmem:[#allocation45_spill] sm:$0xff] }
  0xea   : > { %v1107_v30 = vadd.f32 %v1105_v61, %v1101_v43  ;;  %v1117_v36 = vmul.f32 %v4337_v49, %v3164_v35  ;;  %v1118_v21 = vmul.f32 %v4337_v49, %v3179_v52  ;;  %v1062_v34 = vadd.f32 %v1060_v50, %v1056_v18  ;;  %6485 = vst [vmem:[#allocation159_spill] sm:$0xff] %v4357_v60 }
  0xeb   : > { %v1108_v8 = vadd.f32 %v1106_v7, %v1102_v51  ;;  %v1067_v45 = vadd.f32 %v1065_v6, %v1061_v63  ;;  %v4360_v46 = vstv %s4303_s26  ;;  %v1123_v7 = vmul.f32 %v4357_v60, %v3181_v56 }
  0xec   : > { %6486 = vst [vmem:[#allocation160_spill] sm:$0xff] %v4360_v46  ;;  %v1113_v33 = vadd.f32 %v1111_v11, %v1107_v30  ;;  %v1124_v35 = vmul.f32 %v4357_v60, %v3183_v12  ;;  %v927_v52 = vadd.f32 %v4250_v10, %v4136_v44  ;;  %v928_v50 = vadd.f32 %v4253_v0, %v4139_v59 }
  0xed   : > { %v1114_v17 = vadd.f32 %v1112_v29, %v1108_v8  ;;  %v998_v6 = vmax.f32 %v4274_v2, 0.0  ;;  %v1129_v18 = vmul.f32 %v4360_v46, %v3190_v13  ;;  %v1130_v56 = vmul.f32 %v4360_v46, %v3197_v15  ;;  %v6527_v46 = vld [vmem:[#allocation50_spill] sm:$0xff] }
  0xee   : > { %v1119_v63 = vadd.f32 %v1117_v36, %v1113_v33  ;;  %v4376_v43 = vstv %s4325_s27  ;;  %v6488_v12 = vmax.f32 %v4241_v58, 0.0  ;;  %v4382_v10 = vstv %s4327_s28 }
  0xef   : > { %v1120_v61 = vadd.f32 %v1118_v21, %v1114_v17  ;;  %6487 = vst [vmem:[#allocation161_spill] sm:$0xff] %v4376_v43  ;;  %6489 = vst [vmem:[#allocation162_spill] sm:$0xff] %v4382_v10  ;;  %v1068_v59 = vadd.f32 %v1066_v24, %v1062_v34  ;;  %v1071_v2 = vadd.f32 %v4342_v9, %v1067_v45  ;;  %v4399_v30 = vstv %s4348_s29  ;;  %v4409_v34 = vld [vmem:[%s2919_s6 + $0x28] sm:$0xff] }
  0xf0   : > { %v1001_v44 = vmul.f32 %v4277_v27, %v6488_v12  ;;  %v933_v13 = vadd.f32 %v4268_v1, %v4206_v55  ;;  %v1125_v15 = vadd.f32 %v1123_v7, %v1119_v63  ;;  %v1135_v51 = vmul.f32 %v4376_v43, %v3237_v14  ;;  %6490 = vst [vmem:[#allocation163_spill] sm:$0xff] %v4399_v30  ;;  %v4402_v55 = vld [vmem:[%s2919_s6 + $0x20] sm:$0xff] }
  0xf1   : > { %v1126_v0 = vadd.f32 %v1124_v35, %v1120_v61  ;;  %v934_v24 = vadd.f32 %v4271_v20, %v4233_v54  ;;  %v1002_v11 = vmul.f32 %v4277_v27, %v998_v6  ;;  %v1136_v29 = vmul.f32 %v4376_v43, %v3252_v48  ;;  %v4412_v20 = vld [vmem:[%s2919_s6 + $0x30] sm:$0xff]  ;;  %v4415_v54 = vld [vmem:[%s2919_s6 + $0x38] sm:$0xff] }
  0xf2   : > { %v6491_v1 = vmov %v6488_v12  ;;  %v1008_v14 = vmul.f32 %v4382_v10, %v998_v6  ;;  %v1131_v36 = vadd.f32 %v1129_v18, %v1125_v15  ;;  %v1003_v45 = vadd.f32 %v1001_v44, %v927_v52  ;;  %v6512_v27 = vld [vmem:[#allocation34_spill] sm:$0xff] }
  0xf3   : > { %v1007_v8 = vmul.f32 %v4382_v10, %v6491_v1  ;;  %v1132_v21 = vadd.f32 %v1130_v56, %v1126_v0  ;;  %v1072_v48 = vadd.f32 %v4342_v9, %v1068_v59  ;;  %v1073_v33 = vmax.f32 %v1071_v2, 0.0 }
  0xf4   : > { %v4419_v17 = vstv %s4354_s30  ;;  %v1137_v7 = vadd.f32 %v1135_v51, %v1131_v36  ;;  %v1141_v58 = vmul.f32 %v4399_v30, %v3254_v4  ;;  %v1142_v35 = vmul.f32 %v4399_v30, %v3268_v37 }
  0xf5   : > { %6492 = vst [vmem:[#allocation164_spill] sm:$0xff] %v4419_v17  ;;  %v1169_v6 = vmul.f32 %v4402_v55, %v2935_v16  ;;  %v1138_v18 = vadd.f32 %v1136_v29, %v1132_v21  ;;  %v1170_v52 = vmul.f32 %v4409_v34, %v2935_v16  ;;  %v1171_v63 = vmul.f32 %v4412_v20, %v2941_v19 }
  0xf6   : > { %v1172_v4 = vmul.f32 %v4415_v54, %v2941_v19  ;;  %v1179_v37 = vmul.f32 %v4402_v55, %v2949_v22  ;;  %v1180_v61 = vmul.f32 %v4409_v34, %v2949_v22  ;;  %v1181_v56 = vmul.f32 %v4412_v20, %v2953_v26 }
  0xf7   : > { %v1182_v12 = vmul.f32 %v4415_v54, %v2953_v26  ;;  %v4445_v44 = vadd.f32 %v1002_v11, %v928_v50  ;;  %v1074_v59 = vmax.f32 %v1072_v48, 0.0  ;;  %v1189_v2 = vmul.f32 %v4402_v55, %v2967_v31 }
  0xf8   : > { %v1190_v15 = vmul.f32 %v4409_v34, %v2967_v31  ;;  %v4451_v0 = vadd.f32 %v1007_v8, %v933_v13  ;;  %v1077_v51 = vmul.f32 %v4419_v17, %v1073_v33  ;;  %v4455_v29 = vstv %s4385_s3 }
  0xf9   : > { %6493 = vst [vmem:[#allocation165_spill] sm:$0xff] %v4455_v29  ;;  %v4458_v1 = vstv %s4391_s5  ;;  %v1143_v36 = vadd.f32 %v1141_v58, %v1137_v7  ;;  %v1144_v21 = vadd.f32 %v1142_v35, %v1138_v18  ;;  %v1191_v50 = vmul.f32 %v4412_v20, %v2969_v32 }
  0xfa   : > { %6494 = vst [vmem:[#allocation166_spill] sm:$0xff] %v4458_v1  ;;  %v1192_v11 = vmul.f32 %v4415_v54, %v2969_v32  ;;  %v1173_v48 = vadd.f32 %v1171_v63, %v1169_v6  ;;  %v1174_v31 = vadd.f32 %v1172_v4, %v1170_v52  ;;  %v1183_v13 = vadd.f32 %v1181_v56, %v1179_v37 }
  0xfb   : > { %v1184_v8 = vadd.f32 %v1182_v12, %v1180_v61  ;;  %v4464_v30 = vadd.f32 %v1008_v14, %v934_v24  ;;  %v4467_v9 = vmul.f32 %v4419_v17, %v1074_v59  ;;  %v1193_v26 = vadd.f32 %v1191_v50, %v1189_v2  ;;  %v6497_v2 = vld [vmem:[#allocation18_spill] sm:$0xff] }
  0xfc   : > { %v1194_v10 = vadd.f32 %v1192_v11, %v1190_v15  ;;  %v4469_v7 = vadd.f32 %v1077_v51, %v1003_v45  ;;  %v4472_v58 = vmul.f32 %v4455_v29, %v1073_v33  ;;  %v4475_v35 = vmul.f32 %v4455_v29, %v1074_v59  ;;  %v6498_v51 = vld [vmem:[#allocation19_spill] sm:$0xff] }
  0xfd   : > { %v4478_v18 = vstv %s4425_s7  ;;  %v4481_v6 = vadd.f32 %v4458_v1, %v1143_v36  ;;  %v4484_v24 = vadd.f32 %v4458_v1, %v1144_v21  ;;  %v4487_v14 = vstv %s4429_s8  ;;  %v6499_v21 = vld [vmem:[#allocation21_spill] sm:$0xff] }
  0xfe   : > { %6495 = vst [vmem:[#allocation167_spill] sm:$0xff] %v4478_v18  ;;  %6496 = vst [vmem:[#allocation168_spill] sm:$0xff] %v4487_v14  ;;  %v1199_v45 = vmul.f32 %v4402_v55, %v2985_v40  ;;  %v1175_v52 = vadd.f32 %v1173_v48, %v2951_v25  ;;  %v1176_v33 = vadd.f32 %v1174_v31, %v2951_v25 }
  0xff   : > { %v1185_v63 = vadd.f32 %v1183_v13, %v2990_v42  ;;  %v1186_v4 = vadd.f32 %v1184_v8, %v2990_v42  ;;  %v1195_v37 = vadd.f32 %v1193_v26, %v3012_v53  ;;  %v1196_v61 = vadd.f32 %v1194_v10, %v3012_v53  ;;  %v6500_v8 = vld [vmem:[#allocation22_spill] sm:$0xff] }
 0x100   : > { %v1200_v56 = vmul.f32 %v4409_v34, %v2985_v40  ;;  %v1201_v12 = vmul.f32 %v4412_v20, %v3000_v47  ;;  %v1202_v59 = vmul.f32 %v4415_v54, %v3000_v47  ;;  %v1209_v31 = vmul.f32 %v4402_v55, %v6497_v2  ;;  %v6510_v40 = vld [vmem:[#allocation32_spill] sm:$0xff] }
 0x101   : > { %v1210_v15 = vmul.f32 %v4409_v34, %v6497_v2  ;;  %v1211_v26 = vmul.f32 %v4412_v20, %v6498_v51  ;;  %v1212_v10 = vmul.f32 %v4415_v54, %v6498_v51  ;;  %v1219_v50 = vmul.f32 %v4402_v55, %v6499_v21  ;;  %v6502_v51 = vld [vmem:[#allocation24_spill] sm:$0xff] }
 0x102   : > { %v1203_v36 = vadd.f32 %v1201_v12, %v1199_v45  ;;  %v1220_v11 = vmul.f32 %v4409_v34, %v6499_v21  ;;  %v1204_v48 = vadd.f32 %v1202_v59, %v1200_v56  ;;  %v1221_v29 = vmul.f32 %v4412_v20, %v6500_v8  ;;  %v6501_v45 = vld [vmem:[#allocation20_spill] sm:$0xff] }
 0x103   : > { %v1213_v13 = vadd.f32 %v1211_v26, %v1209_v31  ;;  %v1222_v53 = vmul.f32 %v4415_v54, %v6500_v8  ;;  %v4519_v1 = vmax.f32 %v1175_v52, 0.0  ;;  %v1214_v2 = vadd.f32 %v1212_v10, %v1210_v15  ;;  %v6503_v8 = vld [vmem:[#allocation25_spill] sm:$0xff] }
 0x104   : > { %v1205_v12 = vadd.f32 %v1203_v36, %v6501_v45  ;;  %v1229_v17 = vmul.f32 %v4402_v55, %v6502_v51  ;;  %v4524_v47 = vmax.f32 %v1176_v33, 0.0  ;;  %v4526_v42 = vmax.f32 %v1185_v63, 0.0  ;;  %v6504_v63 = vld [vmem:[#allocation23_spill] sm:$0xff] }
 0x105   : > { %v1206_v56 = vadd.f32 %v1204_v48, %v6501_v45  ;;  %v1223_v59 = vadd.f32 %v1221_v29, %v1219_v50  ;;  %v1224_v31 = vadd.f32 %v1222_v53, %v1220_v11  ;;  %v1230_v26 = vmul.f32 %v4409_v34, %v6502_v51  ;;  %v6505_v50 = vld [vmem:[#allocation27_spill] sm:$0xff]  ;;  %v6506_v45 = vld [vmem:[#allocation26_spill] sm:$0xff] }
 0x106   : > { %v1231_v52 = vmul.f32 %v4412_v20, %v6503_v8  ;;  %v1232_v15 = vmul.f32 %v4415_v54, %v6503_v8  ;;  %v4535_v36 = vmax.f32 %v1186_v4, 0.0  ;;  %v4537_v10 = vmax.f32 %v1195_v37, 0.0  ;;  %v6507_v37 = vld [vmem:[#allocation28_spill] sm:$0xff] }
 0x107   : > { %v4539_v33 = vmax.f32 %v1196_v61, 0.0  ;;  %v1215_v21 = vadd.f32 %v1213_v13, %v6504_v63  ;;  %v4542_v48 = vmax.f32 %v1205_v12, 0.0  ;;  %v1216_v53 = vadd.f32 %v1214_v2, %v6504_v63  ;;  %v6509_v63 = vld [vmem:[#allocation29_spill] sm:$0xff] }
 0x108   : > { %v1233_v29 = vadd.f32 %v1231_v52, %v1229_v17  ;;  %v1239_v11 = vmul.f32 %v4402_v55, %v6505_v50  ;;  %v4547_v51 = vmax.f32 %v1206_v56, 0.0  ;;  %v1225_v8 = vadd.f32 %v1223_v59, %v6506_v45  ;;  %v6508_v17 = vld [vmem:[#allocation30_spill] sm:$0xff] }
 0x109   : > { %v1240_v4 = vmul.f32 %v4409_v34, %v6505_v50  ;;  %v1241_v61 = vmul.f32 %v4412_v20, %v6507_v37  ;;  %v1226_v13 = vadd.f32 %v1224_v31, %v6506_v45  ;;  %v1234_v12 = vadd.f32 %v1232_v15, %v1230_v26  ;;  %v6511_v15 = vld [vmem:[#allocation33_spill] sm:$0xff] }
 0x10a   : > { %v1242_v2 = vmul.f32 %v4415_v54, %v6507_v37  ;;  %v1249_v52 = vmul.f32 %v4402_v55, %v6508_v17  ;;  %v1235_v56 = vadd.f32 %v1233_v29, %v6509_v63  ;;  %v1250_v59 = vmul.f32 %v4409_v34, %v6508_v17 }
 0x10b   : > { %v1251_v50 = vmul.f32 %v4412_v20, %v6510_v40  ;;  %v1252_v25 = vmul.f32 %v4415_v54, %v6510_v40  ;;  %v4566_v32 = vmax.f32 %v1215_v21, 0.0  ;;  %v1243_v31 = vadd.f32 %v1241_v61, %v1239_v11  ;;  %v6513_v11 = vld [vmem:[#allocation36_spill] sm:$0xff] }
 0x10c   : > { %v1244_v26 = vadd.f32 %v1242_v2, %v1240_v4  ;;  %v1259_v37 = vmul.f32 %v4402_v55, %v6511_v15  ;;  %v4570_v45 = vmax.f32 %v1216_v53, 0.0  ;;  %v4572_v22 = vmax.f32 %v1225_v8, 0.0  ;;  %v6514_v53 = vld [vmem:[#allocation31_spill] sm:$0xff]  ;;  %v6515_v2 = vld [vmem:[#allocation38_spill] sm:$0xff] }
 0x10d   : > { %v1253_v29 = vadd.f32 %v1251_v50, %v1249_v52  ;;  %v1254_v43 = vadd.f32 %v1252_v25, %v1250_v59  ;;  %v1260_v17 = vmul.f32 %v4409_v34, %v6511_v15  ;;  %v1261_v19 = vmul.f32 %v4412_v20, %v6512_v27  ;;  %v6516_v52 = vld [vmem:[#allocation35_spill] sm:$0xff] }
 0x10e   : > { %v1262_v21 = vmul.f32 %v4415_v54, %v6512_v27  ;;  %v1269_v4 = vmul.f32 %v4519_v1, %v6513_v11  ;;  %v4582_v61 = vmax.f32 %v1226_v13, 0.0  ;;  %v1236_v55 = vadd.f32 %v1234_v12, %v6509_v63  ;;  %v6526_v63 = vld [vmem:[#allocation49_spill] sm:$0xff] }
 0x10f   : > { %v4585_v8 = vmax.f32 %v1235_v56, 0.0  ;;  %v1270_v25 = vmul.f32 %v4524_v47, %v6513_v11  ;;  %v1245_v34 = vadd.f32 %v1243_v31, %v6514_v53  ;;  %v1246_v50 = vadd.f32 %v1244_v26, %v6514_v53  ;;  %v6517_v56 = vld [vmem:[#allocation39_spill] sm:$0xff]  ;;  %v6518_v11 = vld [vmem:[#allocation37_spill] sm:$0xff]  ;;  %v6519_v53 = vld [vmem:[#allocation40_spill] sm:$0xff] }
 0x110   : > { %v1263_v20 = vadd.f32 %v1261_v19, %v1259_v37  ;;  %v1271_v54 = vmul.f32 %v4526_v42, %v6515_v2  ;;  %v1255_v59 = vadd.f32 %v1253_v29, %v6516_v52  ;;  %v1256_v13 = vadd.f32 %v1254_v43, %v6516_v52 }
 0x111   : > { %v1272_v12 = vmul.f32 %v4535_v36, %v6515_v2  ;;  %v1275_v27 = vmul.f32 %v4537_v10, %v6517_v56  ;;  %v1264_v15 = vadd.f32 %v1262_v21, %v1260_v17  ;;  %v1276_v19 = vmul.f32 %v4539_v33, %v6517_v56  ;;  %v6520_v21 = vld [vmem:[#allocation41_spill] sm:$0xff] }
 0x112   : > { %v1265_v40 = vadd.f32 %v1263_v20, %v6518_v11  ;;  %v1273_v31 = vadd.f32 %v1271_v54, %v1269_v4  ;;  %v4602_v37 = vmax.f32 %v1236_v55, 0.0  ;;  %v1279_v29 = vmul.f32 %v4542_v48, %v6519_v53 }
 0x113   : > { %v1274_v26 = vadd.f32 %v1272_v12, %v1270_v25  ;;  %v1280_v43 = vmul.f32 %v4547_v51, %v6519_v53  ;;  %v4608_v2 = vmax.f32 %v1245_v34, 0.0  ;;  %v4610_v52 = vmax.f32 %v1246_v50, 0.0  ;;  %v6521_v53 = vld [vmem:[#allocation42_spill] sm:$0xff] }
 0x114   : > { %v1277_v17 = vadd.f32 %v1275_v27, %v1273_v31  ;;  %v1283_v4 = vmul.f32 %v4566_v32, %v6520_v21  ;;  %v4614_v20 = vmax.f32 %v1255_v59, 0.0  ;;  %v4616_v54 = vmax.f32 %v1256_v13, 0.0  ;;  %v6522_v59 = vld [vmem:[#allocation43_spill] sm:$0xff] }
 0x115   : > { %v1278_v55 = vadd.f32 %v1276_v19, %v1274_v26  ;;  %v1284_v25 = vmul.f32 %v4570_v45, %v6520_v21  ;;  %v1266_v12 = vadd.f32 %v1264_v15, %v6518_v11  ;;  %v4621_v56 = vmax.f32 %v1265_v40, 0.0  ;;  %v6523_v21 = vld [vmem:[#allocation44_spill] sm:$0xff]  ;;  %v6524_v40 = vld [vmem:[#allocation47_spill] sm:$0xff] }
 0x116   : > { %v1281_v34 = vadd.f32 %v1279_v29, %v1277_v17  ;;  %v1287_v50 = vmul.f32 %v4572_v22, %v6521_v53  ;;  %v1288_v31 = vmul.f32 %v4582_v61, %v6521_v53  ;;  %v1291_v13 = vmul.f32 %v4585_v8, %v6522_v59 }
 0x117   : > { %v1282_v27 = vadd.f32 %v1280_v43, %v1278_v55  ;;  %v1292_v19 = vmul.f32 %v4602_v37, %v6522_v59  ;;  %v1295_v15 = vmul.f32 %v4608_v2, %v6523_v21  ;;  %v1319_v29 = vmul.f32 %v4519_v1, %v6524_v40  ;;  %v6525_v55 = vld [vmem:[#allocation48_spill] sm:$0xff] }
 0x118   : > { %v1285_v26 = vadd.f32 %v1283_v4, %v1281_v34  ;;  %v1320_v17 = vmul.f32 %v4524_v47, %v6524_v40  ;;  %v1321_v53 = vmul.f32 %v4526_v42, %v6525_v55  ;;  %v1322_v11 = vmul.f32 %v4535_v36, %v6525_v55 }
 0x119   : > { %v1286_v43 = vadd.f32 %v1284_v25, %v1282_v27  ;;  %v1325_v59 = vmul.f32 %v4537_v10, %v6526_v63  ;;  %v1296_v34 = vmul.f32 %v4610_v52, %v6523_v21  ;;  %v1326_v16 = vmul.f32 %v4539_v33, %v6526_v63 }
 0x11a   : > { %v1289_v4 = vadd.f32 %v1287_v50, %v1285_v26  ;;  %v1329_v40 = vmul.f32 %v4542_v48, %v6527_v46  ;;  %v1323_v27 = vadd.f32 %v1321_v53, %v1319_v29  ;;  %v1324_v60 = vadd.f32 %v1322_v11, %v1320_v17  ;;  %v6529_v26 = vld [vmem:[#allocation51_spill] sm:$0xff]  ;;  %v6530_v29 = vld [vmem:[#allocation52_spill] sm:$0xff] }
 0x11b   : > { %v1290_v25 = vadd.f32 %v1288_v31, %v1286_v43  ;;  %v1330_v62 = vmul.f32 %v4547_v51, %v6527_v46  ;;  %v4651_v55 = vmax.f32 %v1266_v12, 0.0  ;;  %v1299_v50 = vmul.f32 %v4614_v20, %v6528_v23 }
 0x11c   : > { %v1293_v49 = vadd.f32 %v1291_v13, %v1289_v4  ;;  %v1333_v21 = vmul.f32 %v4566_v32, %v6529_v26  ;;  %v1327_v63 = vadd.f32 %v1325_v59, %v1323_v27  ;;  %v1328_v38 = vadd.f32 %v1326_v16, %v1324_v60  ;;  %v6531_v59 = vld [vmem:[#allocation46_spill] sm:$0xff] }
 0x11d   : > { %v1294_v39 = vadd.f32 %v1292_v19, %v1290_v25  ;;  %v1334_v31 = vmul.f32 %v4570_v45, %v6529_v26  ;;  %v1149_v11 = vmax.f32 %v4481_v6, 0.0  ;;  %v1300_v12 = vmul.f32 %v4616_v54, %v6528_v23  ;;  %v6532_v6 = vld [vmem:[#allocation53_spill] sm:$0xff] }
 0x11e   : > { %v1297_v53 = vadd.f32 %v1295_v15, %v1293_v49  ;;  %v1337_v13 = vmul.f32 %v4572_v22, %v6530_v29  ;;  %v1331_v43 = vadd.f32 %v1329_v40, %v1327_v63  ;;  %v1332_v4 = vadd.f32 %v1330_v62, %v1328_v38  ;;  %v6533_v63 = vld [vmem:[#allocation59_spill] sm:$0xff]  ;;  %v6534_v38 = vld [vmem:[#allocation54_spill] sm:$0xff] }
 0x11f   : > { %v1298_v17 = vadd.f32 %v1296_v34, %v1294_v39  ;;  %v1338_v19 = vmul.f32 %v4582_v61, %v6530_v29  ;;  %v1303_v16 = vmul.f32 %v4621_v56, %v6531_v59  ;;  %v1304_v60 = vmul.f32 %v4651_v55, %v6531_v59  ;;  %v6535_v29 = vld [vmem:[#allocation63_spill] sm:$0xff] }
 0x120   : > { %v1341_v49 = vmul.f32 %v4585_v8, %v6532_v6  ;;  %v1342_v15 = vmul.f32 %v4602_v37, %v6532_v6  ;;  %v1301_v25 = vadd.f32 %v1299_v50, %v1297_v53  ;;  %v1335_v27 = vadd.f32 %v1333_v21, %v1331_v43  ;;  %v6536_v21 = vld [vmem:[#allocation64_spill] sm:$0xff] }
 0x121   : > { %v1336_v39 = vadd.f32 %v1334_v31, %v1332_v4  ;;  %v1369_v62 = vmul.f32 %v4519_v1, %v6533_v63  ;;  %v1345_v40 = vmul.f32 %v4608_v2, %v6534_v38  ;;  %v1370_v34 = vmul.f32 %v4524_v47, %v6533_v63 }
 0x122   : > { %v1371_v26 = vmul.f32 %v4526_v42, %v6535_v29  ;;  %v1372_v59 = vmul.f32 %v4535_v36, %v6535_v29  ;;  %v1302_v46 = vadd.f32 %v1300_v12, %v1298_v17  ;;  %v1339_v6 = vadd.f32 %v1337_v13, %v1335_v27 }
 0x123   : > { %v1340_v50 = vadd.f32 %v1338_v19, %v1336_v39  ;;  %v1375_v31 = vmul.f32 %v4537_v10, %v6536_v21  ;;  %v1346_v53 = vmul.f32 %v4610_v52, %v6534_v38  ;;  %v1376_v63 = vmul.f32 %v4539_v33, %v6536_v21 }
 0x124   : > { %v1373_v43 = vadd.f32 %v1371_v26, %v1369_v62  ;;  %v1374_v4 = vadd.f32 %v1372_v59, %v1370_v34  ;;  %v1305_v23 = vadd.f32 %v1303_v16, %v1301_v25  ;;  %v1343_v3 = vadd.f32 %v1341_v49, %v1339_v6  ;;  %v6538_v26 = vld [vmem:[#allocation55_spill] sm:$0xff]  ;;  %v6539_v62 = vld [vmem:[#allocation66_spill] sm:$0xff] }
 0x125   : > { %v1344_v57 = vadd.f32 %v1342_v15, %v1340_v50  ;;  %v1379_v29 = vmul.f32 %v4542_v48, %v6537_v41  ;;  %v1150_v12 = vmax.f32 %v4484_v24, 0.0  ;;  %v1380_v19 = vmul.f32 %v4547_v51, %v6537_v41  ;;  %v6619_v41 = vld [vmem:[#allocation136_spill] sm:$0xff] }
 0x126   : > { %v1377_v13 = vadd.f32 %v1375_v31, %v1373_v43  ;;  %v1378_v17 = vadd.f32 %v1376_v63, %v1374_v4  ;;  %v1306_v27 = vadd.f32 %v1304_v60, %v1302_v46  ;;  %v1347_v39 = vadd.f32 %v1345_v40, %v1343_v3  ;;  %v6540_v46 = vld [vmem:[#allocation56_spill] sm:$0xff] }
 0x127   : > { %v1349_v59 = vmul.f32 %v4614_v20, %v6538_v26  ;;  %v1383_v16 = vmul.f32 %v4566_v32, %v6539_v62  ;;  %v1348_v6 = vadd.f32 %v1346_v53, %v1344_v57  ;;  %v1350_v49 = vmul.f32 %v4616_v54, %v6538_v26  ;;  %v6541_v53 = vld [vmem:[#allocation58_spill] sm:$0xff] }
 0x128   : > { %v1381_v15 = vadd.f32 %v1379_v29, %v1377_v13  ;;  %v1382_v25 = vadd.f32 %v1380_v19, %v1378_v17  ;;  %v1080_v24 = vadd.f32 %v4467_v9, %v4445_v44  ;;  %v1085_v63 = vadd.f32 %v4472_v58, %v4451_v0 }
 0x129   : > { %v1153_v3 = vmul.f32 %v4478_v18, %v1149_v11  ;;  %v1307_v60 = vadd.f32 %v1305_v23, %v6540_v46  ;;  %v1154_v40 = vmul.f32 %v4478_v18, %v1150_v12  ;;  %v1159_v34 = vmul.f32 %v4487_v14, %v1149_v11  ;;  %v6542_v23 = vld [vmem:[#allocation68_spill] sm:$0xff] }
 0x12a   : > { %v1384_v57 = vmul.f32 %v4570_v45, %v6539_v62  ;;  %v1385_v50 = vadd.f32 %v1383_v16, %v1381_v15  ;;  %v1308_v29 = vadd.f32 %v1306_v27, %v6540_v46  ;;  %v1351_v31 = vadd.f32 %v1349_v59, %v1347_v39  ;;  %v6543_v39 = vld [vmem:[#allocation70_spill] sm:$0xff] }
 0x12b   : > { %v1353_v9 = vmul.f32 %v4621_v56, %v6541_v53  ;;  %v1354_v44 = vmul.f32 %v4651_v55, %v6541_v53  ;;  %v1352_v0 = vadd.f32 %v1350_v49, %v1348_v6  ;;  %v1387_v43 = vmul.f32 %v4572_v22, %v6542_v23 }
 0x12c   : > { %v1386_v58 = vadd.f32 %v1384_v57, %v1382_v25  ;;  %v1388_v11 = vmul.f32 %v4582_v61, %v6542_v23  ;;  %v1086_v4 = vadd.f32 %v4475_v35, %v4464_v30  ;;  %v1160_v13 = vmul.f32 %v4487_v14, %v1150_v12  ;;  %v6547_v35 = vld [vmem:[#allocation75_spill] sm:$0xff] }
 0x12d   : > { %v1309_v17 = vmax.f32 %v1307_v60, 0.0  ;;  %v1389_v19 = vadd.f32 %v1387_v43, %v1385_v50  ;;  %v1391_v59 = vmul.f32 %v4585_v8, %v6543_v39  ;;  %v1392_v16 = vmul.f32 %v4602_v37, %v6543_v39  ;;  %v6549_v50 = vld [vmem:[#allocation61_spill] sm:$0xff]  ;;  %v6550_v43 = vld [vmem:[#allocation71_spill] sm:$0xff] }
 0x12e   : > { %v1390_v27 = vadd.f32 %v1388_v11, %v1386_v58  ;;  %v4728_v6 = vadd.f32 %v1153_v3, %v4469_v7  ;;  %v1310_v49 = vmax.f32 %v1308_v29, 0.0  ;;  %v1355_v15 = vadd.f32 %v1353_v9, %v1351_v31  ;;  %v6552_v31 = vld [vmem:[#allocation62_spill] sm:$0xff] }
 0x12f   : > { %v4730_v25 = vadd.f32 %v1154_v40, %v1080_v24  ;;  %v4732_v57 = vadd.f32 %v1159_v34, %v1085_v63  ;;  %v1356_v30 = vadd.f32 %v1354_v44, %v1352_v0  ;;  %v1419_v12 = vmul.f32 %v4519_v1, %v6547_v35  ;;  %v6551_v63 = vld [vmem:[#allocation76_spill] sm:$0xff]  ;;  %v6553_v0 = vld [vmem:[#allocation67_spill] sm:$0xff] }
 0x130   : > { %6544 = vst [vmem:[#allocation54_spill] sm:$0xff] %v4728_v6  ;;  %v4736_v60 = vadd.f32 %v1160_v13, %v1086_v4  ;;  %v1311_v58 = vmul.f32 %v1309_v17, %v6549_v50  ;;  %v1395_v11 = vmul.f32 %v4608_v2, %v6550_v43  ;;  %v1396_v7 = vmul.f32 %v4610_v52, %v6550_v43 }
 0x131   : > { %6545 = vst [vmem:[#allocation64_spill] sm:$0xff] %v4730_v25  ;;  %6546 = vst [vmem:[#allocation55_spill] sm:$0xff] %v4732_v57  ;;  %v1393_v3 = vadd.f32 %v1391_v59, %v1389_v19  ;;  %v1394_v29 = vadd.f32 %v1392_v16, %v1390_v27  ;;  %v1420_v24 = vmul.f32 %v4524_v47, %v6547_v35  ;;  %v6555_v57 = vld [vmem:[#allocation77_spill] sm:$0xff]  ;;  %v6558_v35 = vld [vmem:[#allocation79_spill] sm:$0xff] }
 0x132   : > { %6548 = vst [vmem:[#allocation58_spill] sm:$0xff] %v4736_v60  ;;  %v1421_v40 = vmul.f32 %v4526_v42, %v6551_v63  ;;  %v1312_v34 = vmul.f32 %v1310_v49, %v6549_v50  ;;  %v1315_v9 = vmul.f32 %v1309_v17, %v6552_v31  ;;  %v1316_v44 = vmul.f32 %v1310_v49, %v6552_v31  ;;  %v6554_v60 = vld [vmem:[#allocation73_spill] sm:$0xff] }
 0x133   : > { %v1357_v4 = vadd.f32 %v1355_v15, %v6553_v0  ;;  %v1358_v13 = vadd.f32 %v1356_v30, %v6553_v0  ;;  %v1399_v19 = vmul.f32 %v4614_v20, %v6554_v60  ;;  %v1422_v27 = vmul.f32 %v4535_v36, %v6551_v63  ;;  %v6556_v63 = vld [vmem:[#allocation57_spill] sm:$0xff] }
 0x134   : > { %v1423_v59 = vadd.f32 %v1421_v40, %v1419_v12  ;;  %v1400_v16 = vmul.f32 %v4616_v54, %v6554_v60  ;;  %v1425_v25 = vmul.f32 %v4537_v10, %v6555_v57  ;;  %v1426_v17 = vmul.f32 %v4539_v33, %v6555_v57  ;;  %v6557_v40 = vld [vmem:[#allocation60_spill] sm:$0xff] }
 0x135   : > { %v1429_v49 = vmul.f32 %v4542_v48, %v3554_v28  ;;  %v1397_v15 = vadd.f32 %v1395_v11, %v1393_v3  ;;  %v1398_v30 = vadd.f32 %v1396_v7, %v1394_v29  ;;  %v1424_v6 = vadd.f32 %v1422_v27, %v1420_v24  ;;  %v6559_v11 = vld [vmem:[#allocation74_spill] sm:$0xff] }
 0x136   : > { %v1430_v31 = vmul.f32 %v4547_v51, %v3554_v28  ;;  %v1313_v12 = vadd.f32 %v1311_v58, %v6556_v63  ;;  %v4768_v50 = vadd.f32 %v1315_v9, %v6557_v40  ;;  %v1427_v60 = vadd.f32 %v1425_v25, %v1423_v59  ;;  %v6560_v58 = vld [vmem:[#allocation80_spill] sm:$0xff] }
 0x137   : > { %v1433_v14 = vmul.f32 %v4566_v32, %v6558_v35  ;;  %v1314_v57 = vadd.f32 %v1312_v34, %v6556_v63  ;;  %v1359_v0 = vmax.f32 %v1357_v4, 0.0  ;;  %v1360_v18 = vmax.f32 %v1358_v13, 0.0  ;;  %v6565_v63 = vld [vmem:[#allocation83_spill] sm:$0xff] }
 0x138   : > { %v1428_v43 = vadd.f32 %v1426_v17, %v1424_v6  ;;  %v1403_v7 = vmul.f32 %v4621_v56, %v6559_v11  ;;  %v1431_v3 = vadd.f32 %v1429_v49, %v1427_v60  ;;  %v1434_v29 = vmul.f32 %v4570_v45, %v6558_v35  ;;  %v6561_v60 = vld [vmem:[#allocation82_spill] sm:$0xff]  ;;  %v6562_v17 = vld [vmem:[#allocation69_spill] sm:$0xff] }
 0x139   : > { %v1437_v24 = vmul.f32 %v4572_v22, %v6560_v58  ;;  %v1401_v9 = vadd.f32 %v1399_v19, %v1397_v15  ;;  %v1402_v25 = vadd.f32 %v1400_v16, %v1398_v30  ;;  %v1404_v27 = vmul.f32 %v4651_v55, %v6559_v11  ;;  %v6563_v19 = vld [vmem:[#allocation72_spill] sm:$0xff] }
 0x13a   : > { %v1432_v59 = vadd.f32 %v1430_v31, %v1428_v43  ;;  %v4782_v34 = vadd.f32 %v1316_v44, %v6557_v40  ;;  %v1435_v6 = vadd.f32 %v1433_v14, %v1431_v3  ;;  %v1438_v4 = vmul.f32 %v4582_v61, %v6560_v58  ;;  %v6564_v44 = vld [vmem:[#allocation87_spill] sm:$0xff]  ;;  %v6566_v11 = vld [vmem:[#allocation88_spill] sm:$0xff] }
 0x13b   : > { %v1441_v13 = vmul.f32 %v4585_v8, %v6561_v60  ;;  %v1361_v49 = vmul.f32 %v1359_v0, %v6562_v17  ;;  %v1362_v35 = vmul.f32 %v1360_v18, %v6562_v17  ;;  %v1365_v16 = vmul.f32 %v1359_v0, %v6563_v19 }
 0x13c   : > { %v1442_v15 = vmul.f32 %v4602_v37, %v6561_v60  ;;  %v1436_v43 = vadd.f32 %v1434_v29, %v1432_v59  ;;  %v1439_v31 = vadd.f32 %v1437_v24, %v1435_v6  ;;  %v1469_v14 = vmul.f32 %v4519_v1, %v6564_v44  ;;  %v6567_v59 = vld [vmem:[#allocation89_spill] sm:$0xff] }
 0x13d   : > { %v1470_v30 = vmul.f32 %v4524_v47, %v6564_v44  ;;  %v1366_v3 = vmul.f32 %v1360_v18, %v6563_v19  ;;  %v1405_v58 = vadd.f32 %v1403_v7, %v1401_v9  ;;  %v1406_v40 = vadd.f32 %v1404_v27, %v1402_v25  ;;  %v6568_v7 = vld [vmem:[#allocation90_spill] sm:$0xff] }
 0x13e   : > { %v1445_v17 = vmul.f32 %v4608_v2, %v6565_v63  ;;  %v1440_v28 = vadd.f32 %v1438_v4, %v1436_v43  ;;  %v1443_v0 = vadd.f32 %v1441_v13, %v1439_v31  ;;  %v1471_v60 = vmul.f32 %v4526_v42, %v6566_v11  ;;  %v6569_v31 = vld [vmem:[#allocation81_spill] sm:$0xff] }
 0x13f   : > { %v1472_v29 = vmul.f32 %v4535_v36, %v6566_v11  ;;  %v1446_v24 = vmul.f32 %v4610_v52, %v6565_v63  ;;  %v1475_v6 = vmul.f32 %v4537_v10, %v6567_v59  ;;  %v1476_v18 = vmul.f32 %v4539_v33, %v6567_v59  ;;  %v6570_v63 = vld [vmem:[#allocation84_spill] sm:$0xff]  ;;  %v6571_v59 = vld [vmem:[#allocation91_spill] sm:$0xff] }
 0x140   : > { %v1479_v9 = vmul.f32 %v4542_v48, %v6568_v7  ;;  %v1444_v25 = vadd.f32 %v1442_v15, %v1440_v28  ;;  %v1473_v27 = vadd.f32 %v1471_v60, %v1469_v14  ;;  %v1480_v13 = vmul.f32 %v4547_v51, %v6568_v7 }
 0x141   : > { %v1474_v4 = vadd.f32 %v1472_v29, %v1470_v30  ;;  %v4814_v43 = vadd.f32 %v1361_v49, %v1313_v12  ;;  %v1407_v11 = vadd.f32 %v1405_v58, %v6569_v31  ;;  %v1447_v44 = vadd.f32 %v1445_v17, %v1443_v0  ;;  %v6572_v58 = vld [vmem:[#allocation94_spill] sm:$0xff] }
 0x142   : > { %v1449_v19 = vmul.f32 %v4614_v20, %v6570_v63  ;;  %v1477_v39 = vadd.f32 %v1475_v6, %v1473_v27  ;;  %v1483_v46 = vmul.f32 %v4566_v32, %v6571_v59  ;;  %v1484_v28 = vmul.f32 %v4570_v45, %v6571_v59 }
 0x143   : > { %v1478_v23 = vadd.f32 %v1476_v18, %v1474_v4  ;;  %v4823_v60 = vadd.f32 %v1362_v35, %v1314_v57  ;;  %v1408_v15 = vadd.f32 %v1406_v40, %v6569_v31  ;;  %v1450_v12 = vmul.f32 %v4616_v54, %v6570_v63  ;;  %v6573_v18 = vld [vmem:[#allocation86_spill] sm:$0xff]  ;;  %v6574_v4 = vld [vmem:[#allocation95_spill] sm:$0xff] }
 0x144   : > { %v1487_v17 = vmul.f32 %v4572_v22, %v6572_v58  ;;  %v1448_v49 = vadd.f32 %v1446_v24, %v1444_v25  ;;  %v1481_v14 = vadd.f32 %v1479_v9, %v1477_v39  ;;  %v1488_v0 = vmul.f32 %v4582_v61, %v6572_v58  ;;  %v6578_v58 = vld [vmem:[#allocation103_spill] sm:$0xff] }
 0x145   : > { %v1482_v30 = vadd.f32 %v1480_v13, %v1478_v23  ;;  %v1409_v29 = vmax.f32 %v1407_v11, 0.0  ;;  %v1451_v6 = vadd.f32 %v1449_v19, %v1447_v44  ;;  %v1453_v57 = vmul.f32 %v4621_v56, %v6573_v18  ;;  %v6575_v23 = vld [vmem:[#allocation100_spill] sm:$0xff]  ;;  %v6576_v19 = vld [vmem:[#allocation101_spill] sm:$0xff] }
 0x146   : > { %v1454_v35 = vmul.f32 %v4651_v55, %v6573_v18  ;;  %v1485_v40 = vadd.f32 %v1483_v46, %v1481_v14  ;;  %v1491_v59 = vmul.f32 %v4585_v8, %v6574_v4  ;;  %v1492_v39 = vmul.f32 %v4602_v37, %v6574_v4 }
 0x147   : > { %v1486_v27 = vadd.f32 %v1484_v28, %v1482_v30  ;;  %v1519_v24 = vmul.f32 %v4519_v1, %v6575_v23  ;;  %v1520_v11 = vmul.f32 %v4524_v47, %v6575_v23  ;;  %v1521_v44 = vmul.f32 %v4526_v42, %v6576_v19  ;;  %v6577_v28 = vld [vmem:[#allocation96_spill] sm:$0xff] }
 0x148   : > { %v1522_v9 = vmul.f32 %v4535_v36, %v6576_v19  ;;  %v1452_v46 = vadd.f32 %v1450_v12, %v1448_v49  ;;  %v1489_v25 = vadd.f32 %v1487_v17, %v1485_v40  ;;  %v1495_v14 = vmul.f32 %v4608_v2, %v6577_v28  ;;  %v6579_v40 = vld [vmem:[#allocation104_spill] sm:$0xff]  ;;  %v6581_v19 = vld [vmem:[#allocation97_spill] sm:$0xff] }
 0x149   : > { %v1490_v13 = vadd.f32 %v1488_v0, %v1486_v27  ;;  %v1523_v30 = vadd.f32 %v1521_v44, %v1519_v24  ;;  %v1525_v18 = vmul.f32 %v4537_v10, %v6578_v58  ;;  %v1526_v23 = vmul.f32 %v4539_v33, %v6578_v58 }
 0x14a   : > { %v1524_v4 = vadd.f32 %v1522_v9, %v1520_v11  ;;  %v1367_v7 = vadd.f32 %v1365_v16, %v4768_v50  ;;  %v1410_v63 = vmax.f32 %v1408_v15, 0.0  ;;  %v1493_v31 = vadd.f32 %v1491_v59, %v1489_v25  ;;  %v6580_v11 = vld [vmem:[#allocation85_spill] sm:$0xff] }
 0x14b   : > { %v1496_v12 = vmul.f32 %v4610_v52, %v6577_v28  ;;  %v1494_v17 = vadd.f32 %v1492_v39, %v1490_v13  ;;  %v1527_v49 = vadd.f32 %v1525_v18, %v1523_v30  ;;  %v1529_v27 = vmul.f32 %v4542_v48, %v6579_v40  ;;  %v6585_v30 = vld [vmem:[#allocation107_spill] sm:$0xff] }
 0x14c   : > { %v1528_v0 = vadd.f32 %v1526_v23, %v1524_v4  ;;  %v1368_v24 = vadd.f32 %v1366_v3, %v4782_v34  ;;  %v1411_v44 = vmul.f32 %v1409_v29, %v6580_v11  ;;  %v1455_v9 = vadd.f32 %v1453_v57, %v1451_v6  ;;  %v6582_v6 = vld [vmem:[#allocation92_spill] sm:$0xff]  ;;  %v6610_v28 = vld [vmem:[#allocation131_spill] sm:$0xff] }
 0x14d   : > { %v1499_v58 = vmul.f32 %v4614_v20, %v6581_v19  ;;  %v1456_v50 = vadd.f32 %v1454_v35, %v1452_v46  ;;  %v1497_v16 = vadd.f32 %v1495_v14, %v1493_v31  ;;  %v1530_v59 = vmul.f32 %v4547_v51, %v6579_v40  ;;  %v6583_v31 = vld [vmem:[#allocation106_spill] sm:$0xff] }
 0x14e   : > { %v1531_v15 = vadd.f32 %v1529_v27, %v1527_v49  ;;  %v1498_v39 = vadd.f32 %v1496_v12, %v1494_v17  ;;  %v1500_v18 = vmul.f32 %v4616_v54, %v6581_v19  ;;  %v1533_v4 = vmul.f32 %v4566_v32, %v3835_v5  ;;  %v6584_v46 = vld [vmem:[#allocation102_spill] sm:$0xff]  ;;  %v6586_v17 = vld [vmem:[#allocation93_spill] sm:$0xff]  ;;  %v6587_v19 = vld [vmem:[#allocation108_spill] sm:$0xff] }
 0x14f   : > { %v1534_v34 = vmul.f32 %v4570_v45, %v3835_v5  ;;  %v1412_v3 = vmul.f32 %v1410_v63, %v6580_v11  ;;  %v1415_v57 = vmul.f32 %v1409_v29, %v6582_v6  ;;  %v1532_v35 = vadd.f32 %v1530_v59, %v1528_v0 }
 0x150   : > { %v1537_v23 = vmul.f32 %v4572_v22, %v6583_v31  ;;  %v1503_v25 = vmul.f32 %v4621_v56, %v6584_v46  ;;  %v1535_v13 = vadd.f32 %v1533_v4, %v1531_v15  ;;  %v1538_v14 = vmul.f32 %v4582_v61, %v6583_v31 }
 0x151   : > { %v1541_v12 = vmul.f32 %v4585_v8, %v6585_v30  ;;  %v1457_v49 = vadd.f32 %v1455_v9, %v6586_v17  ;;  %v1458_v27 = vadd.f32 %v1456_v50, %v6586_v17  ;;  %v1501_v5 = vadd.f32 %v1499_v58, %v1497_v16  ;;  %v6588_v16 = vld [vmem:[#allocation114_spill] sm:$0xff]  ;;  %v6595_v17 = vld [vmem:[#allocation117_spill] sm:$0xff] }
 0x152   : > { %v1536_v29 = vadd.f32 %v1534_v34, %v1532_v35  ;;  %v1416_v0 = vmul.f32 %v1410_v63, %v6582_v6  ;;  %v1502_v59 = vadd.f32 %v1500_v18, %v1498_v39  ;;  %v1504_v11 = vmul.f32 %v4651_v55, %v6584_v46 }
 0x153   : > { %v1539_v40 = vadd.f32 %v1537_v23, %v1535_v13  ;;  %v1413_v15 = vadd.f32 %v1411_v44, %v4814_v43  ;;  %v1414_v4 = vadd.f32 %v1412_v3, %v4823_v60  ;;  %v1542_v31 = vmul.f32 %v4602_v37, %v6585_v30  ;;  %v6589_v43 = vld [vmem:[#allocation115_spill] sm:$0xff]  ;;  %v6590_v23 = vld [vmem:[#allocation116_spill] sm:$0xff] }
 0x154   : > { %v1545_v9 = vmul.f32 %v4608_v2, %v6587_v19  ;;  %v1540_v50 = vadd.f32 %v1538_v14, %v1536_v29  ;;  %v1569_v63 = vmul.f32 %v4519_v1, %v6588_v16  ;;  %v1570_v39 = vmul.f32 %v4524_v47, %v6588_v16  ;;  %v6592_v16 = vld [vmem:[#allocation98_spill] sm:$0xff]  ;;  %v6593_v30 = vld [vmem:[#allocation99_spill] sm:$0xff] }
 0x155   : > { %v1543_v58 = vadd.f32 %v1541_v12, %v1539_v40  ;;  %v1459_v18 = vmax.f32 %v1457_v49, 0.0  ;;  %v1460_v34 = vmax.f32 %v1458_v27, 0.0  ;;  %v1505_v35 = vadd.f32 %v1503_v25, %v1501_v5  ;;  %v6591_v27 = vld [vmem:[#allocation110_spill] sm:$0xff] }
 0x156   : > { %v1571_v60 = vmul.f32 %v4526_v42, %v6589_v43  ;;  %v1506_v44 = vadd.f32 %v1504_v11, %v1502_v59  ;;  %v1572_v3 = vmul.f32 %v4535_v36, %v6589_v43  ;;  %v1575_v13 = vmul.f32 %v4537_v10, %v6590_v23 }
 0x157   : > { %v1576_v40 = vmul.f32 %v4539_v33, %v6590_v23  ;;  %v1417_v14 = vadd.f32 %v1415_v57, %v1367_v7  ;;  %v1418_v12 = vadd.f32 %v1416_v0, %v1368_v24  ;;  %v1546_v49 = vmul.f32 %v4610_v52, %v6587_v19  ;;  %v6594_v7 = vld [vmem:[#allocation109_spill] sm:$0xff] }
 0x158   : > { %v1549_v5 = vmul.f32 %v4614_v20, %v6591_v27  ;;  %v1544_v25 = vadd.f32 %v1542_v31, %v1540_v50  ;;  %v1547_v29 = vadd.f32 %v1545_v9, %v1543_v58  ;;  %v1573_v11 = vadd.f32 %v1571_v60, %v1569_v63  ;;  %v6596_v50 = vld [vmem:[#allocation118_spill] sm:$0xff] }
 0x159   : > { %v1574_v59 = vadd.f32 %v1572_v3, %v1570_v39  ;;  %v1461_v43 = vmul.f32 %v1459_v18, %v6592_v16  ;;  %v1462_v6 = vmul.f32 %v1460_v34, %v6592_v16  ;;  %v1465_v46 = vmul.f32 %v1459_v18, %v6593_v30 }
 0x15a   : > { %v1466_v23 = vmul.f32 %v1460_v34, %v6593_v30  ;;  %v1507_v24 = vadd.f32 %v1505_v35, %v6594_v7  ;;  %v1508_v57 = vadd.f32 %v1506_v44, %v6594_v7  ;;  %v1577_v0 = vadd.f32 %v1575_v13, %v1573_v11  ;;  %v6597_v35 = vld [vmem:[#allocation113_spill] sm:$0xff]  ;;  %v6598_v13 = vld [vmem:[#allocation119_spill] sm:$0xff] }
 0x15b   : > { %v1578_v19 = vadd.f32 %v1576_v40, %v1574_v59  ;;  %v1579_v31 = vmul.f32 %v4542_v48, %v6595_v17  ;;  %v1580_v9 = vmul.f32 %v4547_v51, %v6595_v17  ;;  %v1583_v58 = vmul.f32 %v4566_v32, %v6596_v50 }
 0x15c   : > { %v1584_v63 = vmul.f32 %v4570_v45, %v6596_v50  ;;  %v1548_v39 = vadd.f32 %v1546_v49, %v1544_v25  ;;  %v1550_v18 = vmul.f32 %v4616_v54, %v6591_v27  ;;  %v1551_v34 = vadd.f32 %v1549_v5, %v1547_v29  ;;  %v6599_v27 = vld [vmem:[#allocation120_spill] sm:$0xff] }
 0x15d   : > { %v1553_v60 = vmul.f32 %v4621_v56, %v6597_v35  ;;  %v1581_v44 = vadd.f32 %v1579_v31, %v1577_v0  ;;  %v1582_v3 = vadd.f32 %v1580_v9, %v1578_v19  ;;  %v1587_v40 = vmul.f32 %v4572_v22, %v6598_v13 }
 0x15e   : > { %v1588_v11 = vmul.f32 %v4582_v61, %v6598_v13  ;;  %v1463_v59 = vadd.f32 %v1461_v43, %v1413_v15  ;;  %v4930_v17 = vadd.f32 %v1465_v46, %v1417_v14  ;;  %v1509_v50 = vmax.f32 %v1507_v24, 0.0  ;;  %v6600_v43 = vld [vmem:[#allocation125_spill] sm:$0xff]  ;;  %v6601_v24 = vld [vmem:[#allocation111_spill] sm:$0xff] }
 0x15f   : > { %v1510_v49 = vmax.f32 %v1508_v57, 0.0  ;;  %v1585_v25 = vadd.f32 %v1583_v58, %v1581_v44  ;;  %v1586_v30 = vadd.f32 %v1584_v63, %v1582_v3  ;;  %v1591_v5 = vmul.f32 %v4585_v8, %v6599_v27  ;;  %v6602_v63 = vld [vmem:[#allocation122_spill] sm:$0xff] }
 0x160   : > { %v1592_v29 = vmul.f32 %v4602_v37, %v6599_v27  ;;  %v1464_v19 = vadd.f32 %v1462_v6, %v1414_v4  ;;  %v1468_v0 = vadd.f32 %v1466_v23, %v1418_v12  ;;  %v1552_v31 = vadd.f32 %v1550_v18, %v1548_v39  ;;  %v6603_v39 = vld [vmem:[#allocation126_spill] sm:$0xff]  ;;  %v6604_v18 = vld [vmem:[#allocation112_spill] sm:$0xff] }
 0x161   : > { %v1554_v9 = vmul.f32 %v4651_v55, %v6597_v35  ;;  %v1555_v13 = vadd.f32 %v1553_v60, %v1551_v34  ;;  %v1589_v15 = vadd.f32 %v1587_v40, %v1585_v25  ;;  %v1590_v46 = vadd.f32 %v1588_v11, %v1586_v30  ;;  %v6605_v40 = vld [vmem:[#allocation127_spill] sm:$0xff]  ;;  %v6606_v25 = vld [vmem:[#allocation121_spill] sm:$0xff]  ;;  %v6609_v35 = vld [vmem:[#allocation130_spill] sm:$0xff] }
 0x162   : > { %v1619_v14 = vmul.f32 %v4519_v1, %v6600_v43  ;;  %v1511_v57 = vmul.f32 %v1509_v50, %v6601_v24  ;;  %v1512_v58 = vmul.f32 %v1510_v49, %v6601_v24  ;;  %v1595_v44 = vmul.f32 %v4608_v2, %v6602_v63 }
 0x163   : > { %v1596_v6 = vmul.f32 %v4610_v52, %v6602_v63  ;;  %v1593_v4 = vadd.f32 %v1591_v5, %v1589_v15  ;;  %v1594_v23 = vadd.f32 %v1592_v29, %v1590_v46  ;;  %v1620_v12 = vmul.f32 %v4524_v47, %v6600_v43  ;;  %v6607_v63 = vld [vmem:[#allocation124_spill] sm:$0xff] }
 0x164   : > { %v1621_v30 = vmul.f32 %v4526_v42, %v6603_v39  ;;  %v1515_v34 = vmul.f32 %v1509_v50, %v6604_v18  ;;  %v1556_v60 = vadd.f32 %v1554_v9, %v1552_v31  ;;  %v1622_v3 = vmul.f32 %v4535_v36, %v6603_v39  ;;  %v6608_v31 = vld [vmem:[#allocation128_spill] sm:$0xff] }
 0x165   : > { %v1625_v11 = vmul.f32 %v4537_v10, %v6605_v40  ;;  %v1557_v27 = vadd.f32 %v1555_v13, %v6606_v25  ;;  %v1599_v5 = vmul.f32 %v4614_v20, %v6607_v63  ;;  %v1626_v15 = vmul.f32 %v4539_v33, %v6605_v40 }
 0x166   : > { %v1623_v29 = vadd.f32 %v1621_v30, %v1619_v14  ;;  %v1600_v46 = vmul.f32 %v4616_v54, %v6607_v63  ;;  %v1624_v50 = vadd.f32 %v1622_v3, %v1620_v12  ;;  %v1629_v9 = vmul.f32 %v4542_v48, %v6608_v31 }
 0x167   : > { %v1630_v39 = vmul.f32 %v4547_v51, %v6608_v31  ;;  %v1597_v43 = vadd.f32 %v1595_v44, %v1593_v4  ;;  %v1598_v24 = vadd.f32 %v1596_v6, %v1594_v23  ;;  %v1633_v7 = vmul.f32 %v4566_v32, %v6609_v35  ;;  %v6611_v6 = vld [vmem:[#allocation129_spill] sm:$0xff] }
 0x168   : > { %v1627_v13 = vadd.f32 %v1625_v11, %v1623_v29  ;;  %v1516_v14 = vmul.f32 %v1510_v49, %v6604_v18  ;;  %v1558_v30 = vadd.f32 %v1556_v60, %v6606_v25  ;;  %v1628_v40 = vadd.f32 %v1626_v15, %v1624_v50  ;;  %v6612_v15 = vld [vmem:[#allocation132_spill] sm:$0xff] }
 0x169   : > { %v1634_v12 = vmul.f32 %v4570_v45, %v6609_v35  ;;  %v1513_v3 = vadd.f32 %v1511_v57, %v1463_v59  ;;  %v1559_v63 = vmax.f32 %v1557_v27, 0.0  ;;  %v1637_v31 = vmul.f32 %v4572_v22, %v6610_v28  ;;  %v6618_v35 = vld [vmem:[#allocation133_spill] sm:$0xff] }
 0x16a   : > { %v1631_v16 = vadd.f32 %v1629_v9, %v1627_v13  ;;  %v4974_v44 = vadd.f32 %v1512_v58, %v1464_v19  ;;  %v1603_v4 = vmul.f32 %v4621_v56, %v6611_v6  ;;  %v1632_v23 = vadd.f32 %v1630_v39, %v1628_v40  ;;  %v6613_v19 = vld [vmem:[#allocation138_spill] sm:$0xff]  ;;  %v6614_v9 = vld [vmem:[#allocation123_spill] sm:$0xff] }
 0x16b   : > { %v1638_v49 = vmul.f32 %v4582_v61, %v6610_v28  ;;  %v1601_v60 = vadd.f32 %v1599_v5, %v1597_v43  ;;  %v1602_v11 = vadd.f32 %v1600_v46, %v1598_v24  ;;  %v1604_v29 = vmul.f32 %v4651_v55, %v6611_v6  ;;  %v6615_v5 = vld [vmem:[#allocation139_spill] sm:$0xff]  ;;  %v6616_v46 = vld [vmem:[#allocation140_spill] sm:$0xff] }
 0x16c   : > { %v1635_v59 = vadd.f32 %v1633_v7, %v1631_v16  ;;  %v1560_v27 = vmax.f32 %v1558_v30, 0.0  ;;  %v1636_v57 = vadd.f32 %v1634_v12, %v1632_v23  ;;  %v1641_v50 = vmul.f32 %v4585_v8, %v6612_v15 }
 0x16d   : > { %v1669_v58 = vmul.f32 %v4519_v1, %v6613_v19  ;;  %v1561_v13 = vmul.f32 %v1559_v63, %v6614_v9  ;;  %v1642_v40 = vmul.f32 %v4602_v37, %v6612_v15  ;;  %v1670_v43 = vmul.f32 %v4524_v47, %v6613_v19  ;;  %v6617_v15 = vld [vmem:[#allocation134_spill] sm:$0xff] }
 0x16e   : > { %v1639_v39 = vadd.f32 %v1637_v31, %v1635_v59  ;;  %v1640_v24 = vadd.f32 %v1638_v49, %v1636_v57  ;;  %v1671_v16 = vmul.f32 %v4526_v42, %v6615_v5  ;;  %v1672_v7 = vmul.f32 %v4535_v36, %v6615_v5 }
 0x16f   : > { %v1675_v30 = vmul.f32 %v4537_v10, %v6616_v46  ;;  %v1517_v12 = vadd.f32 %v1515_v34, %v4930_v17  ;;  %v1518_v23 = vadd.f32 %v1516_v14, %v1468_v0  ;;  %v1605_v31 = vadd.f32 %v1603_v4, %v1601_v60  ;;  %v6620_v14 = vld [vmem:[#allocation135_spill] sm:$0xff]  ;;  %v6621_v60 = vld [vmem:[#allocation141_spill] sm:$0xff] }
 0x170   : > { %v1606_v59 = vadd.f32 %v1604_v29, %v1602_v11  ;;  %v1643_v28 = vadd.f32 %v1641_v50, %v1639_v39  ;;  %v1645_v6 = vmul.f32 %v4608_v2, %v6617_v15  ;;  %v1673_v19 = vadd.f32 %v1671_v16, %v1669_v58  ;;  %v6622_v29 = vld [vmem:[#allocation142_spill] sm:$0xff] }
 0x171   : > { %v1674_v49 = vadd.f32 %v1672_v7, %v1670_v43  ;;  %v1562_v57 = vmul.f32 %v1560_v27, %v6614_v9  ;;  %v1565_v25 = vmul.f32 %v1559_v63, %v6618_v35  ;;  %v1644_v18 = vadd.f32 %v1642_v40, %v1640_v24  ;;  %v6623_v24 = vld [vmem:[#allocation144_spill] sm:$0xff] }
 0x172   : > { %v1646_v5 = vmul.f32 %v4610_v52, %v6617_v15  ;;  %v1563_v62 = vadd.f32 %v1561_v13, %v1513_v3  ;;  %v1649_v17 = vmul.f32 %v4614_v20, %v6619_v41  ;;  %v1676_v0 = vmul.f32 %v4539_v33, %v6616_v46 }
 0x173   : > { %v1677_v34 = vadd.f32 %v1675_v30, %v1673_v19  ;;  %v1607_v4 = vadd.f32 %v1605_v31, %v6620_v14  ;;  %v1679_v11 = vmul.f32 %v4542_v48, %v6621_v60  ;;  %v1680_v63 = vmul.f32 %v4547_v51, %v6621_v60 }
 0x174   : > { %v1683_v50 = vmul.f32 %v4566_v32, %v6622_v29  ;;  %v1608_v3 = vadd.f32 %v1606_v59, %v6620_v14  ;;  %v1647_v58 = vadd.f32 %v1645_v6, %v1643_v28  ;;  %v1678_v13 = vadd.f32 %v1676_v0, %v1674_v49  ;;  %v6624_v28 = vld [vmem:[#allocation137_spill] sm:$0xff]  ;;  %v6625_v49 = vld [vmem:[#allocation146_spill] sm:$0xff] }
 0x175   : > { %v1684_v39 = vmul.f32 %v4570_v45, %v6622_v29  ;;  %v1648_v40 = vadd.f32 %v1646_v5, %v1644_v18  ;;  %v1650_v19 = vmul.f32 %v4616_v54, %v6619_v41  ;;  %v1681_v43 = vadd.f32 %v1679_v11, %v1677_v34  ;;  %v6628_v14 = vld [vmem:[#allocation153_spill] sm:$0xff] }
 0x176   : > { %v1687_v16 = vmul.f32 %v4572_v22, %v6623_v24  ;;  %v1566_v7 = vmul.f32 %v1560_v27, %v6618_v35  ;;  %v1567_v30 = vadd.f32 %v1565_v25, %v1517_v12  ;;  %v1682_v31 = vadd.f32 %v1680_v63, %v1678_v13  ;;  %v6626_v12 = vld [vmem:[#allocation152_spill] sm:$0xff]  ;;  %v6691_v35 = vld [vmem:[#allocation51_spill] sm:$0xff] }
 0x177   : > { %v1688_v59 = vmul.f32 %v4582_v61, %v6623_v24  ;;  %v1653_v6 = vmul.f32 %v4621_v56, %v6624_v28  ;;  %v1654_v18 = vmul.f32 %v4651_v55, %v6624_v28  ;;  %v1685_v5 = vadd.f32 %v1683_v50, %v1681_v43  ;;  %v6627_v50 = vld [vmem:[#allocation148_spill] sm:$0xff] }
 0x178   : > { %v1691_v0 = vmul.f32 %v4585_v8, %v6625_v49  ;;  %v1609_v34 = vmax.f32 %v1607_v4, 0.0  ;;  %v1610_v11 = vmax.f32 %v1608_v3, 0.0  ;;  %v1651_v29 = vadd.f32 %v1649_v17, %v1647_v58  ;;  %v6629_v58 = vld [vmem:[#allocation154_spill] sm:$0xff] }
 0x179   : > { %v1686_v60 = vadd.f32 %v1684_v39, %v1682_v31  ;;  %v1652_v27 = vadd.f32 %v1650_v19, %v1648_v40  ;;  %v1689_v25 = vadd.f32 %v1687_v16, %v1685_v5  ;;  %v1719_v63 = vmul.f32 %v4519_v1, %v6626_v12  ;;  %v6630_v40 = vld [vmem:[#allocation145_spill] sm:$0xff] }
 0x17a   : > { %v1720_v13 = vmul.f32 %v4524_v47, %v6626_v12  ;;  %v1692_v28 = vmul.f32 %v4602_v37, %v6625_v49  ;;  %v1695_v43 = vmul.f32 %v4608_v2, %v6627_v50  ;;  %v1721_v4 = vmul.f32 %v4526_v42, %v6628_v14  ;;  %v6689_v12 = vld [vmem:[#allocation50_spill] sm:$0xff] }
 0x17b   : > { %v1690_v24 = vadd.f32 %v1688_v59, %v1686_v60  ;;  %v1693_v17 = vadd.f32 %v1691_v0, %v1689_v25  ;;  %v1722_v3 = vmul.f32 %v4535_v36, %v6628_v14  ;;  %v1725_v1 = vmul.f32 %v4537_v10, %v6629_v58  ;;  %v6631_v0 = vld [vmem:[#allocation147_spill] sm:$0xff]  ;;  %v6632_v14 = vld [vmem:[#allocation149_spill] sm:$0xff] }
 0x17c   : > { %v1726_v47 = vmul.f32 %v4539_v33, %v6629_v58  ;;  %v1564_v60 = vadd.f32 %v1562_v57, %v4974_v44  ;;  %v1568_v39 = vadd.f32 %v1566_v7, %v1518_v23  ;;  %v1611_v19 = vmul.f32 %v1609_v34, %v6630_v40  ;;  %v6633_v58 = vld [vmem:[#allocation155_spill] sm:$0xff] }
 0x17d   : > { %v1612_v16 = vmul.f32 %v1610_v11, %v6630_v40  ;;  %v1655_v31 = vadd.f32 %v1653_v6, %v1651_v29  ;;  %v1656_v59 = vadd.f32 %v1654_v18, %v1652_v27  ;;  %v1723_v42 = vadd.f32 %v1721_v4, %v1719_v63  ;;  %v6634_v18 = vld [vmem:[#allocation156_spill] sm:$0xff]  ;;  %v6636_v4 = vld [vmem:[#allocation157_spill] sm:$0xff] }
 0x17e   : > { %v1724_v5 = vadd.f32 %v1722_v3, %v1720_v13  ;;  %v1615_v25 = vmul.f32 %v1609_v34, %v6631_v0  ;;  %v1616_v36 = vmul.f32 %v1610_v11, %v6631_v0  ;;  %v1696_v10 = vmul.f32 %v4610_v52, %v6627_v50  ;;  %v6637_v3 = vld [vmem:[#allocation151_spill] sm:$0xff] }
 0x17f   : > { %v1699_v33 = vmul.f32 %v4614_v20, %v6632_v14  ;;  %v1694_v44 = vadd.f32 %v1692_v28, %v1690_v24  ;;  %v1697_v23 = vadd.f32 %v1695_v43, %v1693_v17  ;;  %v1727_v57 = vadd.f32 %v1725_v1, %v1723_v42  ;;  %v6635_v24 = vld [vmem:[#allocation143_spill] sm:$0xff] }
 0x180   : > { %v1728_v7 = vadd.f32 %v1726_v47, %v1724_v5  ;;  %v1729_v29 = vmul.f32 %v4542_v48, %v6633_v58  ;;  %v1730_v6 = vmul.f32 %v4547_v51, %v6633_v58  ;;  %v1733_v34 = vmul.f32 %v4566_v32, %v6634_v18 }
 0x181   : > { %v1734_v11 = vmul.f32 %v4570_v45, %v6634_v18  ;;  %v1613_v27 = vadd.f32 %v1611_v19, %v1563_v62  ;;  %v5064_v63 = vadd.f32 %v1612_v16, %v1564_v60  ;;  %v1657_v28 = vadd.f32 %v1655_v31, %v6635_v24  ;;  %v6638_v19 = vld [vmem:[#allocation159_spill] sm:$0xff]  ;;  %v6670_v18 = vld [vmem:[#allocation30_spill] sm:$0xff] }
 0x182   : > { %v1658_v13 = vadd.f32 %v1656_v59, %v6635_v24  ;;  %v1731_v43 = vadd.f32 %v1729_v29, %v1727_v57  ;;  %v1732_v48 = vadd.f32 %v1730_v6, %v1728_v7  ;;  %v1737_v51 = vmul.f32 %v4572_v22, %v6636_v4  ;;  %v5081_v31 = vld [vmem:[%s2919_s6 + $0x40] sm:$0xff] }
 0x183   : > { %v1738_v32 = vmul.f32 %v4582_v61, %v6636_v4  ;;  %v1698_v45 = vadd.f32 %v1696_v10, %v1694_v44  ;;  %v1700_v62 = vmul.f32 %v4616_v54, %v6632_v14  ;;  %v1701_v17 = vadd.f32 %v1699_v33, %v1697_v23  ;;  %v5084_v61 = vld [vmem:[%s2919_s6 + $0x48] sm:$0xff]  ;;  %v5089_v33 = vld [vmem:[%s2919_s6 + $0x50] sm:$0xff]  ;;  %v5092_v44 = vld [vmem:[%s2919_s6 + $0x58] sm:$0xff]  ;;  %s2560_s6 = sshll.u32 %s211_s4, 5 }
 0x184   : > { %v1703_v1 = vmul.f32 %v4621_v56, %v6637_v3  ;;  %v1735_v47 = vadd.f32 %v1733_v34, %v1731_v43  ;;  %v1736_v60 = vadd.f32 %v1734_v11, %v1732_v48  ;;  %v1741_v16 = vmul.f32 %v4585_v8, %v6638_v19  ;;  %v6639_v8 = vld [vmem:[#allocation160_spill] sm:$0xff]  ;;  %s231_s11 = scalar_lea.vmem [#allocation5], %s2560_s6 }
 0x185   : > { %v1742_v22 = vmul.f32 %v4602_v37, %v6638_v19  ;;  %v1617_v59 = vadd.f32 %v1615_v25, %v1567_v30  ;;  %v1659_v42 = vmax.f32 %v1657_v28, 0.0  ;;  %v1660_v5 = vmax.f32 %v1658_v13, 0.0  ;;  %v6640_v30 = vld [vmem:[#allocation7_spill] sm:$0xff]  ;;  %v6641_v13 = vld [vmem:[#allocation8_spill] sm:$0xff] }
 0x186   : > { %v1704_v10 = vmul.f32 %v4651_v55, %v6637_v3  ;;  %v1739_v23 = vadd.f32 %v1737_v51, %v1735_v47  ;;  %v1740_v57 = vadd.f32 %v1738_v32, %v1736_v60  ;;  %v1745_v7 = vmul.f32 %v4608_v2, %v6639_v8  ;;  %v6642_v51 = vld [vmem:[#allocation150_spill] sm:$0xff]  ;;  %v6644_v60 = vld [vmem:[#allocation9_spill] sm:$0xff] }
 0x187   : > { %v1746_v37 = vmul.f32 %v4610_v52, %v6639_v8  ;;  %v1702_v29 = vadd.f32 %v1700_v62, %v1698_v45  ;;  %v1705_v6 = vadd.f32 %v1703_v1, %v1701_v17  ;;  %v1775_v25 = vmul.f32 %v5081_v31, %v6640_v30  ;;  %v6643_v52 = vld [vmem:[#allocation161_spill] sm:$0xff] }
 0x188   : > { %v1776_v34 = vmul.f32 %v5084_v61, %v6640_v30  ;;  %v1743_v11 = vadd.f32 %v1741_v16, %v1739_v23  ;;  %v1744_v28 = vadd.f32 %v1742_v22, %v1740_v57  ;;  %v1777_v43 = vmul.f32 %v5089_v33, %v6641_v13  ;;  %v6645_v22 = vld [vmem:[#allocation162_spill] sm:$0xff] }
 0x189   : > { %v1778_v48 = vmul.f32 %v5092_v44, %v6641_v13  ;;  %v1618_v2 = vadd.f32 %v1616_v36, %v1568_v39  ;;  %v1661_v32 = vmul.f32 %v1659_v42, %v6642_v51  ;;  %v1749_v45 = vmul.f32 %v4614_v20, %v6643_v52  ;;  %v6646_v36 = vld [vmem:[#allocation11_spill] sm:$0xff]  ;;  %v6647_v20 = vld [vmem:[#allocation158_spill] sm:$0xff] }
 0x18a   : > { %v1750_v62 = vmul.f32 %v4616_v54, %v6643_v52  ;;  %v1662_v17 = vmul.f32 %v1660_v5, %v6642_v51  ;;  %v1747_v1 = vadd.f32 %v1745_v7, %v1743_v11  ;;  %v1748_v47 = vadd.f32 %v1746_v37, %v1744_v28  ;;  %v6648_v54 = vld [vmem:[#allocation163_spill] sm:$0xff] }
 0x18b   : > { %v1785_v16 = vmul.f32 %v5081_v31, %v6644_v60  ;;  %v1665_v23 = vmul.f32 %v1659_v42, %v6645_v22  ;;  %v1706_v57 = vadd.f32 %v1704_v10, %v1702_v29  ;;  %v1786_v39 = vmul.f32 %v5084_v61, %v6644_v60 }
 0x18c   : > { %v1787_v30 = vmul.f32 %v5089_v33, %v6646_v36  ;;  %v5120_v13 = vadd.f32 %v1705_v6, %v6647_v20  ;;  %v1753_v52 = vmul.f32 %v4621_v56, %v6648_v54  ;;  %v1779_v7 = vadd.f32 %v1777_v43, %v1775_v25  ;;  %v6649_v6 = vld [vmem:[#allocation12_spill] sm:$0xff]  ;;  %v6650_v25 = vld [vmem:[#allocation13_spill] sm:$0xff] }
 0x18d   : > { %v1780_v37 = vadd.f32 %v1778_v48, %v1776_v34  ;;  %v1751_v11 = vadd.f32 %v1749_v45, %v1747_v1  ;;  %v1752_v28 = vadd.f32 %v1750_v62, %v1748_v47  ;;  %v1754_v42 = vmul.f32 %v4651_v55, %v6648_v54  ;;  %v6652_v1 = vld [vmem:[#allocation14_spill] sm:$0xff] }
 0x18e   : > { %v1788_v10 = vmul.f32 %v5092_v44, %v6646_v36  ;;  %v5128_v29 = vadd.f32 %v1661_v32, %v1613_v27  ;;  %v1666_v60 = vmul.f32 %v1660_v5, %v6645_v22  ;;  %v1789_v51 = vadd.f32 %v1787_v30, %v1785_v16  ;;  %v6651_v5 = vld [vmem:[#allocation10_spill] sm:$0xff] }
 0x18f   : > { %v1795_v8 = vmul.f32 %v5081_v31, %v6649_v6  ;;  %v1796_v56 = vmul.f32 %v5084_v61, %v6649_v6  ;;  %v1797_v34 = vmul.f32 %v5089_v33, %v6650_v25  ;;  %v1798_v55 = vmul.f32 %v5092_v44, %v6650_v25 }
 0x190   : > { %v1790_v19 = vadd.f32 %v1788_v10, %v1786_v39  ;;  %v5140_v43 = vadd.f32 %v1706_v57, %v6647_v20  ;;  %v6303_v27 = vmax.f32 %v5120_v13, 0.0  ;;  %v1781_v48 = vadd.f32 %v1779_v7, %v6651_v5  ;;  %v6653_v39 = vld [vmem:[#allocation15_spill] sm:$0xff]  ;;  %v6654_v57 = vld [vmem:[#allocation16_spill] sm:$0xff]  ;;  %v6665_v20 = vld [vmem:[#allocation25_spill] sm:$0xff] }
 0x191   : > { %v1782_v32 = vadd.f32 %v1780_v37, %v6651_v5  ;;  %v1755_v45 = vadd.f32 %v1753_v52, %v1751_v11  ;;  %v1756_v62 = vadd.f32 %v1754_v42, %v1752_v28  ;;  %v1805_v47 = vmul.f32 %v5081_v31, %v6652_v1 }
 0x192   : > { %v1806_v16 = vmul.f32 %v5084_v61, %v6652_v1  ;;  %v1791_v36 = vadd.f32 %v1789_v51, %v6653_v39  ;;  %v1792_v30 = vadd.f32 %v1790_v19, %v6653_v39  ;;  %v1807_v10 = vmul.f32 %v5089_v33, %v6654_v57  ;;  %v6655_v51 = vld [vmem:[#allocation164_spill] sm:$0xff]  ;;  %v6660_v39 = vld [vmem:[#allocation21_spill] sm:$0xff] }
 0x193   : > { %v1808_v7 = vmul.f32 %v5092_v44, %v6654_v57  ;;  %v5156_v37 = vadd.f32 %v1662_v17, %v5064_v63  ;;  %v5158_v52 = vadd.f32 %v1665_v23, %v1617_v59  ;;  %v1799_v11 = vadd.f32 %v1797_v34, %v1795_v8  ;;  %v6656_v17 = vld [vmem:[#allocation18_spill] sm:$0xff]  ;;  %v6658_v34 = vld [vmem:[#allocation17_spill] sm:$0xff] }
 0x194   : > { %v1800_v28 = vadd.f32 %v1798_v55, %v1796_v56  ;;  %v5160_v42 = vadd.f32 %v1666_v60, %v1618_v2  ;;  %v5166_v19 = vmul.f32 %v6303_v27, %v6655_v51  ;;  %v5168_v25 = vmax.f32 %v1781_v48, 0.0  ;;  %v6657_v8 = vld [vmem:[#allocation166_spill] sm:$0xff] }
 0x195   : > { %v5170_v5 = vmax.f32 %v1782_v32, 0.0  ;;  %v1809_v1 = vadd.f32 %v1807_v10, %v1805_v47  ;;  %v1810_v63 = vadd.f32 %v1808_v7, %v1806_v16  ;;  %v1815_v59 = vmul.f32 %v5081_v31, %v6656_v17  ;;  %v6659_v47 = vld [vmem:[#allocation19_spill] sm:$0xff]  ;;  %v6662_v10 = vld [vmem:[#allocation20_spill] sm:$0xff] }
 0x196   : > { %v5175_v23 = vadd.f32 %v1755_v45, %v6657_v8  ;;  %v5178_v2 = vadd.f32 %v1756_v62, %v6657_v8  ;;  %v5180_v60 = vmax.f32 %v1791_v36, 0.0  ;;  %v5182_v56 = vmax.f32 %v1792_v30, 0.0  ;;  %v6661_v30 = vld [vmem:[#allocation22_spill] sm:$0xff] }
 0x197   : > { %v1801_v55 = vadd.f32 %v1799_v11, %v6658_v34  ;;  %v1802_v48 = vadd.f32 %v1800_v28, %v6658_v34  ;;  %v1816_v32 = vmul.f32 %v5084_v61, %v6656_v17  ;;  %v1817_v16 = vmul.f32 %v5089_v33, %v6659_v47 }
 0x198   : > { %v1818_v45 = vmul.f32 %v5092_v44, %v6659_v47  ;;  %v1825_v62 = vmul.f32 %v5081_v31, %v6660_v39  ;;  %v1826_v36 = vmul.f32 %v5084_v61, %v6660_v39  ;;  %v1827_v57 = vmul.f32 %v5089_v33, %v6661_v30  ;;  %v6663_v47 = vld [vmem:[#allocation24_spill] sm:$0xff]  ;;  %v6664_v39 = vld [vmem:[#allocation23_spill] sm:$0xff] }
 0x199   : > { %v1811_v7 = vadd.f32 %v1809_v1, %v6662_v10  ;;  %v1812_v11 = vadd.f32 %v1810_v63, %v6662_v10  ;;  %v1819_v28 = vadd.f32 %v1817_v16, %v1815_v59  ;;  %v1828_v17 = vmul.f32 %v5092_v44, %v6661_v30 }
 0x19a   : > { %v1820_v34 = vadd.f32 %v1818_v45, %v1816_v32  ;;  %v1829_v27 = vadd.f32 %v1827_v57, %v1825_v62  ;;  %v1835_v6 = vmul.f32 %v5081_v31, %v6663_v47  ;;  %v1836_v8 = vmul.f32 %v5084_v61, %v6663_v47  ;;  %v6666_v32 = vld [vmem:[#allocation27_spill] sm:$0xff]  ;;  %v6667_v57 = vld [vmem:[#allocation26_spill] sm:$0xff] }
 0x19b   : > { %v1821_v54 = vadd.f32 %v1819_v28, %v6664_v39  ;;  %v1830_v22 = vadd.f32 %v1828_v17, %v1826_v36  ;;  %v1837_v1 = vmul.f32 %v5089_v33, %v6665_v20  ;;  %v1838_v63 = vmul.f32 %v5092_v44, %v6665_v20 }
 0x19c   : > { %v5211_v59 = vmax.f32 %v1801_v55, 0.0  ;;  %v5213_v16 = vmax.f32 %v1802_v48, 0.0  ;;  %v1845_v45 = vmul.f32 %v5081_v31, %v6666_v32  ;;  %v1846_v62 = vmul.f32 %v5084_v61, %v6666_v32  ;;  %v6668_v55 = vld [vmem:[#allocation28_spill] sm:$0xff] }
 0x19d   : > { %v5219_v30 = vmax.f32 %v1811_v7, 0.0  ;;  %v1822_v36 = vadd.f32 %v1820_v34, %v6664_v39  ;;  %v1831_v10 = vadd.f32 %v1829_v27, %v6667_v57  ;;  %v1839_v28 = vadd.f32 %v1837_v1, %v1835_v6  ;;  %v6669_v7 = vld [vmem:[#allocation29_spill] sm:$0xff] }
 0x19e   : > { %v1832_v17 = vadd.f32 %v1830_v22, %v6667_v57  ;;  %v1840_v20 = vadd.f32 %v1838_v63, %v1836_v8  ;;  %v1847_v48 = vmul.f32 %v5089_v33, %v6668_v55  ;;  %v1848_v47 = vmul.f32 %v5092_v44, %v6668_v55  ;;  %v6671_v8 = vld [vmem:[#allocation32_spill] sm:$0xff] }
 0x19f   : > { %v5228_v4 = vmax.f32 %v1812_v11, 0.0  ;;  %v5230_v0 = vmax.f32 %v1821_v54, 0.0  ;;  %v1841_v32 = vadd.f32 %v1839_v28, %v6669_v7  ;;  %v1855_v34 = vmul.f32 %v5081_v31, %v6670_v18  ;;  %v6672_v11 = vld [vmem:[#allocation33_spill] sm:$0xff] }
 0x1a0   : > { %v1849_v27 = vadd.f32 %v1847_v48, %v1845_v45  ;;  %v1850_v6 = vadd.f32 %v1848_v47, %v1846_v62  ;;  %v1856_v22 = vmul.f32 %v5084_v61, %v6670_v18  ;;  %v1857_v39 = vmul.f32 %v5089_v33, %v6671_v8  ;;  %v6673_v48 = vld [vmem:[#allocation34_spill] sm:$0xff]  ;;  %v6674_v47 = vld [vmem:[#allocation36_spill] sm:$0xff] }
 0x1a1   : > { %v5239_v1 = vmax.f32 %v1822_v36, 0.0  ;;  %v5241_v63 = vmax.f32 %v1831_v10, 0.0  ;;  %v1858_v54 = vmul.f32 %v5092_v44, %v6671_v8  ;;  %v1865_v57 = vmul.f32 %v5081_v31, %v6672_v11  ;;  %v6675_v31 = vld [vmem:[#allocation31_spill] sm:$0xff] }
 0x1a2   : > { %v5247_v28 = vmax.f32 %v1832_v17, 0.0  ;;  %v1842_v45 = vadd.f32 %v1840_v20, %v6669_v7  ;;  %v1859_v62 = vadd.f32 %v1857_v39, %v1855_v34  ;;  %v1866_v18 = vmul.f32 %v5084_v61, %v6672_v11  ;;  %v6676_v61 = vld [vmem:[#allocation35_spill] sm:$0xff] }
 0x1a3   : > { %v1860_v55 = vadd.f32 %v1858_v54, %v1856_v22  ;;  %v1867_v36 = vmul.f32 %v5089_v33, %v6673_v48  ;;  %v1868_v10 = vmul.f32 %v5092_v44, %v6673_v48  ;;  %v1875_v8 = vmul.f32 %v5168_v25, %v6674_v47  ;;  %v6677_v33 = vld [vmem:[#allocation38_spill] sm:$0xff]  ;;  %v6678_v11 = vld [vmem:[#allocation39_spill] sm:$0xff] }
 0x1a4   : > { %v5258_v58 = vmax.f32 %v1841_v32, 0.0  ;;  %v1851_v17 = vadd.f32 %v1849_v27, %v6675_v31  ;;  %v1852_v20 = vadd.f32 %v1850_v6, %v6675_v31  ;;  %v1876_v7 = vmul.f32 %v5170_v5, %v6674_v47  ;;  %v6679_v47 = vld [vmem:[#allocation37_spill] sm:$0xff] }
 0x1a5   : > { %v1861_v34 = vadd.f32 %v1859_v62, %v6676_v61  ;;  %v1869_v22 = vadd.f32 %v1867_v36, %v1865_v57  ;;  %v1870_v39 = vadd.f32 %v1868_v10, %v1866_v18  ;;  %v1877_v54 = vmul.f32 %v5180_v60, %v6677_v33 }
 0x1a6   : > { %v1862_v44 = vadd.f32 %v1860_v55, %v6676_v61  ;;  %v1878_v32 = vmul.f32 %v5182_v56, %v6677_v33  ;;  %v1881_v27 = vmul.f32 %v5211_v59, %v6678_v11  ;;  %v1882_v6 = vmul.f32 %v5213_v16, %v6678_v11  ;;  %v6680_v55 = vld [vmem:[#allocation40_spill] sm:$0xff]  ;;  %v6681_v11 = vld [vmem:[#allocation41_spill] sm:$0xff] }
 0x1a7   : > { %v5274_v48 = vmax.f32 %v1842_v45, 0.0  ;;  %v1871_v62 = vadd.f32 %v1869_v22, %v6679_v47  ;;  %v1872_v57 = vadd.f32 %v1870_v39, %v6679_v47  ;;  %v1879_v18 = vadd.f32 %v1877_v54, %v1875_v8  ;;  %v6683_v47 = vld [vmem:[#allocation43_spill] sm:$0xff] }
 0x1a8   : > { %v5278_v36 = vmax.f32 %v1851_v17, 0.0  ;;  %v1880_v10 = vadd.f32 %v1878_v32, %v1876_v7  ;;  %v1885_v31 = vmul.f32 %v5219_v30, %v6680_v55  ;;  %v1886_v61 = vmul.f32 %v5228_v4, %v6680_v55  ;;  %v6682_v32 = vld [vmem:[#allocation42_spill] sm:$0xff]  ;;  %v6685_v55 = vld [vmem:[#allocation47_spill] sm:$0xff] }
 0x1a9   : > { %v5284_v33 = vmax.f32 %v1852_v20, 0.0  ;;  %v5286_v24 = vmax.f32 %v1861_v34, 0.0  ;;  %v1883_v45 = vadd.f32 %v1881_v27, %v1879_v18  ;;  %v1889_v22 = vmul.f32 %v5230_v0, %v6681_v11 }
 0x1aa   : > { %v5290_v40 = vmax.f32 %v1862_v44, 0.0  ;;  %v5292_v8 = vmax.f32 %v1871_v62, 0.0  ;;  %v1884_v17 = vadd.f32 %v1882_v6, %v1880_v10  ;;  %v1890_v7 = vmul.f32 %v5239_v1, %v6681_v11  ;;  %v6684_v6 = vld [vmem:[#allocation44_spill] sm:$0xff] }
 0x1ab   : > { %v5296_v39 = vmax.f32 %v1872_v57, 0.0  ;;  %v1887_v54 = vadd.f32 %v1885_v31, %v1883_v45  ;;  %v1893_v20 = vmul.f32 %v5241_v63, %v6682_v32  ;;  %v1894_v34 = vmul.f32 %v5247_v28, %v6682_v32  ;;  %v6686_v11 = vld [vmem:[#allocation48_spill] sm:$0xff] }
 0x1ac   : > { %v1888_v27 = vadd.f32 %v1886_v61, %v1884_v17  ;;  %v1897_v44 = vmul.f32 %v5258_v58, %v6683_v47  ;;  %v1898_v62 = vmul.f32 %v5274_v48, %v6683_v47  ;;  %v1901_v18 = vmul.f32 %v5278_v36, %v6684_v6  ;;  %v6687_v47 = vld [vmem:[#allocation49_spill] sm:$0xff] }
 0x1ad   : > { %v1891_v10 = vadd.f32 %v1889_v22, %v1887_v54  ;;  %v1902_v57 = vmul.f32 %v5284_v33, %v6684_v6  ;;  %v1925_v31 = vmul.f32 %v5168_v25, %v6685_v55  ;;  %v1926_v45 = vmul.f32 %v5170_v5, %v6685_v55  ;;  %v6688_v54 = vld [vmem:[#allocation45_spill] sm:$0xff] }
 0x1ae   : > { %v1892_v61 = vadd.f32 %v1890_v7, %v1888_v27  ;;  %v1927_v17 = vmul.f32 %v5180_v60, %v6686_v11  ;;  %v1928_v32 = vmul.f32 %v5182_v56, %v6686_v11  ;;  %v1931_v3 = vmul.f32 %v5211_v59, %v6687_v47 }
 0x1af   : > { %v1895_v22 = vadd.f32 %v1893_v20, %v1891_v10  ;;  %v1905_v6 = vmul.f32 %v5286_v24, %v6688_v54  ;;  %v1932_v14 = vmul.f32 %v5213_v16, %v6687_v47  ;;  %v1935_v55 = vmul.f32 %v5219_v30, %v6689_v12  ;;  %v6690_v20 = vld [vmem:[#allocation46_spill] sm:$0xff] }
 0x1b0   : > { %v1896_v7 = vadd.f32 %v1894_v34, %v1892_v61  ;;  %v1929_v27 = vadd.f32 %v1927_v17, %v1925_v31  ;;  %v1930_v50 = vadd.f32 %v1928_v32, %v1926_v45  ;;  %v1936_v49 = vmul.f32 %v5228_v4, %v6689_v12 }
 0x1b1   : > { %v1899_v11 = vadd.f32 %v1897_v44, %v1895_v22  ;;  %v1906_v41 = vmul.f32 %v5290_v40, %v6688_v54  ;;  %v1909_v10 = vmul.f32 %v5292_v8, %v6690_v20  ;;  %v1939_v9 = vmul.f32 %v5230_v0, %v6691_v35  ;;  %v6692_v44 = vld [vmem:[#allocation52_spill] sm:$0xff]  ;;  %v6693_v54 = vld [vmem:[#allocation53_spill] sm:$0xff] }
 0x1b2   : > { %v1900_v47 = vadd.f32 %v1898_v62, %v1896_v7  ;;  %v1933_v46 = vadd.f32 %v1931_v3, %v1929_v27  ;;  %v1934_v15 = vadd.f32 %v1932_v14, %v1930_v50  ;;  %v1940_v34 = vmul.f32 %v5239_v1, %v6691_v35  ;;  %v6695_v27 = vld [vmem:[#allocation63_spill] sm:$0xff] }
 0x1b3   : > { %v1903_v31 = vadd.f32 %v1901_v18, %v1899_v11  ;;  %v1910_v12 = vmul.f32 %v5296_v39, %v6690_v20  ;;  %v1943_v45 = vmul.f32 %v5241_v63, %v6692_v44  ;;  %v1944_v61 = vmul.f32 %v5247_v28, %v6692_v44 }
 0x1b4   : > { %v1904_v17 = vadd.f32 %v1902_v57, %v1900_v47  ;;  %v1937_v32 = vadd.f32 %v1935_v55, %v1933_v46  ;;  %v1938_v22 = vadd.f32 %v1936_v49, %v1934_v15  ;;  %v1947_v3 = vmul.f32 %v5258_v58, %v6693_v54  ;;  %v6694_v46 = vld [vmem:[#allocation59_spill] sm:$0xff] }
 0x1b5   : > { %v1948_v14 = vmul.f32 %v5274_v48, %v6693_v54  ;;  %v1951_v35 = vmul.f32 %v5278_v36, %v6534_v38  ;;  %v1952_v50 = vmul.f32 %v5284_v33, %v6534_v38  ;;  %v1955_v62 = vmul.f32 %v5286_v24, %v6538_v26 }
 0x1b6   : > { %v1907_v18 = vadd.f32 %v1905_v6, %v1903_v31  ;;  %v1941_v7 = vadd.f32 %v1939_v9, %v1937_v32  ;;  %v1942_v57 = vadd.f32 %v1940_v34, %v1938_v22  ;;  %v1975_v15 = vmul.f32 %v5168_v25, %v6694_v46 }
 0x1b7   : > { %v1956_v49 = vmul.f32 %v5290_v40, %v6538_v26  ;;  %v1976_v55 = vmul.f32 %v5170_v5, %v6694_v46  ;;  %v1977_v11 = vmul.f32 %v5180_v60, %v6695_v27  ;;  %v1978_v38 = vmul.f32 %v5182_v56, %v6695_v27  ;;  %v6696_v46 = vld [vmem:[#allocation65_spill] sm:$0xff] }
 0x1b8   : > { %v1908_v20 = vadd.f32 %v1906_v41, %v1904_v17  ;;  %v1945_v47 = vadd.f32 %v1943_v45, %v1941_v7  ;;  %v1946_v6 = vadd.f32 %v1944_v61, %v1942_v57  ;;  %v1981_v9 = vmul.f32 %v5211_v59, %v6536_v21 }
 0x1b9   : > { %v1959_v34 = vmul.f32 %v5292_v8, %v6541_v53  ;;  %v1979_v31 = vadd.f32 %v1977_v11, %v1975_v15  ;;  %v1980_v26 = vadd.f32 %v1978_v38, %v1976_v55  ;;  %v1982_v44 = vmul.f32 %v5213_v16, %v6536_v21  ;;  %v6697_v55 = vld [vmem:[#allocation66_spill] sm:$0xff] }
 0x1ba   : > { %v1911_v32 = vadd.f32 %v1909_v10, %v1907_v18  ;;  %v1949_v22 = vadd.f32 %v1947_v3, %v1945_v47  ;;  %v1950_v54 = vadd.f32 %v1948_v14, %v1946_v6  ;;  %v1985_v27 = vmul.f32 %v5219_v30, %v6696_v46  ;;  %v6699_v14 = vld [vmem:[#allocation165_spill] sm:$0xff] }
 0x1bb   : > { %v1960_v41 = vmul.f32 %v5296_v39, %v6541_v53  ;;  %v1983_v45 = vadd.f32 %v1981_v9, %v1979_v31  ;;  %v1984_v61 = vadd.f32 %v1982_v44, %v1980_v26  ;;  %v1986_v17 = vmul.f32 %v5228_v4, %v6696_v46 }
 0x1bc   : > { %v1912_v7 = vadd.f32 %v1910_v12, %v1908_v20  ;;  %v1953_v57 = vadd.f32 %v1951_v35, %v1949_v22  ;;  %v1954_v15 = vadd.f32 %v1952_v50, %v1950_v54  ;;  %v1989_v21 = vmul.f32 %v5230_v0, %v6697_v55  ;;  %v6702_v12 = vld [vmem:[#allocation56_spill] sm:$0xff] }
 0x1bd   : > { %v6698_v10 = vmax.f32 %v5140_v43, 0.0  ;;  %v6700_v18 = vmax.f32 %v5120_v13, 0.0  ;;  %v1987_v53 = vadd.f32 %v1985_v27, %v1983_v45  ;;  %v1988_v38 = vadd.f32 %v1986_v17, %v1984_v61  ;;  %v6707_v17 = vld [vmem:[#allocation71_spill] sm:$0xff] }
 0x1be   : > { %v1913_v35 = vadd.f32 %v1911_v32, %v6702_v12  ;;  %v1957_v50 = vadd.f32 %v1955_v62, %v1953_v57  ;;  %v1958_v20 = vadd.f32 %v1956_v49, %v1954_v15  ;;  %v5388_v9 = vadd.f32 %v5166_v19, %v5128_v29  ;;  %v6703_v32 = vld [vmem:[#allocation68_spill] sm:$0xff]  ;;  %v6704_v19 = vld [vmem:[#allocation70_spill] sm:$0xff]  ;;  %v6708_v57 = vld [vmem:[#allocation167_spill] sm:$0xff] }
 0x1bf   : > { %v1712_v3 = vmul.f32 %v6698_v10, %v6655_v51  ;;  %v1715_v11 = vmul.f32 %v6700_v18, %v6699_v14  ;;  %v6701_v47 = vmov %v6698_v10  ;;  %v1759_v31 = vmax.f32 %v5175_v23, 0.0 }
 0x1c0   : > { %v1716_v6 = vmul.f32 %v6701_v47, %v6699_v14  ;;  %v1990_v13 = vmul.f32 %v5239_v1, %v6697_v55  ;;  %v1991_v26 = vadd.f32 %v1989_v21, %v1987_v53  ;;  %v1760_v44 = vmax.f32 %v5178_v2, 0.0  ;;  %v6710_v55 = vld [vmem:[#allocation67_spill] sm:$0xff]  ;;  %v6715_v47 = vld [vmem:[#allocation61_spill] sm:$0xff] }
 0x1c1   : > { %v1914_v22 = vadd.f32 %v1912_v7, %v6702_v12  ;;  %v1961_v43 = vadd.f32 %v1959_v34, %v1957_v50  ;;  %v1962_v54 = vadd.f32 %v1960_v41, %v1958_v20  ;;  %v1993_v62 = vmul.f32 %v5241_v63, %v6703_v32  ;;  %v6736_v14 = vld [vmem:[#allocation91_spill] sm:$0xff] }
 0x1c2   : > { %v1992_v46 = vadd.f32 %v1990_v13, %v1988_v38  ;;  %v1994_v29 = vmul.f32 %v5247_v28, %v6703_v32  ;;  %v1997_v23 = vmul.f32 %v5258_v58, %v6704_v19  ;;  %v5402_v49 = vadd.f32 %v1712_v3, %v5156_v37 }
 0x1c3   : > { %v5405_v27 = vadd.f32 %v1715_v11, %v5158_v52  ;;  %v5408_v2 = vadd.f32 %v1716_v6, %v5160_v42  ;;  %v1915_v34 = vmax.f32 %v1913_v35, 0.0  ;;  %v1995_v41 = vadd.f32 %v1993_v62, %v1991_v26  ;;  %v6711_v42 = vld [vmem:[#allocation168_spill] sm:$0xff]  ;;  %v6713_v11 = vld [vmem:[#allocation75_spill] sm:$0xff]  ;;  %v6716_v35 = vld [vmem:[#allocation73_spill] sm:$0xff] }
 0x1c4   : > { %v1996_v45 = vadd.f32 %v1994_v29, %v1992_v46  ;;  %v1998_v61 = vmul.f32 %v5274_v48, %v6704_v19  ;;  %v2001_v7 = vmul.f32 %v5278_v36, %v6707_v17  ;;  %v5415_v15 = vmul.f32 %v1759_v31, %v6708_v57  ;;  %v6717_v26 = vld [vmem:[#allocation76_spill] sm:$0xff] }
 0x1c5   : > { %6705 = vst [vmem:[#allocation7_spill] sm:$0xff] %v5405_v27  ;;  %6706 = vst [vmem:[#allocation8_spill] sm:$0xff] %v5408_v2  ;;  %v5418_v37 = vmul.f32 %v1760_v44, %v6708_v57  ;;  %v1916_v52 = vmax.f32 %v1914_v22, 0.0  ;;  %v1963_v21 = vadd.f32 %v1961_v43, %v6710_v55  ;;  %v5422_v10 = vmul.f32 %v1759_v31, %v6711_v42  ;;  %v6725_v57 = vld [vmem:[#allocation69_spill] sm:$0xff] }
 0x1c6   : > { %v1964_v3 = vadd.f32 %v1962_v54, %v6710_v55  ;;  %v1999_v18 = vadd.f32 %v1997_v23, %v1995_v41  ;;  %v2025_v53 = vmul.f32 %v5168_v25, %v6713_v11  ;;  %v5428_v38 = vmul.f32 %v1760_v44, %v6711_v42  ;;  %v6718_v44 = vld [vmem:[#allocation62_spill] sm:$0xff] }
 0x1c7   : > { %6709 = vst [vmem:[#allocation9_spill] sm:$0xff] %v5418_v37  ;;  %6712 = vst [vmem:[#allocation11_spill] sm:$0xff] %v5422_v10  ;;  %v1917_v6 = vmul.f32 %v1915_v34, %v6715_v47  ;;  %v2002_v12 = vmul.f32 %v5284_v33, %v6707_v17  ;;  %v2005_v50 = vmul.f32 %v5286_v24, %v6716_v35  ;;  %v1965_v32 = vmax.f32 %v1963_v21, 0.0  ;;  %v6719_v41 = vld [vmem:[#allocation74_spill] sm:$0xff] }
 0x1c8   : > { %6714 = vst [vmem:[#allocation12_spill] sm:$0xff] %v5428_v38  ;;  %v2000_v20 = vadd.f32 %v1998_v61, %v1996_v45  ;;  %v2003_v31 = vadd.f32 %v2001_v7, %v1999_v18  ;;  %v2026_v13 = vmul.f32 %v5170_v5, %v6713_v11  ;;  %v2027_v22 = vmul.f32 %v5180_v60, %v6717_v26  ;;  %v6720_v61 = vld [vmem:[#allocation77_spill] sm:$0xff]  ;;  %v6721_v7 = vld [vmem:[#allocation78_spill] sm:$0xff] }
 0x1c9   : > { %v1918_v43 = vmul.f32 %v1916_v52, %v6715_v47  ;;  %v1921_v54 = vmul.f32 %v1915_v34, %v6718_v44  ;;  %v1922_v46 = vmul.f32 %v1916_v52, %v6718_v44  ;;  %v1966_v62 = vmax.f32 %v1964_v3, 0.0  ;;  %v6722_v11 = vld [vmem:[#allocation57_spill] sm:$0xff]  ;;  %v6723_v47 = vld [vmem:[#allocation60_spill] sm:$0xff] }
 0x1ca   : > { %v2006_v29 = vmul.f32 %v5290_v40, %v6716_v35  ;;  %v2028_v19 = vmul.f32 %v5182_v56, %v6717_v26  ;;  %v2029_v23 = vadd.f32 %v2027_v22, %v2025_v53  ;;  %v2009_v45 = vmul.f32 %v5292_v8, %v6719_v41  ;;  %v6724_v22 = vld [vmem:[#allocation79_spill] sm:$0xff] }
 0x1cb   : > { %v2031_v17 = vmul.f32 %v5211_v59, %v6720_v61  ;;  %v2032_v34 = vmul.f32 %v5213_v16, %v6720_v61  ;;  %v2035_v52 = vmul.f32 %v5219_v30, %v6721_v7  ;;  %v2004_v55 = vadd.f32 %v2002_v12, %v2000_v20 }
 0x1cc   : > { %v2007_v21 = vadd.f32 %v2005_v50, %v2003_v31  ;;  %v2030_v3 = vadd.f32 %v2028_v19, %v2026_v13  ;;  %v2036_v18 = vmul.f32 %v5228_v4, %v6721_v7  ;;  %v1919_v53 = vadd.f32 %v1917_v6, %v6722_v11  ;;  %v6726_v13 = vld [vmem:[#allocation80_spill] sm:$0xff] }
 0x1cd   : > { %v1923_v35 = vadd.f32 %v1921_v54, %v6723_v47  ;;  %v2033_v26 = vadd.f32 %v2031_v17, %v2029_v23  ;;  %v2039_v44 = vmul.f32 %v5230_v0, %v6724_v22  ;;  %v1920_v42 = vadd.f32 %v1918_v43, %v6722_v11 }
 0x1ce   : > { %v5462_v61 = vadd.f32 %v1922_v46, %v6723_v47  ;;  %v1967_v12 = vmul.f32 %v1965_v32, %v6725_v57  ;;  %v2034_v50 = vadd.f32 %v2032_v34, %v2030_v3  ;;  %v2010_v20 = vmul.f32 %v5296_v39, %v6719_v41  ;;  %v6727_v46 = vld [vmem:[#allocation72_spill] sm:$0xff]  ;;  %v6728_v3 = vld [vmem:[#allocation82_spill] sm:$0xff] }
 0x1cf   : > { %v2037_v31 = vadd.f32 %v2035_v52, %v2033_v26  ;;  %v2040_v6 = vmul.f32 %v5239_v1, %v6724_v22  ;;  %v2043_v54 = vmul.f32 %v5241_v63, %v6726_v13  ;;  %v1968_v19 = vmul.f32 %v1966_v62, %v6725_v57 }
 0x1d0   : > { %v2008_v23 = vadd.f32 %v2006_v29, %v2004_v55  ;;  %v2011_v43 = vadd.f32 %v2009_v45, %v2007_v21  ;;  %v2038_v17 = vadd.f32 %v2036_v18, %v2034_v50  ;;  %v1971_v7 = vmul.f32 %v1965_v32, %v6727_v46  ;;  %v6729_v29 = vld [vmem:[#allocation83_spill] sm:$0xff] }
 0x1d1   : > { %v2041_v11 = vadd.f32 %v2039_v44, %v2037_v31  ;;  %v2044_v34 = vmul.f32 %v5247_v28, %v6726_v13  ;;  %v2047_v41 = vmul.f32 %v5258_v58, %v6728_v3  ;;  %v5477_v52 = vadd.f32 %v1967_v12, %v1919_v53  ;;  %v6730_v21 = vld [vmem:[#allocation87_spill] sm:$0xff]  ;;  %v6731_v53 = vld [vmem:[#allocation81_spill] sm:$0xff]  ;;  %v6732_v12 = vld [vmem:[#allocation84_spill] sm:$0xff] }
 0x1d2   : > { %v5480_v47 = vmul.f32 %v1966_v62, %v6727_v46  ;;  %v2048_v57 = vmul.f32 %v5274_v48, %v6728_v3  ;;  %v2051_v45 = vmul.f32 %v5278_v36, %v6729_v29  ;;  %v2042_v55 = vadd.f32 %v2040_v6, %v2038_v17  ;;  %v6733_v6 = vld [vmem:[#allocation88_spill] sm:$0xff]  ;;  %v6734_v46 = vld [vmem:[#allocation89_spill] sm:$0xff] }
 0x1d3   : > { %v2045_v32 = vadd.f32 %v2043_v54, %v2041_v11  ;;  %v2075_v18 = vmul.f32 %v5168_v25, %v6730_v21  ;;  %v2076_v26 = vmul.f32 %v5170_v5, %v6730_v21  ;;  %v2012_v22 = vadd.f32 %v2010_v20, %v2008_v23 }
 0x1d4   : > { %v5491_v44 = vadd.f32 %v2011_v43, %v6731_v53  ;;  %v2052_v62 = vmul.f32 %v5284_v33, %v6729_v29  ;;  %v2055_v50 = vmul.f32 %v5286_v24, %v6732_v12  ;;  %v2046_v31 = vadd.f32 %v2044_v34, %v2042_v55  ;;  %v6735_v43 = vld [vmem:[#allocation90_spill] sm:$0xff] }
 0x1d5   : > { %v2049_v13 = vadd.f32 %v2047_v41, %v2045_v32  ;;  %v2077_v54 = vmul.f32 %v5180_v60, %v6733_v6  ;;  %v2078_v17 = vmul.f32 %v5182_v56, %v6733_v6  ;;  %v2081_v20 = vmul.f32 %v5211_v59, %v6734_v46 }
 0x1d6   : > { %v2082_v23 = vmul.f32 %v5213_v16, %v6734_v46  ;;  %v2085_v11 = vmul.f32 %v5219_v30, %v6735_v43  ;;  %v2086_v3 = vmul.f32 %v5228_v4, %v6735_v43  ;;  %v2050_v34 = vadd.f32 %v2048_v57, %v2046_v31 }
 0x1d7   : > { %v2053_v41 = vadd.f32 %v2051_v45, %v2049_v13  ;;  %v2079_v29 = vadd.f32 %v2077_v54, %v2075_v18  ;;  %v2080_v55 = vadd.f32 %v2078_v17, %v2076_v26  ;;  %v5509_v32 = vadd.f32 %v1968_v19, %v1920_v42  ;;  %v6737_v19 = vld [vmem:[#allocation86_spill] sm:$0xff] }
 0x1d8   : > { %v5512_v21 = vadd.f32 %v2012_v22, %v6731_v53  ;;  %v2056_v6 = vmul.f32 %v5290_v40, %v6732_v12  ;;  %v2089_v46 = vmul.f32 %v5230_v0, %v6736_v14  ;;  %v2054_v51 = vadd.f32 %v2052_v62, %v2050_v34  ;;  %v6738_v26 = vld [vmem:[#allocation94_spill] sm:$0xff] }
 0x1d9   : > { %v2083_v38 = vadd.f32 %v2081_v20, %v2079_v29  ;;  %v2084_v2 = vadd.f32 %v2082_v23, %v2080_v55  ;;  %v2090_v57 = vmul.f32 %v5239_v1, %v6736_v14  ;;  %v5520_v45 = vadd.f32 %v1971_v7, %v1923_v35  ;;  %v6739_v35 = vld [vmem:[#allocation95_spill] sm:$0xff] }
 0x1da   : > { %v2015_v42 = vmax.f32 %v5491_v44, 0.0  ;;  %v2059_v18 = vmul.f32 %v5292_v8, %v6737_v19  ;;  %v2093_v22 = vmul.f32 %v5241_v63, %v6738_v26  ;;  %v2057_v53 = vadd.f32 %v2055_v50, %v2053_v41  ;;  %v6740_v50 = vld [vmem:[#allocation96_spill] sm:$0xff] }
 0x1db   : > { %v2087_v12 = vadd.f32 %v2085_v11, %v2083_v38  ;;  %v2088_v31 = vadd.f32 %v2086_v3, %v2084_v2  ;;  %v2094_v62 = vmul.f32 %v5247_v28, %v6738_v26  ;;  %v2016_v13 = vmax.f32 %v5512_v21, 0.0  ;;  %v6741_v38 = vld [vmem:[#allocation100_spill] sm:$0xff]  ;;  %v6742_v11 = vld [vmem:[#allocation101_spill] sm:$0xff] }
 0x1dc   : > { %v2060_v14 = vmul.f32 %v5296_v39, %v6737_v19  ;;  %v2097_v7 = vmul.f32 %v5258_v58, %v6739_v35  ;;  %v2098_v44 = vmul.f32 %v5274_v48, %v6739_v35  ;;  %v2058_v54 = vadd.f32 %v2056_v6, %v2054_v51 }
 0x1dd   : > { %v2091_v17 = vadd.f32 %v2089_v46, %v2087_v12  ;;  %v2092_v20 = vadd.f32 %v2090_v57, %v2088_v31  ;;  %v2101_v2 = vmul.f32 %v5278_v36, %v6740_v50  ;;  %v2125_v23 = vmul.f32 %v5168_v25, %v6741_v38  ;;  %v6743_v46 = vld [vmem:[#allocation103_spill] sm:$0xff]  ;;  %v6744_v31 = vld [vmem:[#allocation97_spill] sm:$0xff] }
 0x1de   : > { %v2126_v43 = vmul.f32 %v5170_v5, %v6741_v38  ;;  %v2127_v3 = vmul.f32 %v5180_v60, %v6742_v11  ;;  %v2128_v34 = vmul.f32 %v5182_v56, %v6742_v11  ;;  %v2061_v41 = vadd.f32 %v2059_v18, %v2057_v53 }
 0x1df   : > { %v2095_v29 = vadd.f32 %v2093_v22, %v2091_v17  ;;  %v2096_v51 = vadd.f32 %v2094_v62, %v2092_v20  ;;  %v2102_v55 = vmul.f32 %v5284_v33, %v6740_v50  ;;  %v2131_v57 = vmul.f32 %v5211_v59, %v6743_v46  ;;  %v6745_v17 = vld [vmem:[#allocation104_spill] sm:$0xff]  ;;  %v6746_v50 = vld [vmem:[#allocation85_spill] sm:$0xff] }
 0x1e0   : > { %v2129_v21 = vadd.f32 %v2127_v3, %v2125_v23  ;;  %v2130_v6 = vadd.f32 %v2128_v34, %v2126_v43  ;;  %v2132_v19 = vmul.f32 %v5213_v16, %v6743_v46  ;;  %v2062_v26 = vadd.f32 %v2060_v14, %v2058_v54  ;;  %v6747_v43 = vld [vmem:[#allocation93_spill] sm:$0xff]  ;;  %v6748_v14 = vld [vmem:[#allocation102_spill] sm:$0xff] }
 0x1e1   : > { %v2099_v12 = vadd.f32 %v2097_v7, %v2095_v29  ;;  %v2105_v35 = vmul.f32 %v5286_v24, %v6744_v31  ;;  %v2106_v18 = vmul.f32 %v5290_v40, %v6744_v31  ;;  %v2100_v22 = vadd.f32 %v2098_v44, %v2096_v51 }
 0x1e2   : > { %v2133_v53 = vadd.f32 %v2131_v57, %v2129_v21  ;;  %v2134_v62 = vadd.f32 %v2132_v19, %v2130_v6  ;;  %v2135_v20 = vmul.f32 %v5219_v30, %v6745_v17  ;;  %v2017_v38 = vmul.f32 %v2015_v42, %v6746_v50  ;;  %v6749_v21 = vld [vmem:[#allocation105_spill] sm:$0xff] }
 0x1e3   : > { %v2018_v23 = vmul.f32 %v2016_v13, %v6746_v50  ;;  %v2063_v11 = vadd.f32 %v2061_v41, %v6747_v43  ;;  %v2109_v7 = vmul.f32 %v5292_v8, %v6748_v14  ;;  %v2103_v54 = vadd.f32 %v2101_v2, %v2099_v12  ;;  %v6750_v2 = vld [vmem:[#allocation106_spill] sm:$0xff] }
 0x1e4   : > { %v2104_v3 = vadd.f32 %v2102_v55, %v2100_v22  ;;  %v2136_v34 = vmul.f32 %v5228_v4, %v6745_v17  ;;  %v2137_v44 = vadd.f32 %v2135_v20, %v2133_v53  ;;  %v2064_v29 = vadd.f32 %v2062_v26, %v6747_v43  ;;  %v6751_v22 = vld [vmem:[#allocation107_spill] sm:$0xff]  ;;  %v6752_v17 = vld [vmem:[#allocation92_spill] sm:$0xff] }
 0x1e5   : > { %v2110_v51 = vmul.f32 %v5296_v39, %v6748_v14  ;;  %v2139_v6 = vmul.f32 %v5230_v0, %v6749_v21  ;;  %v2140_v41 = vmul.f32 %v5239_v1, %v6749_v21  ;;  %v2107_v46 = vadd.f32 %v2105_v35, %v2103_v54  ;;  %v6753_v21 = vld [vmem:[#allocation108_spill] sm:$0xff] }
 0x1e6   : > { %v2108_v57 = vadd.f32 %v2106_v18, %v2104_v3  ;;  %v2138_v19 = vadd.f32 %v2136_v34, %v2134_v62  ;;  %v2143_v55 = vmul.f32 %v5241_v63, %v6750_v2  ;;  %v1974_v12 = vadd.f32 %v5480_v47, %v5462_v61 }
 0x1e7   : > { %v2141_v31 = vadd.f32 %v2139_v6, %v2137_v44  ;;  %v2144_v26 = vmul.f32 %v5247_v28, %v6750_v2  ;;  %v2147_v53 = vmul.f32 %v5258_v58, %v6751_v22  ;;  %v2021_v20 = vmul.f32 %v2015_v42, %v6752_v17  ;;  %v6756_v6 = vld [vmem:[#allocation109_spill] sm:$0xff] }
 0x1e8   : > { %v2065_v50 = vmax.f32 %v2063_v11, 0.0  ;;  %v2111_v43 = vadd.f32 %v2109_v7, %v2107_v46  ;;  %v2142_v35 = vadd.f32 %v2140_v41, %v2138_v19  ;;  %v2019_v18 = vadd.f32 %v2017_v38, %v5477_v52  ;;  %v6754_v11 = vld [vmem:[#allocation114_spill] sm:$0xff] }
 0x1e9   : > { %v2022_v62 = vmul.f32 %v2016_v13, %v6752_v17  ;;  %v2145_v14 = vadd.f32 %v2143_v55, %v2141_v31  ;;  %v2148_v61 = vmul.f32 %v5274_v48, %v6751_v22  ;;  %v2020_v47 = vadd.f32 %v2018_v23, %v5509_v32  ;;  %v6755_v13 = vld [vmem:[#allocation98_spill] sm:$0xff]  ;;  %v6757_v23 = vld [vmem:[#allocation115_spill] sm:$0xff] }
 0x1ea   : > { %v2066_v54 = vmax.f32 %v2064_v29, 0.0  ;;  %v2112_v3 = vadd.f32 %v2110_v51, %v2108_v57  ;;  %v2146_v34 = vadd.f32 %v2144_v26, %v2142_v35  ;;  %v2151_v42 = vmul.f32 %v5278_v36, %v6753_v21  ;;  %v6758_v57 = vld [vmem:[#allocation116_spill] sm:$0xff]  ;;  %v6759_v26 = vld [vmem:[#allocation99_spill] sm:$0xff] }
 0x1eb   : > { %v2149_v44 = vadd.f32 %v2147_v53, %v2145_v14  ;;  %v2175_v7 = vmul.f32 %v5168_v25, %v6754_v11  ;;  %v2176_v52 = vmul.f32 %v5170_v5, %v6754_v11  ;;  %v2067_v38 = vmul.f32 %v2065_v50, %v6755_v13  ;;  %v6760_v53 = vld [vmem:[#allocation110_spill] sm:$0xff] }
 0x1ec   : > { %v2113_v41 = vadd.f32 %v2111_v43, %v6756_v6  ;;  %v2152_v32 = vmul.f32 %v5284_v33, %v6753_v21  ;;  %v2177_v29 = vmul.f32 %v5180_v60, %v6757_v23  ;;  %v2150_v51 = vadd.f32 %v2148_v61, %v2146_v34 }
 0x1ed   : > { %v2178_v46 = vmul.f32 %v5182_v56, %v6757_v23  ;;  %v2181_v19 = vmul.f32 %v5211_v59, %v6758_v57  ;;  %v2182_v2 = vmul.f32 %v5213_v16, %v6758_v57  ;;  %v2023_v55 = vadd.f32 %v2021_v20, %v5520_v45 }
 0x1ee   : > { %v2024_v31 = vadd.f32 %v2022_v62, %v1974_v12  ;;  %v2071_v22 = vmul.f32 %v2065_v50, %v6759_v26  ;;  %v2155_v17 = vmul.f32 %v5286_v24, %v6760_v53  ;;  %v2114_v43 = vadd.f32 %v2112_v3, %v6756_v6  ;;  %v6761_v62 = vld [vmem:[#allocation117_spill] sm:$0xff] }
 0x1ef   : > { %v2153_v35 = vadd.f32 %v2151_v42, %v2149_v44  ;;  %v2179_v14 = vadd.f32 %v2177_v29, %v2175_v7  ;;  %v2180_v61 = vadd.f32 %v2178_v46, %v2176_v52  ;;  %v2068_v34 = vmul.f32 %v2066_v54, %v6755_v13  ;;  %v6762_v44 = vld [vmem:[#allocation118_spill] sm:$0xff]  ;;  %v6763_v13 = vld [vmem:[#allocation113_spill] sm:$0xff] }
 0x1f0   : > { %v2069_v21 = vadd.f32 %v2067_v38, %v2019_v18  ;;  %v2072_v11 = vmul.f32 %v2066_v54, %v6759_v26  ;;  %v2156_v23 = vmul.f32 %v5290_v40, %v6760_v53  ;;  %v2115_v45 = vmax.f32 %v2113_v41, 0.0 }
 0x1f1   : > { %v2154_v12 = vadd.f32 %v2152_v32, %v2150_v51  ;;  %v2183_v20 = vadd.f32 %v2181_v19, %v2179_v14  ;;  %v2184_v50 = vadd.f32 %v2182_v2, %v2180_v61  ;;  %v2185_v57 = vmul.f32 %v5219_v30, %v6761_v62  ;;  %v6764_v32 = vld [vmem:[#allocation119_spill] sm:$0xff] }
 0x1f2   : > { %v2186_v3 = vmul.f32 %v5228_v4, %v6761_v62  ;;  %v2189_v42 = vmul.f32 %v5230_v0, %v6762_v44  ;;  %v2190_v18 = vmul.f32 %v5239_v1, %v6762_v44  ;;  %v2073_v54 = vadd.f32 %v2071_v22, %v2023_v55  ;;  %v6765_v19 = vld [vmem:[#allocation111_spill] sm:$0xff] }
 0x1f3   : > { %v2116_v7 = vmax.f32 %v2114_v43, 0.0  ;;  %v2157_v52 = vadd.f32 %v2155_v17, %v2153_v35  ;;  %v2159_v38 = vmul.f32 %v5292_v8, %v6763_v13  ;;  %v2187_v6 = vadd.f32 %v2185_v57, %v2183_v20  ;;  %v6766_v17 = vld [vmem:[#allocation120_spill] sm:$0xff]  ;;  %v6769_v57 = vld [vmem:[#allocation125_spill] sm:$0xff] }
 0x1f4   : > { %v2188_v41 = vadd.f32 %v2186_v3, %v2184_v50  ;;  %v2193_v29 = vmul.f32 %v5241_v63, %v6764_v32  ;;  %v2194_v51 = vmul.f32 %v5247_v28, %v6764_v32  ;;  %v2070_v46 = vadd.f32 %v2068_v34, %v2020_v47  ;;  %v6767_v20 = vld [vmem:[#allocation112_spill] sm:$0xff]  ;;  %v6772_v32 = vld [vmem:[#allocation127_spill] sm:$0xff] }
 0x1f5   : > { %v2117_v2 = vmul.f32 %v2115_v45, %v6765_v19  ;;  %v2158_v26 = vadd.f32 %v2156_v23, %v2154_v12  ;;  %v2160_v55 = vmul.f32 %v5296_v39, %v6763_v13  ;;  %v2191_v22 = vadd.f32 %v2189_v42, %v2187_v6  ;;  %v6768_v23 = vld [vmem:[#allocation122_spill] sm:$0xff] }
 0x1f6   : > { %v2192_v53 = vadd.f32 %v2190_v18, %v2188_v41  ;;  %v2197_v43 = vmul.f32 %v5258_v58, %v6766_v17  ;;  %v2198_v35 = vmul.f32 %v5274_v48, %v6766_v17  ;;  %v2074_v14 = vadd.f32 %v2072_v11, %v2024_v31  ;;  %v6771_v41 = vld [vmem:[#allocation124_spill] sm:$0xff] }
 0x1f7   : > { %v2118_v61 = vmul.f32 %v2116_v7, %v6765_v19  ;;  %v2121_v50 = vmul.f32 %v2115_v45, %v6767_v20  ;;  %v2161_v47 = vadd.f32 %v2159_v38, %v2157_v52  ;;  %v2195_v34 = vadd.f32 %v2193_v29, %v2191_v22  ;;  %v6770_v52 = vld [vmem:[#allocation126_spill] sm:$0xff] }
 0x1f8   : > { %v2196_v62 = vadd.f32 %v2194_v51, %v2192_v53  ;;  %v2201_v12 = vmul.f32 %v5278_v36, %v6768_v23  ;;  %v2225_v3 = vmul.f32 %v5168_v25, %v6769_v57  ;;  %v5640_v44 = vadd.f32 %v2117_v2, %v2069_v21  ;;  %v6773_v51 = vld [vmem:[#allocation121_spill] sm:$0xff]  ;;  %v6774_v53 = vld [vmem:[#allocation128_spill] sm:$0xff] }
 0x1f9   : > { %v2122_v42 = vmul.f32 %v2116_v7, %v6767_v20  ;;  %v2162_v18 = vadd.f32 %v2160_v55, %v2158_v26  ;;  %v2202_v31 = vmul.f32 %v5284_v33, %v6768_v23  ;;  %v2199_v11 = vadd.f32 %v2197_v43, %v2195_v34  ;;  %v6776_v23 = vld [vmem:[#allocation129_spill] sm:$0xff] }
 0x1fa   : > { %v2200_v13 = vadd.f32 %v2198_v35, %v2196_v62  ;;  %v2226_v45 = vmul.f32 %v5170_v5, %v6769_v57  ;;  %v2227_v38 = vmul.f32 %v5180_v60, %v6770_v52  ;;  %v5649_v6 = vadd.f32 %v2118_v61, %v2070_v46 }
 0x1fb   : > { %v2205_v21 = vmul.f32 %v5286_v24, %v6771_v41  ;;  %v2228_v7 = vmul.f32 %v5182_v56, %v6770_v52  ;;  %v2231_v29 = vmul.f32 %v5211_v59, %v6772_v32  ;;  %v2163_v19 = vadd.f32 %v2161_v47, %v6773_v51  ;;  %v6775_v47 = vld [vmem:[#allocation130_spill] sm:$0xff] }
 0x1fc   : > { %v2203_v2 = vadd.f32 %v2201_v12, %v2199_v11  ;;  %v2229_v26 = vadd.f32 %v2227_v38, %v2225_v3  ;;  %v2232_v55 = vmul.f32 %v5213_v16, %v6772_v32  ;;  %v2164_v22 = vadd.f32 %v2162_v18, %v6773_v51  ;;  %v6778_v51 = vld [vmem:[#allocation132_spill] sm:$0xff] }
 0x1fd   : > { %v2230_v46 = vadd.f32 %v2228_v7, %v2226_v45  ;;  %v2235_v17 = vmul.f32 %v5219_v30, %v6774_v53  ;;  %v2236_v43 = vmul.f32 %v5228_v4, %v6774_v53  ;;  %v2204_v35 = vadd.f32 %v2202_v31, %v2200_v13  ;;  %v6777_v31 = vld [vmem:[#allocation131_spill] sm:$0xff] }
 0x1fe   : > { %v2206_v61 = vmul.f32 %v5290_v40, %v6771_v41  ;;  %v2233_v20 = vadd.f32 %v2231_v29, %v2229_v26  ;;  %v2239_v34 = vmul.f32 %v5230_v0, %v6775_v47  ;;  %v2207_v62 = vadd.f32 %v2205_v21, %v2203_v2  ;;  %v6779_v2 = vld [vmem:[#allocation138_spill] sm:$0xff] }
 0x1ff   : > { %v2209_v12 = vmul.f32 %v5292_v8, %v6776_v23  ;;  %v2234_v57 = vadd.f32 %v2232_v55, %v2230_v46  ;;  %v2240_v3 = vmul.f32 %v5239_v1, %v6775_v47  ;;  %v2123_v18 = vadd.f32 %v2121_v50, %v2073_v54  ;;  %v6780_v55 = vld [vmem:[#allocation134_spill] sm:$0xff] }
 0x200   : > { %v5673_v11 = vadd.f32 %v2122_v42, %v2074_v14  ;;  %v2237_v45 = vadd.f32 %v2235_v17, %v2233_v20  ;;  %v2243_v13 = vmul.f32 %v5241_v63, %v6777_v31  ;;  %v2165_v52 = vmax.f32 %v2163_v19, 0.0  ;;  %v6782_v20 = vld [vmem:[#allocation140_spill] sm:$0xff] }
 0x201   : > { %v2166_v38 = vmax.f32 %v2164_v22, 0.0  ;;  %v2238_v41 = vadd.f32 %v2236_v43, %v2234_v57  ;;  %v2244_v21 = vmul.f32 %v5247_v28, %v6777_v31  ;;  %v2208_v7 = vadd.f32 %v2206_v61, %v2204_v35  ;;  %v6781_v43 = vld [vmem:[#allocation139_spill] sm:$0xff]  ;;  %v6785_v57 = vld [vmem:[#allocation136_spill] sm:$0xff] }
 0x202   : > { %v2210_v32 = vmul.f32 %v5296_v39, %v6776_v23  ;;  %v2241_v29 = vadd.f32 %v2239_v34, %v2237_v45  ;;  %v2247_v54 = vmul.f32 %v5258_v58, %v6778_v51  ;;  %v2211_v14 = vadd.f32 %v2209_v12, %v2207_v62  ;;  %v6783_v34 = vld [vmem:[#allocation123_spill] sm:$0xff]  ;;  %v6784_v23 = vld [vmem:[#allocation133_spill] sm:$0xff] }
 0x203   : > { %v2242_v50 = vadd.f32 %v2240_v3, %v2238_v41  ;;  %v2248_v42 = vmul.f32 %v5274_v48, %v6778_v51  ;;  %v2275_v19 = vmul.f32 %v5168_v25, %v6779_v2  ;;  %v2251_v22 = vmul.f32 %v5278_v36, %v6780_v55 }
 0x204   : > { %v2245_v26 = vadd.f32 %v2243_v13, %v2241_v29  ;;  %v2252_v46 = vmul.f32 %v5284_v33, %v6780_v55  ;;  %v2276_v53 = vmul.f32 %v5170_v5, %v6779_v2  ;;  %v2277_v35 = vmul.f32 %v5180_v60, %v6781_v43  ;;  %v6787_v55 = vld [vmem:[#allocation137_spill] sm:$0xff] }
 0x205   : > { %v2246_v17 = vadd.f32 %v2244_v21, %v2242_v50  ;;  %v2278_v61 = vmul.f32 %v5182_v56, %v6781_v43  ;;  %v2281_v47 = vmul.f32 %v5211_v59, %v6782_v20  ;;  %v2167_v62 = vmul.f32 %v2165_v52, %v6783_v34  ;;  %v6786_v50 = vld [vmem:[#allocation135_spill] sm:$0xff] }
 0x206   : > { %v2171_v12 = vmul.f32 %v2165_v52, %v6784_v23  ;;  %v2255_v3 = vmul.f32 %v5286_v24, %v6785_v57  ;;  %v2256_v45 = vmul.f32 %v5290_v40, %v6785_v57  ;;  %v2249_v31 = vadd.f32 %v2247_v54, %v2245_v26 }
 0x207   : > { %v2250_v13 = vadd.f32 %v2248_v42, %v2246_v17  ;;  %v2279_v41 = vadd.f32 %v2277_v35, %v2275_v19  ;;  %v2280_v21 = vadd.f32 %v2278_v61, %v2276_v53  ;;  %v2168_v29 = vmul.f32 %v2166_v38, %v6783_v34  ;;  %v6788_v42 = vld [vmem:[#allocation141_spill] sm:$0xff] }
 0x208   : > { %v2212_v51 = vadd.f32 %v2210_v32, %v2208_v7  ;;  %v5707_v2 = vadd.f32 %v2211_v14, %v6786_v50  ;;  %v2259_v43 = vmul.f32 %v5292_v8, %v6787_v55  ;;  %v2253_v52 = vadd.f32 %v2251_v22, %v2249_v31  ;;  %v6789_v32 = vld [vmem:[#allocation142_spill] sm:$0xff] }
 0x209   : > { %v2254_v10 = vadd.f32 %v2252_v46, %v2250_v13  ;;  %v2282_v27 = vmul.f32 %v5213_v16, %v6782_v20  ;;  %v2283_v37 = vadd.f32 %v2281_v47, %v2279_v41  ;;  %v2260_v54 = vmul.f32 %v5296_v39, %v6787_v55  ;;  %v6790_v20 = vld [vmem:[#allocation144_spill] sm:$0xff] }
 0x20a   : > { %v2285_v19 = vmul.f32 %v5219_v30, %v6788_v42  ;;  %v2286_v7 = vmul.f32 %v5228_v4, %v6788_v42  ;;  %v2289_v14 = vmul.f32 %v5230_v0, %v6789_v32  ;;  %v2257_v26 = vadd.f32 %v2255_v3, %v2253_v52  ;;  %v6793_v41 = vld [vmem:[#allocation152_spill] sm:$0xff] }
 0x20b   : > { %v2258_v53 = vadd.f32 %v2256_v45, %v2254_v10  ;;  %v2284_v22 = vadd.f32 %v2282_v27, %v2280_v21  ;;  %v2290_v46 = vmul.f32 %v5239_v1, %v6789_v32  ;;  %v5724_v17 = vadd.f32 %v2167_v62, %v5640_v44  ;;  %v6791_v62 = vld [vmem:[#allocation146_spill] sm:$0xff] }
 0x20c   : > { %v2172_v35 = vmul.f32 %v2166_v38, %v6784_v23  ;;  %v2287_v61 = vadd.f32 %v2285_v19, %v2283_v37  ;;  %v2293_v47 = vmul.f32 %v5241_v63, %v6790_v20  ;;  %v2170_v34 = vadd.f32 %v2168_v29, %v5649_v6  ;;  %v6796_v19 = vld [vmem:[#allocation154_spill] sm:$0xff] }
 0x20d   : > { %v5730_v57 = vadd.f32 %v2171_v12, %v2123_v18  ;;  %v2288_v31 = vadd.f32 %v2286_v7, %v2284_v22  ;;  %v2294_v27 = vmul.f32 %v5247_v28, %v6790_v20  ;;  %v2214_v10 = vadd.f32 %v2212_v51, %v6786_v50  ;;  %v6792_v12 = vld [vmem:[#allocation148_spill] sm:$0xff] }
 0x20e   : > { %v2215_v3 = vmax.f32 %v5707_v2, 0.0  ;;  %v2291_v44 = vadd.f32 %v2289_v14, %v2287_v61  ;;  %v2297_v38 = vmul.f32 %v5258_v58, %v6791_v62  ;;  %v2261_v37 = vadd.f32 %v2259_v43, %v2257_v26  ;;  %v6794_v2 = vld [vmem:[#allocation149_spill] sm:$0xff]  ;;  %v6797_v26 = vld [vmem:[#allocation151_spill] sm:$0xff] }
 0x20f   : > { %v2262_v23 = vadd.f32 %v2260_v54, %v2258_v53  ;;  %v2292_v45 = vadd.f32 %v2290_v46, %v2288_v31  ;;  %v2298_v6 = vmul.f32 %v5274_v48, %v6791_v62  ;;  %v2301_v13 = vmul.f32 %v5278_v36, %v6792_v12  ;;  %v6795_v43 = vld [vmem:[#allocation153_spill] sm:$0xff] }
 0x210   : > { %v2295_v18 = vadd.f32 %v2293_v47, %v2291_v44  ;;  %v2325_v21 = vmul.f32 %v5168_v25, %v6793_v41  ;;  %v2326_v29 = vmul.f32 %v5170_v5, %v6793_v41  ;;  %v2302_v50 = vmul.f32 %v5284_v33, %v6792_v12  ;;  %v6799_v47 = vld [vmem:[#allocation143_spill] sm:$0xff] }
 0x211   : > { %v2296_v51 = vadd.f32 %v2294_v27, %v2292_v45  ;;  %v2305_v55 = vmul.f32 %v5286_v24, %v6794_v2  ;;  %v2327_v52 = vmul.f32 %v5180_v60, %v6795_v43  ;;  %v2328_v42 = vmul.f32 %v5182_v56, %v6795_v43  ;;  %v6798_v56 = vld [vmem:[#allocation145_spill] sm:$0xff]  ;;  %v6800_v44 = vld [vmem:[#allocation155_spill] sm:$0xff]  ;;  %v6801_v45 = vld [vmem:[#allocation156_spill] sm:$0xff] }
 0x212   : > { %v2299_v54 = vadd.f32 %v2297_v38, %v2295_v18  ;;  %v2331_v25 = vmul.f32 %v5211_v59, %v6796_v19  ;;  %v2332_v5 = vmul.f32 %v5213_v16, %v6796_v19  ;;  %v2174_v7 = vadd.f32 %v2172_v35, %v5673_v11  ;;  %v6802_v18 = vld [vmem:[#allocation147_spill] sm:$0xff] }
 0x213   : > { %v2216_v32 = vmax.f32 %v2214_v10, 0.0  ;;  %v2306_v14 = vmul.f32 %v5290_v40, %v6794_v2  ;;  %v2309_v53 = vmul.f32 %v5292_v8, %v6797_v26  ;;  %v2300_v60 = vadd.f32 %v2298_v6, %v2296_v51  ;;  %v6803_v51 = vld [vmem:[#allocation157_spill] sm:$0xff] }
 0x214   : > { %v2303_v22 = vadd.f32 %v2301_v13, %v2299_v54  ;;  %v2329_v46 = vadd.f32 %v2327_v52, %v2325_v21  ;;  %v2330_v61 = vadd.f32 %v2328_v42, %v2326_v29  ;;  %v2217_v20 = vmul.f32 %v2215_v3, %v6798_v56  ;;  %v6804_v52 = vld [vmem:[#allocation159_spill] sm:$0xff] }
 0x215   : > { %v2263_v59 = vadd.f32 %v2261_v37, %v6799_v47  ;;  %v2264_v31 = vadd.f32 %v2262_v23, %v6799_v47  ;;  %v2310_v16 = vmul.f32 %v5296_v39, %v6797_v26  ;;  %v2304_v11 = vadd.f32 %v2302_v50, %v2300_v60 }
 0x216   : > { %v2307_v35 = vadd.f32 %v2305_v55, %v2303_v22  ;;  %v2333_v27 = vadd.f32 %v2331_v25, %v2329_v46  ;;  %v2334_v10 = vadd.f32 %v2332_v5, %v2330_v61  ;;  %v2335_v62 = vmul.f32 %v5219_v30, %v6800_v44  ;;  %v6806_v5 = vld [vmem:[#allocation160_spill] sm:$0xff]  ;;  %v6807_v22 = vld [vmem:[#allocation150_spill] sm:$0xff]  ;;  %v6808_v61 = vld [vmem:[#allocation161_spill] sm:$0xff] }
 0x217   : > { %v2336_v38 = vmul.f32 %v5228_v4, %v6800_v44  ;;  %v2339_v6 = vmul.f32 %v5230_v0, %v6801_v45  ;;  %v2340_v37 = vmul.f32 %v5239_v1, %v6801_v45  ;;  %v2218_v23 = vmul.f32 %v2216_v32, %v6798_v56  ;;  %v6813_v44 = vld [vmem:[#allocation11_spill] sm:$0xff]  ;;  %v6815_v45 = vld [vmem:[#allocation12_spill] sm:$0xff] }
 0x218   : > { %v2221_v12 = vmul.f32 %v2215_v3, %v6802_v18  ;;  %v2308_v13 = vadd.f32 %v2306_v14, %v2304_v11  ;;  %v2311_v41 = vadd.f32 %v2309_v53, %v2307_v35  ;;  %v2337_v21 = vadd.f32 %v2335_v62, %v2333_v27  ;;  %v6811_v27 = vld [vmem:[#allocation9_spill] sm:$0xff] }
 0x219   : > { %v2338_v29 = vadd.f32 %v2336_v38, %v2334_v10  ;;  %v2343_v30 = vmul.f32 %v5241_v63, %v6803_v51  ;;  %v2344_v4 = vmul.f32 %v5247_v28, %v6803_v51  ;;  %v2222_v50 = vmul.f32 %v2216_v32, %v6802_v18  ;;  %v6805_v63 = vld [vmem:[#allocation158_spill] sm:$0xff]  ;;  %v6812_v10 = vld [vmem:[#allocation7_spill] sm:$0xff]  ;;  %v6814_v38 = vld [vmem:[#allocation8_spill] sm:$0xff] }
 0x21a   : > { %v2265_v0 = vmax.f32 %v2263_v59, 0.0  ;;  %v2266_v2 = vmax.f32 %v2264_v31, 0.0  ;;  %v2312_v55 = vadd.f32 %v2310_v16, %v2308_v13  ;;  %v2341_v1 = vadd.f32 %v2339_v6, %v2337_v21  ;;  %v6810_v31 = vld [vmem:[#allocation163_spill] sm:$0xff]  ;;  %v6817_v21 = vld [vmem:[#allocation165_spill] sm:$0xff] }
 0x21b   : > { %v2342_v43 = vadd.f32 %v2340_v37, %v2338_v29  ;;  %v2347_v3 = vmul.f32 %v5258_v58, %v6804_v52  ;;  %v2348_v54 = vmul.f32 %v5274_v48, %v6804_v52  ;;  %v2219_v42 = vadd.f32 %v2217_v20, %v5724_v17  ;;  %v6809_v20 = vld [vmem:[#allocation162_spill] sm:$0xff] }
 0x21c   : > { %v2220_v19 = vadd.f32 %v2218_v23, %v2170_v34  ;;  %v2313_v25 = vadd.f32 %v2311_v41, %v6805_v63  ;;  %v2351_v28 = vmul.f32 %v5278_v36, %v6806_v5  ;;  %v2314_v32 = vadd.f32 %v2312_v55, %v6805_v63  ;;  %v6816_v41 = vld [vmem:[#allocation164_spill] sm:$0xff] }
 0x21d   : > { %v2345_v14 = vadd.f32 %v2343_v30, %v2341_v1  ;;  %v2346_v26 = vadd.f32 %v2344_v4, %v2342_v43  ;;  %v2352_v53 = vmul.f32 %v5284_v33, %v6806_v5  ;;  %v2223_v58 = vadd.f32 %v2221_v12, %v5730_v57  ;;  %v6818_v30 = vld [vmem:[#allocation166_spill] sm:$0xff]  ;;  %v6820_v55 = vld [vmem:[#allocation64_spill] sm:$0xff] }
 0x21e   : > { %v2224_v60 = vadd.f32 %v2222_v50, %v2174_v7  ;;  %v2267_v48 = vmul.f32 %v2265_v0, %v6807_v22  ;;  %v2268_v17 = vmul.f32 %v2266_v2, %v6807_v22  ;;  %v2355_v56 = vmul.f32 %v5286_v24, %v6808_v61 }
 0x21f   : > { %v2349_v34 = vadd.f32 %v2347_v3, %v2345_v14  ;;  %v2350_v46 = vadd.f32 %v2348_v54, %v2346_v26  ;;  %v2356_v36 = vmul.f32 %v5290_v40, %v6808_v61  ;;  %v2271_v47 = vmul.f32 %v2265_v0, %v6809_v20  ;;  %v6819_v0 = vld [vmem:[#allocation54_spill] sm:$0xff]  ;;  %v6821_v3 = vld [vmem:[#allocation55_spill] sm:$0xff] }
 0x220   : > { %v2272_v59 = vmul.f32 %v2266_v2, %v6809_v20  ;;  %v2315_v33 = vmax.f32 %v2313_v25, 0.0  ;;  %v2359_v57 = vmul.f32 %v5292_v8, %v6810_v31  ;;  %v2316_v7 = vmax.f32 %v2314_v32, 0.0  ;;  %v6823_v32 = vld [vmem:[#allocation167_spill] sm:$0xff] }
 0x221   : > { %v2353_v16 = vadd.f32 %v2351_v28, %v2349_v34  ;;  %v2354_v11 = vadd.f32 %v2352_v53, %v2350_v46  ;;  %v2360_v35 = vmul.f32 %v5296_v39, %v6810_v31  ;;  %v1763_v24 = vadd.f32 %v5415_v15, %v5388_v9  ;;  %v6824_v53 = vld [vmem:[#allocation168_spill] sm:$0xff] }
 0x222   : > { %v1764_v40 = vadd.f32 %v6811_v27, %v5402_v49  ;;  %v1767_v62 = vadd.f32 %v6813_v44, %v6812_v10  ;;  %v1768_v6 = vadd.f32 %v6815_v45, %v6814_v38  ;;  %v2269_v37 = vadd.f32 %v2267_v48, %v2219_v42  ;;  %v6822_v42 = vld [vmem:[#allocation58_spill] sm:$0xff] }
 0x223   : > { %v2270_v8 = vadd.f32 %v2268_v17, %v2220_v19  ;;  %v2357_v23 = vadd.f32 %v2355_v56, %v2353_v16  ;;  %v2358_v18 = vadd.f32 %v2356_v36, %v2354_v11  ;;  %v2273_v12 = vadd.f32 %v2271_v47, %v2223_v58 }
 0x224   : > { %v2274_v13 = vadd.f32 %v2272_v59, %v2224_v60  ;;  %v2317_v39 = vmul.f32 %v2315_v33, %v6816_v41  ;;  %v2321_v29 = vmul.f32 %v2315_v33, %v6817_v21  ;;  %v2318_v9 = vmul.f32 %v2316_v7, %v6816_v41 }
 0x225   : > { %v2322_v49 = vmul.f32 %v2316_v7, %v6817_v21  ;;  %v2361_v15 = vadd.f32 %v2359_v57, %v2357_v23  ;;  %v2362_v51 = vadd.f32 %v2360_v35, %v2358_v18  ;;  %v2375_v2 = vsub.f32 %v6819_v0, %v1763_v24 }
 0x226   : > { %v2376_v1 = vsub.f32 %v6820_v55, %v1764_v40  ;;  %v2319_v43 = vadd.f32 %v2317_v39, %v2269_v37  ;;  %v2323_v52 = vadd.f32 %v2321_v29, %v2273_v12  ;;  %v2377_v54 = vsub.f32 %v6821_v3, %v1767_v62 }
 0x227   : > { %v2363_v4 = vadd.f32 %v2361_v15, %v6818_v30  ;;  %v2364_v50 = vadd.f32 %v2362_v51, %v6818_v30  ;;  %v2378_v19 = vsub.f32 %v6822_v42, %v1768_v6  ;;  %v2320_v63 = vadd.f32 %v2318_v9, %v2270_v8 }
 0x228   : > { %v2324_v25 = vadd.f32 %v2322_v49, %v2274_v13  ;;  %v2383_v22 = vmul.f32 %v2375_v2, %v2375_v2  ;;  %v2384_v48 = vmul.f32 %v2376_v1, %v2376_v1  ;;  %v2385_v17 = vmul.f32 %v2377_v54, %v2377_v54 }
 0x229   : > { %v2365_v5 = vmax.f32 %v2363_v4, 0.0  ;;  %v2366_v28 = vmax.f32 %v2364_v50, 0.0  ;;  %v2386_v34 = vmul.f32 %v2378_v19, %v2378_v19 }
 0x22a   : > { %v2387_v31 = vadd.f32 %v2385_v17, %v2383_v22 }
 0x22b   : > { %v2367_v14 = vmul.f32 %v2365_v5, %v6823_v32  ;;  %v2368_v26 = vmul.f32 %v2366_v28, %v6823_v32  ;;  %v2371_v58 = vmul.f32 %v2365_v5, %v6824_v53  ;;  %v2372_v60 = vmul.f32 %v2366_v28, %v6824_v53 }
 0x22c   : > { %v2388_v57 = vadd.f32 %v2386_v34, %v2384_v48 }
 0x22d   : > { %v2369_v46 = vadd.f32 %v2367_v14, %v2319_v43  ;;  %v2370_v61 = vadd.f32 %v2368_v26, %v2320_v63  ;;  %v2373_v56 = vadd.f32 %v2371_v58, %v2323_v52  ;;  %v2374_v36 = vadd.f32 %v2372_v60, %v2324_v25 }
 0x22f   : > { %v2379_v20 = vsub.f32 %v6819_v0, %v2369_v46  ;;  %v2380_v47 = vsub.f32 %v6820_v55, %v2370_v61  ;;  %v2381_v59 = vsub.f32 %v6821_v3, %v2373_v56  ;;  %v2382_v33 = vsub.f32 %v6822_v42, %v2374_v36 }
 0x231   : > { %v2389_v7 = vmul.f32 %v2379_v20, %v2379_v20  ;;  %v2390_v16 = vmul.f32 %v2380_v47, %v2380_v47  ;;  %v2391_v11 = vmul.f32 %v2381_v59, %v2381_v59  ;;  %v2392_v35 = vmul.f32 %v2382_v33, %v2382_v33 }
 0x233   : > { %v2393_v24 = vadd.f32 %v2391_v11, %v2389_v7  ;;  %v2394_v27 = vadd.f32 %v2392_v35, %v2390_v16 }
 0x235   : > { %v2395_v40 = vmax.f32 %v2387_v31, %v2393_v24  ;;  %v2396_v10 = vmax.f32 %v2388_v57, %v2394_v27 }
 0x237   : > { %v2397_v44 = vsub.f32 %v2387_v31, %v2395_v40  ;;  %v2398_v62 = vsub.f32 %v2388_v57, %v2396_v10  ;;  %v2403_v38 = vsub.f32 %v2393_v24, %v2395_v40  ;;  %v2404_v45 = vsub.f32 %v2394_v27, %v2396_v10 }
 0x239   : > { %v2399_v6 = vmul.f32 1.442695, %v2397_v44  ;;  %v2401_v37 = vmul.f32 1.442695, %v2398_v62  ;;  %v2405_v8 = vmul.f32 1.442695, %v2403_v38 }
 0x23a   : > { %v2407_v23 = vmul.f32 1.442695, %v2404_v45 }
 0x23b   : > { %2778 = vpow2.f32 %v2399_v6 }
 0x23c   : > { %2780 = vpow2.f32 %v2401_v37 }
 0x23d   : > { %2782 = vpow2.f32 %v2405_v8 }
 0x23e   : > { %2784 = vpow2.f32 %v2407_v23 }
 0x248   : > { %v2779_v18 = vpop.eup %2778 }
 0x249   : > { %v2781_v12 = vpop.eup %2780 }
 0x24a   : > { %v2783_v13 = vpop.eup %2782 }
 0x24b   : > { %v2785_v41 = vpop.eup %2784  ;;  %v2409_v39 = vadd.f32 %v2783_v13, %v2779_v18 }
 0x24c   : > { %v2410_v21 = vadd.f32 %v2785_v41, %v2781_v12 }
 0x24d   : > { %2786 = vrcp.f32 %v2409_v39 }
 0x24e   : > { %2788 = vrcp.f32 %v2410_v21 }
 0x25a   : > { %v2787_v29 = vpop.eup %2786 }
 0x25b   : > { %v2789_v9 = vpop.eup %2788  ;;  %v2413_v49 = vmul.f32 %v2787_v29, %v2409_v39 }
 0x25c   : > { %v2414_v15 = vmul.f32 %v2789_v9, %v2410_v21 }
 0x25d   : > { %v2415_v51 = vsub.f32 2.0, %v2413_v49 }
 0x25e   : > { %v2416_v30 = vsub.f32 2.0, %v2414_v15 }
 0x25f   : > { %v2417_v4 = vmul.f32 %v2787_v29, %v2415_v51 }
 0x260   : > { %v2418_v50 = vmul.f32 %v2789_v9, %v2416_v30  ;;  %2434 = sbr.rel (!%p6825_p4) target bundleno = 621 (0x26d), region = 74 }
 0x261   : > { %v2419_v0 = vmul.f32 %v2779_v18, %v2417_v4  ;;  %v2423_v2 = vmul.f32 %v2783_v13, %v2417_v4 }
 0x262   : > { %v2420_v55 = vmul.f32 %v2781_v12, %v2418_v50  ;;  %v2424_v1 = vmul.f32 %v2785_v41, %v2418_v50 }
 0x263   : > { %2421 = vst [vmem:[%s231_s11] sm:$0xff] %v2419_v0  ;;  %2732 = vst [vmem:[%s231_s11 + $0x10] sm:$0xff] %v2423_v2 }
 0x264   : > { %2422 = vst [vmem:[%s231_s11 + $0x8] sm:$0xff] %v2420_v55  ;;  %2733 = vst [vmem:[%s231_s11 + $0x18] sm:$0xff] %v2424_v1 }
 0x26a   : > { %v2472_v43 = vld [vmem:[%s231_s11] sm:$0xff]  ;;  %v2476_v3 = vld [vmem:[%s231_s11 + $0x10] sm:$0xff] }
 0x26b   : > { %v2474_v52 = vld [vmem:[%s231_s11 + $0x8] sm:$0xff]  ;;  %v2478_v54 = vld [vmem:[%s231_s11 + $0x18] sm:$0xff]  ;;  %2473 = vst [vmem:[%s2437_s15] sm:$0xff] %v2472_v43  ;;  %2477 = vst [vmem:[%s2437_s15 + $0x20] sm:$0xff] %v2476_v3 }
 0x26c   : > { %2475 = vst [vmem:[%s2437_s15 + $0x8] sm:$0xff] %v2474_v52  ;;  %2479 = vst [vmem:[%s2437_s15 + $0x28] sm:$0xff] %v2478_v54 }
 0x26d PF: > { %p10_p5 = scmp.ge.s32.totalorder %s2868_s13, 4   ;;  %s6826_s9 = smov %s2827_s10 }
 0x26e   : > { %s6827_s10 = smov %s2878_s16  ;;  %s6828_s11 = smov %s2868_s13 }
 0x26f   :  { %12 = sbr.rel (!%p10_p5) target bundleno = 2 (0x2), region = 150 }
 0x274   :  { %2495 = vsyncpa [#allocation3], 1 }
 0x275   :  { %2497 = vsyncpa [#allocation3 + $0x1], 1 }

</bundles_post_ra>
